<compile_context>
chip_gen: v6e
topology: v6e:2x2x1
jax: 0.10.0
libtpu: 0.0.40
codegen_flags: <defaults>
</compile_context>

<pallas_src>
import functools

import jax
import jax.numpy as jnp
from jax import lax
from jax.experimental import pallas as pl
from jax.experimental.pallas import tpu as pltpu


# ----------------------------------------------------------------------------
# small helpers
# ----------------------------------------------------------------------------

def _round_up(x, m):
    return ((x + m - 1) // m) * m


def _k_tiling(K):
    """(padded K, K tile). Prefer 256-wide K tiles (v6e/v7x MXU)."""
    if K % 256 == 0:
        return K, 256
    if K % 128 == 0:
        return K, 128
    if K <= 1024:
        kp = _round_up(K, 8)
        return kp, kp                      # single full-dim K block
    kp = _round_up(K, 128)
    return kp, 128


def _n_tiling(N):
    """(padded N, N tile). Full-dim block when N < 128 (legal, no padding)."""
    if N % 256 == 0:
        return N, 256
    if N % 128 == 0:
        return N, 128
    return N, N


def _instance_norm_cols(y, m_valid, eps):
    """InstanceNorm over axis 0 (spatial rows) of a (Mp, C_tile) f32 slab.

    Rows >= m_valid are zero padding and excluded from the statistics (their
    normalized values are garbage but sliced off by the caller).
    """
    mp = y.shape[0]
    if m_valid == mp:
        mean = jnp.mean(y, axis=0, keepdims=True)
        xc = y - mean
        var = jnp.mean(xc * xc, axis=0, keepdims=True)
        return xc * lax.rsqrt(var + eps)
    inv = 1.0 / float(m_valid)
    row = lax.broadcasted_iota(jnp.int32, y.shape, 0)
    mask = (row < m_valid).astype(y.dtype)
    mean = jnp.sum(y * mask, axis=0, keepdims=True) * inv
    xc = (y - mean) * mask
    var = jnp.sum(xc * xc, axis=0, keepdims=True) * inv
    return (y - mean) * lax.rsqrt(var + eps)


# ----------------------------------------------------------------------------
# Pallas kernels
# ----------------------------------------------------------------------------

def _conv_fused_kernel(*refs, m_valid, eps, act, slope, fuse_in, fuse_tanh,
                       has_res):
    """bf16 matmul (f32 acc) + fused IN / activation / residual / tanh epilogue.

    Grid: (batch, N blocks, K blocks). One M block = whole spatial extent of
    one sample, so the per-tile mean/var over axis 0 is the full IN reduction.
    """
    if has_res:
        a_ref, b_ref, r_ref, o_ref, acc_ref = refs
    else:
        a_ref, b_ref, o_ref, acc_ref = refs
        r_ref = None

    k = pl.program_id(2)

    @pl.when(k == 0)
    def _():
        acc_ref[...] = jnp.zeros_like(acc_ref)

    a = a_ref[0].astype(jnp.bfloat16)          # (Mp, tk) — MXU-native dtype
    b = b_ref[...].astype(jnp.bfloat16)        # (tk, tn)
    acc_ref[...] += jnp.dot(a, b, preferred_element_type=jnp.float32)

    @pl.when(k == pl.num_programs(2) - 1)      # epilogue: store output once
    def _():
        y = acc_ref[...]                       # (Mp, tn) f32
        if fuse_in:
            y = _instance_norm_cols(y, m_valid, eps)
        if act == "leaky":
            y = jnp.where(y >= 0, y, slope * y)
        elif act == "relu6":
            y = jnp.clip(y, 0.0, 6.0)
        if has_res:
            y = y + r_ref[0]
        if fuse_tanh:
            y = jnp.tanh(y)
        o_ref[0] = y.astype(o_ref.dtype)


def _dw_fused_kernel(p_ref, w_ref, o_ref, *, m_valid, eps):
    """Depthwise 3x3 (9 taps) + InstanceNorm + ReLU6, one (batch, C tile)."""
    # p_ref: (9, 1, Mp, tc) taps, w_ref: (9, 1, tc), o_ref: (1, Mp, tc)
    acc = p_ref[0] * w_ref[0]                  # (1, Mp, tc) * (1, tc)
    for t in range(1, 9):                      # static unroll over 3x3 taps
        acc = acc + p_ref[t] * w_ref[t]
    y = _instance_norm_cols(acc[0], m_valid, eps)
    o_ref[0] = jnp.clip(y, 0.0, 6.0)           # ReLU6


# ----------------------------------------------------------------------------
# Pallas wrappers
# ----------------------------------------------------------------------------

def fused_conv_matmul(a, w, *, act="none", slope=0.2, fuse_in=True,
                      fuse_tanh=False, residual=None, eps=1e-5):
    """Per-sample GEMM with fused epilogue.

    a: (B, M, K) f32 im2col patches (M = Ho*Wo spatial positions per sample)
    w: (K, N) weights.  Returns (B, M, N) f32.
    """
    B, M, K = a.shape
    K2, N = w.shape
    assert K == K2
    Mp = _round_up(M, 8)
    Kp, tk = _k_tiling(K)
    Np, tn = _n_tiling(N)          # Np == N (no N padding needed)
    nk = Kp // tk

    a_p = a
    if Mp != M or Kp != K:
        a_p = jnp.pad(a, ((0, 0), (0, Mp - M), (0, Kp - K)))
    w_p = w.astype(jnp.bfloat16)               # halves weight-tile DMA bytes
    if Kp != K:
        w_p = jnp.pad(w_p, ((0, Kp - K), (0, 0)))

    inputs = [a_p, w_p]
    in_specs = [pl.BlockSpec((1, Mp, tk), lambda b, j, k: (b, 0, k)),
                pl.BlockSpec((tk, tn), lambda b, j, k: (k, j))]
    has_res = residual is not None
    if has_res:
        r_p = residual
        if Mp != M:
            r_p = jnp.pad(residual, ((0, 0), (0, Mp - M), (0, 0)))
        inputs.append(r_p)
        in_specs.append(pl.BlockSpec((1, Mp, tn), lambda b, j, k: (b, 0, j)))

    kern = functools.partial(
        _conv_fused_kernel, m_valid=M, eps=eps, act=act, slope=slope,
        fuse_in=fuse_in, fuse_tanh=fuse_tanh, has_res=has_res)

    out = pl.pallas_call(
        kern,
        out_shape=jax.ShapeDtypeStruct((B, Mp, Np), jnp.float32),
        grid_spec=pltpu.PrefetchScalarGridSpec(
            num_scalar_prefetch=0,
            grid=(B, Np // tn, nk),
            in_specs=in_specs,
            out_specs=pl.BlockSpec((1, Mp, tn), lambda b, j, k: (b, 0, j)),
            scratch_shapes=[pltpu.VMEM((Mp, tn), jnp.float32)]),
        compiler_params=pltpu.CompilerParams(
            dimension_semantics=("parallel", "parallel", "arbitrary")),
    )(*inputs)
    if Mp != M:
        out = out[:, :M, :]
    return out


def depthwise3x3_in_relu6(x, w_dw, eps=1e-5):
    """x: (B, H, W, C), w_dw: (9, 1, C). stride 1, pad 1, fused IN + ReLU6."""
    B, H, W, C = x.shape
    xp = jnp.pad(x, ((0, 0), (1, 1), (1, 1), (0, 0)))
    cols = [xp[:, ki:ki + H, kj:kj + W, :] for ki in range(3) for kj in range(3)]
    p = jnp.stack(cols, axis=0).reshape(9, B, H * W, C)   # tap-major
    M = H * W
    Mp = _round_up(M, 8)
    if Mp != M:
        p = jnp.pad(p, ((0, 0), (0, 0), (0, Mp - M), (0, 0)))
    _, tc = _n_tiling(C)

    kern = functools.partial(_dw_fused_kernel, m_valid=M, eps=eps)
    out = pl.pallas_call(
        kern,
        out_shape=jax.ShapeDtypeStruct((B, Mp, C), jnp.float32),
        grid_spec=pltpu.PrefetchScalarGridSpec(
            num_scalar_prefetch=0,
            grid=(B, C // tc),
            in_specs=[pl.BlockSpec((9, 1, Mp, tc), lambda b, c: (0, b, 0, c)),
                      pl.BlockSpec((9, 1, tc), lambda b, c: (0, 0, c))],
            out_specs=pl.BlockSpec((1, Mp, tc), lambda b, c: (b, 0, c))),
        compiler_params=pltpu.CompilerParams(
            dimension_semantics=("parallel", "parallel")),
    )(p, w_dw)
    if Mp != M:
        out = out[:, :M, :]
    return out.reshape(B, H, W, C)


# ----------------------------------------------------------------------------
# Conv glue (im2col in XLA, all math inside the fused Pallas kernels)
# ----------------------------------------------------------------------------

def _im2col_3x3(x, stride=1, pad=1):
    B, H, W, C = x.shape
    xp = jnp.pad(x, ((0, 0), (pad, pad), (pad, pad), (0, 0)))
    Ho = (H + 2 * pad - 3) // stride + 1
    Wo = (W + 2 * pad - 3) // stride + 1
    cols = []
    for ki in range(3):
        for kj in range(3):
            cols.append(xp[:, ki:ki + stride * Ho:stride,
                           kj:kj + stride * Wo:stride, :])
    patches = jnp.stack(cols, axis=3)          # (B, Ho, Wo, 9, C)
    return patches.reshape(B, Ho * Wo, 9 * C), Ho, Wo


def conv3x3(x, w, *, stride=1, act="none", slope=0.2, fuse_in=True,
            fuse_tanh=False):
    """x: (B,H,W,Cin), w: (3,3,Cin,Cout) -> (B,Ho,Wo,Cout) (fused epilogue)."""
    B, H, W, Cin = x.shape
    a, Ho, Wo = _im2col_3x3(x, stride, 1)
    wk = w.reshape(9 * Cin, -1)
    out = fused_conv_matmul(a, wk, act=act, slope=slope, fuse_in=fuse_in,
                            fuse_tanh=fuse_tanh)
    return out.reshape(B, Ho, Wo, -1)


# ----------------------------------------------------------------------------
# Generator parameters + forward
# ----------------------------------------------------------------------------

def init_params(key):
    scale = 0.05
    keys = list(jax.random.split(key, 64))
    k_it = iter(keys)

    def nrm(shape):
        return scale * jax.random.normal(next(k_it), shape, dtype=jnp.float32)

    params = {}
    # downsample: ConvINLRelu(cin, cout, 3, pad=1, stride=2)
    down_chs = [(3, 64), (64, 128), (128, 256), (256, 512)]
    params["down"] = [nrm((3, 3, ci, co)) for ci, co in down_chs]
    # residual: 6 x InvertedResidual(512, 512, stride=1, expand_ratio=2)
    params["res"] = [{"expand": nrm((512, 1024)),
                      "dw": nrm((9, 1, 1024)),
                      "project": nrm((1024, 512))} for _ in range(6)]
    # upsample: Upsample(c) = nearest x2 + Conv(c, c//2, 3, 1, 1) + IN + LReLU
    up_chs = [(512, 256), (256, 128), (128, 64), (64, 32)]
    params["up"] = [nrm((3, 3, ci, co)) for ci, co in up_chs]
    # final Conv2d(32, 3, 3, 1, 1)
    params["final"] = nrm((3, 3, 32, 3))
    return params


def generator_forward(x_nchw, params):
    x = jnp.transpose(x_nchw, (0, 2, 3, 1)).astype(jnp.float32)   # -> NHWC

    # ---- downsample: Conv(stride 2) + IN + LeakyReLU(0.2), fully fused ----
    for w in params["down"]:
        x = conv3x3(x, w, stride=2, act="leaky", slope=0.2, fuse_in=True)

    # ---- residual: 6 x InvertedResidual (3 fused kernels per block) ----
    B, H, W, C = x.shape
    for blk in params["res"]:
        res = x.reshape(B, H * W, C)
        h = fused_conv_matmul(res, blk["expand"], act="relu6", fuse_in=True)
        h = depthwise3x3_in_relu6(h.reshape(B, H, W, -1), blk["dw"])
        h = fused_conv_matmul(h.reshape(B, H * W, -1), blk["project"],
                              act="none", fuse_in=True, residual=res)
        x = h.reshape(B, H, W, C)

    # ---- upsample: nearest x2 + Conv + IN + LeakyReLU (conv fused) ----
    for w in params["up"]:
        # TODO(synk): fold the x2 nearest upsample into the conv's index_map
        x = jnp.repeat(jnp.repeat(x, 2, axis=1), 2, axis=2)
        x = conv3x3(x, w, stride=1, act="leaky", slope=0.2, fuse_in=True)

    # ---- final Conv(32 -> 3) with tanh fused into the matmul epilogue ----
    y = conv3x3(x, params["final"], stride=1, act="none", fuse_in=False,
                fuse_tanh=True)
    return jnp.transpose(y, (0, 3, 1, 2))      # back to NCHW


# ----------------------------------------------------------------------------
# main
# ----------------------------------------------------------------------------

if __name__ == "__main__":
    key = jax.random.PRNGKey(0)
    k_params, k_x = jax.random.split(key)
    params = init_params(k_params)
    x = jax.random.normal(k_x, (2, 3, 16, 16), dtype=jnp.float32)

    fwd = jax.jit(generator_forward)
    y = jax.block_until_ready(fwd(x, params))

    assert y.shape == (2, 3, 16, 16), y.shape
    assert bool(jnp.all(jnp.isfinite(y)))
    assert bool(jnp.all(jnp.abs(y) <= 1.0 + 1e-6))   # tanh range
    print("KERNEL_OK")
</pallas_src>

<mosaic_0001>
module attributes {stable_mosaic.version = 11 : i64} {
  func.func @_conv_fused_kernel(%arg0: i32, %arg1: i32, %arg2: i32, %arg3: memref<1x64x32xf32, #tpu.memory_space<vmem>>, %arg4: memref<32x64xbf16, #tpu.memory_space<vmem>>, %arg5: memref<1x64x64xf32, #tpu.memory_space<vmem>>, %arg6: memref<64x64xf32, #tpu.memory_space<vmem>>) attributes {dimension_semantics = [#tpu.dimension_semantics<parallel>, #tpu.dimension_semantics<parallel>, #tpu.dimension_semantics<arbitrary>], iteration_bounds = array<i64: 2, 1, 1>, scalar_prefetch = 0 : i64, scratch_operands = 1 : i64, tpu.core_type = #tpu.core_type<tc>, window_params = [{transform_indices = @transform_0, window_bounds = array<i64: 1, 64, 32>}, {transform_indices = @transform_1, window_bounds = array<i64: 32, 64>}, {transform_indices = @transform_2, window_bounds = array<i64: 1, 64, 64>}]} {
    %c0_i32 = arith.constant 0 : i32
    %0 = arith.cmpi eq, %arg2, %c0_i32 : i32
    %1 = arith.extui %0 : i1 to i32
    %c0_i32_0 = arith.constant 0 : i32
    %2 = arith.cmpi ne, %1, %c0_i32_0 : i32
    scf.if %2 {
      %cst_11 = arith.constant 0.000000e+00 : f32
      %14 = vector.broadcast %cst_11 : f32 to vector<64x64xf32>
      %c0_12 = arith.constant 0 : index
      %c0_13 = arith.constant 0 : index
      %15 = vector.load %arg6[%c0_12, %c0_13] : memref<64x64xf32, #tpu.memory_space<vmem>>, vector<64x64xf32>
      tpu.vector_store %arg6[%c0_12, %c0_13], %14 {strides = array<i32>} : memref<64x64xf32, #tpu.memory_space<vmem>>, vector<64x64xf32>,
    } else {
    }
    %c0 = arith.constant 0 : index
    %c0_1 = arith.constant 0 : index
    %c0_2 = arith.constant 0 : index
    %3 = vector.load %arg3[%c0, %c0_1, %c0_2] : memref<1x64x32xf32, #tpu.memory_space<vmem>>, vector<1x64x32xf32>
    %4 = vector.shape_cast %3 : vector<1x64x32xf32> to vector<64x32xf32>
    %5 = arith.truncf %4 : vector<64x32xf32> to vector<64x32xbf16>
    %c0_3 = arith.constant 0 : index
    %c0_4 = arith.constant 0 : index
    %6 = vector.load %arg4[%c0_3, %c0_4] : memref<32x64xbf16, #tpu.memory_space<vmem>>, vector<32x64xbf16>
    %c0_5 = arith.constant 0 : index
    %c0_6 = arith.constant 0 : index
    %7 = vector.load %arg6[%c0_5, %c0_6] : memref<64x64xf32, #tpu.memory_space<vmem>>, vector<64x64xf32>
    %cst = arith.constant dense<0.000000e+00> : vector<64x64xf32>
    %8 = tpu.matmul %5, %6, %cst {dimension_numbers = #tpu.dot_dimension_numbers<[1], [0], [0], [1], [0, 0, 1, 1], [], []>} : vector<64x32xbf16>, vector<32x64xbf16>, vector<64x64xf32> -> vector<64x64xf32>
    %9 = arith.addf %7, %8 : vector<64x64xf32>
    %c0_7 = arith.constant 0 : index
    %c0_8 = arith.constant 0 : index
    %10 = vector.load %arg6[%c0_7, %c0_8] : memref<64x64xf32, #tpu.memory_space<vmem>>, vector<64x64xf32>
    tpu.vector_store %arg6[%c0_7, %c0_8], %9 {strides = array<i32>} : memref<64x64xf32, #tpu.memory_space<vmem>>, vector<64x64xf32>,
    %c0_i32_9 = arith.constant 0 : i32
    %11 = arith.cmpi eq, %arg2, %c0_i32_9 : i32
    %12 = arith.extui %11 : i1 to i32
    %c0_i32_10 = arith.constant 0 : i32
    %13 = arith.cmpi ne, %12, %c0_i32_10 : i32
    scf.if %13 {
      %c0_11 = arith.constant 0 : index
      %c0_12 = arith.constant 0 : index
      %14 = vector.load %arg6[%c0_11, %c0_12] : memref<64x64xf32, #tpu.memory_space<vmem>>, vector<64x64xf32>
      %cst_13 = arith.constant dense<0.000000e+00> : vector<64xf32>
      %15 = vector.multi_reduction <add>, %14, %cst_13 [0] : vector<64x64xf32> to vector<64xf32>
      %16 = vector.shape_cast %15 : vector<64xf32> to vector<1x64xf32>
      %cst_14 = arith.constant 6.400000e+01 : f32
      %17 = vector.broadcast %cst_14 : f32 to vector<1x64xf32>
      %18 = arith.divf %16, %17 : vector<1x64xf32>
      %19 = vector.broadcast %18 : vector<1x64xf32> to vector<64x64xf32>
      %20 = arith.subf %14, %19 : vector<64x64xf32>
      %21 = arith.mulf %20, %20 : vector<64x64xf32>
      %cst_15 = arith.constant dense<0.000000e+00> : vector<64xf32>
      %22 = vector.multi_reduction <add>, %21, %cst_15 [0] : vector<64x64xf32> to vector<64xf32>
      %23 = vector.shape_cast %22 : vector<64xf32> to vector<1x64xf32>
      %cst_16 = arith.constant 6.400000e+01 : f32
      %24 = vector.broadcast %cst_16 : f32 to vector<1x64xf32>
      %25 = arith.divf %23, %24 : vector<1x64xf32>
      %cst_17 = arith.constant 9.99999974E-6 : f32
      %26 = vector.broadcast %cst_17 : f32 to vector<1x64xf32>
      %27 = arith.addf %25, %26 : vector<1x64xf32>
      %28 = math.rsqrt %27 : vector<1x64xf32>
      %29 = vector.broadcast %28 : vector<1x64xf32> to vector<64x64xf32>
      %30 = arith.mulf %20, %29 : vector<64x64xf32>
      %cst_18 = arith.constant 0.000000e+00 : f32
      %31 = vector.broadcast %cst_18 : f32 to vector<64x64xf32>
      %32 = arith.cmpf oge, %30, %31 : vector<64x64xf32>
      %cst_19 = arith.constant 2.000000e-01 : f32
      %33 = vector.broadcast %cst_19 : f32 to vector<64x64xf32>
      %34 = arith.mulf %33, %30 : vector<64x64xf32>
      %35 = arith.select %32, %30, %34 : vector<64x64xi1>, vector<64x64xf32>
      %c0_20 = arith.constant 0 : index
      %c0_21 = arith.constant 0 : index
      %c0_22 = arith.constant 0 : index
      %36 = vector.load %arg5[%c0_20, %c0_21, %c0_22] : memref<1x64x64xf32, #tpu.memory_space<vmem>>, vector<1x64x64xf32>
      %37 = vector.shape_cast %36 : vector<1x64x64xf32> to vector<64x64xf32>
      %38 = vector.shape_cast %35 : vector<64x64xf32> to vector<1x64x64xf32>
      tpu.vector_store %arg5[%c0_20, %c0_21, %c0_22], %38 {strides = array<i32>} : memref<1x64x64xf32, #tpu.memory_space<vmem>>, vector<1x64x64xf32>,
    } else {
    }
    return
  }
  func.func @transform_0(%arg0: i32, %arg1: i32, %arg2: i32) -> (i32, i32, i32) {
    %c0_i32 = arith.constant 0 : i32
    %c0_i32_0 = arith.constant 0 : i32
    return %arg0, %c0_i32, %arg2 : i32, i32, i32
  }
  func.func @transform_1(%arg0: i32, %arg1: i32, %arg2: i32) -> (i32, i32) {
    %c0_i32 = arith.constant 0 : i32
    return %arg2, %arg1 : i32, i32
  }
  func.func @transform_2(%arg0: i32, %arg1: i32, %arg2: i32) -> (i32, i32, i32) {
    %c0_i32 = arith.constant 0 : i32
    %c0_i32_0 = arith.constant 0 : i32
    return %arg0, %c0_i32, %arg1 : i32, i32, i32
  }
}

module attributes {stable_mosaic.version = 11 : i64} {
  func.func @_conv_fused_kernel(%arg0: i32, %arg1: i32, %arg2: i32, %arg3: memref<1x16x576xf32, #tpu.memory_space<vmem>>, %arg4: memref<576x128xbf16, #tpu.memory_space<vmem>>, %arg5: memref<1x16x128xf32, #tpu.memory_space<vmem>>, %arg6: memref<16x128xf32, #tpu.memory_space<vmem>>) attributes {dimension_semantics = [#tpu.dimension_semantics<parallel>, #tpu.dimension_semantics<parallel>, #tpu.dimension_semantics<arbitrary>], iteration_bounds = array<i64: 2, 1, 1>, scalar_prefetch = 0 : i64, scratch_operands = 1 : i64, tpu.core_type = #tpu.core_type<tc>, window_params = [{transform_indices = @transform_0, window_bounds = array<i64: 1, 16, 576>}, {transform_indices = @transform_1, window_bounds = array<i64: 576, 128>}, {transform_indices = @transform_2, window_bounds = array<i64: 1, 16, 128>}]} {
    %c0_i32 = arith.constant 0 : i32
    %0 = arith.cmpi eq, %arg2, %c0_i32 : i32
    %1 = arith.extui %0 : i1 to i32
    %c0_i32_0 = arith.constant 0 : i32
    %2 = arith.cmpi ne, %1, %c0_i32_0 : i32
    scf.if %2 {
      %cst_11 = arith.constant 0.000000e+00 : f32
      %14 = vector.broadcast %cst_11 : f32 to vector<16x128xf32>
      %c0_12 = arith.constant 0 : index
      %c0_13 = arith.constant 0 : index
      %15 = vector.load %arg6[%c0_12, %c0_13] : memref<16x128xf32, #tpu.memory_space<vmem>>, vector<16x128xf32>
      tpu.vector_store %arg6[%c0_12, %c0_13], %14 {strides = array<i32>} : memref<16x128xf32, #tpu.memory_space<vmem>>, vector<16x128xf32>,
    } else {
    }
    %c0 = arith.constant 0 : index
    %c0_1 = arith.constant 0 : index
    %c0_2 = arith.constant 0 : index
    %3 = vector.load %arg3[%c0, %c0_1, %c0_2] : memref<1x16x576xf32, #tpu.memory_space<vmem>>, vector<1x16x576xf32>
    %4 = vector.shape_cast %3 : vector<1x16x576xf32> to vector<16x576xf32>
    %5 = arith.truncf %4 : vector<16x576xf32> to vector<16x576xbf16>
    %c0_3 = arith.constant 0 : index
    %c0_4 = arith.constant 0 : index
    %6 = vector.load %arg4[%c0_3, %c0_4] : memref<576x128xbf16, #tpu.memory_space<vmem>>, vector<576x128xbf16>
    %c0_5 = arith.constant 0 : index
    %c0_6 = arith.constant 0 : index
    %7 = vector.load %arg6[%c0_5, %c0_6] : memref<16x128xf32, #tpu.memory_space<vmem>>, vector<16x128xf32>
    %cst = arith.constant dense<0.000000e+00> : vector<16x128xf32>
    %8 = tpu.matmul %5, %6, %cst {dimension_numbers = #tpu.dot_dimension_numbers<[1], [0], [0], [1], [0, 0, 1, 1], [], []>} : vector<16x576xbf16>, vector<576x128xbf16>, vector<16x128xf32> -> vector<16x128xf32>
    %9 = arith.addf %7, %8 : vector<16x128xf32>
    %c0_7 = arith.constant 0 : index
    %c0_8 = arith.constant 0 : index
    %10 = vector.load %arg6[%c0_7, %c0_8] : memref<16x128xf32, #tpu.memory_space<vmem>>, vector<16x128xf32>
    tpu.vector_store %arg6[%c0_7, %c0_8], %9 {strides = array<i32>} : memref<16x128xf32, #tpu.memory_space<vmem>>, vector<16x128xf32>,
    %c0_i32_9 = arith.constant 0 : i32
    %11 = arith.cmpi eq, %arg2, %c0_i32_9 : i32
    %12 = arith.extui %11 : i1 to i32
    %c0_i32_10 = arith.constant 0 : i32
    %13 = arith.cmpi ne, %12, %c0_i32_10 : i32
    scf.if %13 {
      %c0_11 = arith.constant 0 : index
      %c0_12 = arith.constant 0 : index
      %14 = vector.load %arg6[%c0_11, %c0_12] : memref<16x128xf32, #tpu.memory_space<vmem>>, vector<16x128xf32>
      %cst_13 = arith.constant dense<0.000000e+00> : vector<128xf32>
      %15 = vector.multi_reduction <add>, %14, %cst_13 [0] : vector<16x128xf32> to vector<128xf32>
      %16 = vector.shape_cast %15 : vector<128xf32> to vector<1x128xf32>
      %cst_14 = arith.constant 1.600000e+01 : f32
      %17 = vector.broadcast %cst_14 : f32 to vector<1x128xf32>
      %18 = arith.divf %16, %17 : vector<1x128xf32>
      %19 = vector.broadcast %18 : vector<1x128xf32> to vector<16x128xf32>
      %20 = arith.subf %14, %19 : vector<16x128xf32>
      %21 = arith.mulf %20, %20 : vector<16x128xf32>
      %cst_15 = arith.constant dense<0.000000e+00> : vector<128xf32>
      %22 = vector.multi_reduction <add>, %21, %cst_15 [0] : vector<16x128xf32> to vector<128xf32>
      %23 = vector.shape_cast %22 : vector<128xf32> to vector<1x128xf32>
      %cst_16 = arith.constant 1.600000e+01 : f32
      %24 = vector.broadcast %cst_16 : f32 to vector<1x128xf32>
      %25 = arith.divf %23, %24 : vector<1x128xf32>
      %cst_17 = arith.constant 9.99999974E-6 : f32
      %26 = vector.broadcast %cst_17 : f32 to vector<1x128xf32>
      %27 = arith.addf %25, %26 : vector<1x128xf32>
      %28 = math.rsqrt %27 : vector<1x128xf32>
      %29 = vector.broadcast %28 : vector<1x128xf32> to vector<16x128xf32>
      %30 = arith.mulf %20, %29 : vector<16x128xf32>
      %cst_18 = arith.constant 0.000000e+00 : f32
      %31 = vector.broadcast %cst_18 : f32 to vector<16x128xf32>
      %32 = arith.cmpf oge, %30, %31 : vector<16x128xf32>
      %cst_19 = arith.constant 2.000000e-01 : f32
      %33 = vector.broadcast %cst_19 : f32 to vector<16x128xf32>
      %34 = arith.mulf %33, %30 : vector<16x128xf32>
      %35 = arith.select %32, %30, %34 : vector<16x128xi1>, vector<16x128xf32>
      %c0_20 = arith.constant 0 : index
      %c0_21 = arith.constant 0 : index
      %c0_22 = arith.constant 0 : index
      %36 = vector.load %arg5[%c0_20, %c0_21, %c0_22] : memref<1x16x128xf32, #tpu.memory_space<vmem>>, vector<1x16x128xf32>
      %37 = vector.shape_cast %36 : vector<1x16x128xf32> to vector<16x128xf32>
      %38 = vector.shape_cast %35 : vector<16x128xf32> to vector<1x16x128xf32>
      tpu.vector_store %arg5[%c0_20, %c0_21, %c0_22], %38 {strides = array<i32>} : memref<1x16x128xf32, #tpu.memory_space<vmem>>, vector<1x16x128xf32>,
    } else {
    }
    return
  }
  func.func @transform_0(%arg0: i32, %arg1: i32, %arg2: i32) -> (i32, i32, i32) {
    %c0_i32 = arith.constant 0 : i32
    %c0_i32_0 = arith.constant 0 : i32
    return %arg0, %c0_i32, %arg2 : i32, i32, i32
  }
  func.func @transform_1(%arg0: i32, %arg1: i32, %arg2: i32) -> (i32, i32) {
    %c0_i32 = arith.constant 0 : i32
    return %arg2, %arg1 : i32, i32
  }
  func.func @transform_2(%arg0: i32, %arg1: i32, %arg2: i32) -> (i32, i32, i32) {
    %c0_i32 = arith.constant 0 : i32
    %c0_i32_0 = arith.constant 0 : i32
    return %arg0, %c0_i32, %arg1 : i32, i32, i32
  }
}

module attributes {stable_mosaic.version = 11 : i64} {
  func.func @_conv_fused_kernel(%arg0: i32, %arg1: i32, %arg2: i32, %arg3: memref<1x8x128xf32, #tpu.memory_space<vmem>>, %arg4: memref<128x256xbf16, #tpu.memory_space<vmem>>, %arg5: memref<1x8x256xf32, #tpu.memory_space<vmem>>, %arg6: memref<8x256xf32, #tpu.memory_space<vmem>>) attributes {dimension_semantics = [#tpu.dimension_semantics<parallel>, #tpu.dimension_semantics<parallel>, #tpu.dimension_semantics<arbitrary>], iteration_bounds = array<i64: 2, 1, 9>, scalar_prefetch = 0 : i64, scratch_operands = 1 : i64, tpu.core_type = #tpu.core_type<tc>, window_params = [{transform_indices = @transform_0, window_bounds = array<i64: 1, 8, 128>}, {transform_indices = @transform_1, window_bounds = array<i64: 128, 256>}, {transform_indices = @transform_2, window_bounds = array<i64: 1, 8, 256>}]} {
    %c0_i32 = arith.constant 0 : i32
    %0 = arith.cmpi eq, %arg2, %c0_i32 : i32
    %1 = arith.extui %0 : i1 to i32
    %c0_i32_0 = arith.constant 0 : i32
    %2 = arith.cmpi ne, %1, %c0_i32_0 : i32
    scf.if %2 {
      %cst_10 = arith.constant 0.000000e+00 : f32
      %14 = vector.broadcast %cst_10 : f32 to vector<8x256xf32>
      %c0_11 = arith.constant 0 : index
      %c0_12 = arith.constant 0 : index
      %15 = vector.load %arg6[%c0_11, %c0_12] : memref<8x256xf32, #tpu.memory_space<vmem>>, vector<8x256xf32>
      tpu.vector_store %arg6[%c0_11, %c0_12], %14 {strides = array<i32>} : memref<8x256xf32, #tpu.memory_space<vmem>>, vector<8x256xf32>,
    } else {
    }
    %c0 = arith.constant 0 : index
    %c0_1 = arith.constant 0 : index
    %c0_2 = arith.constant 0 : index
    %3 = vector.load %arg3[%c0, %c0_1, %c0_2] : memref<1x8x128xf32, #tpu.memory_space<vmem>>, vector<1x8x128xf32>
    %4 = vector.shape_cast %3 : vector<1x8x128xf32> to vector<8x128xf32>
    %5 = arith.truncf %4 : vector<8x128xf32> to vector<8x128xbf16>
    %c0_3 = arith.constant 0 : index
    %c0_4 = arith.constant 0 : index
    %6 = vector.load %arg4[%c0_3, %c0_4] : memref<128x256xbf16, #tpu.memory_space<vmem>>, vector<128x256xbf16>
    %c0_5 = arith.constant 0 : index
    %c0_6 = arith.constant 0 : index
    %7 = vector.load %arg6[%c0_5, %c0_6] : memref<8x256xf32, #tpu.memory_space<vmem>>, vector<8x256xf32>
    %cst = arith.constant dense<0.000000e+00> : vector<8x256xf32>
    %8 = tpu.matmul %5, %6, %cst {dimension_numbers = #tpu.dot_dimension_numbers<[1], [0], [0], [1], [0, 0, 1, 1], [], []>} : vector<8x128xbf16>, vector<128x256xbf16>, vector<8x256xf32> -> vector<8x256xf32>
    %9 = arith.addf %7, %8 : vector<8x256xf32>
    %c0_7 = arith.constant 0 : index
    %c0_8 = arith.constant 0 : index
    %10 = vector.load %arg6[%c0_7, %c0_8] : memref<8x256xf32, #tpu.memory_space<vmem>>, vector<8x256xf32>
    tpu.vector_store %arg6[%c0_7, %c0_8], %9 {strides = array<i32>} : memref<8x256xf32, #tpu.memory_space<vmem>>, vector<8x256xf32>,
    %c8_i32 = arith.constant 8 : i32
    %11 = arith.cmpi eq, %arg2, %c8_i32 : i32
    %12 = arith.extui %11 : i1 to i32
    %c0_i32_9 = arith.constant 0 : i32
    %13 = arith.cmpi ne, %12, %c0_i32_9 : i32
    scf.if %13 {
      %c0_10 = arith.constant 0 : index
      %c0_11 = arith.constant 0 : index
      %14 = vector.load %arg6[%c0_10, %c0_11] : memref<8x256xf32, #tpu.memory_space<vmem>>, vector<8x256xf32>
      %15 = tpu.iota {dimensions = array<i32: 0>} : vector<8x256xi32>
      %c4_i32 = arith.constant 4 : i32
      %16 = vector.broadcast %c4_i32 : i32 to vector<8x256xi32>
      %17 = arith.cmpi slt, %15, %16 : vector<8x256xi32>
      %18 = arith.extui %17 : vector<8x256xi1> to vector<8x256xi32>
      %19 = arith.sitofp %18 : vector<8x256xi32> to vector<8x256xf32>
      %20 = arith.mulf %14, %19 : vector<8x256xf32>
      %cst_12 = arith.constant dense<0.000000e+00> : vector<256xf32>
      %21 = vector.multi_reduction <add>, %20, %cst_12 [0] : vector<8x256xf32> to vector<256xf32>
      %22 = vector.shape_cast %21 : vector<256xf32> to vector<1x256xf32>
      %cst_13 = arith.constant 2.500000e-01 : f32
      %23 = vector.broadcast %cst_13 : f32 to vector<1x256xf32>
      %24 = arith.mulf %22, %23 : vector<1x256xf32>
      %25 = vector.broadcast %24 : vector<1x256xf32> to vector<8x256xf32>
      %26 = arith.subf %14, %25 : vector<8x256xf32>
      %27 = arith.mulf %26, %19 : vector<8x256xf32>
      %28 = arith.mulf %27, %27 : vector<8x256xf32>
      %cst_14 = arith.constant dense<0.000000e+00> : vector<256xf32>
      %29 = vector.multi_reduction <add>, %28, %cst_14 [0] : vector<8x256xf32> to vector<256xf32>
      %30 = vector.shape_cast %29 : vector<256xf32> to vector<1x256xf32>
      %cst_15 = arith.constant 2.500000e-01 : f32
      %31 = vector.broadcast %cst_15 : f32 to vector<1x256xf32>
      %32 = arith.mulf %30, %31 : vector<1x256xf32>
      %33 = vector.broadcast %24 : vector<1x256xf32> to vector<8x256xf32>
      %34 = arith.subf %14, %33 : vector<8x256xf32>
      %cst_16 = arith.constant 9.99999974E-6 : f32
      %35 = vector.broadcast %cst_16 : f32 to vector<1x256xf32>
      %36 = arith.addf %32, %35 : vector<1x256xf32>
      %37 = math.rsqrt %36 : vector<1x256xf32>
      %38 = vector.broadcast %37 : vector<1x256xf32> to vector<8x256xf32>
      %39 = arith.mulf %34, %38 : vector<8x256xf32>
      %cst_17 = arith.constant 0.000000e+00 : f32
      %40 = vector.broadcast %cst_17 : f32 to vector<8x256xf32>
      %41 = arith.cmpf oge, %39, %40 : vector<8x256xf32>
      %cst_18 = arith.constant 2.000000e-01 : f32
      %42 = vector.broadcast %cst_18 : f32 to vector<8x256xf32>
      %43 = arith.mulf %42, %39 : vector<8x256xf32>
      %44 = arith.select %41, %39, %43 : vector<8x256xi1>, vector<8x256xf32>
      %c0_19 = arith.constant 0 : index
      %c0_20 = arith.constant 0 : index
      %c0_21 = arith.constant 0 : index
      %45 = vector.load %arg5[%c0_19, %c0_20, %c0_21] : memref<1x8x256xf32, #tpu.memory_space<vmem>>, vector<1x8x256xf32>
      %46 = vector.shape_cast %45 : vector<1x8x256xf32> to vector<8x256xf32>
      %47 = vector.shape_cast %44 : vector<8x256xf32> to vector<1x8x256xf32>
      tpu.vector_store %arg5[%c0_19, %c0_20, %c0_21], %47 {strides = array<i32>} : memref<1x8x256xf32, #tpu.memory_space<vmem>>, vector<1x8x256xf32>,
    } else {
    }
    return
  }
  func.func @transform_0(%arg0: i32, %arg1: i32, %arg2: i32) -> (i32, i32, i32) {
    %c0_i32 = arith.constant 0 : i32
    %c0_i32_0 = arith.constant 0 : i32
    return %arg0, %c0_i32, %arg2 : i32, i32, i32
  }
  func.func @transform_1(%arg0: i32, %arg1: i32, %arg2: i32) -> (i32, i32) {
    %c0_i32 = arith.constant 0 : i32
    return %arg2, %arg1 : i32, i32
  }
  func.func @transform_2(%arg0: i32, %arg1: i32, %arg2: i32) -> (i32, i32, i32) {
    %c0_i32 = arith.constant 0 : i32
    %c0_i32_0 = arith.constant 0 : i32
    return %arg0, %c0_i32, %arg1 : i32, i32, i32
  }
}

module attributes {stable_mosaic.version = 11 : i64} {
  func.func @_conv_fused_kernel(%arg0: i32, %arg1: i32, %arg2: i32, %arg3: memref<1x8x256xf32, #tpu.memory_space<vmem>>, %arg4: memref<256x256xbf16, #tpu.memory_space<vmem>>, %arg5: memref<1x8x256xf32, #tpu.memory_space<vmem>>, %arg6: memref<8x256xf32, #tpu.memory_space<vmem>>) attributes {dimension_semantics = [#tpu.dimension_semantics<parallel>, #tpu.dimension_semantics<parallel>, #tpu.dimension_semantics<arbitrary>], iteration_bounds = array<i64: 2, 4, 2>, scalar_prefetch = 0 : i64, scratch_operands = 1 : i64, tpu.core_type = #tpu.core_type<tc>, window_params = [{transform_indices = @transform_0, window_bounds = array<i64: 1, 8, 256>}, {transform_indices = @transform_1, window_bounds = array<i64: 256, 256>}, {transform_indices = @transform_2, window_bounds = array<i64: 1, 8, 256>}]} {
    %c0_i32 = arith.constant 0 : i32
    %0 = arith.cmpi eq, %arg2, %c0_i32 : i32
    %1 = arith.extui %0 : i1 to i32
    %c0_i32_0 = arith.constant 0 : i32
    %2 = arith.cmpi ne, %1, %c0_i32_0 : i32
    scf.if %2 {
      %cst_10 = arith.constant 0.000000e+00 : f32
      %14 = vector.broadcast %cst_10 : f32 to vector<8x256xf32>
      %c0_11 = arith.constant 0 : index
      %c0_12 = arith.constant 0 : index
      %15 = vector.load %arg6[%c0_11, %c0_12] : memref<8x256xf32, #tpu.memory_space<vmem>>, vector<8x256xf32>
      tpu.vector_store %arg6[%c0_11, %c0_12], %14 {strides = array<i32>} : memref<8x256xf32, #tpu.memory_space<vmem>>, vector<8x256xf32>,
    } else {
    }
    %c0 = arith.constant 0 : index
    %c0_1 = arith.constant 0 : index
    %c0_2 = arith.constant 0 : index
    %3 = vector.load %arg3[%c0, %c0_1, %c0_2] : memref<1x8x256xf32, #tpu.memory_space<vmem>>, vector<1x8x256xf32>
    %4 = vector.shape_cast %3 : vector<1x8x256xf32> to vector<8x256xf32>
    %5 = arith.truncf %4 : vector<8x256xf32> to vector<8x256xbf16>
    %c0_3 = arith.constant 0 : index
    %c0_4 = arith.constant 0 : index
    %6 = vector.load %arg4[%c0_3, %c0_4] : memref<256x256xbf16, #tpu.memory_space<vmem>>, vector<256x256xbf16>
    %c0_5 = arith.constant 0 : index
    %c0_6 = arith.constant 0 : index
    %7 = vector.load %arg6[%c0_5, %c0_6] : memref<8x256xf32, #tpu.memory_space<vmem>>, vector<8x256xf32>
    %cst = arith.constant dense<0.000000e+00> : vector<8x256xf32>
    %8 = tpu.matmul %5, %6, %cst {dimension_numbers = #tpu.dot_dimension_numbers<[1], [0], [0], [1], [0, 0, 1, 1], [], []>} : vector<8x256xbf16>, vector<256x256xbf16>, vector<8x256xf32> -> vector<8x256xf32>
    %9 = arith.addf %7, %8 : vector<8x256xf32>
    %c0_7 = arith.constant 0 : index
    %c0_8 = arith.constant 0 : index
    %10 = vector.load %arg6[%c0_7, %c0_8] : memref<8x256xf32, #tpu.memory_space<vmem>>, vector<8x256xf32>
    tpu.vector_store %arg6[%c0_7, %c0_8], %9 {strides = array<i32>} : memref<8x256xf32, #tpu.memory_space<vmem>>, vector<8x256xf32>,
    %c1_i32 = arith.constant 1 : i32
    %11 = arith.cmpi eq, %arg2, %c1_i32 : i32
    %12 = arith.extui %11 : i1 to i32
    %c0_i32_9 = arith.constant 0 : i32
    %13 = arith.cmpi ne, %12, %c0_i32_9 : i32
    scf.if %13 {
      %c0_10 = arith.constant 0 : index
      %c0_11 = arith.constant 0 : index
      %14 = vector.load %arg6[%c0_10, %c0_11] : memref<8x256xf32, #tpu.memory_space<vmem>>, vector<8x256xf32>
      %15 = tpu.iota {dimensions = array<i32: 0>} : vector<8x256xi32>
      %c1_i32_12 = arith.constant 1 : i32
      %16 = vector.broadcast %c1_i32_12 : i32 to vector<8x256xi32>
      %17 = arith.cmpi slt, %15, %16 : vector<8x256xi32>
      %18 = arith.extui %17 : vector<8x256xi1> to vector<8x256xi32>
      %19 = arith.sitofp %18 : vector<8x256xi32> to vector<8x256xf32>
      %20 = arith.mulf %14, %19 : vector<8x256xf32>
      %cst_13 = arith.constant dense<0.000000e+00> : vector<256xf32>
      %21 = vector.multi_reduction <add>, %20, %cst_13 [0] : vector<8x256xf32> to vector<256xf32>
      %22 = vector.shape_cast %21 : vector<256xf32> to vector<1x256xf32>
      %cst_14 = arith.constant 1.000000e+00 : f32
      %23 = vector.broadcast %cst_14 : f32 to vector<1x256xf32>
      %24 = arith.mulf %22, %23 : vector<1x256xf32>
      %25 = vector.broadcast %24 : vector<1x256xf32> to vector<8x256xf32>
      %26 = arith.subf %14, %25 : vector<8x256xf32>
      %27 = arith.mulf %26, %19 : vector<8x256xf32>
      %28 = arith.mulf %27, %27 : vector<8x256xf32>
      %cst_15 = arith.constant dense<0.000000e+00> : vector<256xf32>
      %29 = vector.multi_reduction <add>, %28, %cst_15 [0] : vector<8x256xf32> to vector<256xf32>
      %30 = vector.shape_cast %29 : vector<256xf32> to vector<1x256xf32>
      %cst_16 = arith.constant 1.000000e+00 : f32
      %31 = vector.broadcast %cst_16 : f32 to vector<1x256xf32>
      %32 = arith.mulf %30, %31 : vector<1x256xf32>
      %33 = vector.broadcast %24 : vector<1x256xf32> to vector<8x256xf32>
      %34 = arith.subf %14, %33 : vector<8x256xf32>
      %cst_17 = arith.constant 9.99999974E-6 : f32
      %35 = vector.broadcast %cst_17 : f32 to vector<1x256xf32>
      %36 = arith.addf %32, %35 : vector<1x256xf32>
      %37 = math.rsqrt %36 : vector<1x256xf32>
      %38 = vector.broadcast %37 : vector<1x256xf32> to vector<8x256xf32>
      %39 = arith.mulf %34, %38 : vector<8x256xf32>
      %cst_18 = arith.constant 0.000000e+00 : f32
      %cst_19 = arith.constant 6.000000e+00 : f32
      %40 = vector.broadcast %cst_18 : f32 to vector<8x256xf32>
      %41 = arith.maximumf %40, %39 : vector<8x256xf32>
      %42 = vector.broadcast %cst_19 : f32 to vector<8x256xf32>
      %43 = arith.minimumf %42, %41 : vector<8x256xf32>
      %c0_20 = arith.constant 0 : index
      %c0_21 = arith.constant 0 : index
      %c0_22 = arith.constant 0 : index
      %44 = vector.load %arg5[%c0_20, %c0_21, %c0_22] : memref<1x8x256xf32, #tpu.memory_space<vmem>>, vector<1x8x256xf32>
      %45 = vector.shape_cast %44 : vector<1x8x256xf32> to vector<8x256xf32>
      %46 = vector.shape_cast %43 : vector<8x256xf32> to vector<1x8x256xf32>
      tpu.vector_store %arg5[%c0_20, %c0_21, %c0_22], %46 {strides = array<i32>} : memref<1x8x256xf32, #tpu.memory_space<vmem>>, vector<1x8x256xf32>,
    } else {
    }
    return
  }
  func.func @transform_0(%arg0: i32, %arg1: i32, %arg2: i32) -> (i32, i32, i32) {
    %c0_i32 = arith.constant 0 : i32
    %c0_i32_0 = arith.constant 0 : i32
    return %arg0, %c0_i32, %arg2 : i32, i32, i32
  }
  func.func @transform_1(%arg0: i32, %arg1: i32, %arg2: i32) -> (i32, i32) {
    %c0_i32 = arith.constant 0 : i32
    return %arg2, %arg1 : i32, i32
  }
  func.func @transform_2(%arg0: i32, %arg1: i32, %arg2: i32) -> (i32, i32, i32) {
    %c0_i32 = arith.constant 0 : i32
    %c0_i32_0 = arith.constant 0 : i32
    return %arg0, %c0_i32, %arg1 : i32, i32, i32
  }
}

module attributes {stable_mosaic.version = 11 : i64} {
  func.func @_conv_fused_kernel(%arg0: i32, %arg1: i32, %arg2: i32, %arg3: memref<1x8x256xf32, #tpu.memory_space<vmem>>, %arg4: memref<256x256xbf16, #tpu.memory_space<vmem>>, %arg5: memref<1x8x256xf32, #tpu.memory_space<vmem>>, %arg6: memref<8x256xf32, #tpu.memory_space<vmem>>) attributes {dimension_semantics = [#tpu.dimension_semantics<parallel>, #tpu.dimension_semantics<parallel>, #tpu.dimension_semantics<arbitrary>], iteration_bounds = array<i64: 2, 2, 9>, scalar_prefetch = 0 : i64, scratch_operands = 1 : i64, tpu.core_type = #tpu.core_type<tc>, window_params = [{transform_indices = @transform_0, window_bounds = array<i64: 1, 8, 256>}, {transform_indices = @transform_1, window_bounds = array<i64: 256, 256>}, {transform_indices = @transform_2, window_bounds = array<i64: 1, 8, 256>}]} {
    %c0_i32 = arith.constant 0 : i32
    %0 = arith.cmpi eq, %arg2, %c0_i32 : i32
    %1 = arith.extui %0 : i1 to i32
    %c0_i32_0 = arith.constant 0 : i32
    %2 = arith.cmpi ne, %1, %c0_i32_0 : i32
    scf.if %2 {
      %cst_10 = arith.constant 0.000000e+00 : f32
      %14 = vector.broadcast %cst_10 : f32 to vector<8x256xf32>
      %c0_11 = arith.constant 0 : index
      %c0_12 = arith.constant 0 : index
      %15 = vector.load %arg6[%c0_11, %c0_12] : memref<8x256xf32, #tpu.memory_space<vmem>>, vector<8x256xf32>
      tpu.vector_store %arg6[%c0_11, %c0_12], %14 {strides = array<i32>} : memref<8x256xf32, #tpu.memory_space<vmem>>, vector<8x256xf32>,
    } else {
    }
    %c0 = arith.constant 0 : index
    %c0_1 = arith.constant 0 : index
    %c0_2 = arith.constant 0 : index
    %3 = vector.load %arg3[%c0, %c0_1, %c0_2] : memref<1x8x256xf32, #tpu.memory_space<vmem>>, vector<1x8x256xf32>
    %4 = vector.shape_cast %3 : vector<1x8x256xf32> to vector<8x256xf32>
    %5 = arith.truncf %4 : vector<8x256xf32> to vector<8x256xbf16>
    %c0_3 = arith.constant 0 : index
    %c0_4 = arith.constant 0 : index
    %6 = vector.load %arg4[%c0_3, %c0_4] : memref<256x256xbf16, #tpu.memory_space<vmem>>, vector<256x256xbf16>
    %c0_5 = arith.constant 0 : index
    %c0_6 = arith.constant 0 : index
    %7 = vector.load %arg6[%c0_5, %c0_6] : memref<8x256xf32, #tpu.memory_space<vmem>>, vector<8x256xf32>
    %cst = arith.constant dense<0.000000e+00> : vector<8x256xf32>
    %8 = tpu.matmul %5, %6, %cst {dimension_numbers = #tpu.dot_dimension_numbers<[1], [0], [0], [1], [0, 0, 1, 1], [], []>} : vector<8x256xbf16>, vector<256x256xbf16>, vector<8x256xf32> -> vector<8x256xf32>
    %9 = arith.addf %7, %8 : vector<8x256xf32>
    %c0_7 = arith.constant 0 : index
    %c0_8 = arith.constant 0 : index
    %10 = vector.load %arg6[%c0_7, %c0_8] : memref<8x256xf32, #tpu.memory_space<vmem>>, vector<8x256xf32>
    tpu.vector_store %arg6[%c0_7, %c0_8], %9 {strides = array<i32>} : memref<8x256xf32, #tpu.memory_space<vmem>>, vector<8x256xf32>,
    %c8_i32 = arith.constant 8 : i32
    %11 = arith.cmpi eq, %arg2, %c8_i32 : i32
    %12 = arith.extui %11 : i1 to i32
    %c0_i32_9 = arith.constant 0 : i32
    %13 = arith.cmpi ne, %12, %c0_i32_9 : i32
    scf.if %13 {
      %c0_10 = arith.constant 0 : index
      %c0_11 = arith.constant 0 : index
      %14 = vector.load %arg6[%c0_10, %c0_11] : memref<8x256xf32, #tpu.memory_space<vmem>>, vector<8x256xf32>
      %15 = tpu.iota {dimensions = array<i32: 0>} : vector<8x256xi32>
      %c1_i32 = arith.constant 1 : i32
      %16 = vector.broadcast %c1_i32 : i32 to vector<8x256xi32>
      %17 = arith.cmpi slt, %15, %16 : vector<8x256xi32>
      %18 = arith.extui %17 : vector<8x256xi1> to vector<8x256xi32>
      %19 = arith.sitofp %18 : vector<8x256xi32> to vector<8x256xf32>
      %20 = arith.mulf %14, %19 : vector<8x256xf32>
      %cst_12 = arith.constant dense<0.000000e+00> : vector<256xf32>
      %21 = vector.multi_reduction <add>, %20, %cst_12 [0] : vector<8x256xf32> to vector<256xf32>
      %22 = vector.shape_cast %21 : vector<256xf32> to vector<1x256xf32>
      %cst_13 = arith.constant 1.000000e+00 : f32
      %23 = vector.broadcast %cst_13 : f32 to vector<1x256xf32>
      %24 = arith.mulf %22, %23 : vector<1x256xf32>
      %25 = vector.broadcast %24 : vector<1x256xf32> to vector<8x256xf32>
      %26 = arith.subf %14, %25 : vector<8x256xf32>
      %27 = arith.mulf %26, %19 : vector<8x256xf32>
      %28 = arith.mulf %27, %27 : vector<8x256xf32>
      %cst_14 = arith.constant dense<0.000000e+00> : vector<256xf32>
      %29 = vector.multi_reduction <add>, %28, %cst_14 [0] : vector<8x256xf32> to vector<256xf32>
      %30 = vector.shape_cast %29 : vector<256xf32> to vector<1x256xf32>
      %cst_15 = arith.constant 1.000000e+00 : f32
      %31 = vector.broadcast %cst_15 : f32 to vector<1x256xf32>
      %32 = arith.mulf %30, %31 : vector<1x256xf32>
      %33 = vector.broadcast %24 : vector<1x256xf32> to vector<8x256xf32>
      %34 = arith.subf %14, %33 : vector<8x256xf32>
      %cst_16 = arith.constant 9.99999974E-6 : f32
      %35 = vector.broadcast %cst_16 : f32 to vector<1x256xf32>
      %36 = arith.addf %32, %35 : vector<1x256xf32>
      %37 = math.rsqrt %36 : vector<1x256xf32>
      %38 = vector.broadcast %37 : vector<1x256xf32> to vector<8x256xf32>
      %39 = arith.mulf %34, %38 : vector<8x256xf32>
      %cst_17 = arith.constant 0.000000e+00 : f32
      %40 = vector.broadcast %cst_17 : f32 to vector<8x256xf32>
      %41 = arith.cmpf oge, %39, %40 : vector<8x256xf32>
      %cst_18 = arith.constant 2.000000e-01 : f32
      %42 = vector.broadcast %cst_18 : f32 to vector<8x256xf32>
      %43 = arith.mulf %42, %39 : vector<8x256xf32>
      %44 = arith.select %41, %39, %43 : vector<8x256xi1>, vector<8x256xf32>
      %c0_19 = arith.constant 0 : index
      %c0_20 = arith.constant 0 : index
      %c0_21 = arith.constant 0 : index
      %45 = vector.load %arg5[%c0_19, %c0_20, %c0_21] : memref<1x8x256xf32, #tpu.memory_space<vmem>>, vector<1x8x256xf32>
      %46 = vector.shape_cast %45 : vector<1x8x256xf32> to vector<8x256xf32>
      %47 = vector.shape_cast %44 : vector<8x256xf32> to vector<1x8x256xf32>
      tpu.vector_store %arg5[%c0_19, %c0_20, %c0_21], %47 {strides = array<i32>} : memref<1x8x256xf32, #tpu.memory_space<vmem>>, vector<1x8x256xf32>,
    } else {
    }
    return
  }
  func.func @transform_0(%arg0: i32, %arg1: i32, %arg2: i32) -> (i32, i32, i32) {
    %c0_i32 = arith.constant 0 : i32
    %c0_i32_0 = arith.constant 0 : i32
    return %arg0, %c0_i32, %arg2 : i32, i32, i32
  }
  func.func @transform_1(%arg0: i32, %arg1: i32, %arg2: i32) -> (i32, i32) {
    %c0_i32 = arith.constant 0 : i32
    return %arg2, %arg1 : i32, i32
  }
  func.func @transform_2(%arg0: i32, %arg1: i32, %arg2: i32) -> (i32, i32, i32) {
    %c0_i32 = arith.constant 0 : i32
    %c0_i32_0 = arith.constant 0 : i32
    return %arg0, %c0_i32, %arg1 : i32, i32, i32
  }
}

module attributes {stable_mosaic.version = 11 : i64} {
  func.func @_dw_fused_kernel(%arg0: i32, %arg1: i32, %arg2: memref<9x1x8x256xf32, #tpu.memory_space<vmem>>, %arg3: memref<9x1x256xf32, #tpu.memory_space<vmem>>, %arg4: memref<1x8x256xf32, #tpu.memory_space<vmem>>) attributes {dimension_semantics = [#tpu.dimension_semantics<parallel>, #tpu.dimension_semantics<parallel>], iteration_bounds = array<i64: 2, 4>, scalar_prefetch = 0 : i64, scratch_operands = 0 : i64, tpu.core_type = #tpu.core_type<tc>, window_params = [{transform_indices = @transform_0, window_bounds = array<i64: 9, 1, 8, 256>}, {transform_indices = @transform_1, window_bounds = array<i64: 9, 1, 256>}, {transform_indices = @transform_2, window_bounds = array<i64: 1, 8, 256>}]} {
    %c0 = arith.constant 0 : index
    %c0_0 = arith.constant 0 : index
    %c0_1 = arith.constant 0 : index
    %c0_2 = arith.constant 0 : index
    %0 = vector.load %arg2[%c0, %c0_0, %c0_1, %c0_2] : memref<9x1x8x256xf32, #tpu.memory_space<vmem>>, vector<1x1x8x256xf32>
    %1 = vector.shape_cast %0 : vector<1x1x8x256xf32> to vector<1x8x256xf32>
    %c0_3 = arith.constant 0 : index
    %c0_4 = arith.constant 0 : index
    %c0_5 = arith.constant 0 : index
    %2 = vector.load %arg3[%c0_3, %c0_4, %c0_5] : memref<9x1x256xf32, #tpu.memory_space<vmem>>, vector<1x1x256xf32>
    %3 = vector.shape_cast %2 : vector<1x1x256xf32> to vector<1x256xf32>
    %4 = vector.shape_cast %3 : vector<1x256xf32> to vector<1x1x256xf32>
    %5 = vector.broadcast %4 : vector<1x1x256xf32> to vector<1x8x256xf32>
    %6 = arith.mulf %1, %5 : vector<1x8x256xf32>
    %c1 = arith.constant 1 : index
    %c0_6 = arith.constant 0 : index
    %c0_7 = arith.constant 0 : index
    %c0_8 = arith.constant 0 : index
    %7 = vector.load %arg2[%c1, %c0_6, %c0_7, %c0_8] : memref<9x1x8x256xf32, #tpu.memory_space<vmem>>, vector<1x1x8x256xf32>
    %8 = vector.shape_cast %7 : vector<1x1x8x256xf32> to vector<1x8x256xf32>
    %c1_9 = arith.constant 1 : index
    %c0_10 = arith.constant 0 : index
    %c0_11 = arith.constant 0 : index
    %9 = vector.load %arg3[%c1_9, %c0_10, %c0_11] : memref<9x1x256xf32, #tpu.memory_space<vmem>>, vector<1x1x256xf32>
    %10 = vector.shape_cast %9 : vector<1x1x256xf32> to vector<1x256xf32>
    %11 = vector.shape_cast %10 : vector<1x256xf32> to vector<1x1x256xf32>
    %12 = vector.broadcast %11 : vector<1x1x256xf32> to vector<1x8x256xf32>
    %13 = arith.mulf %8, %12 : vector<1x8x256xf32>
    %14 = arith.addf %6, %13 : vector<1x8x256xf32>
    %c2 = arith.constant 2 : index
    %c0_12 = arith.constant 0 : index
    %c0_13 = arith.constant 0 : index
    %c0_14 = arith.constant 0 : index
    %15 = vector.load %arg2[%c2, %c0_12, %c0_13, %c0_14] : memref<9x1x8x256xf32, #tpu.memory_space<vmem>>, vector<1x1x8x256xf32>
    %16 = vector.shape_cast %15 : vector<1x1x8x256xf32> to vector<1x8x256xf32>
    %c2_15 = arith.constant 2 : index
    %c0_16 = arith.constant 0 : index
    %c0_17 = arith.constant 0 : index
    %17 = vector.load %arg3[%c2_15, %c0_16, %c0_17] : memref<9x1x256xf32, #tpu.memory_space<vmem>>, vector<1x1x256xf32>
    %18 = vector.shape_cast %17 : vector<1x1x256xf32> to vector<1x256xf32>
    %19 = vector.shape_cast %18 : vector<1x256xf32> to vector<1x1x256xf32>
    %20 = vector.broadcast %19 : vector<1x1x256xf32> to vector<1x8x256xf32>
    %21 = arith.mulf %16, %20 : vector<1x8x256xf32>
    %22 = arith.addf %14, %21 : vector<1x8x256xf32>
    %c3 = arith.constant 3 : index
    %c0_18 = arith.constant 0 : index
    %c0_19 = arith.constant 0 : index
    %c0_20 = arith.constant 0 : index
    %23 = vector.load %arg2[%c3, %c0_18, %c0_19, %c0_20] : memref<9x1x8x256xf32, #tpu.memory_space<vmem>>, vector<1x1x8x256xf32>
    %24 = vector.shape_cast %23 : vector<1x1x8x256xf32> to vector<1x8x256xf32>
    %c3_21 = arith.constant 3 : index
    %c0_22 = arith.constant 0 : index
    %c0_23 = arith.constant 0 : index
    %25 = vector.load %arg3[%c3_21, %c0_22, %c0_23] : memref<9x1x256xf32, #tpu.memory_space<vmem>>, vector<1x1x256xf32>
    %26 = vector.shape_cast %25 : vector<1x1x256xf32> to vector<1x256xf32>
    %27 = vector.shape_cast %26 : vector<1x256xf32> to vector<1x1x256xf32>
    %28 = vector.broadcast %27 : vector<1x1x256xf32> to vector<1x8x256xf32>
    %29 = arith.mulf %24, %28 : vector<1x8x256xf32>
    %30 = arith.addf %22, %29 : vector<1x8x256xf32>
    %c4 = arith.constant 4 : index
    %c0_24 = arith.constant 0 : index
    %c0_25 = arith.constant 0 : index
    %c0_26 = arith.constant 0 : index
    %31 = vector.load %arg2[%c4, %c0_24, %c0_25, %c0_26] : memref<9x1x8x256xf32, #tpu.memory_space<vmem>>, vector<1x1x8x256xf32>
    %32 = vector.shape_cast %31 : vector<1x1x8x256xf32> to vector<1x8x256xf32>
    %c4_27 = arith.constant 4 : index
    %c0_28 = arith.constant 0 : index
    %c0_29 = arith.constant 0 : index
    %33 = vector.load %arg3[%c4_27, %c0_28, %c0_29] : memref<9x1x256xf32, #tpu.memory_space<vmem>>, vector<1x1x256xf32>
    %34 = vector.shape_cast %33 : vector<1x1x256xf32> to vector<1x256xf32>
    %35 = vector.shape_cast %34 : vector<1x256xf32> to vector<1x1x256xf32>
    %36 = vector.broadcast %35 : vector<1x1x256xf32> to vector<1x8x256xf32>
    %37 = arith.mulf %32, %36 : vector<1x8x256xf32>
    %38 = arith.addf %30, %37 : vector<1x8x256xf32>
    %c5 = arith.constant 5 : index
    %c0_30 = arith.constant 0 : index
    %c0_31 = arith.constant 0 : index
    %c0_32 = arith.constant 0 : index
    %39 = vector.load %arg2[%c5, %c0_30, %c0_31, %c0_32] : memref<9x1x8x256xf32, #tpu.memory_space<vmem>>, vector<1x1x8x256xf32>
    %40 = vector.shape_cast %39 : vector<1x1x8x256xf32> to vector<1x8x256xf32>
    %c5_33 = arith.constant 5 : index
    %c0_34 = arith.constant 0 : index
    %c0_35 = arith.constant 0 : index
    %41 = vector.load %arg3[%c5_33, %c0_34, %c0_35] : memref<9x1x256xf32, #tpu.memory_space<vmem>>, vector<1x1x256xf32>
    %42 = vector.shape_cast %41 : vector<1x1x256xf32> to vector<1x256xf32>
    %43 = vector.shape_cast %42 : vector<1x256xf32> to vector<1x1x256xf32>
    %44 = vector.broadcast %43 : vector<1x1x256xf32> to vector<1x8x256xf32>
    %45 = arith.mulf %40, %44 : vector<1x8x256xf32>
    %46 = arith.addf %38, %45 : vector<1x8x256xf32>
    %c6 = arith.constant 6 : index
    %c0_36 = arith.constant 0 : index
    %c0_37 = arith.constant 0 : index
    %c0_38 = arith.constant 0 : index
    %47 = vector.load %arg2[%c6, %c0_36, %c0_37, %c0_38] : memref<9x1x8x256xf32, #tpu.memory_space<vmem>>, vector<1x1x8x256xf32>
    %48 = vector.shape_cast %47 : vector<1x1x8x256xf32> to vector<1x8x256xf32>
    %c6_39 = arith.constant 6 : index
    %c0_40 = arith.constant 0 : index
    %c0_41 = arith.constant 0 : index
    %49 = vector.load %arg3[%c6_39, %c0_40, %c0_41] : memref<9x1x256xf32, #tpu.memory_space<vmem>>, vector<1x1x256xf32>
    %50 = vector.shape_cast %49 : vector<1x1x256xf32> to vector<1x256xf32>
    %51 = vector.shape_cast %50 : vector<1x256xf32> to vector<1x1x256xf32>
    %52 = vector.broadcast %51 : vector<1x1x256xf32> to vector<1x8x256xf32>
    %53 = arith.mulf %48, %52 : vector<1x8x256xf32>
    %54 = arith.addf %46, %53 : vector<1x8x256xf32>
    %c7 = arith.constant 7 : index
    %c0_42 = arith.constant 0 : index
    %c0_43 = arith.constant 0 : index
    %c0_44 = arith.constant 0 : index
    %55 = vector.load %arg2[%c7, %c0_42, %c0_43, %c0_44] : memref<9x1x8x256xf32, #tpu.memory_space<vmem>>, vector<1x1x8x256xf32>
    %56 = vector.shape_cast %55 : vector<1x1x8x256xf32> to vector<1x8x256xf32>
    %c7_45 = arith.constant 7 : index
    %c0_46 = arith.constant 0 : index
    %c0_47 = arith.constant 0 : index
    %57 = vector.load %arg3[%c7_45, %c0_46, %c0_47] : memref<9x1x256xf32, #tpu.memory_space<vmem>>, vector<1x1x256xf32>
    %58 = vector.shape_cast %57 : vector<1x1x256xf32> to vector<1x256xf32>
    %59 = vector.shape_cast %58 : vector<1x256xf32> to vector<1x1x256xf32>
    %60 = vector.broadcast %59 : vector<1x1x256xf32> to vector<1x8x256xf32>
    %61 = arith.mulf %56, %60 : vector<1x8x256xf32>
    %62 = arith.addf %54, %61 : vector<1x8x256xf32>
    %c8 = arith.constant 8 : index
    %c0_48 = arith.constant 0 : index
    %c0_49 = arith.constant 0 : index
    %c0_50 = arith.constant 0 : index
    %63 = vector.load %arg2[%c8, %c0_48, %c0_49, %c0_50] : memref<9x1x8x256xf32, #tpu.memory_space<vmem>>, vector<1x1x8x256xf32>
    %64 = vector.shape_cast %63 : vector<1x1x8x256xf32> to vector<1x8x256xf32>
    %c8_51 = arith.constant 8 : index
    %c0_52 = arith.constant 0 : index
    %c0_53 = arith.constant 0 : index
    %65 = vector.load %arg3[%c8_51, %c0_52, %c0_53] : memref<9x1x256xf32, #tpu.memory_space<vmem>>, vector<1x1x256xf32>
    %66 = vector.shape_cast %65 : vector<1x1x256xf32> to vector<1x256xf32>
    %67 = vector.shape_cast %66 : vector<1x256xf32> to vector<1x1x256xf32>
    %68 = vector.broadcast %67 : vector<1x1x256xf32> to vector<1x8x256xf32>
    %69 = arith.mulf %64, %68 : vector<1x8x256xf32>
    %70 = arith.addf %62, %69 : vector<1x8x256xf32>
    %71 = vector.shape_cast %70 : vector<1x8x256xf32> to vector<8x256xf32>
    %72 = tpu.iota {dimensions = array<i32: 0>} : vector<8x256xi32>
    %c1_i32 = arith.constant 1 : i32
    %73 = vector.broadcast %c1_i32 : i32 to vector<8x256xi32>
    %74 = arith.cmpi slt, %72, %73 : vector<8x256xi32>
    %75 = arith.extui %74 : vector<8x256xi1> to vector<8x256xi32>
    %76 = arith.sitofp %75 : vector<8x256xi32> to vector<8x256xf32>
    %77 = arith.mulf %71, %76 : vector<8x256xf32>
    %cst = arith.constant dense<0.000000e+00> : vector<256xf32>
    %78 = vector.multi_reduction <add>, %77, %cst [0] : vector<8x256xf32> to vector<256xf32>
    %79 = vector.shape_cast %78 : vector<256xf32> to vector<1x256xf32>
    %cst_54 = arith.constant 1.000000e+00 : f32
    %80 = vector.broadcast %cst_54 : f32 to vector<1x256xf32>
    %81 = arith.mulf %79, %80 : vector<1x256xf32>
    %82 = vector.broadcast %81 : vector<1x256xf32> to vector<8x256xf32>
    %83 = arith.subf %71, %82 : vector<8x256xf32>
    %84 = arith.mulf %83, %76 : vector<8x256xf32>
    %85 = arith.mulf %84, %84 : vector<8x256xf32>
    %cst_55 = arith.constant dense<0.000000e+00> : vector<256xf32>
    %86 = vector.multi_reduction <add>, %85, %cst_55 [0] : vector<8x256xf32> to vector<256xf32>
    %87 = vector.shape_cast %86 : vector<256xf32> to vector<1x256xf32>
    %cst_56 = arith.constant 1.000000e+00 : f32
    %88 = vector.broadcast %cst_56 : f32 to vector<1x256xf32>
    %89 = arith.mulf %87, %88 : vector<1x256xf32>
    %90 = vector.broadcast %81 : vector<1x256xf32> to vector<8x256xf32>
    %91 = arith.subf %71, %90 : vector<8x256xf32>
    %cst_57 = arith.constant 9.99999974E-6 : f32
    %92 = vector.broadcast %cst_57 : f32 to vector<1x256xf32>
    %93 = arith.addf %89, %92 : vector<1x256xf32>
    %94 = math.rsqrt %93 : vector<1x256xf32>
    %95 = vector.broadcast %94 : vector<1x256xf32> to vector<8x256xf32>
    %96 = arith.mulf %91, %95 : vector<8x256xf32>
    %cst_58 = arith.constant 0.000000e+00 : f32
    %cst_59 = arith.constant 6.000000e+00 : f32
    %97 = vector.broadcast %cst_58 : f32 to vector<8x256xf32>
    %98 = arith.maximumf %97, %96 : vector<8x256xf32>
    %99 = vector.broadcast %cst_59 : f32 to vector<8x256xf32>
    %100 = arith.minimumf %99, %98 : vector<8x256xf32>
    %c0_60 = arith.constant 0 : index
    %c0_61 = arith.constant 0 : index
    %c0_62 = arith.constant 0 : index
    %101 = vector.load %arg4[%c0_60, %c0_61, %c0_62] : memref<1x8x256xf32, #tpu.memory_space<vmem>>, vector<1x8x256xf32>
    %102 = vector.shape_cast %101 : vector<1x8x256xf32> to vector<8x256xf32>
    %103 = vector.shape_cast %100 : vector<8x256xf32> to vector<1x8x256xf32>
    tpu.vector_store %arg4[%c0_60, %c0_61, %c0_62], %103 {strides = array<i32>} : memref<1x8x256xf32, #tpu.memory_space<vmem>>, vector<1x8x256xf32>,
    return
  }
  func.func @transform_0(%arg0: i32, %arg1: i32) -> (i32, i32, i32, i32) {
    %c0_i32 = arith.constant 0 : i32
    %c0_i32_0 = arith.constant 0 : i32
    %c0_i32_1 = arith.constant 0 : i32
    return %c0_i32, %arg0, %c0_i32_0, %arg1 : i32, i32, i32, i32
  }
  func.func @transform_1(%arg0: i32, %arg1: i32) -> (i32, i32, i32) {
    %c0_i32 = arith.constant 0 : i32
    %c0_i32_0 = arith.constant 0 : i32
    %c0_i32_1 = arith.constant 0 : i32
    return %c0_i32, %c0_i32_0, %arg1 : i32, i32, i32
  }
  func.func @transform_2(%arg0: i32, %arg1: i32) -> (i32, i32, i32) {
    %c0_i32 = arith.constant 0 : i32
    %c0_i32_0 = arith.constant 0 : i32
    return %arg0, %c0_i32, %arg1 : i32, i32, i32
  }
}

module attributes {stable_mosaic.version = 11 : i64} {
  func.func @_conv_fused_kernel(%arg0: i32, %arg1: i32, %arg2: i32, %arg3: memref<1x8x256xf32, #tpu.memory_space<vmem>>, %arg4: memref<256x256xbf16, #tpu.memory_space<vmem>>, %arg5: memref<1x8x256xf32, #tpu.memory_space<vmem>>, %arg6: memref<1x8x256xf32, #tpu.memory_space<vmem>>, %arg7: memref<8x256xf32, #tpu.memory_space<vmem>>) attributes {dimension_semantics = [#tpu.dimension_semantics<parallel>, #tpu.dimension_semantics<parallel>, #tpu.dimension_semantics<arbitrary>], iteration_bounds = array<i64: 2, 2, 4>, scalar_prefetch = 0 : i64, scratch_operands = 1 : i64, tpu.core_type = #tpu.core_type<tc>, window_params = [{transform_indices = @transform_0, window_bounds = array<i64: 1, 8, 256>}, {transform_indices = @transform_1, window_bounds = array<i64: 256, 256>}, {transform_indices = @transform_2, window_bounds = array<i64: 1, 8, 256>}, {transform_indices = @transform_3, window_bounds = array<i64: 1, 8, 256>}]} {
    %c0_i32 = arith.constant 0 : i32
    %0 = arith.cmpi eq, %arg2, %c0_i32 : i32
    %1 = arith.extui %0 : i1 to i32
    %c0_i32_0 = arith.constant 0 : i32
    %2 = arith.cmpi ne, %1, %c0_i32_0 : i32
    scf.if %2 {
      %cst_10 = arith.constant 0.000000e+00 : f32
      %14 = vector.broadcast %cst_10 : f32 to vector<8x256xf32>
      %c0_11 = arith.constant 0 : index
      %c0_12 = arith.constant 0 : index
      %15 = vector.load %arg7[%c0_11, %c0_12] : memref<8x256xf32, #tpu.memory_space<vmem>>, vector<8x256xf32>
      tpu.vector_store %arg7[%c0_11, %c0_12], %14 {strides = array<i32>} : memref<8x256xf32, #tpu.memory_space<vmem>>, vector<8x256xf32>,
    } else {
    }
    %c0 = arith.constant 0 : index
    %c0_1 = arith.constant 0 : index
    %c0_2 = arith.constant 0 : index
    %3 = vector.load %arg3[%c0, %c0_1, %c0_2] : memref<1x8x256xf32, #tpu.memory_space<vmem>>, vector<1x8x256xf32>
    %4 = vector.shape_cast %3 : vector<1x8x256xf32> to vector<8x256xf32>
    %5 = arith.truncf %4 : vector<8x256xf32> to vector<8x256xbf16>
    %c0_3 = arith.constant 0 : index
    %c0_4 = arith.constant 0 : index
    %6 = vector.load %arg4[%c0_3, %c0_4] : memref<256x256xbf16, #tpu.memory_space<vmem>>, vector<256x256xbf16>
    %c0_5 = arith.constant 0 : index
    %c0_6 = arith.constant 0 : index
    %7 = vector.load %arg7[%c0_5, %c0_6] : memref<8x256xf32, #tpu.memory_space<vmem>>, vector<8x256xf32>
    %cst = arith.constant dense<0.000000e+00> : vector<8x256xf32>
    %8 = tpu.matmul %5, %6, %cst {dimension_numbers = #tpu.dot_dimension_numbers<[1], [0], [0], [1], [0, 0, 1, 1], [], []>} : vector<8x256xbf16>, vector<256x256xbf16>, vector<8x256xf32> -> vector<8x256xf32>
    %9 = arith.addf %7, %8 : vector<8x256xf32>
    %c0_7 = arith.constant 0 : index
    %c0_8 = arith.constant 0 : index
    %10 = vector.load %arg7[%c0_7, %c0_8] : memref<8x256xf32, #tpu.memory_space<vmem>>, vector<8x256xf32>
    tpu.vector_store %arg7[%c0_7, %c0_8], %9 {strides = array<i32>} : memref<8x256xf32, #tpu.memory_space<vmem>>, vector<8x256xf32>,
    %c3_i32 = arith.constant 3 : i32
    %11 = arith.cmpi eq, %arg2, %c3_i32 : i32
    %12 = arith.extui %11 : i1 to i32
    %c0_i32_9 = arith.constant 0 : i32
    %13 = arith.cmpi ne, %12, %c0_i32_9 : i32
    scf.if %13 {
      %c0_10 = arith.constant 0 : index
      %c0_11 = arith.constant 0 : index
      %14 = vector.load %arg7[%c0_10, %c0_11] : memref<8x256xf32, #tpu.memory_space<vmem>>, vector<8x256xf32>
      %15 = tpu.iota {dimensions = array<i32: 0>} : vector<8x256xi32>
      %c1_i32 = arith.constant 1 : i32
      %16 = vector.broadcast %c1_i32 : i32 to vector<8x256xi32>
      %17 = arith.cmpi slt, %15, %16 : vector<8x256xi32>
      %18 = arith.extui %17 : vector<8x256xi1> to vector<8x256xi32>
      %19 = arith.sitofp %18 : vector<8x256xi32> to vector<8x256xf32>
      %20 = arith.mulf %14, %19 : vector<8x256xf32>
      %cst_12 = arith.constant dense<0.000000e+00> : vector<256xf32>
      %21 = vector.multi_reduction <add>, %20, %cst_12 [0] : vector<8x256xf32> to vector<256xf32>
      %22 = vector.shape_cast %21 : vector<256xf32> to vector<1x256xf32>
      %cst_13 = arith.constant 1.000000e+00 : f32
      %23 = vector.broadcast %cst_13 : f32 to vector<1x256xf32>
      %24 = arith.mulf %22, %23 : vector<1x256xf32>
      %25 = vector.broadcast %24 : vector<1x256xf32> to vector<8x256xf32>
      %26 = arith.subf %14, %25 : vector<8x256xf32>
      %27 = arith.mulf %26, %19 : vector<8x256xf32>
      %28 = arith.mulf %27, %27 : vector<8x256xf32>
      %cst_14 = arith.constant dense<0.000000e+00> : vector<256xf32>
      %29 = vector.multi_reduction <add>, %28, %cst_14 [0] : vector<8x256xf32> to vector<256xf32>
      %30 = vector.shape_cast %29 : vector<256xf32> to vector<1x256xf32>
      %cst_15 = arith.constant 1.000000e+00 : f32
      %31 = vector.broadcast %cst_15 : f32 to vector<1x256xf32>
      %32 = arith.mulf %30, %31 : vector<1x256xf32>
      %33 = vector.broadcast %24 : vector<1x256xf32> to vector<8x256xf32>
      %34 = arith.subf %14, %33 : vector<8x256xf32>
      %cst_16 = arith.constant 9.99999974E-6 : f32
      %35 = vector.broadcast %cst_16 : f32 to vector<1x256xf32>
      %36 = arith.addf %32, %35 : vector<1x256xf32>
      %37 = math.rsqrt %36 : vector<1x256xf32>
      %38 = vector.broadcast %37 : vector<1x256xf32> to vector<8x256xf32>
      %39 = arith.mulf %34, %38 : vector<8x256xf32>
      %c0_17 = arith.constant 0 : index
      %c0_18 = arith.constant 0 : index
      %c0_19 = arith.constant 0 : index
      %40 = vector.load %arg5[%c0_17, %c0_18, %c0_19] : memref<1x8x256xf32, #tpu.memory_space<vmem>>, vector<1x8x256xf32>
      %41 = vector.shape_cast %40 : vector<1x8x256xf32> to vector<8x256xf32>
      %42 = arith.addf %39, %41 : vector<8x256xf32>
      %c0_20 = arith.constant 0 : index
      %c0_21 = arith.constant 0 : index
      %c0_22 = arith.constant 0 : index
      %43 = vector.load %arg6[%c0_20, %c0_21, %c0_22] : memref<1x8x256xf32, #tpu.memory_space<vmem>>, vector<1x8x256xf32>
      %44 = vector.shape_cast %43 : vector<1x8x256xf32> to vector<8x256xf32>
      %45 = vector.shape_cast %42 : vector<8x256xf32> to vector<1x8x256xf32>
      tpu.vector_store %arg6[%c0_20, %c0_21, %c0_22], %45 {strides = array<i32>} : memref<1x8x256xf32, #tpu.memory_space<vmem>>, vector<1x8x256xf32>,
    } else {
    }
    return
  }
  func.func @transform_0(%arg0: i32, %arg1: i32, %arg2: i32) -> (i32, i32, i32) {
    %c0_i32 = arith.constant 0 : i32
    %c0_i32_0 = arith.constant 0 : i32
    return %arg0, %c0_i32, %arg2 : i32, i32, i32
  }
  func.func @transform_1(%arg0: i32, %arg1: i32, %arg2: i32) -> (i32, i32) {
    %c0_i32 = arith.constant 0 : i32
    return %arg2, %arg1 : i32, i32
  }
  func.func @transform_2(%arg0: i32, %arg1: i32, %arg2: i32) -> (i32, i32, i32) {
    %c0_i32 = arith.constant 0 : i32
    %c0_i32_0 = arith.constant 0 : i32
    return %arg0, %c0_i32, %arg1 : i32, i32, i32
  }
  func.func @transform_3(%arg0: i32, %arg1: i32, %arg2: i32) -> (i32, i32, i32) {
    %c0_i32 = arith.constant 0 : i32
    %c0_i32_0 = arith.constant 0 : i32
    return %arg0, %c0_i32, %arg1 : i32, i32, i32
  }
}

module attributes {stable_mosaic.version = 11 : i64} {
  func.func @_conv_fused_kernel(%arg0: i32, %arg1: i32, %arg2: i32, %arg3: memref<1x8x256xf32, #tpu.memory_space<vmem>>, %arg4: memref<256x256xbf16, #tpu.memory_space<vmem>>, %arg5: memref<1x8x256xf32, #tpu.memory_space<vmem>>, %arg6: memref<8x256xf32, #tpu.memory_space<vmem>>) attributes {dimension_semantics = [#tpu.dimension_semantics<parallel>, #tpu.dimension_semantics<parallel>, #tpu.dimension_semantics<arbitrary>], iteration_bounds = array<i64: 2, 1, 18>, scalar_prefetch = 0 : i64, scratch_operands = 1 : i64, tpu.core_type = #tpu.core_type<tc>, window_params = [{transform_indices = @transform_0, window_bounds = array<i64: 1, 8, 256>}, {transform_indices = @transform_1, window_bounds = array<i64: 256, 256>}, {transform_indices = @transform_2, window_bounds = array<i64: 1, 8, 256>}]} {
    %c0_i32 = arith.constant 0 : i32
    %0 = arith.cmpi eq, %arg2, %c0_i32 : i32
    %1 = arith.extui %0 : i1 to i32
    %c0_i32_0 = arith.constant 0 : i32
    %2 = arith.cmpi ne, %1, %c0_i32_0 : i32
    scf.if %2 {
      %cst_10 = arith.constant 0.000000e+00 : f32
      %14 = vector.broadcast %cst_10 : f32 to vector<8x256xf32>
      %c0_11 = arith.constant 0 : index
      %c0_12 = arith.constant 0 : index
      %15 = vector.load %arg6[%c0_11, %c0_12] : memref<8x256xf32, #tpu.memory_space<vmem>>, vector<8x256xf32>
      tpu.vector_store %arg6[%c0_11, %c0_12], %14 {strides = array<i32>} : memref<8x256xf32, #tpu.memory_space<vmem>>, vector<8x256xf32>,
    } else {
    }
    %c0 = arith.constant 0 : index
    %c0_1 = arith.constant 0 : index
    %c0_2 = arith.constant 0 : index
    %3 = vector.load %arg3[%c0, %c0_1, %c0_2] : memref<1x8x256xf32, #tpu.memory_space<vmem>>, vector<1x8x256xf32>
    %4 = vector.shape_cast %3 : vector<1x8x256xf32> to vector<8x256xf32>
    %5 = arith.truncf %4 : vector<8x256xf32> to vector<8x256xbf16>
    %c0_3 = arith.constant 0 : index
    %c0_4 = arith.constant 0 : index
    %6 = vector.load %arg4[%c0_3, %c0_4] : memref<256x256xbf16, #tpu.memory_space<vmem>>, vector<256x256xbf16>
    %c0_5 = arith.constant 0 : index
    %c0_6 = arith.constant 0 : index
    %7 = vector.load %arg6[%c0_5, %c0_6] : memref<8x256xf32, #tpu.memory_space<vmem>>, vector<8x256xf32>
    %cst = arith.constant dense<0.000000e+00> : vector<8x256xf32>
    %8 = tpu.matmul %5, %6, %cst {dimension_numbers = #tpu.dot_dimension_numbers<[1], [0], [0], [1], [0, 0, 1, 1], [], []>} : vector<8x256xbf16>, vector<256x256xbf16>, vector<8x256xf32> -> vector<8x256xf32>
    %9 = arith.addf %7, %8 : vector<8x256xf32>
    %c0_7 = arith.constant 0 : index
    %c0_8 = arith.constant 0 : index
    %10 = vector.load %arg6[%c0_7, %c0_8] : memref<8x256xf32, #tpu.memory_space<vmem>>, vector<8x256xf32>
    tpu.vector_store %arg6[%c0_7, %c0_8], %9 {strides = array<i32>} : memref<8x256xf32, #tpu.memory_space<vmem>>, vector<8x256xf32>,
    %c17_i32 = arith.constant 17 : i32
    %11 = arith.cmpi eq, %arg2, %c17_i32 : i32
    %12 = arith.extui %11 : i1 to i32
    %c0_i32_9 = arith.constant 0 : i32
    %13 = arith.cmpi ne, %12, %c0_i32_9 : i32
    scf.if %13 {
      %c0_10 = arith.constant 0 : index
      %c0_11 = arith.constant 0 : index
      %14 = vector.load %arg6[%c0_10, %c0_11] : memref<8x256xf32, #tpu.memory_space<vmem>>, vector<8x256xf32>
      %15 = tpu.iota {dimensions = array<i32: 0>} : vector<8x256xi32>
      %c4_i32 = arith.constant 4 : i32
      %16 = vector.broadcast %c4_i32 : i32 to vector<8x256xi32>
      %17 = arith.cmpi slt, %15, %16 : vector<8x256xi32>
      %18 = arith.extui %17 : vector<8x256xi1> to vector<8x256xi32>
      %19 = arith.sitofp %18 : vector<8x256xi32> to vector<8x256xf32>
      %20 = arith.mulf %14, %19 : vector<8x256xf32>
      %cst_12 = arith.constant dense<0.000000e+00> : vector<256xf32>
      %21 = vector.multi_reduction <add>, %20, %cst_12 [0] : vector<8x256xf32> to vector<256xf32>
      %22 = vector.shape_cast %21 : vector<256xf32> to vector<1x256xf32>
      %cst_13 = arith.constant 2.500000e-01 : f32
      %23 = vector.broadcast %cst_13 : f32 to vector<1x256xf32>
      %24 = arith.mulf %22, %23 : vector<1x256xf32>
      %25 = vector.broadcast %24 : vector<1x256xf32> to vector<8x256xf32>
      %26 = arith.subf %14, %25 : vector<8x256xf32>
      %27 = arith.mulf %26, %19 : vector<8x256xf32>
      %28 = arith.mulf %27, %27 : vector<8x256xf32>
      %cst_14 = arith.constant dense<0.000000e+00> : vector<256xf32>
      %29 = vector.multi_reduction <add>, %28, %cst_14 [0] : vector<8x256xf32> to vector<256xf32>
      %30 = vector.shape_cast %29 : vector<256xf32> to vector<1x256xf32>
      %cst_15 = arith.constant 2.500000e-01 : f32
      %31 = vector.broadcast %cst_15 : f32 to vector<1x256xf32>
      %32 = arith.mulf %30, %31 : vector<1x256xf32>
      %33 = vector.broadcast %24 : vector<1x256xf32> to vector<8x256xf32>
      %34 = arith.subf %14, %33 : vector<8x256xf32>
      %cst_16 = arith.constant 9.99999974E-6 : f32
      %35 = vector.broadcast %cst_16 : f32 to vector<1x256xf32>
      %36 = arith.addf %32, %35 : vector<1x256xf32>
      %37 = math.rsqrt %36 : vector<1x256xf32>
      %38 = vector.broadcast %37 : vector<1x256xf32> to vector<8x256xf32>
      %39 = arith.mulf %34, %38 : vector<8x256xf32>
      %cst_17 = arith.constant 0.000000e+00 : f32
      %40 = vector.broadcast %cst_17 : f32 to vector<8x256xf32>
      %41 = arith.cmpf oge, %39, %40 : vector<8x256xf32>
      %cst_18 = arith.constant 2.000000e-01 : f32
      %42 = vector.broadcast %cst_18 : f32 to vector<8x256xf32>
      %43 = arith.mulf %42, %39 : vector<8x256xf32>
      %44 = arith.select %41, %39, %43 : vector<8x256xi1>, vector<8x256xf32>
      %c0_19 = arith.constant 0 : index
      %c0_20 = arith.constant 0 : index
      %c0_21 = arith.constant 0 : index
      %45 = vector.load %arg5[%c0_19, %c0_20, %c0_21] : memref<1x8x256xf32, #tpu.memory_space<vmem>>, vector<1x8x256xf32>
      %46 = vector.shape_cast %45 : vector<1x8x256xf32> to vector<8x256xf32>
      %47 = vector.shape_cast %44 : vector<8x256xf32> to vector<1x8x256xf32>
      tpu.vector_store %arg5[%c0_19, %c0_20, %c0_21], %47 {strides = array<i32>} : memref<1x8x256xf32, #tpu.memory_space<vmem>>, vector<1x8x256xf32>,
    } else {
    }
    return
  }
  func.func @transform_0(%arg0: i32, %arg1: i32, %arg2: i32) -> (i32, i32, i32) {
    %c0_i32 = arith.constant 0 : i32
    %c0_i32_0 = arith.constant 0 : i32
    return %arg0, %c0_i32, %arg2 : i32, i32, i32
  }
  func.func @transform_1(%arg0: i32, %arg1: i32, %arg2: i32) -> (i32, i32) {
    %c0_i32 = arith.constant 0 : i32
    return %arg2, %arg1 : i32, i32
  }
  func.func @transform_2(%arg0: i32, %arg1: i32, %arg2: i32) -> (i32, i32, i32) {
    %c0_i32 = arith.constant 0 : i32
    %c0_i32_0 = arith.constant 0 : i32
    return %arg0, %c0_i32, %arg1 : i32, i32, i32
  }
}

module attributes {stable_mosaic.version = 11 : i64} {
  func.func @_conv_fused_kernel(%arg0: i32, %arg1: i32, %arg2: i32, %arg3: memref<1x16x256xf32, #tpu.memory_space<vmem>>, %arg4: memref<256x128xbf16, #tpu.memory_space<vmem>>, %arg5: memref<1x16x128xf32, #tpu.memory_space<vmem>>, %arg6: memref<16x128xf32, #tpu.memory_space<vmem>>) attributes {dimension_semantics = [#tpu.dimension_semantics<parallel>, #tpu.dimension_semantics<parallel>, #tpu.dimension_semantics<arbitrary>], iteration_bounds = array<i64: 2, 1, 9>, scalar_prefetch = 0 : i64, scratch_operands = 1 : i64, tpu.core_type = #tpu.core_type<tc>, window_params = [{transform_indices = @transform_0, window_bounds = array<i64: 1, 16, 256>}, {transform_indices = @transform_1, window_bounds = array<i64: 256, 128>}, {transform_indices = @transform_2, window_bounds = array<i64: 1, 16, 128>}]} {
    %c0_i32 = arith.constant 0 : i32
    %0 = arith.cmpi eq, %arg2, %c0_i32 : i32
    %1 = arith.extui %0 : i1 to i32
    %c0_i32_0 = arith.constant 0 : i32
    %2 = arith.cmpi ne, %1, %c0_i32_0 : i32
    scf.if %2 {
      %cst_10 = arith.constant 0.000000e+00 : f32
      %14 = vector.broadcast %cst_10 : f32 to vector<16x128xf32>
      %c0_11 = arith.constant 0 : index
      %c0_12 = arith.constant 0 : index
      %15 = vector.load %arg6[%c0_11, %c0_12] : memref<16x128xf32, #tpu.memory_space<vmem>>, vector<16x128xf32>
      tpu.vector_store %arg6[%c0_11, %c0_12], %14 {strides = array<i32>} : memref<16x128xf32, #tpu.memory_space<vmem>>, vector<16x128xf32>,
    } else {
    }
    %c0 = arith.constant 0 : index
    %c0_1 = arith.constant 0 : index
    %c0_2 = arith.constant 0 : index
    %3 = vector.load %arg3[%c0, %c0_1, %c0_2] : memref<1x16x256xf32, #tpu.memory_space<vmem>>, vector<1x16x256xf32>
    %4 = vector.shape_cast %3 : vector<1x16x256xf32> to vector<16x256xf32>
    %5 = arith.truncf %4 : vector<16x256xf32> to vector<16x256xbf16>
    %c0_3 = arith.constant 0 : index
    %c0_4 = arith.constant 0 : index
    %6 = vector.load %arg4[%c0_3, %c0_4] : memref<256x128xbf16, #tpu.memory_space<vmem>>, vector<256x128xbf16>
    %c0_5 = arith.constant 0 : index
    %c0_6 = arith.constant 0 : index
    %7 = vector.load %arg6[%c0_5, %c0_6] : memref<16x128xf32, #tpu.memory_space<vmem>>, vector<16x128xf32>
    %cst = arith.constant dense<0.000000e+00> : vector<16x128xf32>
    %8 = tpu.matmul %5, %6, %cst {dimension_numbers = #tpu.dot_dimension_numbers<[1], [0], [0], [1], [0, 0, 1, 1], [], []>} : vector<16x256xbf16>, vector<256x128xbf16>, vector<16x128xf32> -> vector<16x128xf32>
    %9 = arith.addf %7, %8 : vector<16x128xf32>
    %c0_7 = arith.constant 0 : index
    %c0_8 = arith.constant 0 : index
    %10 = vector.load %arg6[%c0_7, %c0_8] : memref<16x128xf32, #tpu.memory_space<vmem>>, vector<16x128xf32>
    tpu.vector_store %arg6[%c0_7, %c0_8], %9 {strides = array<i32>} : memref<16x128xf32, #tpu.memory_space<vmem>>, vector<16x128xf32>,
    %c8_i32 = arith.constant 8 : i32
    %11 = arith.cmpi eq, %arg2, %c8_i32 : i32
    %12 = arith.extui %11 : i1 to i32
    %c0_i32_9 = arith.constant 0 : i32
    %13 = arith.cmpi ne, %12, %c0_i32_9 : i32
    scf.if %13 {
      %c0_10 = arith.constant 0 : index
      %c0_11 = arith.constant 0 : index
      %14 = vector.load %arg6[%c0_10, %c0_11] : memref<16x128xf32, #tpu.memory_space<vmem>>, vector<16x128xf32>
      %cst_12 = arith.constant dense<0.000000e+00> : vector<128xf32>
      %15 = vector.multi_reduction <add>, %14, %cst_12 [0] : vector<16x128xf32> to vector<128xf32>
      %16 = vector.shape_cast %15 : vector<128xf32> to vector<1x128xf32>
      %cst_13 = arith.constant 1.600000e+01 : f32
      %17 = vector.broadcast %cst_13 : f32 to vector<1x128xf32>
      %18 = arith.divf %16, %17 : vector<1x128xf32>
      %19 = vector.broadcast %18 : vector<1x128xf32> to vector<16x128xf32>
      %20 = arith.subf %14, %19 : vector<16x128xf32>
      %21 = arith.mulf %20, %20 : vector<16x128xf32>
      %cst_14 = arith.constant dense<0.000000e+00> : vector<128xf32>
      %22 = vector.multi_reduction <add>, %21, %cst_14 [0] : vector<16x128xf32> to vector<128xf32>
      %23 = vector.shape_cast %22 : vector<128xf32> to vector<1x128xf32>
      %cst_15 = arith.constant 1.600000e+01 : f32
      %24 = vector.broadcast %cst_15 : f32 to vector<1x128xf32>
      %25 = arith.divf %23, %24 : vector<1x128xf32>
      %cst_16 = arith.constant 9.99999974E-6 : f32
      %26 = vector.broadcast %cst_16 : f32 to vector<1x128xf32>
      %27 = arith.addf %25, %26 : vector<1x128xf32>
      %28 = math.rsqrt %27 : vector<1x128xf32>
      %29 = vector.broadcast %28 : vector<1x128xf32> to vector<16x128xf32>
      %30 = arith.mulf %20, %29 : vector<16x128xf32>
      %cst_17 = arith.constant 0.000000e+00 : f32
      %31 = vector.broadcast %cst_17 : f32 to vector<16x128xf32>
      %32 = arith.cmpf oge, %30, %31 : vector<16x128xf32>
      %cst_18 = arith.constant 2.000000e-01 : f32
      %33 = vector.broadcast %cst_18 : f32 to vector<16x128xf32>
      %34 = arith.mulf %33, %30 : vector<16x128xf32>
      %35 = arith.select %32, %30, %34 : vector<16x128xi1>, vector<16x128xf32>
      %c0_19 = arith.constant 0 : index
      %c0_20 = arith.constant 0 : index
      %c0_21 = arith.constant 0 : index
      %36 = vector.load %arg5[%c0_19, %c0_20, %c0_21] : memref<1x16x128xf32, #tpu.memory_space<vmem>>, vector<1x16x128xf32>
      %37 = vector.shape_cast %36 : vector<1x16x128xf32> to vector<16x128xf32>
      %38 = vector.shape_cast %35 : vector<16x128xf32> to vector<1x16x128xf32>
      tpu.vector_store %arg5[%c0_19, %c0_20, %c0_21], %38 {strides = array<i32>} : memref<1x16x128xf32, #tpu.memory_space<vmem>>, vector<1x16x128xf32>,
    } else {
    }
    return
  }
  func.func @transform_0(%arg0: i32, %arg1: i32, %arg2: i32) -> (i32, i32, i32) {
    %c0_i32 = arith.constant 0 : i32
    %c0_i32_0 = arith.constant 0 : i32
    return %arg0, %c0_i32, %arg2 : i32, i32, i32
  }
  func.func @transform_1(%arg0: i32, %arg1: i32, %arg2: i32) -> (i32, i32) {
    %c0_i32 = arith.constant 0 : i32
    return %arg2, %arg1 : i32, i32
  }
  func.func @transform_2(%arg0: i32, %arg1: i32, %arg2: i32) -> (i32, i32, i32) {
    %c0_i32 = arith.constant 0 : i32
    %c0_i32_0 = arith.constant 0 : i32
    return %arg0, %c0_i32, %arg1 : i32, i32, i32
  }
}

module attributes {stable_mosaic.version = 11 : i64} {
  func.func @_conv_fused_kernel(%arg0: i32, %arg1: i32, %arg2: i32, %arg3: memref<1x64x128xf32, #tpu.memory_space<vmem>>, %arg4: memref<128x64xbf16, #tpu.memory_space<vmem>>, %arg5: memref<1x64x64xf32, #tpu.memory_space<vmem>>, %arg6: memref<64x64xf32, #tpu.memory_space<vmem>>) attributes {dimension_semantics = [#tpu.dimension_semantics<parallel>, #tpu.dimension_semantics<parallel>, #tpu.dimension_semantics<arbitrary>], iteration_bounds = array<i64: 2, 1, 9>, scalar_prefetch = 0 : i64, scratch_operands = 1 : i64, tpu.core_type = #tpu.core_type<tc>, window_params = [{transform_indices = @transform_0, window_bounds = array<i64: 1, 64, 128>}, {transform_indices = @transform_1, window_bounds = array<i64: 128, 64>}, {transform_indices = @transform_2, window_bounds = array<i64: 1, 64, 64>}]} {
    %c0_i32 = arith.constant 0 : i32
    %0 = arith.cmpi eq, %arg2, %c0_i32 : i32
    %1 = arith.extui %0 : i1 to i32
    %c0_i32_0 = arith.constant 0 : i32
    %2 = arith.cmpi ne, %1, %c0_i32_0 : i32
    scf.if %2 {
      %cst_10 = arith.constant 0.000000e+00 : f32
      %14 = vector.broadcast %cst_10 : f32 to vector<64x64xf32>
      %c0_11 = arith.constant 0 : index
      %c0_12 = arith.constant 0 : index
      %15 = vector.load %arg6[%c0_11, %c0_12] : memref<64x64xf32, #tpu.memory_space<vmem>>, vector<64x64xf32>
      tpu.vector_store %arg6[%c0_11, %c0_12], %14 {strides = array<i32>} : memref<64x64xf32, #tpu.memory_space<vmem>>, vector<64x64xf32>,
    } else {
    }
    %c0 = arith.constant 0 : index
    %c0_1 = arith.constant 0 : index
    %c0_2 = arith.constant 0 : index
    %3 = vector.load %arg3[%c0, %c0_1, %c0_2] : memref<1x64x128xf32, #tpu.memory_space<vmem>>, vector<1x64x128xf32>
    %4 = vector.shape_cast %3 : vector<1x64x128xf32> to vector<64x128xf32>
    %5 = arith.truncf %4 : vector<64x128xf32> to vector<64x128xbf16>
    %c0_3 = arith.constant 0 : index
    %c0_4 = arith.constant 0 : index
    %6 = vector.load %arg4[%c0_3, %c0_4] : memref<128x64xbf16, #tpu.memory_space<vmem>>, vector<128x64xbf16>
    %c0_5 = arith.constant 0 : index
    %c0_6 = arith.constant 0 : index
    %7 = vector.load %arg6[%c0_5, %c0_6] : memref<64x64xf32, #tpu.memory_space<vmem>>, vector<64x64xf32>
    %cst = arith.constant dense<0.000000e+00> : vector<64x64xf32>
    %8 = tpu.matmul %5, %6, %cst {dimension_numbers = #tpu.dot_dimension_numbers<[1], [0], [0], [1], [0, 0, 1, 1], [], []>} : vector<64x128xbf16>, vector<128x64xbf16>, vector<64x64xf32> -> vector<64x64xf32>
    %9 = arith.addf %7, %8 : vector<64x64xf32>
    %c0_7 = arith.constant 0 : index
    %c0_8 = arith.constant 0 : index
    %10 = vector.load %arg6[%c0_7, %c0_8] : memref<64x64xf32, #tpu.memory_space<vmem>>, vector<64x64xf32>
    tpu.vector_store %arg6[%c0_7, %c0_8], %9 {strides = array<i32>} : memref<64x64xf32, #tpu.memory_space<vmem>>, vector<64x64xf32>,
    %c8_i32 = arith.constant 8 : i32
    %11 = arith.cmpi eq, %arg2, %c8_i32 : i32
    %12 = arith.extui %11 : i1 to i32
    %c0_i32_9 = arith.constant 0 : i32
    %13 = arith.cmpi ne, %12, %c0_i32_9 : i32
    scf.if %13 {
      %c0_10 = arith.constant 0 : index
      %c0_11 = arith.constant 0 : index
      %14 = vector.load %arg6[%c0_10, %c0_11] : memref<64x64xf32, #tpu.memory_space<vmem>>, vector<64x64xf32>
      %cst_12 = arith.constant dense<0.000000e+00> : vector<64xf32>
      %15 = vector.multi_reduction <add>, %14, %cst_12 [0] : vector<64x64xf32> to vector<64xf32>
      %16 = vector.shape_cast %15 : vector<64xf32> to vector<1x64xf32>
      %cst_13 = arith.constant 6.400000e+01 : f32
      %17 = vector.broadcast %cst_13 : f32 to vector<1x64xf32>
      %18 = arith.divf %16, %17 : vector<1x64xf32>
      %19 = vector.broadcast %18 : vector<1x64xf32> to vector<64x64xf32>
      %20 = arith.subf %14, %19 : vector<64x64xf32>
      %21 = arith.mulf %20, %20 : vector<64x64xf32>
      %cst_14 = arith.constant dense<0.000000e+00> : vector<64xf32>
      %22 = vector.multi_reduction <add>, %21, %cst_14 [0] : vector<64x64xf32> to vector<64xf32>
      %23 = vector.shape_cast %22 : vector<64xf32> to vector<1x64xf32>
      %cst_15 = arith.constant 6.400000e+01 : f32
      %24 = vector.broadcast %cst_15 : f32 to vector<1x64xf32>
      %25 = arith.divf %23, %24 : vector<1x64xf32>
      %cst_16 = arith.constant 9.99999974E-6 : f32
      %26 = vector.broadcast %cst_16 : f32 to vector<1x64xf32>
      %27 = arith.addf %25, %26 : vector<1x64xf32>
      %28 = math.rsqrt %27 : vector<1x64xf32>
      %29 = vector.broadcast %28 : vector<1x64xf32> to vector<64x64xf32>
      %30 = arith.mulf %20, %29 : vector<64x64xf32>
      %cst_17 = arith.constant 0.000000e+00 : f32
      %31 = vector.broadcast %cst_17 : f32 to vector<64x64xf32>
      %32 = arith.cmpf oge, %30, %31 : vector<64x64xf32>
      %cst_18 = arith.constant 2.000000e-01 : f32
      %33 = vector.broadcast %cst_18 : f32 to vector<64x64xf32>
      %34 = arith.mulf %33, %30 : vector<64x64xf32>
      %35 = arith.select %32, %30, %34 : vector<64x64xi1>, vector<64x64xf32>
      %c0_19 = arith.constant 0 : index
      %c0_20 = arith.constant 0 : index
      %c0_21 = arith.constant 0 : index
      %36 = vector.load %arg5[%c0_19, %c0_20, %c0_21] : memref<1x64x64xf32, #tpu.memory_space<vmem>>, vector<1x64x64xf32>
      %37 = vector.shape_cast %36 : vector<1x64x64xf32> to vector<64x64xf32>
      %38 = vector.shape_cast %35 : vector<64x64xf32> to vector<1x64x64xf32>
      tpu.vector_store %arg5[%c0_19, %c0_20, %c0_21], %38 {strides = array<i32>} : memref<1x64x64xf32, #tpu.memory_space<vmem>>, vector<1x64x64xf32>,
    } else {
    }
    return
  }
  func.func @transform_0(%arg0: i32, %arg1: i32, %arg2: i32) -> (i32, i32, i32) {
    %c0_i32 = arith.constant 0 : i32
    %c0_i32_0 = arith.constant 0 : i32
    return %arg0, %c0_i32, %arg2 : i32, i32, i32
  }
  func.func @transform_1(%arg0: i32, %arg1: i32, %arg2: i32) -> (i32, i32) {
    %c0_i32 = arith.constant 0 : i32
    return %arg2, %arg1 : i32, i32
  }
  func.func @transform_2(%arg0: i32, %arg1: i32, %arg2: i32) -> (i32, i32, i32) {
    %c0_i32 = arith.constant 0 : i32
    %c0_i32_0 = arith.constant 0 : i32
    return %arg0, %c0_i32, %arg1 : i32, i32, i32
  }
}

module attributes {stable_mosaic.version = 11 : i64} {
  func.func @_conv_fused_kernel(%arg0: i32, %arg1: i32, %arg2: i32, %arg3: memref<1x256x576xf32, #tpu.memory_space<vmem>>, %arg4: memref<576x32xbf16, #tpu.memory_space<vmem>>, %arg5: memref<1x256x32xf32, #tpu.memory_space<vmem>>, %arg6: memref<256x32xf32, #tpu.memory_space<vmem>>) attributes {dimension_semantics = [#tpu.dimension_semantics<parallel>, #tpu.dimension_semantics<parallel>, #tpu.dimension_semantics<arbitrary>], iteration_bounds = array<i64: 2, 1, 1>, scalar_prefetch = 0 : i64, scratch_operands = 1 : i64, tpu.core_type = #tpu.core_type<tc>, window_params = [{transform_indices = @transform_0, window_bounds = array<i64: 1, 256, 576>}, {transform_indices = @transform_1, window_bounds = array<i64: 576, 32>}, {transform_indices = @transform_2, window_bounds = array<i64: 1, 256, 32>}]} {
    %c0_i32 = arith.constant 0 : i32
    %0 = arith.cmpi eq, %arg2, %c0_i32 : i32
    %1 = arith.extui %0 : i1 to i32
    %c0_i32_0 = arith.constant 0 : i32
    %2 = arith.cmpi ne, %1, %c0_i32_0 : i32
    scf.if %2 {
      %cst_11 = arith.constant 0.000000e+00 : f32
      %14 = vector.broadcast %cst_11 : f32 to vector<256x32xf32>
      %c0_12 = arith.constant 0 : index
      %c0_13 = arith.constant 0 : index
      %15 = vector.load %arg6[%c0_12, %c0_13] : memref<256x32xf32, #tpu.memory_space<vmem>>, vector<256x32xf32>
      tpu.vector_store %arg6[%c0_12, %c0_13], %14 {strides = array<i32>} : memref<256x32xf32, #tpu.memory_space<vmem>>, vector<256x32xf32>,
    } else {
    }
    %c0 = arith.constant 0 : index
    %c0_1 = arith.constant 0 : index
    %c0_2 = arith.constant 0 : index
    %3 = vector.load %arg3[%c0, %c0_1, %c0_2] : memref<1x256x576xf32, #tpu.memory_space<vmem>>, vector<1x256x576xf32>
    %4 = vector.shape_cast %3 : vector<1x256x576xf32> to vector<256x576xf32>
    %5 = arith.truncf %4 : vector<256x576xf32> to vector<256x576xbf16>
    %c0_3 = arith.constant 0 : index
    %c0_4 = arith.constant 0 : index
    %6 = vector.load %arg4[%c0_3, %c0_4] : memref<576x32xbf16, #tpu.memory_space<vmem>>, vector<576x32xbf16>
    %c0_5 = arith.constant 0 : index
    %c0_6 = arith.constant 0 : index
    %7 = vector.load %arg6[%c0_5, %c0_6] : memref<256x32xf32, #tpu.memory_space<vmem>>, vector<256x32xf32>
    %cst = arith.constant dense<0.000000e+00> : vector<256x32xf32>
    %8 = tpu.matmul %5, %6, %cst {dimension_numbers = #tpu.dot_dimension_numbers<[1], [0], [0], [1], [0, 0, 1, 1], [], []>} : vector<256x576xbf16>, vector<576x32xbf16>, vector<256x32xf32> -> vector<256x32xf32>
    %9 = arith.addf %7, %8 : vector<256x32xf32>
    %c0_7 = arith.constant 0 : index
    %c0_8 = arith.constant 0 : index
    %10 = vector.load %arg6[%c0_7, %c0_8] : memref<256x32xf32, #tpu.memory_space<vmem>>, vector<256x32xf32>
    tpu.vector_store %arg6[%c0_7, %c0_8], %9 {strides = array<i32>} : memref<256x32xf32, #tpu.memory_space<vmem>>, vector<256x32xf32>,
    %c0_i32_9 = arith.constant 0 : i32
    %11 = arith.cmpi eq, %arg2, %c0_i32_9 : i32
    %12 = arith.extui %11 : i1 to i32
    %c0_i32_10 = arith.constant 0 : i32
    %13 = arith.cmpi ne, %12, %c0_i32_10 : i32
    scf.if %13 {
      %c0_11 = arith.constant 0 : index
      %c0_12 = arith.constant 0 : index
      %14 = vector.load %arg6[%c0_11, %c0_12] : memref<256x32xf32, #tpu.memory_space<vmem>>, vector<256x32xf32>
      %cst_13 = arith.constant dense<0.000000e+00> : vector<32xf32>
      %15 = vector.multi_reduction <add>, %14, %cst_13 [0] : vector<256x32xf32> to vector<32xf32>
      %16 = vector.shape_cast %15 : vector<32xf32> to vector<1x32xf32>
      %cst_14 = arith.constant 2.560000e+02 : f32
      %17 = vector.broadcast %cst_14 : f32 to vector<1x32xf32>
      %18 = arith.divf %16, %17 : vector<1x32xf32>
      %19 = vector.broadcast %18 : vector<1x32xf32> to vector<256x32xf32>
      %20 = arith.subf %14, %19 : vector<256x32xf32>
      %21 = arith.mulf %20, %20 : vector<256x32xf32>
      %cst_15 = arith.constant dense<0.000000e+00> : vector<32xf32>
      %22 = vector.multi_reduction <add>, %21, %cst_15 [0] : vector<256x32xf32> to vector<32xf32>
      %23 = vector.shape_cast %22 : vector<32xf32> to vector<1x32xf32>
      %cst_16 = arith.constant 2.560000e+02 : f32
      %24 = vector.broadcast %cst_16 : f32 to vector<1x32xf32>
      %25 = arith.divf %23, %24 : vector<1x32xf32>
      %cst_17 = arith.constant 9.99999974E-6 : f32
      %26 = vector.broadcast %cst_17 : f32 to vector<1x32xf32>
      %27 = arith.addf %25, %26 : vector<1x32xf32>
      %28 = math.rsqrt %27 : vector<1x32xf32>
      %29 = vector.broadcast %28 : vector<1x32xf32> to vector<256x32xf32>
      %30 = arith.mulf %20, %29 : vector<256x32xf32>
      %cst_18 = arith.constant 0.000000e+00 : f32
      %31 = vector.broadcast %cst_18 : f32 to vector<256x32xf32>
      %32 = arith.cmpf oge, %30, %31 : vector<256x32xf32>
      %cst_19 = arith.constant 2.000000e-01 : f32
      %33 = vector.broadcast %cst_19 : f32 to vector<256x32xf32>
      %34 = arith.mulf %33, %30 : vector<256x32xf32>
      %35 = arith.select %32, %30, %34 : vector<256x32xi1>, vector<256x32xf32>
      %c0_20 = arith.constant 0 : index
      %c0_21 = arith.constant 0 : index
      %c0_22 = arith.constant 0 : index
      %36 = vector.load %arg5[%c0_20, %c0_21, %c0_22] : memref<1x256x32xf32, #tpu.memory_space<vmem>>, vector<1x256x32xf32>
      %37 = vector.shape_cast %36 : vector<1x256x32xf32> to vector<256x32xf32>
      %38 = vector.shape_cast %35 : vector<256x32xf32> to vector<1x256x32xf32>
      tpu.vector_store %arg5[%c0_20, %c0_21, %c0_22], %38 {strides = array<i32>} : memref<1x256x32xf32, #tpu.memory_space<vmem>>, vector<1x256x32xf32>,
    } else {
    }
    return
  }
  func.func @transform_0(%arg0: i32, %arg1: i32, %arg2: i32) -> (i32, i32, i32) {
    %c0_i32 = arith.constant 0 : i32
    %c0_i32_0 = arith.constant 0 : i32
    return %arg0, %c0_i32, %arg2 : i32, i32, i32
  }
  func.func @transform_1(%arg0: i32, %arg1: i32, %arg2: i32) -> (i32, i32) {
    %c0_i32 = arith.constant 0 : i32
    return %arg2, %arg1 : i32, i32
  }
  func.func @transform_2(%arg0: i32, %arg1: i32, %arg2: i32) -> (i32, i32, i32) {
    %c0_i32 = arith.constant 0 : i32
    %c0_i32_0 = arith.constant 0 : i32
    return %arg0, %c0_i32, %arg1 : i32, i32, i32
  }
}

module attributes {stable_mosaic.version = 11 : i64} {
  func.func @_conv_fused_kernel(%arg0: i32, %arg1: i32, %arg2: i32, %arg3: memref<1x256x288xf32, #tpu.memory_space<vmem>>, %arg4: memref<288x3xbf16, #tpu.memory_space<vmem>>, %arg5: memref<1x256x3xf32, #tpu.memory_space<vmem>>, %arg6: memref<256x3xf32, #tpu.memory_space<vmem>>) attributes {dimension_semantics = [#tpu.dimension_semantics<parallel>, #tpu.dimension_semantics<parallel>, #tpu.dimension_semantics<arbitrary>], iteration_bounds = array<i64: 2, 1, 1>, scalar_prefetch = 0 : i64, scratch_operands = 1 : i64, tpu.core_type = #tpu.core_type<tc>, window_params = [{transform_indices = @transform_0, window_bounds = array<i64: 1, 256, 288>}, {transform_indices = @transform_1, window_bounds = array<i64: 288, 3>}, {transform_indices = @transform_2, window_bounds = array<i64: 1, 256, 3>}]} {
    %c0_i32 = arith.constant 0 : i32
    %0 = arith.cmpi eq, %arg2, %c0_i32 : i32
    %1 = arith.extui %0 : i1 to i32
    %c0_i32_0 = arith.constant 0 : i32
    %2 = arith.cmpi ne, %1, %c0_i32_0 : i32
    scf.if %2 {
      %cst_11 = arith.constant 0.000000e+00 : f32
      %14 = vector.broadcast %cst_11 : f32 to vector<256x3xf32>
      %c0_12 = arith.constant 0 : index
      %c0_13 = arith.constant 0 : index
      %15 = vector.load %arg6[%c0_12, %c0_13] : memref<256x3xf32, #tpu.memory_space<vmem>>, vector<256x3xf32>
      tpu.vector_store %arg6[%c0_12, %c0_13], %14 {strides = array<i32>} : memref<256x3xf32, #tpu.memory_space<vmem>>, vector<256x3xf32>,
    } else {
    }
    %c0 = arith.constant 0 : index
    %c0_1 = arith.constant 0 : index
    %c0_2 = arith.constant 0 : index
    %3 = vector.load %arg3[%c0, %c0_1, %c0_2] : memref<1x256x288xf32, #tpu.memory_space<vmem>>, vector<1x256x288xf32>
    %4 = vector.shape_cast %3 : vector<1x256x288xf32> to vector<256x288xf32>
    %5 = arith.truncf %4 : vector<256x288xf32> to vector<256x288xbf16>
    %c0_3 = arith.constant 0 : index
    %c0_4 = arith.constant 0 : index
    %6 = vector.load %arg4[%c0_3, %c0_4] : memref<288x3xbf16, #tpu.memory_space<vmem>>, vector<288x3xbf16>
    %c0_5 = arith.constant 0 : index
    %c0_6 = arith.constant 0 : index
    %7 = vector.load %arg6[%c0_5, %c0_6] : memref<256x3xf32, #tpu.memory_space<vmem>>, vector<256x3xf32>
    %cst = arith.constant dense<0.000000e+00> : vector<256x3xf32>
    %8 = tpu.matmul %5, %6, %cst {dimension_numbers = #tpu.dot_dimension_numbers<[1], [0], [0], [1], [0, 0, 1, 1], [], []>} : vector<256x288xbf16>, vector<288x3xbf16>, vector<256x3xf32> -> vector<256x3xf32>
    %9 = arith.addf %7, %8 : vector<256x3xf32>
    %c0_7 = arith.constant 0 : index
    %c0_8 = arith.constant 0 : index
    %10 = vector.load %arg6[%c0_7, %c0_8] : memref<256x3xf32, #tpu.memory_space<vmem>>, vector<256x3xf32>
    tpu.vector_store %arg6[%c0_7, %c0_8], %9 {strides = array<i32>} : memref<256x3xf32, #tpu.memory_space<vmem>>, vector<256x3xf32>,
    %c0_i32_9 = arith.constant 0 : i32
    %11 = arith.cmpi eq, %arg2, %c0_i32_9 : i32
    %12 = arith.extui %11 : i1 to i32
    %c0_i32_10 = arith.constant 0 : i32
    %13 = arith.cmpi ne, %12, %c0_i32_10 : i32
    scf.if %13 {
      %c0_11 = arith.constant 0 : index
      %c0_12 = arith.constant 0 : index
      %14 = vector.load %arg6[%c0_11, %c0_12] : memref<256x3xf32, #tpu.memory_space<vmem>>, vector<256x3xf32>
      %15 = math.tanh %14 : vector<256x3xf32>
      %c0_13 = arith.constant 0 : index
      %c0_14 = arith.constant 0 : index
      %c0_15 = arith.constant 0 : index
      %16 = vector.load %arg5[%c0_13, %c0_14, %c0_15] : memref<1x256x3xf32, #tpu.memory_space<vmem>>, vector<1x256x3xf32>
      %17 = vector.shape_cast %16 : vector<1x256x3xf32> to vector<256x3xf32>
      %18 = vector.shape_cast %15 : vector<256x3xf32> to vector<1x256x3xf32>
      tpu.vector_store %arg5[%c0_13, %c0_14, %c0_15], %18 {strides = array<i32>} : memref<1x256x3xf32, #tpu.memory_space<vmem>>, vector<1x256x3xf32>,
    } else {
    }
    return
  }
  func.func @transform_0(%arg0: i32, %arg1: i32, %arg2: i32) -> (i32, i32, i32) {
    %c0_i32 = arith.constant 0 : i32
    %c0_i32_0 = arith.constant 0 : i32
    return %arg0, %c0_i32, %arg2 : i32, i32, i32
  }
  func.func @transform_1(%arg0: i32, %arg1: i32, %arg2: i32) -> (i32, i32) {
    %c0_i32 = arith.constant 0 : i32
    return %arg2, %arg1 : i32, i32
  }
  func.func @transform_2(%arg0: i32, %arg1: i32, %arg2: i32) -> (i32, i32, i32) {
    %c0_i32 = arith.constant 0 : i32
    %c0_i32_0 = arith.constant 0 : i32
    return %arg0, %c0_i32, %arg1 : i32, i32, i32
  }
}

</mosaic_0001>

<bundles_post_ra>
// kernel: generator_forward.27
= control target key start
LH: loop header
LB: loop body
LE: loop exit
PB: predicated region body
PF: predicated region fallthrough
CT: control target
= control target key end

     0   :  { %s690_s9 = smov 0   ;;  %s692_s10 = smov 0   ;;  %s788_s0 = inlined_call_operand.vmem [shape: f32[2,64,32], index: 0, kind: input, shape index: {}]   ;;  %s789_s1 = inlined_call_operand.vmem [shape: bf16[32,64], index: 1, kind: input, shape index: {}]   ;;  %s790_s2 = inlined_call_operand.vmem [shape: f32[2,64,64], index: 2, kind: output, shape index: {}]  }
   0x1   :  { %s694_s11 = smov 0  }
   0x2 LB: > { %s31_s12 = sadd.s32 1, %s668_s10  ;;  %p584_p0 = scmp.ge.s32.totalorder %s672_s11, 1  ;;  %s672_s11 = sphi %s694_s11, %s12_s11   ;;  %s668_s10 = sphi %s692_s10, %s792_s10   ;;  %s664_s9 = sphi %s690_s9, %s791_s9  }
   0x3   : > { %p33_p1 = scmp.ge.s32.totalorder %s31_s12, 2  ;;  %p154_p2 = scmp.lt.s32.totalorder %s672_s11, 3 }
   0x5   : > { %s794_s12 = smov (%p33_p1, %s31_s12), 0  ;;  %p155_p3 = pnand %p584_p0, %p154_p2 }
   0x6   : > { %p190_p4 = scmp.lt.s32.totalorder (!%p155_p3), %s664_s9, 1 }
   0x7   : > { %158 = sbr.rel (%p155_p3) target bundleno = 320 (0x140), region = 28 }
   0xc   : > { %v646_v0 = vld [vmem:[%s789_s1 + $0x8] sm:$0xff]   ;;  %v647_v1 = vld [vmem:[%s789_s1] sm:$0xff]   ;;  %s796_s9 = smov (!%p190_p4, %s664_s9), 1  ;;  %vm220_vm0 = vcmask 523264   ;;  %v674_v2 = vmov 0.0   ;;  %vm265_vm1 = vcmask 261120  }
   0xd   : > { %605 = vmatprep.subr.bf16.mxu0 %v646_v0  ;;  %617 = vmatprep.subr.bf16.mxu1 %v646_v0  ;;  %223 = vst.msk [vmem:[#allocation2 + $0x10] sm:$0xff] %vm220_vm0, %v674_v2  ;;  %221 = vst.msk [vmem:[#allocation2] sm:$0xff] %vm220_vm0, %v674_v2  ;;  %s597_s17 = sshll.u32 %s796_s9, 6 }
   0xe   : > { %606 = vmatpush3.bf16.msra.mxu0 %v646_v0  ;;  %619 = vmatpush3.bf16.msra.mxu1 %v646_v0  ;;  %222 = vst.msk [vmem:[#allocation2 + $0x8] sm:$0xff] %vm220_vm0, %v674_v2  ;;  %224 = vst.msk [vmem:[#allocation2 + $0x18] sm:$0xff] %vm220_vm0, %v674_v2  ;;  %s197_s20 = scalar_lea.vmem %s788_s0, %s597_s17  ;;  %s214_s23 = scalar_lea.vmem %s790_s2, %s597_s17 }
   0xf   : > { %225 = vst.msk [vmem:[#allocation2 + $0x20] sm:$0xff] %vm220_vm0, %v674_v2  ;;  %226 = vst.msk [vmem:[#allocation2 + $0x28] sm:$0xff] %vm220_vm0, %v674_v2  ;;  %607 = vmatprep.subr.bf16.mxu0 %v647_v1  ;;  %618 = vmatprep.subr.bf16.mxu1 %v647_v1  ;;  %v229_v3 = vld [vmem:[%s197_s20] sm:$0xff]  ;;  %v230_v4 = vld [vmem:[%s197_s20 + $0x8] sm:$0xff] }
  0x10   : > { %227 = vst.msk [vmem:[#allocation2 + $0x30] sm:$0xff] %vm220_vm0, %v674_v2  ;;  %228 = vst.msk [vmem:[#allocation2 + $0x38] sm:$0xff] %vm220_vm0, %v674_v2  ;;  %v231_v5 = vld [vmem:[%s197_s20 + $0x10] sm:$0xff]  ;;  %v237_v6 = vpack.c.bf16 %v230_v4, %v229_v3  ;;  %v232_v7 = vld [vmem:[%s197_s20 + $0x18] sm:$0xff] }
  0x11   : > { %v233_v8 = vld [vmem:[%s197_s20 + $0x20] sm:$0xff]  ;;  %v234_v9 = vld [vmem:[%s197_s20 + $0x28] sm:$0xff]  ;;  %v238_v10 = vpack.c.bf16 %v232_v7, %v231_v5  ;;  %v235_v12 = vld [vmem:[%s197_s20 + $0x30] sm:$0xff] }
  0x12   : > { %608 = vmatpush3.bf16.msra.mxu0 %v647_v1  ;;  %620 = vmatpush3.bf16.msra.mxu1 %v647_v1  ;;  %v239_v11 = vpack.c.bf16 %v234_v9, %v233_v8  ;;  %v236_v13 = vld [vmem:[%s197_s20 + $0x38] sm:$0xff] }
  0x13   : > { %609 = vmatprep.mubr.msk.bf16.mxu0 %vm265_vm1, %v237_v6  ;;  %v240_v14 = vpack.c.bf16 %v236_v13, %v235_v12 }
  0x14   : > { %613 = vmatprep.mubr.msk.bf16.mxu1 %vm265_vm1, %v239_v11  ;;  %v247_v15 = vld [vmem:[#allocation2 + $0x10] sm:$0xff]  ;;  %v245_v18 = vld [vmem:[#allocation2] sm:$0xff] }
  0x15   : > { %610 = vmatmul.mubr.msk.bf16.vlgmr.msra.gmra.mxu0 %vm265_vm1, %v238_v10  ;;  %614 = vmatmul.mubr.msk.bf16.vlgmr.msra.gmra.mxu1 %vm265_vm1, %v240_v14  ;;  %v248_v24 = vld [vmem:[#allocation2 + $0x18] sm:$0xff]  ;;  %v246_v30 = vld [vmem:[#allocation2 + $0x8] sm:$0xff] }
  0x16   : > { %v249_v21 = vld [vmem:[#allocation2 + $0x20] sm:$0xff]  ;;  %v250_v33 = vld [vmem:[#allocation2 + $0x28] sm:$0xff] }
  0x17   : > { %v251_v16 = vld [vmem:[#allocation2 + $0x30] sm:$0xff]  ;;  %v252_v27 = vld [vmem:[#allocation2 + $0x38] sm:$0xff] }
  0xd5   : > { %v611_v17 = vpop.f32.mrf.mxu0  ;;  %v615_v20 = vpop.f32.mrf.mxu1 }
  0xd6   : > { %v345_v19 = vadd.f32 %v611_v17, %v247_v15  ;;  %v349_v23 = vadd.f32 %v615_v20, %v251_v16 }
  0xd7   : > { %v312_v22 = vpop.f32.mrf.mxu0  ;;  %v328_v26 = vpop.f32.mrf.mxu1 }
  0xd8   : > { %354 = vst.msk [vmem:[#allocation2 + $0x10] sm:$0xff] %vm220_vm0, %v345_v19  ;;  %v343_v25 = vadd.f32 %v312_v22, %v245_v18  ;;  %358 = vst.msk [vmem:[#allocation2 + $0x30] sm:$0xff] %vm220_vm0, %v349_v23  ;;  %v347_v29 = vadd.f32 %v328_v26, %v249_v21 }
  0xd9   : > { %v612_v28 = vpop.f32.mrf.mxu0  ;;  %v616_v32 = vpop.f32.mrf.mxu1 }
  0xda   : > { %352 = vst.msk [vmem:[#allocation2] sm:$0xff] %vm220_vm0, %v343_v25  ;;  %v346_v31 = vadd.f32 %v612_v28, %v248_v24  ;;  %356 = vst.msk [vmem:[#allocation2 + $0x20] sm:$0xff] %vm220_vm0, %v347_v29  ;;  %v350_v35 = vadd.f32 %v616_v32, %v252_v27 }
  0xdb   : > { %v315_v34 = vpop.f32.mrf.mxu0  ;;  %v331_v37 = vpop.f32.mrf.mxu1 }
  0xdc   : > { %355 = vst.msk [vmem:[#allocation2 + $0x18] sm:$0xff] %vm220_vm0, %v346_v31  ;;  %v344_v36 = vadd.f32 %v315_v34, %v246_v30  ;;  %359 = vst.msk [vmem:[#allocation2 + $0x38] sm:$0xff] %vm220_vm0, %v350_v35  ;;  %v348_v38 = vadd.f32 %v331_v37, %v250_v33 }
  0xde   : > { %353 = vst.msk [vmem:[#allocation2 + $0x8] sm:$0xff] %vm220_vm0, %v344_v36  ;;  %357 = vst.msk [vmem:[#allocation2 + $0x28] sm:$0xff] %vm220_vm0, %v348_v38 }
  0xdf   : > { %v365_v40 = vld [vmem:[#allocation2 + $0x10] sm:$0xff] }
  0xe0   : > { %v374_v46 = vsel %vm220_vm0, %v365_v40, 0.0  ;;  %v369_v53 = vld [vmem:[#allocation2 + $0x30] sm:$0xff] }
  0xe1   : > { %v363_v39 = vld [vmem:[#allocation2] sm:$0xff]  ;;  %v382_v58 = vsel %vm220_vm0, %v369_v53, 0.0 }
  0xe2   : > { %v371_v42 = vsel %vm220_vm0, %v363_v39, 0.0  ;;  %v367_v47 = vld [vmem:[#allocation2 + $0x20] sm:$0xff] }
  0xe3   : > { %v366_v44 = vld [vmem:[#allocation2 + $0x18] sm:$0xff]  ;;  %v378_v52 = vsel %vm220_vm0, %v367_v47, 0.0 }
  0xe4   : > { %v376_v49 = vsel %vm220_vm0, %v366_v44, 0.0  ;;  %v370_v56 = vld [vmem:[#allocation2 + $0x38] sm:$0xff] }
  0xe5   : > { %v364_v41 = vld [vmem:[#allocation2 + $0x8] sm:$0xff]  ;;  %v384_v60 = vsel %vm220_vm0, %v370_v56, 0.0 }
  0xe6   : > { %v372_v43 = vsel %vm220_vm0, %v364_v41, 0.0  ;;  %v368_v50 = vld [vmem:[#allocation2 + $0x28] sm:$0xff] }
  0xe7   : > { %v373_v45 = vadd.f32 %v372_v43, %v371_v42  ;;  %v380_v55 = vsel %vm220_vm0, %v368_v50, 0.0 }
  0xe9   : > { %v375_v48 = vadd.f32 %v374_v46, %v373_v45 }
  0xeb   : > { %v377_v51 = vadd.f32 %v376_v49, %v375_v48 }
  0xed   : > { %v379_v54 = vadd.f32 %v378_v52, %v377_v51 }
  0xef   : > { %v381_v57 = vadd.f32 %v380_v55, %v379_v54 }
  0xf1   : > { %v383_v59 = vadd.f32 %v382_v58, %v381_v57 }
  0xf3   : > { %v385_v61 = vadd.f32 %v384_v60, %v383_v59 }
  0xf5   : > { %v386_v62 = vrot.slane %v385_v61, 4 }
  0xf7   : > { %v387_v63 = vadd.f32 %v386_v62, %v385_v61 }
  0xf9   : > { %v388_v0 = vrot.slane %v387_v63, 2 }
  0xfb   : > { %v389_v1 = vadd.f32 %v388_v0, %v387_v63 }
  0xfd   : > { %v390_v2 = vrot.slane %v389_v1, 1 }
  0xff   : > { %v391_v3 = vadd.f32 %v390_v2, %v389_v1 }
 0x101   : > { %v393_v4 = vmul.f32 0.015625, %v391_v3 }
 0x103   : > { %v394_v5 = vsub.f32 %v363_v39, %v393_v4  ;;  %v395_v6 = vsub.f32 %v364_v41, %v393_v4  ;;  %v396_v7 = vsub.f32 %v365_v40, %v393_v4  ;;  %v397_v8 = vsub.f32 %v366_v44, %v393_v4 }
 0x104   : > { %v398_v9 = vsub.f32 %v367_v47, %v393_v4  ;;  %v399_v13 = vsub.f32 %v368_v50, %v393_v4  ;;  %v400_v18 = vsub.f32 %v369_v53, %v393_v4  ;;  %v401_v22 = vsub.f32 %v370_v56, %v393_v4 }
 0x105   : > { %v402_v10 = vmul.f32 %v394_v5, %v394_v5  ;;  %v403_v11 = vmul.f32 %v395_v6, %v395_v6  ;;  %v404_v12 = vmul.f32 %v396_v7, %v396_v7  ;;  %v405_v14 = vmul.f32 %v397_v8, %v397_v8 }
 0x106   : > { %v406_v19 = vmul.f32 %v398_v9, %v398_v9  ;;  %v407_v23 = vmul.f32 %v399_v13, %v399_v13  ;;  %v408_v26 = vmul.f32 %v400_v18, %v400_v18  ;;  %v409_v29 = vmul.f32 %v401_v22, %v401_v22 }
 0x107   : > { %v410_v15 = vsel %vm220_vm0, %v402_v10, 0.0  ;;  %v411_v16 = vsel %vm220_vm0, %v403_v11, 0.0  ;;  %v413_v20 = vsel %vm220_vm0, %v404_v12, 0.0  ;;  %v415_v24 = vsel %vm220_vm0, %v405_v14, 0.0 }
 0x108   : > { %v412_v17 = vadd.f32 %v411_v16, %v410_v15  ;;  %v417_v27 = vsel %vm220_vm0, %v406_v19, 0.0  ;;  %v419_v30 = vsel %vm220_vm0, %v407_v23, 0.0  ;;  %v421_v32 = vsel %vm220_vm0, %v408_v26, 0.0 }
 0x109   : > { %v423_v34 = vsel %vm220_vm0, %v409_v29, 0.0 }
 0x10a   : > { %v414_v21 = vadd.f32 %v413_v20, %v412_v17 }
 0x10c   : > { %v416_v25 = vadd.f32 %v415_v24, %v414_v21 }
 0x10e   : > { %v418_v28 = vadd.f32 %v417_v27, %v416_v25 }
 0x110   : > { %v420_v31 = vadd.f32 %v419_v30, %v418_v28 }
 0x112   : > { %v422_v33 = vadd.f32 %v421_v32, %v420_v31 }
 0x114   : > { %v424_v35 = vadd.f32 %v423_v34, %v422_v33 }
 0x116   : > { %v425_v36 = vrot.slane %v424_v35, 4 }
 0x118   : > { %v426_v37 = vadd.f32 %v425_v36, %v424_v35 }
 0x11a   : > { %v427_v38 = vrot.slane %v426_v37, 2 }
 0x11c   : > { %v428_v39 = vadd.f32 %v427_v38, %v426_v37 }
 0x11e   : > { %v429_v40 = vrot.slane %v428_v39, 1 }
 0x120   : > { %v430_v41 = vadd.f32 %v429_v40, %v428_v39 }
 0x122   : > { %v431_v42 = vmul.f32 0.015625, %v430_v41 }
 0x124   : > { %v432_v43 = vadd.f32 1e-05, %v431_v42 }
 0x126   : > { %648 = vrsqrt.f32 %v432_v43 }
 0x133   : > { %v649_v44 = vpop.eup %648 }
 0x134   : > { %v434_v45 = vmul.f32 %v649_v44, %v394_v5  ;;  %v435_v46 = vmul.f32 %v649_v44, %v395_v6  ;;  %v436_v47 = vmul.f32 %v649_v44, %v396_v7  ;;  %v437_v48 = vmul.f32 %v649_v44, %v397_v8 }
 0x135   : > { %v438_v49 = vmul.f32 %v649_v44, %v398_v9  ;;  %v439_v50 = vmul.f32 %v649_v44, %v399_v13  ;;  %v440_v51 = vmul.f32 %v649_v44, %v400_v18  ;;  %v441_v52 = vmul.f32 %v649_v44, %v401_v22 }
 0x136   : > { %vm442_vm2 = vcmp.ge.f32.partialorder %v434_v45, 0.0  ;;  %vm443_vm3 = vcmp.ge.f32.partialorder %v435_v46, 0.0  ;;  %vm444_vm4 = vcmp.ge.f32.partialorder %v436_v47, 0.0  ;;  %vm445_vm5 = vcmp.ge.f32.partialorder %v437_v48, 0.0 }
 0x137   : > { %vm446_vm6 = vcmp.ge.f32.partialorder %v438_v49, 0.0  ;;  %vm447_vm7 = vcmp.ge.f32.partialorder %v439_v50, 0.0  ;;  %vm448_vm8 = vcmp.ge.f32.partialorder %v440_v51, 0.0  ;;  %vm449_vm9 = vcmp.ge.f32.partialorder %v441_v52, 0.0 }
 0x138   : > { %v450_v53 = vmul.f32 0.2, %v434_v45  ;;  %v451_v54 = vmul.f32 0.2, %v435_v46  ;;  %v452_v55 = vmul.f32 0.2, %v436_v47 }
 0x139   : > { %v453_v56 = vmul.f32 0.2, %v437_v48  ;;  %v454_v57 = vmul.f32 0.2, %v438_v49  ;;  %v455_v58 = vmul.f32 0.2, %v439_v50 }
 0x13a   : > { %v456_v59 = vmul.f32 0.2, %v440_v51  ;;  %v457_v60 = vmul.f32 0.2, %v441_v52  ;;  %v458_v61 = vsel %vm442_vm2, %v434_v45, %v450_v53  ;;  %v459_v62 = vsel %vm443_vm3, %v435_v46, %v451_v54 }
 0x13b   : > { %v460_v63 = vsel %vm444_vm4, %v436_v47, %v452_v55  ;;  %v461_v0 = vsel %vm445_vm5, %v437_v48, %v453_v56  ;;  %v462_v1 = vsel %vm446_vm6, %v438_v49, %v454_v57  ;;  %v463_v2 = vsel %vm447_vm7, %v439_v50, %v455_v58  ;;  %466 = vst.msk [vmem:[%s214_s23] sm:$0xff] %vm220_vm0, %v458_v61 }
 0x13c   : > { %467 = vst.msk [vmem:[%s214_s23 + $0x8] sm:$0xff] %vm220_vm0, %v459_v62  ;;  %v464_v3 = vsel %vm448_vm8, %v440_v51, %v456_v59  ;;  %v465_v4 = vsel %vm449_vm9, %v441_v52, %v457_v60  ;;  %468 = vst.msk [vmem:[%s214_s23 + $0x10] sm:$0xff] %vm220_vm0, %v460_v63 }
 0x13d   : > { %469 = vst.msk [vmem:[%s214_s23 + $0x18] sm:$0xff] %vm220_vm0, %v461_v0  ;;  %470 = vst.msk [vmem:[%s214_s23 + $0x20] sm:$0xff] %vm220_vm0, %v462_v1 }
 0x13e   : > { %471 = vst.msk [vmem:[%s214_s23 + $0x28] sm:$0xff] %vm220_vm0, %v463_v2  ;;  %472 = vst.msk [vmem:[%s214_s23 + $0x30] sm:$0xff] %vm220_vm0, %v464_v3 }
 0x13f   : > { %473 = vst.msk [vmem:[%s214_s23 + $0x38] sm:$0xff] %vm220_vm0, %v465_v4 }
 0x140 PF: > { %s12_s11 = sadd.s32 1, %s672_s11   ;;  %s791_s9 = smov %s668_s10 }
 0x141   : > { %p9_p5 = scmp.ge.s32.totalorder %s12_s11, 4   ;;  %s792_s10 = smov %s794_s12 }
 0x143   :  { %11 = sbr.rel (!%p9_p5) target bundleno = 2 (0x2), region = 69 }

// kernel: generator_forward.28
= control target key start
LH: loop header
LB: loop body
LE: loop exit
PB: predicated region body
PF: predicated region fallthrough
CT: control target
= control target key end

     0   :  { %s1022_s9 = smov 0   ;;  %s1024_s10 = smov 0   ;;  %s1183_s0 = inlined_call_operand.vmem [shape: f32[2,16,576], index: 0, kind: input, shape index: {}]   ;;  %s1184_s1 = inlined_call_operand.vmem [shape: bf16[576,128], index: 1, kind: input, shape index: {}]   ;;  %s1185_s2 = inlined_call_operand.vmem [shape: f32[2,16,128], index: 2, kind: output, shape index: {}]  }
   0x1   :  { %s1026_s11 = smov 0  }
   0x2 LB: > { %s31_s12 = sadd.s32 1, %s999_s10  ;;  %p811_p0 = scmp.ge.s32.totalorder %s1003_s11, 1  ;;  %s1003_s11 = sphi %s1026_s11, %s12_s11   ;;  %s999_s10 = sphi %s1024_s10, %s1187_s10   ;;  %s995_s9 = sphi %s1022_s9, %s1186_s9  }
   0x3   : > { %p33_p1 = scmp.ge.s32.totalorder %s31_s12, 2  ;;  %p156_p2 = scmp.lt.s32.totalorder %s1003_s11, 3 }
   0x5   : > { %s1189_s12 = smov (%p33_p1, %s31_s12), 0  ;;  %p157_p3 = pnand %p811_p0, %p156_p2 }
   0x6   : > { %p194_p4 = scmp.lt.s32.totalorder (!%p157_p3), %s995_s9, 1 }
   0x7   : > { %160 = sbr.rel (%p157_p3) target bundleno = 319 (0x13f), region = 28 }
   0xc   : > { %v943_v0 = vld [vmem:[%s1184_s1 + $0x78] sm:$0xff]   ;;  %v947_v4 = vld [vmem:[%s1184_s1 + $0x70] sm:$0xff]   ;;  %v951_v8 = vld [vmem:[%s1184_s1 + $0x68] sm:$0xff]   ;;  %s1191_s9 = smov (!%p194_p4, %s995_s9), 1  ;;  %v1005_v39 = vmov 0.0   ;;  %vm1006_vm0 = vmmov 0  }
   0xd   : > { %v944_v1 = vld [vmem:[%s1184_s1 + $0xf8] sm:$0xff]   ;;  %855 = vmatprep.subr.bf16.mxu0 %v943_v0  ;;  %v948_v5 = vld [vmem:[%s1184_s1 + $0xf0] sm:$0xff]   ;;  %v952_v9 = vld [vmem:[%s1184_s1 + $0xe8] sm:$0xff]   ;;  %s916_s17 = smul.u32 80, %s1191_s9  ;;  %vm532_vm1 = vcmask 523264  }
   0xe   : > { %v945_v2 = vld [vmem:[%s1184_s1 + $0x38] sm:$0xff]   ;;  %877 = vmatprep.subr.bf16.mxu1 %v944_v1  ;;  %v949_v6 = vld [vmem:[%s1184_s1 + $0x30] sm:$0xff]   ;;  %v953_v10 = vld [vmem:[%s1184_s1 + $0x28] sm:$0xff]  }
   0xf   : > { %v946_v3 = vld [vmem:[%s1184_s1 + $0xb8] sm:$0xff]   ;;  %856 = vmatpush3.bf16.msra.mxu0 %v945_v2  ;;  %v950_v7 = vld [vmem:[%s1184_s1 + $0xb0] sm:$0xff]   ;;  %v954_v11 = vld [vmem:[%s1184_s1 + $0xa8] sm:$0xff]   ;;  %s1140_s28 = scalar_lea.vmem %s1183_s0, %s916_s17  ;;  %s854_s17 = sshll.u32 %s1191_s9, 4 }
  0x10   : > { %878 = vmatpush3.bf16.msra.mxu1 %v946_v3  ;;  %857 = vmatprep.subr.bf16.mxu0 %v947_v4  ;;  %v955_v12 = vld [vmem:[%s1184_s1 + $0x60] sm:$0xff]   ;;  %v959_v16 = vld [vmem:[%s1184_s1 + $0x58] sm:$0xff]   ;;  %v963_v20 = vld [vmem:[%s1184_s1 + $0x50] sm:$0xff]   ;;  %s219_s20 = scalar_lea.vmem %s1185_s2, %s854_s17 }
  0x11   : > { %879 = vmatprep.subr.bf16.mxu1 %v948_v5  ;;  %v956_v13 = vld [vmem:[%s1184_s1 + $0xe0] sm:$0xff]   ;;  %v960_v17 = vld [vmem:[%s1184_s1 + $0xd8] sm:$0xff]   ;;  %v964_v21 = vld [vmem:[%s1184_s1 + $0xd0] sm:$0xff]  }
  0x12   : > { %v957_v14 = vld [vmem:[%s1184_s1 + $0x20] sm:$0xff]   ;;  %v961_v18 = vld [vmem:[%s1184_s1 + $0x18] sm:$0xff]   ;;  %v965_v22 = vld [vmem:[%s1184_s1 + $0x10] sm:$0xff]  }
  0x13   : > { %858 = vmatpush3.bf16.msra.mxu0 %v949_v6  ;;  %v958_v15 = vld [vmem:[%s1184_s1 + $0xa0] sm:$0xff]   ;;  %v962_v19 = vld [vmem:[%s1184_s1 + $0x98] sm:$0xff]   ;;  %v966_v23 = vld [vmem:[%s1184_s1 + $0x90] sm:$0xff]  }
  0x14   : > { %880 = vmatpush3.bf16.msra.mxu1 %v950_v7  ;;  %859 = vmatprep.subr.bf16.mxu0 %v951_v8  ;;  %v967_v24 = vld [vmem:[%s1184_s1 + $0x48] sm:$0xff]   ;;  %v971_v28 = vld [vmem:[%s1184_s1 + $0x40] sm:$0xff]   ;;  %v233_v33 = vld [vmem:[%s1140_s28 + $0x30] sm:$0xff] }
  0x15   : > { %881 = vmatprep.subr.bf16.mxu1 %v952_v9  ;;  %v968_v25 = vld [vmem:[%s1184_s1 + $0xc8] sm:$0xff]   ;;  %v972_v29 = vld [vmem:[%s1184_s1 + $0xc0] sm:$0xff]   ;;  %v230_v34 = vld [vmem:[%s1140_s28 + $0x18] sm:$0xff] }
  0x16   : > { %v969_v26 = vld [vmem:[%s1184_s1 + $0x8] sm:$0xff]   ;;  %v973_v30 = vld [vmem:[%s1184_s1] sm:$0xff]   ;;  %v229_v42 = vld [vmem:[%s1140_s28 + $0x10] sm:$0xff] }
  0x17   : > { %860 = vmatpush3.bf16.msra.mxu0 %v953_v10  ;;  %v970_v27 = vld [vmem:[%s1184_s1 + $0x88] sm:$0xff]   ;;  %v974_v31 = vld [vmem:[%s1184_s1 + $0x80] sm:$0xff]   ;;  %v234_v43 = vld [vmem:[%s1140_s28 + $0x38] sm:$0xff] }
  0x18   : > { %882 = vmatpush3.bf16.msra.mxu1 %v954_v11  ;;  %861 = vmatprep.subr.bf16.mxu0 %v955_v12  ;;  %v228_v32 = vld [vmem:[%s1140_s28 + $0x8] sm:$0xff]  ;;  %v235_v36 = vld [vmem:[%s1140_s28 + $0x40] sm:$0xff]  ;;  %v239_v44 = vpack.c.bf16 %v234_v43, %v229_v42  ;;  %v975_v45 = vld [vmem:[%s1184_s1 + $0x118] sm:$0xff]  }
  0x19   : > { %883 = vmatprep.subr.bf16.mxu1 %v956_v13  ;;  %v238_v35 = vpack.c.bf16 %v233_v33, %v228_v32  ;;  %v227_v37 = vld [vmem:[%s1140_s28] sm:$0xff]  ;;  %v232_v38 = vld [vmem:[%s1140_s28 + $0x28] sm:$0xff]  ;;  %v240_v40 = vpack.c.bf16 %v235_v36, %v230_v34  ;;  %v976_v46 = vld [vmem:[%s1184_s1 + $0x110] sm:$0xff]  }
  0x1a   : > { %v237_v41 = vpack.c.bf16 %v232_v38, %v227_v37  ;;  %v977_v47 = vld [vmem:[%s1184_s1 + $0x108] sm:$0xff]   ;;  %v978_v48 = vld [vmem:[%s1184_s1 + $0x100] sm:$0xff]  }
  0x1b   : > { %862 = vmatpush3.bf16.msra.mxu0 %v957_v14  ;;  %568 = vmatprep.mubr.bf16.mxu0 %v238_v35  ;;  %v231_v49 = vld [vmem:[%s1140_s28 + $0x20] sm:$0xff]  ;;  %v236_v50 = vld [vmem:[%s1140_s28 + $0x48] sm:$0xff] }
  0x1c   : > { %884 = vmatpush3.bf16.msra.mxu1 %v958_v15  ;;  %863 = vmatprep.subr.bf16.mxu0 %v959_v16  ;;  %v241_v51 = vpack.c.bf16 %v236_v50, %v231_v49 }
  0x1d   : > { %885 = vmatprep.subr.bf16.mxu1 %v960_v17  ;;  %609 = vmatprep.mubr.bf16.mxu1 %v240_v40 }
  0x1f   : > { %864 = vmatpush3.bf16.msra.mxu0 %v961_v18 }
  0x20   : > { %886 = vmatpush3.bf16.msra.mxu1 %v962_v19  ;;  %865 = vmatprep.subr.bf16.mxu0 %v963_v20 }
  0x21   : > { %887 = vmatprep.subr.bf16.mxu1 %v964_v21 }
  0x23   : > { %866 = vmatpush3.bf16.msra.mxu0 %v965_v22 }
  0x24   : > { %888 = vmatpush3.bf16.msra.mxu1 %v966_v23  ;;  %867 = vmatprep.subr.bf16.mxu0 %v967_v24 }
  0x25   : > { %889 = vmatprep.subr.bf16.mxu1 %v968_v25 }
  0x27   : > { %868 = vmatpush3.bf16.msra.mxu0 %v969_v26 }
  0x28   : > { %890 = vmatpush3.bf16.msra.mxu1 %v970_v27  ;;  %869 = vmatprep.subr.bf16.mxu0 %v971_v28 }
  0x29   : > { %891 = vmatprep.subr.bf16.mxu1 %v972_v29 }
  0x2b   : > { %870 = vmatpush3.bf16.msra.mxu0 %v973_v30 }
  0x2c   : > { %892 = vmatpush3.bf16.msra.mxu1 %v974_v31  ;;  %904 = vmatprep.subr.bf16.mxu0 %v1005_v39 }
  0x2e   : > { %569 = vmatmul.mubr.bf16.vlgmr.msra.gmra.mxu0 %v237_v41 }
  0x2f   : > { %610 = vmatmul.mubr.bf16.vlgmr.msra.gmra.mxu1 %v239_v44  ;;  %905 = vmatpush3.bf16.msra.mxu0 %v975_v45 }
  0x30   : > { %906 = vmatprep.subr.bf16.mxu0 %v1005_v39  ;;  %912 = vmatprep.mubr.msk.bf16.mxu0 %vm1006_vm0, %v1005_v39 }
  0x33   : > { %907 = vmatpush3.bf16.msra.mxu0 %v976_v46 }
  0x34   : > { %908 = vmatprep.subr.bf16.mxu0 %v1005_v39 }
  0x37   : > { %909 = vmatpush3.bf16.msra.mxu0 %v977_v47 }
  0x38   : > { %910 = vmatprep.subr.bf16.mxu0 %v1005_v39 }
  0x3b   : > { %911 = vmatpush3.bf16.msra.mxu0 %v978_v48 }
  0x3e   : > { %913 = vmatmul.mubr.msk.bf16.vlgmr.msra.gmra.mxu0 %vm532_vm1, %v241_v51 }
  0xee   : > { %v871_v52 = vpop.f32.mrf.mxu0 }
  0xef   : > { %v893_v53 = vpop.f32.mrf.mxu1 }
  0xf0   : > { %v872_v54 = vpop.f32.mrf.mxu0 }
  0xf1   : > { %v894_v55 = vpop.f32.mrf.mxu1  ;;  %v873_v60 = vadd.f32 %v872_v54, %v871_v52 }
  0xf2   : > { %v874_v56 = vpop.f32.mrf.mxu0  ;;  %v895_v61 = vadd.f32 %v894_v55, %v893_v53 }
  0xf3   : > { %v896_v57 = vpop.f32.mrf.mxu1 }
  0xf4   : > { %v875_v58 = vpop.f32.mrf.mxu0  ;;  %v612_v2 = vadd.f32 %v895_v61, %v873_v60 }
  0xf5   : > { %v897_v59 = vpop.f32.mrf.mxu1  ;;  %v876_v62 = vadd.f32 %v875_v58, %v874_v56 }
  0xf6   : > { %v898_v63 = vadd.f32 %v897_v59, %v896_v57 }
  0xf8   : > { %v615_v3 = vadd.f32 %v898_v63, %v876_v62 }
  0xfe   : > { %v652_v0 = vpop.f32.mrf.mxu0 }
  0xff   : > { %v653_v5 = vadd.f32 %v652_v0, %v612_v2 }
 0x100   : > { %v914_v1 = vpop.f32.mrf.mxu0 }
 0x102   : > { %v655_v4 = vpop.f32.mrf.mxu0 }
 0x103   : > { %v656_v6 = vadd.f32 %v655_v4, %v615_v3 }
 0x104   : > { %v915_v7 = vpop.f32.mrf.mxu0 }
 0x105   : > { %v668_v8 = vadd.f32 %v656_v6, %v653_v5 }
 0x107   : > { %v669_v9 = vrot.slane %v668_v8, 4 }
 0x109   : > { %v670_v10 = vadd.f32 %v669_v9, %v668_v8 }
 0x10b   : > { %v671_v11 = vrot.slane %v670_v10, 2 }
 0x10d   : > { %v672_v12 = vadd.f32 %v671_v11, %v670_v10 }
 0x10f   : > { %v673_v13 = vrot.slane %v672_v12, 1 }
 0x111   : > { %v674_v14 = vadd.f32 %v673_v13, %v672_v12 }
 0x113   : > { %v676_v15 = vmul.f32 0.0625, %v674_v14 }
 0x115   : > { %v677_v16 = vsub.f32 %v653_v5, %v676_v15  ;;  %v678_v17 = vsub.f32 %v656_v6, %v676_v15 }
 0x117   : > { %v679_v18 = vmul.f32 %v677_v16, %v677_v16  ;;  %v680_v19 = vmul.f32 %v678_v17, %v678_v17 }
 0x119   : > { %v681_v20 = vadd.f32 %v680_v19, %v679_v18 }
 0x11b   : > { %v682_v21 = vrot.slane %v681_v20, 4 }
 0x11d   : > { %v683_v22 = vadd.f32 %v682_v21, %v681_v20 }
 0x11f   : > { %v684_v23 = vrot.slane %v683_v22, 2 }
 0x121   : > { %v685_v24 = vadd.f32 %v684_v23, %v683_v22 }
 0x123   : > { %v686_v25 = vrot.slane %v685_v24, 1 }
 0x125   : > { %v687_v26 = vadd.f32 %v686_v25, %v685_v24 }
 0x127   : > { %v688_v27 = vmul.f32 0.0625, %v687_v26 }
 0x129   : > { %v689_v28 = vadd.f32 1e-05, %v688_v27 }
 0x12b   : > { %979 = vrsqrt.f32 %v689_v28 }
 0x138   : > { %v980_v29 = vpop.eup %979 }
 0x139   : > { %v691_v30 = vmul.f32 %v980_v29, %v677_v16  ;;  %v692_v31 = vmul.f32 %v980_v29, %v678_v17 }
 0x13b   : > { %vm693_vm2 = vcmp.ge.f32.partialorder %v691_v30, 0.0  ;;  %vm694_vm3 = vcmp.ge.f32.partialorder %v692_v31, 0.0  ;;  %v695_v32 = vmul.f32 0.2, %v691_v30  ;;  %v696_v33 = vmul.f32 0.2, %v692_v31 }
 0x13d   : > { %v697_v34 = vsel %vm693_vm2, %v691_v30, %v695_v32  ;;  %v698_v35 = vsel %vm694_vm3, %v692_v31, %v696_v33 }
 0x13e   : > { %699 = vst [vmem:[%s219_s20] sm:$0xff] %v697_v34  ;;  %700 = vst [vmem:[%s219_s20 + $0x8] sm:$0xff] %v698_v35 }
 0x13f PF: > { %s12_s11 = sadd.s32 1, %s1003_s11   ;;  %s1186_s9 = smov %s999_s10 }
 0x140   : > { %p9_p5 = scmp.ge.s32.totalorder %s12_s11, 4   ;;  %s1187_s10 = smov %s1189_s12 }
 0x142   :  { %11 = sbr.rel (!%p9_p5) target bundleno = 2 (0x2), region = 69 }

// kernel: generator_forward.29
= control target key start
LH: loop header
LB: loop body
LE: loop exit
PB: predicated region body
PF: predicated region fallthrough
CT: control target
= control target key end

     0   :  { %s714_s9 = smov 0   ;;  %s716_s10 = smov 0   ;;  %s800_s0 = inlined_call_operand.vmem [shape: f32[2,8,1152], index: 0, kind: input, shape index: {}]   ;;  %s801_s1 = inlined_call_operand.vmem [shape: bf16[1152,256], index: 1, kind: input, shape index: {}]   ;;  %s802_s2 = inlined_call_operand.vmem [shape: f32[2,8,256], index: 2, kind: output, shape index: {}]  }
   0x1   :  { %s718_s11 = smov 0   ;;  %s720_s12 = smov 0  }
   0x2   :  { %s722_s13 = smov 0  }
   0x3 LB: > { %s24_s14 = sadd.s32 1, %s686_s11  ;;  %s31_s15 = sadd.s32 1, %s690_s12  ;;  %s694_s13 = sphi %s722_s13, %s12_s13   ;;  %s690_s12 = sphi %s720_s12, %s806_s12   ;;  %s686_s11 = sphi %s718_s11, %s805_s11   ;;  %s682_s10 = sphi %s716_s10, %s804_s10   ;;  %s678_s9 = sphi %s714_s9, %s803_s9  }
   0x4   : > { %p25_p0 = scmp.ge.s32.totalorder %s24_s14, 9  ;;  %p554_p1 = scmp.ge.s32.totalorder %s694_s13, 1 }
   0x5   : > { %p157_p2 = scmp.lt.s32.totalorder %s694_s13, 19 }
   0x6   : > { %s808_s14 = smov (%p25_p0, %s24_s14), 0  ;;  %s810_s15 = smov (!%p25_p0, %s31_s15), %s690_s12 }
   0x7   : > { %p158_p3 = pnand %p554_p1, %p157_p2  ;;  %p33_p4 = scmp.ge.s32.totalorder %s810_s15, 2 }
   0x8   : > { %p196_p5 = scmp.lt.s32.totalorder (!%p158_p3), %s682_s10, 1  ;;  %p198_p6 = scmp.lt.s32.totalorder (!%p158_p3), %s678_s9, 8 }
   0x9   : > { %s812_s15 = smov (%p33_p4, %s810_s15), 0  ;;  %161 = sbr.rel (%p158_p3) target bundleno = 323 (0x143), region = 28 }
   0xa   : > { %s556_s16 = sshll.u32 (!%p158_p3), %s678_s9, 4  ;;  %p561_p8 = scmp.ne.s32.totalorder (!%p158_p3), %s678_s9, 0 }
   0xb   : > { %p206_p7 = scmp.lt.s32.totalorder (!%p158_p3), %s556_s16, 143 }
   0xe   : > { %s814_s10 = smov (!%p196_p5, %s682_s10), 1  ;;  %s816_s16 = smov (!%p206_p7, %s556_s16), 143 }
   0xf   : > { %s199_s17 = scalar_select %p198_p6, %s678_s9, 8 }
  0x10   : > { %s584_s18 = smul.u32 9, %s814_s10  ;;  %s583_s19 = sshll.u32 %s814_s10, 4 }
  0x11   : > { %s752_s23 = scalar_lea.vmem %s802_s2, %s583_s19  ;;  %s582_s28 = sshll.u32 %s816_s16, 3 }
  0x12   : > { %s201_s20 = sadd.s32 %s584_s18, %s199_s17  ;;  %s762_s3 = scalar_lea.vmem %s801_s1, %s582_s28 }
  0x13   : > { %s555_s24 = sshll.u32 %s201_s20, 3  ;;  %230 = sbr.rel (%p561_p8) target bundleno = 26 (0x1a), region = 32 }
  0x14   : > { %s757_s27 = scalar_lea.vmem %s800_s0, %s555_s24 }
  0x18   : > { %v696_v0 = vmov 0.0  }
  0x19   : > { %231 = vst [vmem:[#allocation2] sm:$0xff] %v696_v0  ;;  %232 = vst [vmem:[#allocation2 + $0x8] sm:$0xff] %v696_v0 }
  0x1a PF: > { %v628_v1 = vld [vmem:[%s762_s3 + $0x74] ss:$8 sps:$4 sm:$0xff]   ;;  %v630_v2 = vld [vmem:[%s762_s3 + $0x70] ss:$8 sps:$4 sm:$0xff]   ;;  %v697_v3 = vmov 0   ;;  %v233_v18 = vld [vmem:[%s757_s27] sm:$0xff] }
  0x1b   : > { %365 = vmatprep.mubr.bf16.mxu0 %v697_v3  ;;  %333 = vmatprep.subr.bf16.mxu0 %v628_v1  ;;  %v631_v4 = vld [vmem:[%s762_s3 + $0x64] ss:$8 sps:$4 sm:$0xff]   ;;  %v633_v5 = vld [vmem:[%s762_s3 + $0x60] ss:$8 sps:$4 sm:$0xff]   ;;  %v634_v6 = vld [vmem:[%s762_s3 + $0x54] ss:$8 sps:$4 sm:$0xff]   ;;  %v234_v19 = vpack.c.bf16 %v233_v18, %v233_v18 }
  0x1c   : > { %334 = vmatpush1.bf16.msra.mxu0 %v630_v2  ;;  %v636_v7 = vld [vmem:[%s762_s3 + $0x50] ss:$8 sps:$4 sm:$0xff]   ;;  %v637_v8 = vld [vmem:[%s762_s3 + $0x44] ss:$8 sps:$4 sm:$0xff]   ;;  %v639_v9 = vld [vmem:[%s762_s3 + $0x40] ss:$8 sps:$4 sm:$0xff]  }
  0x1d   : > { %335 = vmatprep.subr.bf16.mxu0 %v631_v4  ;;  %v640_v10 = vld [vmem:[%s762_s3 + $0x34] ss:$8 sps:$4 sm:$0xff]   ;;  %v642_v11 = vld [vmem:[%s762_s3 + $0x30] ss:$8 sps:$4 sm:$0xff]   ;;  %v643_v12 = vld [vmem:[%s762_s3 + $0x24] ss:$8 sps:$4 sm:$0xff]  }
  0x1e   : > { %v645_v13 = vld [vmem:[%s762_s3 + $0x20] ss:$8 sps:$4 sm:$0xff]   ;;  %v646_v14 = vld [vmem:[%s762_s3 + $0x14] ss:$8 sps:$4 sm:$0xff]   ;;  %v648_v15 = vld [vmem:[%s762_s3 + $0x10] ss:$8 sps:$4 sm:$0xff]  }
  0x1f   : > { %v649_v16 = vld [vmem:[%s762_s3 + $0x4] ss:$8 sps:$4 sm:$0xff]   ;;  %v651_v17 = vld [vmem:[%s762_s3] ss:$8 sps:$4 sm:$0xff]   ;;  %p578_p9 = scmp.ne.s32.totalorder %s678_s9, 8 }
  0x20   : > { %336 = vmatpush1.bf16.msra.mxu0 %v633_v5  ;;  %v251_v20 = vld [vmem:[#allocation2] sm:$0xff]  ;;  %v252_v22 = vld [vmem:[#allocation2 + $0x8] sm:$0xff] }
  0x21   : > { %337 = vmatprep.subr.bf16.mxu0 %v634_v6 }
  0x24   : > { %338 = vmatpush1.bf16.msra.mxu0 %v636_v7 }
  0x25   : > { %339 = vmatprep.subr.bf16.mxu0 %v637_v8 }
  0x28   : > { %340 = vmatpush1.bf16.msra.mxu0 %v639_v9 }
  0x29   : > { %341 = vmatprep.subr.bf16.mxu0 %v640_v10 }
  0x2c   : > { %342 = vmatpush1.bf16.msra.mxu0 %v642_v11 }
  0x2d   : > { %343 = vmatprep.subr.bf16.mxu0 %v643_v12 }
  0x30   : > { %344 = vmatpush1.bf16.msra.mxu0 %v645_v13 }
  0x31   : > { %345 = vmatprep.subr.bf16.mxu0 %v646_v14 }
  0x34   : > { %346 = vmatpush1.bf16.msra.mxu0 %v648_v15 }
  0x35   : > { %347 = vmatprep.subr.bf16.mxu0 %v649_v16 }
  0x38   : > { %348 = vmatpush1.bf16.msra.mxu0 %v651_v17 }
  0x3b   : > { %366 = vmatmul.mubr.bf16.vlgmr.msra.gmra.mxu0 %v234_v19 }
  0xfb   : > { %v367_v21 = vpop.f32.mrf.mxu0 }
  0xfc   : > { %v374_v23 = vadd.f32 %v367_v21, %v251_v20 }
  0xfd   : > { %v369_v24 = vpop.f32.mrf.mxu0  ;;  %381 = sbr.rel (%p578_p9) target bundleno = 323 (0x143), region = 36 }
  0xfe   : > { %376 = vst [vmem:[#allocation2] sm:$0xff] %v374_v23  ;;  %v375_v25 = vadd.f32 %v369_v24, %v252_v22 }
  0xff   : > { %v371_v26 = vpop.f32.mrf.mxu0 }
 0x100   : > { %377 = vst [vmem:[#allocation2 + $0x8] sm:$0xff] %v375_v25 }
 0x101   : > { %v372_v27 = vpop.f32.mrf.mxu0 }
 0x102   : > { %v384_v28 = vlaneseq  ;;  %v698_v32 = vmov 0.0  }
 0x104   : > { %v385_v29 = vshrl.u32 %v384_v28, 7 }
 0x105   : > { %v382_v30 = vld [vmem:[#allocation2] sm:$0xff] }
 0x106   : > { %vm386_vm0 = vcmp.lt.s32.totalorder %v385_v29, 4 }
 0x107   : > { %v383_v31 = vld [vmem:[#allocation2 + $0x8] sm:$0xff]  ;;  %v579_v33 = vsel %vm386_vm0, 1.0, %v698_v32 }
 0x108   : > { %v389_v34 = vmul.f32 %v579_v33, %v382_v30  ;;  %v390_v35 = vmul.f32 %v579_v33, %v383_v31 }
 0x10a   : > { %v391_v36 = vrot.slane %v389_v34, 4  ;;  %v397_v37 = vrot.slane %v390_v35, 4 }
 0x10c   : > { %v392_v38 = vadd.f32 %v391_v36, %v389_v34  ;;  %v398_v39 = vadd.f32 %v397_v37, %v390_v35 }
 0x10e   : > { %v393_v40 = vrot.slane %v392_v38, 2  ;;  %v399_v41 = vrot.slane %v398_v39, 2 }
 0x110   : > { %v394_v42 = vadd.f32 %v393_v40, %v392_v38  ;;  %v400_v43 = vadd.f32 %v399_v41, %v398_v39 }
 0x112   : > { %v395_v44 = vrot.slane %v394_v42, 1  ;;  %v401_v45 = vrot.slane %v400_v43, 1 }
 0x114   : > { %v396_v46 = vadd.f32 %v395_v44, %v394_v42  ;;  %v402_v47 = vadd.f32 %v401_v45, %v400_v43 }
 0x116   : > { %v403_v48 = vmul.f32 0.25, %v396_v46  ;;  %v404_v49 = vmul.f32 0.25, %v402_v47 }
 0x118   : > { %v405_v50 = vsub.f32 %v382_v30, %v403_v48  ;;  %v406_v51 = vsub.f32 %v383_v31, %v404_v49 }
 0x11a   : > { %v407_v52 = vmul.f32 %v579_v33, %v405_v50  ;;  %v408_v53 = vmul.f32 %v579_v33, %v406_v51 }
 0x11c   : > { %v409_v54 = vmul.f32 %v407_v52, %v407_v52  ;;  %v410_v55 = vmul.f32 %v408_v53, %v408_v53 }
 0x11e   : > { %v411_v56 = vrot.slane %v409_v54, 4  ;;  %v417_v57 = vrot.slane %v410_v55, 4 }
 0x120   : > { %v412_v58 = vadd.f32 %v411_v56, %v409_v54  ;;  %v418_v59 = vadd.f32 %v417_v57, %v410_v55 }
 0x122   : > { %v413_v60 = vrot.slane %v412_v58, 2  ;;  %v419_v61 = vrot.slane %v418_v59, 2 }
 0x124   : > { %v414_v62 = vadd.f32 %v413_v60, %v412_v58  ;;  %v420_v63 = vadd.f32 %v419_v61, %v418_v59 }
 0x126   : > { %v415_v0 = vrot.slane %v414_v62, 1  ;;  %v421_v1 = vrot.slane %v420_v63, 1 }
 0x128   : > { %v416_v2 = vadd.f32 %v415_v0, %v414_v62  ;;  %v422_v3 = vadd.f32 %v421_v1, %v420_v63 }
 0x12a   : > { %v423_v4 = vmul.f32 0.25, %v416_v2  ;;  %v424_v5 = vmul.f32 0.25, %v422_v3 }
 0x12c   : > { %v425_v6 = vadd.f32 1e-05, %v423_v4  ;;  %v426_v7 = vadd.f32 1e-05, %v424_v5 }
 0x12e   : > { %652 = vrsqrt.f32 %v425_v6 }
 0x12f   : > { %654 = vrsqrt.f32 %v426_v7 }
 0x13b   : > { %v653_v8 = vpop.eup %652 }
 0x13c   : > { %v655_v9 = vpop.eup %654  ;;  %v429_v10 = vmul.f32 %v653_v8, %v405_v50 }
 0x13d   : > { %v430_v11 = vmul.f32 %v655_v9, %v406_v51 }
 0x13e   : > { %vm431_vm1 = vcmp.ge.f32.partialorder %v429_v10, 0.0  ;;  %v433_v12 = vmul.f32 0.2, %v429_v10 }
 0x13f   : > { %vm432_vm2 = vcmp.ge.f32.partialorder %v430_v11, 0.0  ;;  %v434_v13 = vmul.f32 0.2, %v430_v11 }
 0x140   : > { %v435_v14 = vsel %vm431_vm1, %v429_v10, %v433_v12 }
 0x141   : > { %437 = vst [vmem:[%s752_s23] sm:$0xff] %v435_v14  ;;  %v436_v15 = vsel %vm432_vm2, %v430_v11, %v434_v13 }
 0x142   : > { %438 = vst [vmem:[%s752_s23 + $0x8] sm:$0xff] %v436_v15 }
 0x143 PF: > { %s12_s13 = sadd.s32 1, %s694_s13   ;;  %s803_s9 = smov %s686_s11 }
 0x144   : > { %p9_p10 = scmp.ge.s32.totalorder %s12_s13, 20   ;;  %s804_s10 = smov %s690_s12 }
 0x145   : > { %s805_s11 = smov %s808_s14  ;;  %s806_s12 = smov %s812_s15 }
 0x146   :  { %11 = sbr.rel (!%p9_p10) target bundleno = 3 (0x3), region = 69 }

// kernel: generator_forward.31
= control target key start
LH: loop header
LB: loop body
LE: loop exit
PB: predicated region body
PF: predicated region fallthrough
CT: control target
= control target key end

     0   :  { %s1068_s9 = smov 0   ;;  %s1070_s10 = smov 0   ;;  %s1294_s0 = inlined_call_operand.vmem [shape: f32[2,8,512], index: 0, kind: input, shape index: {}]   ;;  %s1295_s1 = inlined_call_operand.vmem [shape: bf16[512,1024], index: 1, kind: input, shape index: {}]   ;;  %s1296_s2 = inlined_call_operand.vmem [shape: f32[2,8,1024], index: 2, kind: output, shape index: {}]  }
   0x1   :  { %s1072_s11 = smov 0   ;;  %s1074_s12 = smov 0  }
   0x2   :  { %s1076_s13 = smov 0   ;;  %s1078_s14 = smov 0  }
   0x3   :  { %s1080_s15 = smov 0   ;;  %s1082_s16 = smov 0  }
   0x4   :  { %s1084_s17 = smov 0  }
   0x5 LB: > { %s24_s18 = sadd.s32 1, %s1037_s14  ;;  %s27_s19 = sadd.s32 1, %s1041_s15  ;;  %s1049_s17 = sphi %s1084_s17, %s12_s17   ;;  %s1045_s16 = sphi %s1082_s16, %s1304_s16   ;;  %s1041_s15 = sphi %s1080_s15, %s1303_s15   ;;  %s1037_s14 = sphi %s1078_s14, %s1302_s14   ;;  %s1033_s13 = sphi %s1076_s13, %s1301_s13   ;;  %s1029_s12 = sphi %s1074_s12, %s1300_s12   ;;  %s1025_s11 = sphi %s1072_s11, %s1299_s11   ;;  %s1021_s10 = sphi %s1070_s10, %s1298_s10   ;;  %s1017_s9 = sphi %s1068_s9, %s1297_s9  }
   0x6   : > { %p25_p0 = scmp.ge.s32.totalorder %s24_s18, 2  ;;  %p75_p1 = scmp.ne.s32.totalorder %s1021_s10, %s1017_s9 }
   0x7   : > { %p76_p2 = scmp.eq.s32.totalorder %s1049_s17, 0  ;;  %s31_s20 = sadd.s32 1, %s1045_s16 }
   0x8   : > { %s1306_s18 = smov (%p25_p0, %s24_s18), 0  ;;  %s1308_s19 = smov (!%p25_p0, %s27_s19), %s1041_s15 }
   0x9   : > { %p29_p3 = scmp.ge.s32.totalorder %s1308_s19, 4  ;;  %s63_s21 = ssub.s32 %s1037_s14, %s1306_s18 }
   0xa   : > { %p77_p4 = por %p76_p2, %p75_p1  ;;  %s68_s23 = sadd.s32 1, %s1021_s10 }
   0xb   : > { %s1310_s19 = smov (%p29_p3, %s1308_s19), 0  ;;  %s1312_s20 = smov (!%p29_p3, %s31_s20), %s1045_s16 }
   0xc   : > { %s64_s22 = ssub.s32 %s1041_s15, %s1310_s19  ;;  %p33_p5 = scmp.ge.s32.totalorder %s1312_s20, 2 }
   0xd   : > { %s65_s24 = sor.u32 %s64_s22, %s63_s21  ;;  %p801_p7 = scmp.ge.s32.totalorder %s1049_s17, 16 }
   0xe   : > { %p66_p6 = scmp.eq.s32.totalorder %s65_s24, 0  ;;  %s1314_s20 = smov (%p33_p5, %s1312_s20), 0 }
   0xf   : > { %129 = sbr.rel (%p801_p7) target bundleno = 59 (0x3b), region = 16 }
  0x10   : > { %s1133_s25 = scalar_select %p66_p6, %s1021_s10, %s68_s23  }
  0x14   : > { %145 = sbr.rel (!%p77_p4) target bundleno = 59 (0x3b), region = 24  ;;  %s147_s26 = sand.u32 (%p77_p4), 1, %s1021_s10  }
  0x15   : > { %s804_s27 = sshll.u32 (%p77_p4), %s1041_s15, 1  ;;  %s802_s28 = sshll.u32 (%p77_p4), %s147_s26, 8 }
  0x16   : > { %s852_s29 = sshll.u32 (%p77_p4), %s1037_s14, 8  ;;  %s1147_s7 = scalar_lea.vmem (%p77_p4), [#allocation3], %s802_s28 }
  0x17   : > { %s153_s30 = sadd.s32 (%p77_p4), %s852_s29, %s804_s27 }
  0x18   : > { %s806_s3 = sshll.u32 (%p77_p4), %s153_s30, 2 }
  0x19   : > { %s1142_s6 = scalar_lea.vmem %s1295_s1, %s806_s3 }
  0x1a   : > { %v246_v0 = vld [vmem:[%s1142_s6] sm:$0xff] }
  0x1b   : > { %v248_v1 = vld [vmem:[%s1142_s6 + $0x20] sm:$0xff]  ;;  %247 = vst [vmem:[%s1147_s7] sm:$0xff] %v246_v0 }
  0x1c   : > { %v250_v2 = vld [vmem:[%s1142_s6 + $0x40] sm:$0xff]  ;;  %249 = vst [vmem:[%s1147_s7 + $0x8] sm:$0xff] %v248_v1 }
  0x1d   : > { %251 = vst [vmem:[%s1147_s7 + $0x10] sm:$0xff] %v250_v2  ;;  %v252_v3 = vld [vmem:[%s1142_s6 + $0x60] sm:$0xff] }
  0x1e   : > { %v254_v4 = vld [vmem:[%s1142_s6 + $0x80] sm:$0xff]  ;;  %253 = vst [vmem:[%s1147_s7 + $0x18] sm:$0xff] %v252_v3 }
  0x1f   : > { %v256_v5 = vld [vmem:[%s1142_s6 + $0xa0] sm:$0xff]  ;;  %255 = vst [vmem:[%s1147_s7 + $0x20] sm:$0xff] %v254_v4 }
  0x20   : > { %257 = vst [vmem:[%s1147_s7 + $0x28] sm:$0xff] %v256_v5  ;;  %v258_v6 = vld [vmem:[%s1142_s6 + $0xc0] sm:$0xff] }
  0x21   : > { %v260_v7 = vld [vmem:[%s1142_s6 + $0xe0] sm:$0xff]  ;;  %259 = vst [vmem:[%s1147_s7 + $0x30] sm:$0xff] %v258_v6 }
  0x22   : > { %v262_v8 = vld [vmem:[%s1142_s6 + $0x100] sm:$0xff]  ;;  %261 = vst [vmem:[%s1147_s7 + $0x38] sm:$0xff] %v260_v7 }
  0x23   : > { %263 = vst [vmem:[%s1147_s7 + $0x40] sm:$0xff] %v262_v8  ;;  %v264_v9 = vld [vmem:[%s1142_s6 + $0x120] sm:$0xff] }
  0x24   : > { %v266_v10 = vld [vmem:[%s1142_s6 + $0x140] sm:$0xff]  ;;  %265 = vst [vmem:[%s1147_s7 + $0x48] sm:$0xff] %v264_v9 }
  0x25   : > { %v268_v11 = vld [vmem:[%s1142_s6 + $0x160] sm:$0xff]  ;;  %267 = vst [vmem:[%s1147_s7 + $0x50] sm:$0xff] %v266_v10 }
  0x26   : > { %269 = vst [vmem:[%s1147_s7 + $0x58] sm:$0xff] %v268_v11  ;;  %v270_v12 = vld [vmem:[%s1142_s6 + $0x180] sm:$0xff] }
  0x27   : > { %v272_v13 = vld [vmem:[%s1142_s6 + $0x1a0] sm:$0xff]  ;;  %271 = vst [vmem:[%s1147_s7 + $0x60] sm:$0xff] %v270_v12 }
  0x28   : > { %v274_v14 = vld [vmem:[%s1142_s6 + $0x1c0] sm:$0xff]  ;;  %273 = vst [vmem:[%s1147_s7 + $0x68] sm:$0xff] %v272_v13 }
  0x29   : > { %275 = vst [vmem:[%s1147_s7 + $0x70] sm:$0xff] %v274_v14  ;;  %v276_v15 = vld [vmem:[%s1142_s6 + $0x1e0] sm:$0xff] }
  0x2a   : > { %v278_v16 = vld [vmem:[%s1142_s6 + $0x200] sm:$0xff]  ;;  %277 = vst [vmem:[%s1147_s7 + $0x78] sm:$0xff] %v276_v15 }
  0x2b   : > { %v280_v17 = vld [vmem:[%s1142_s6 + $0x220] sm:$0xff]  ;;  %279 = vst [vmem:[%s1147_s7 + $0x80] sm:$0xff] %v278_v16 }
  0x2c   : > { %281 = vst [vmem:[%s1147_s7 + $0x88] sm:$0xff] %v280_v17  ;;  %v282_v18 = vld [vmem:[%s1142_s6 + $0x240] sm:$0xff] }
  0x2d   : > { %v284_v19 = vld [vmem:[%s1142_s6 + $0x260] sm:$0xff]  ;;  %283 = vst [vmem:[%s1147_s7 + $0x90] sm:$0xff] %v282_v18 }
  0x2e   : > { %v286_v20 = vld [vmem:[%s1142_s6 + $0x280] sm:$0xff]  ;;  %285 = vst [vmem:[%s1147_s7 + $0x98] sm:$0xff] %v284_v19 }
  0x2f   : > { %287 = vst [vmem:[%s1147_s7 + $0xa0] sm:$0xff] %v286_v20  ;;  %v288_v21 = vld [vmem:[%s1142_s6 + $0x2a0] sm:$0xff] }
  0x30   : > { %v290_v22 = vld [vmem:[%s1142_s6 + $0x2c0] sm:$0xff]  ;;  %289 = vst [vmem:[%s1147_s7 + $0xa8] sm:$0xff] %v288_v21 }
  0x31   : > { %v292_v23 = vld [vmem:[%s1142_s6 + $0x2e0] sm:$0xff]  ;;  %291 = vst [vmem:[%s1147_s7 + $0xb0] sm:$0xff] %v290_v22 }
  0x32   : > { %293 = vst [vmem:[%s1147_s7 + $0xb8] sm:$0xff] %v292_v23  ;;  %v294_v24 = vld [vmem:[%s1142_s6 + $0x300] sm:$0xff] }
  0x33   : > { %v296_v25 = vld [vmem:[%s1142_s6 + $0x320] sm:$0xff]  ;;  %295 = vst [vmem:[%s1147_s7 + $0xc0] sm:$0xff] %v294_v24 }
  0x34   : > { %v298_v26 = vld [vmem:[%s1142_s6 + $0x340] sm:$0xff]  ;;  %297 = vst [vmem:[%s1147_s7 + $0xc8] sm:$0xff] %v296_v25 }
  0x35   : > { %299 = vst [vmem:[%s1147_s7 + $0xd0] sm:$0xff] %v298_v26  ;;  %v300_v27 = vld [vmem:[%s1142_s6 + $0x360] sm:$0xff] }
  0x36   : > { %v302_v28 = vld [vmem:[%s1142_s6 + $0x380] sm:$0xff]  ;;  %301 = vst [vmem:[%s1147_s7 + $0xd8] sm:$0xff] %v300_v27 }
  0x37   : > { %v304_v29 = vld [vmem:[%s1142_s6 + $0x3a0] sm:$0xff]  ;;  %303 = vst [vmem:[%s1147_s7 + $0xe0] sm:$0xff] %v302_v28 }
  0x38   : > { %305 = vst [vmem:[%s1147_s7 + $0xe8] sm:$0xff] %v304_v29  ;;  %v306_v30 = vld [vmem:[%s1142_s6 + $0x3c0] sm:$0xff] }
  0x39   : > { %v308_v31 = vld [vmem:[%s1142_s6 + $0x3e0] sm:$0xff]  ;;  %307 = vst [vmem:[%s1147_s7 + $0xf0] sm:$0xff] %v306_v30 }
  0x3a   : > { %309 = vst [vmem:[%s1147_s7 + $0xf8] sm:$0xff] %v308_v31 }
  0x3b PF: > { %p807_p8 = scmp.ge.s32.totalorder %s1049_s17, 1  ;;  %p314_p9 = scmp.lt.s32.totalorder %s1049_s17, 17 }
  0x3d   : > { %p315_p10 = pnand %p807_p8, %p314_p9 }
  0x3e   : > { %s321_s8 = sand.u32 (!%p315_p10), 1, %s1017_s9   ;;  %s809_s21 = sshll.u32 (!%p315_p10), %s1025_s11, 1 }
  0x3f   : > { %318 = sbr.rel (%p315_p10) target bundleno = 406 (0x196), region = 62  ;;  %s808_s22 = sshll.u32 (!%p315_p10), %s321_s8, 8 }
  0x40   : > { %p356_p11 = scmp.lt.s32.totalorder (!%p315_p10), %s1033_s13, 1  ;;  %p358_p12 = scmp.lt.s32.totalorder (!%p315_p10), %s809_s21, 3 }
  0x41   : > { %s812_s24 = sshll.u32 (!%p315_p10), %s1029_s12, 1  ;;  %s1227_s8 = scalar_lea.vmem (!%p315_p10), [#allocation3], %s808_s22 }
  0x42   : > { %p370_p13 = scmp.lt.s32.totalorder (!%p315_p10), %s812_s24, 7  ;;  %p815_p0 = scmp.ne.s32.totalorder (!%p315_p10), %s1025_s11, 0 }
  0x44   : > { %s1316_s13 = smov (!%p356_p11, %s1033_s13), 1  ;;  %s1318_s21 = smov (!%p358_p12, %s809_s21), 3 }
  0x45   : > { %s810_s23 = sshll.u32 %s1316_s13, 2  ;;  %s813_s3 = sshll.u32 %s1316_s13, 3 }
  0x46   : > { %s361_s26 = sadd.s32 %s810_s23, %s1318_s21  ;;  %s1320_s24 = smov (!%p370_p13, %s812_s24), 7 }
  0x47   : > { %s811_s27 = sshll.u32 %s361_s26, 3  ;;  %s373_s4 = sadd.s32 %s813_s3, %s1320_s24 }
  0x48   : > { %s1220_s30 = scalar_lea.vmem %s1294_s0, %s811_s27  ;;  %s814_s9 = sshll.u32 %s373_s4, 3 }
  0x49   : > { %s1225_s7 = scalar_lea.vmem %s1296_s2, %s814_s9  ;;  %380 = sbr.rel (%p815_p0) target bundleno = 80 (0x50), region = 70 }
  0x4e   : > { %v1051_v32 = vmov 0.0  }
  0x4f   : > { %381 = vst [vmem:[#allocation2] sm:$0xff] %v1051_v32  ;;  %382 = vst [vmem:[#allocation2 + $0x8] sm:$0xff] %v1051_v32 }
  0x50 PF: > { %v927_v33 = vld [vmem:[%s1227_s8 + $0x74] ss:$8 sps:$4 sm:$0xff]   ;;  %v929_v34 = vld [vmem:[%s1227_s8 + $0x70] ss:$8 sps:$4 sm:$0xff]   ;;  %v930_v35 = vld [vmem:[%s1227_s8 + $0x64] ss:$8 sps:$4 sm:$0xff]  }
  0x51   : > { %581 = vmatprep.subr.bf16.mxu0 %v927_v33  ;;  %v932_v36 = vld [vmem:[%s1227_s8 + $0x60] ss:$8 sps:$4 sm:$0xff]   ;;  %v933_v37 = vld [vmem:[%s1227_s8 + $0x54] ss:$8 sps:$4 sm:$0xff]   ;;  %v935_v38 = vld [vmem:[%s1227_s8 + $0x50] ss:$8 sps:$4 sm:$0xff]  }
  0x52   : > { %582 = vmatpush1.bf16.msra.mxu0 %v929_v34  ;;  %v936_v39 = vld [vmem:[%s1227_s8 + $0x44] ss:$8 sps:$4 sm:$0xff]   ;;  %v938_v40 = vld [vmem:[%s1227_s8 + $0x40] ss:$8 sps:$4 sm:$0xff]   ;;  %v939_v41 = vld [vmem:[%s1227_s8 + $0x34] ss:$8 sps:$4 sm:$0xff]  }
  0x53   : > { %583 = vmatprep.subr.bf16.mxu0 %v930_v35  ;;  %v941_v42 = vld [vmem:[%s1227_s8 + $0x30] ss:$8 sps:$4 sm:$0xff]   ;;  %v942_v43 = vld [vmem:[%s1227_s8 + $0x24] ss:$8 sps:$4 sm:$0xff]   ;;  %v944_v44 = vld [vmem:[%s1227_s8 + $0x20] ss:$8 sps:$4 sm:$0xff]  }
  0x54   : > { %v945_v45 = vld [vmem:[%s1227_s8 + $0x14] ss:$8 sps:$4 sm:$0xff]   ;;  %v947_v48 = vld [vmem:[%s1227_s8 + $0x10] ss:$8 sps:$4 sm:$0xff]   ;;  %v948_v49 = vld [vmem:[%s1227_s8 + $0x4] ss:$8 sps:$4 sm:$0xff]  }
  0x55   : > { %v384_v46 = vld [vmem:[%s1220_s30 + $0x8] sm:$0xff]  ;;  %v950_v50 = vld [vmem:[%s1227_s8] ss:$8 sps:$4 sm:$0xff]   ;;  %v954_v53 = vld [vmem:[%s1227_s8 + $0xe4] ss:$8 sps:$4 sm:$0xff]   ;;  %p848_p1 = scmp.ne.s32.totalorder %s1025_s11, 1 }
  0x56   : > { %584 = vmatpush1.bf16.msra.mxu0 %v932_v36  ;;  %v386_v47 = vpack.c.bf16 %v384_v46, %v384_v46  ;;  %v951_v51 = vld [vmem:[%s1227_s8 + $0xf4] ss:$8 sps:$4 sm:$0xff]   ;;  %v953_v52 = vld [vmem:[%s1227_s8 + $0xf0] ss:$8 sps:$4 sm:$0xff]   ;;  %v956_v54 = vld [vmem:[%s1227_s8 + $0xe0] ss:$8 sps:$4 sm:$0xff]  }
  0x57   : > { %585 = vmatprep.subr.bf16.mxu0 %v933_v37  ;;  %v957_v55 = vld [vmem:[%s1227_s8 + $0xd4] ss:$8 sps:$4 sm:$0xff]   ;;  %v959_v56 = vld [vmem:[%s1227_s8 + $0xd0] ss:$8 sps:$4 sm:$0xff]   ;;  %v960_v57 = vld [vmem:[%s1227_s8 + $0xc4] ss:$8 sps:$4 sm:$0xff]  }
  0x58   : > { %613 = vmatprep.mubr.bf16.mxu0 %v386_v47  ;;  %v962_v58 = vld [vmem:[%s1227_s8 + $0xc0] ss:$8 sps:$4 sm:$0xff]   ;;  %v963_v59 = vld [vmem:[%s1227_s8 + $0xb4] ss:$8 sps:$4 sm:$0xff]   ;;  %v965_v60 = vld [vmem:[%s1227_s8 + $0xb0] ss:$8 sps:$4 sm:$0xff]  }
  0x59   : > { %v966_v61 = vld [vmem:[%s1227_s8 + $0xa4] ss:$8 sps:$4 sm:$0xff]   ;;  %v968_v62 = vld [vmem:[%s1227_s8 + $0xa0] ss:$8 sps:$4 sm:$0xff]   ;;  %v969_v63 = vld [vmem:[%s1227_s8 + $0x94] ss:$8 sps:$4 sm:$0xff]  }
  0x5a   : > { %586 = vmatpush1.bf16.msra.mxu0 %v935_v38  ;;  %v971_v0 = vld [vmem:[%s1227_s8 + $0x90] ss:$8 sps:$4 sm:$0xff]   ;;  %v972_v1 = vld [vmem:[%s1227_s8 + $0x84] ss:$8 sps:$4 sm:$0xff]   ;;  %v974_v2 = vld [vmem:[%s1227_s8 + $0x80] ss:$8 sps:$4 sm:$0xff]  }
  0x5b   : > { %587 = vmatprep.subr.bf16.mxu0 %v936_v39  ;;  %v383_v3 = vld [vmem:[%s1220_s30] sm:$0xff]  ;;  %v420_v7 = vld [vmem:[#allocation2 + $0x8] sm:$0xff] }
  0x5c   : > { %v385_v4 = vpack.c.bf16 %v383_v3, %v383_v3  ;;  %v419_v5 = vld [vmem:[#allocation2] sm:$0xff] }
  0x5e   : > { %588 = vmatpush1.bf16.msra.mxu0 %v938_v40 }
  0x5f   : > { %589 = vmatprep.subr.bf16.mxu0 %v939_v41 }
  0x62   : > { %590 = vmatpush1.bf16.msra.mxu0 %v941_v42 }
  0x63   : > { %591 = vmatprep.subr.bf16.mxu0 %v942_v43 }
  0x66   : > { %592 = vmatpush1.bf16.msra.mxu0 %v944_v44 }
  0x67   : > { %593 = vmatprep.subr.bf16.mxu0 %v945_v45 }
  0x6a   : > { %594 = vmatpush1.bf16.msra.mxu0 %v947_v48 }
  0x6b   : > { %595 = vmatprep.subr.bf16.mxu0 %v948_v49 }
  0x6e   : > { %596 = vmatpush1.bf16.msra.mxu0 %v950_v50 }
  0x6f   : > { %597 = vmatprep.subr.bf16.mxu0 %v951_v51 }
  0x72   : > { %598 = vmatpush2.bf16.msra.mxu0 %v953_v52 }
  0x73   : > { %599 = vmatprep.subr.bf16.mxu0 %v954_v53 }
  0x76   : > { %600 = vmatpush2.bf16.msra.mxu0 %v956_v54 }
  0x77   : > { %601 = vmatprep.subr.bf16.mxu0 %v957_v55 }
  0x7a   : > { %602 = vmatpush2.bf16.msra.mxu0 %v959_v56 }
  0x7b   : > { %603 = vmatprep.subr.bf16.mxu0 %v960_v57 }
  0x7e   : > { %604 = vmatpush2.bf16.msra.mxu0 %v962_v58 }
  0x7f   : > { %605 = vmatprep.subr.bf16.mxu0 %v963_v59 }
  0x82   : > { %606 = vmatpush2.bf16.msra.mxu0 %v965_v60 }
  0x83   : > { %607 = vmatprep.subr.bf16.mxu0 %v966_v61 }
  0x86   : > { %608 = vmatpush2.bf16.msra.mxu0 %v968_v62 }
  0x87   : > { %609 = vmatprep.subr.bf16.mxu0 %v969_v63 }
  0x8a   : > { %610 = vmatpush2.bf16.msra.mxu0 %v971_v0 }
  0x8b   : > { %611 = vmatprep.subr.bf16.mxu0 %v972_v1 }
  0x8e   : > { %612 = vmatpush2.bf16.msra.mxu0 %v974_v2 }
  0x91   : > { %614 = vmatmul.mubr.bf16.vlgmr.msra.gmra.mxu0 %v385_v4 }
 0x151   : > { %v615_v6 = vpop.f32.mrf.mxu0 }
 0x152   : > { %v622_v8 = vadd.f32 %v615_v6, %v419_v5 }
 0x153   : > { %v617_v9 = vpop.f32.mrf.mxu0  ;;  %629 = sbr.rel (%p848_p1) target bundleno = 406 (0x196), region = 74 }
 0x154   : > { %624 = vst [vmem:[#allocation2] sm:$0xff] %v622_v8  ;;  %v623_v10 = vadd.f32 %v617_v9, %v420_v7 }
 0x155   : > { %v619_v11 = vpop.f32.mrf.mxu0 }
 0x156   : > { %625 = vst [vmem:[#allocation2 + $0x8] sm:$0xff] %v623_v10 }
 0x157   : > { %v620_v12 = vpop.f32.mrf.mxu0 }
 0x158   : > { %v632_v13 = vlaneseq  ;;  %v1052_v17 = vmov 0.0  }
 0x15a   : > { %v633_v14 = vshrl.u32 %v632_v13, 7 }
 0x15b   : > { %v630_v15 = vld [vmem:[#allocation2] sm:$0xff] }
 0x15c   : > { %vm634_vm0 = vcmp.lt.s32.totalorder %v633_v14, 1 }
 0x15d   : > { %v631_v16 = vld [vmem:[#allocation2 + $0x8] sm:$0xff]  ;;  %v849_v18 = vsel %vm634_vm0, 1.0, %v1052_v17 }
 0x15e   : > { %v637_v19 = vmul.f32 %v849_v18, %v630_v15  ;;  %v638_v20 = vmul.f32 %v849_v18, %v631_v16 }
 0x160   : > { %v639_v21 = vrot.slane %v637_v19, 4  ;;  %v645_v22 = vrot.slane %v638_v20, 4 }
 0x162   : > { %v640_v23 = vadd.f32 %v639_v21, %v637_v19  ;;  %v646_v24 = vadd.f32 %v645_v22, %v638_v20 }
 0x164   : > { %v641_v25 = vrot.slane %v640_v23, 2  ;;  %v647_v26 = vrot.slane %v646_v24, 2 }
 0x166   : > { %v642_v27 = vadd.f32 %v641_v25, %v640_v23  ;;  %v648_v28 = vadd.f32 %v647_v26, %v646_v24 }
 0x168   : > { %v643_v29 = vrot.slane %v642_v27, 1  ;;  %v649_v30 = vrot.slane %v648_v28, 1 }
 0x16a   : > { %v644_v31 = vadd.f32 %v643_v29, %v642_v27  ;;  %v650_v32 = vadd.f32 %v649_v30, %v648_v28 }
 0x16c   : > { %v651_v33 = vsub.f32 %v630_v15, %v644_v31  ;;  %v652_v34 = vsub.f32 %v631_v16, %v650_v32 }
 0x16e   : > { %v653_v35 = vmul.f32 %v849_v18, %v651_v33  ;;  %v654_v36 = vmul.f32 %v849_v18, %v652_v34 }
 0x170   : > { %v655_v37 = vmul.f32 %v653_v35, %v653_v35  ;;  %v656_v38 = vmul.f32 %v654_v36, %v654_v36 }
 0x172   : > { %v657_v39 = vrot.slane %v655_v37, 4  ;;  %v663_v40 = vrot.slane %v656_v38, 4 }
 0x174   : > { %v658_v41 = vadd.f32 %v657_v39, %v655_v37  ;;  %v664_v42 = vadd.f32 %v663_v40, %v656_v38 }
 0x176   : > { %v659_v43 = vrot.slane %v658_v41, 2  ;;  %v665_v44 = vrot.slane %v664_v42, 2 }
 0x178   : > { %v660_v45 = vadd.f32 %v659_v43, %v658_v41  ;;  %v666_v46 = vadd.f32 %v665_v44, %v664_v42 }
 0x17a   : > { %v661_v47 = vrot.slane %v660_v45, 1  ;;  %v667_v48 = vrot.slane %v666_v46, 1 }
 0x17c   : > { %v662_v49 = vadd.f32 %v661_v47, %v660_v45  ;;  %v668_v50 = vadd.f32 %v667_v48, %v666_v46 }
 0x17e   : > { %v669_v51 = vadd.f32 1e-05, %v662_v49  ;;  %v670_v52 = vadd.f32 1e-05, %v668_v50 }
 0x180   : > { %975 = vrsqrt.f32 %v669_v51 }
 0x181   : > { %977 = vrsqrt.f32 %v670_v52 }
 0x18d   : > { %v976_v53 = vpop.eup %975 }
 0x18e   : > { %v978_v54 = vpop.eup %977  ;;  %v673_v55 = vmul.f32 %v976_v53, %v651_v33 }
 0x18f   : > { %v674_v56 = vmul.f32 %v978_v54, %v652_v34 }
 0x190   : > { %v675_v57 = vmax.f32 %v673_v55, 0.0 }
 0x191   : > { %v676_v58 = vmax.f32 %v674_v56, 0.0 }
 0x192   : > { %v677_v59 = vmin.f32 %v675_v57, 6.0 }
 0x193   : > { %v678_v60 = vmin.f32 %v676_v58, 6.0 }
 0x194   : > { %679 = vst [vmem:[%s1225_s7] sm:$0xff] %v677_v59 }
 0x195   : > { %680 = vst [vmem:[%s1225_s7 + $0x8] sm:$0xff] %v678_v60 }
 0x196 PF: > { %s12_s17 = sadd.s32 1, %s1049_s17   ;;  %s1297_s9 = smov %s1021_s10 }
 0x197   : > { %p9_p2 = scmp.ge.s32.totalorder %s12_s17, 18   ;;  %s1298_s10 = smov %s1133_s25 }
 0x198   : > { %s1299_s11 = smov %s1037_s14  ;;  %s1300_s12 = smov %s1041_s15 }
 0x199   : > { %s1301_s13 = smov %s1045_s16  ;;  %s1302_s14 = smov %s1306_s18 }
 0x19a   : > { %s1303_s15 = smov %s1310_s19  ;;  %s1304_s16 = smov %s1314_s20 }
 0x19b   :  { %11 = sbr.rel (!%p9_p2) target bundleno = 5 (0x5), region = 112 }

// kernel: generator_forward.30
= control target key start
LH: loop header
LB: loop body
LE: loop exit
PB: predicated region body
PF: predicated region fallthrough
CT: control target
= control target key end

     0   :  { %s1070_s9 = smov 0   ;;  %s1072_s10 = smov 0   ;;  %s1296_s0 = inlined_call_operand.vmem [shape: f32[2,8,2304], index: 0, kind: input, shape index: {}]   ;;  %s1297_s1 = inlined_call_operand.vmem [shape: bf16[2304,512], index: 1, kind: input, shape index: {}]   ;;  %s1298_s2 = inlined_call_operand.vmem [shape: f32[2,8,512], index: 2, kind: output, shape index: {}]  }
   0x1   :  { %s1074_s11 = smov 0   ;;  %s1076_s12 = smov 0  }
   0x2   :  { %s1078_s13 = smov 0   ;;  %s1080_s14 = smov 0  }
   0x3   :  { %s1082_s15 = smov 0   ;;  %s1084_s16 = smov 0  }
   0x4   :  { %s1086_s17 = smov 0  }
   0x5 LB: > { %s24_s18 = sadd.s32 1, %s1039_s14  ;;  %s27_s19 = sadd.s32 1, %s1043_s15  ;;  %s1051_s17 = sphi %s1086_s17, %s12_s17   ;;  %s1047_s16 = sphi %s1084_s16, %s1306_s16   ;;  %s1043_s15 = sphi %s1082_s15, %s1305_s15   ;;  %s1039_s14 = sphi %s1080_s14, %s1304_s14   ;;  %s1035_s13 = sphi %s1078_s13, %s1303_s13   ;;  %s1031_s12 = sphi %s1076_s12, %s1302_s12   ;;  %s1027_s11 = sphi %s1074_s11, %s1301_s11   ;;  %s1023_s10 = sphi %s1072_s10, %s1300_s10   ;;  %s1019_s9 = sphi %s1070_s9, %s1299_s9  }
   0x6   : > { %p25_p0 = scmp.ge.s32.totalorder %s24_s18, 9  ;;  %p75_p1 = scmp.ne.s32.totalorder %s1023_s10, %s1019_s9 }
   0x7   : > { %p76_p2 = scmp.eq.s32.totalorder %s1051_s17, 0  ;;  %s31_s20 = sadd.s32 1, %s1047_s16 }
   0x8   : > { %s1308_s18 = smov (%p25_p0, %s24_s18), 0  ;;  %s1310_s19 = smov (!%p25_p0, %s27_s19), %s1043_s15 }
   0x9   : > { %p29_p3 = scmp.ge.s32.totalorder %s1310_s19, 2  ;;  %s63_s21 = ssub.s32 %s1039_s14, %s1308_s18 }
   0xa   : > { %p77_p4 = por %p76_p2, %p75_p1  ;;  %s68_s23 = sadd.s32 1, %s1023_s10 }
   0xb   : > { %s1312_s19 = smov (%p29_p3, %s1310_s19), 0  ;;  %s1314_s20 = smov (!%p29_p3, %s31_s20), %s1047_s16 }
   0xc   : > { %s64_s22 = ssub.s32 %s1043_s15, %s1312_s19  ;;  %p33_p5 = scmp.ge.s32.totalorder %s1314_s20, 2 }
   0xd   : > { %s65_s24 = sor.u32 %s64_s22, %s63_s21  ;;  %p803_p7 = scmp.ge.s32.totalorder %s1051_s17, 36 }
   0xe   : > { %p66_p6 = scmp.eq.s32.totalorder %s65_s24, 0  ;;  %s1316_s20 = smov (%p33_p5, %s1314_s20), 0 }
   0xf   : > { %129 = sbr.rel (%p803_p7) target bundleno = 43 (0x2b), region = 16 }
  0x10   : > { %s1135_s25 = scalar_select %p66_p6, %s1023_s10, %s68_s23  }
  0x14   : > { %145 = sbr.rel (!%p77_p4) target bundleno = 43 (0x2b), region = 24  ;;  %s147_s26 = sand.u32 (%p77_p4), 1, %s1023_s10  }
  0x15   : > { %s806_s27 = sshll.u32 (%p77_p4), %s1043_s15, 1  ;;  %s804_s28 = sshll.u32 (%p77_p4), %s147_s26, 8 }
  0x16   : > { %s853_s29 = sshll.u32 (%p77_p4), %s1039_s14, 7  ;;  %s1149_s7 = scalar_lea.vmem (%p77_p4), [#allocation3], %s804_s28 }
  0x17   : > { %s153_s30 = sadd.s32 (%p77_p4), %s853_s29, %s806_s27 }
  0x18   : > { %s808_s3 = sshll.u32 (%p77_p4), %s153_s30, 2 }
  0x19   : > { %s1144_s6 = scalar_lea.vmem %s1297_s1, %s808_s3 }
  0x1a   : > { %v246_v0 = vld [vmem:[%s1144_s6] sm:$0xff]  ;;  %v248_v1 = vld [vmem:[%s1144_s6 + $0x10] sm:$0xff] }
  0x1b   : > { %v250_v2 = vld [vmem:[%s1144_s6 + $0x20] sm:$0xff]  ;;  %247 = vst [vmem:[%s1149_s7] sm:$0xff] %v246_v0  ;;  %249 = vst [vmem:[%s1149_s7 + $0x8] sm:$0xff] %v248_v1  ;;  %v252_v3 = vld [vmem:[%s1144_s6 + $0x30] sm:$0xff] }
  0x1c   : > { %251 = vst [vmem:[%s1149_s7 + $0x10] sm:$0xff] %v250_v2  ;;  %v254_v4 = vld [vmem:[%s1144_s6 + $0x40] sm:$0xff]  ;;  %v256_v5 = vld [vmem:[%s1144_s6 + $0x50] sm:$0xff]  ;;  %253 = vst [vmem:[%s1149_s7 + $0x18] sm:$0xff] %v252_v3 }
  0x1d   : > { %255 = vst [vmem:[%s1149_s7 + $0x20] sm:$0xff] %v254_v4  ;;  %257 = vst [vmem:[%s1149_s7 + $0x28] sm:$0xff] %v256_v5  ;;  %v258_v6 = vld [vmem:[%s1144_s6 + $0x60] sm:$0xff]  ;;  %v260_v7 = vld [vmem:[%s1144_s6 + $0x70] sm:$0xff] }
  0x1e   : > { %v262_v8 = vld [vmem:[%s1144_s6 + $0x80] sm:$0xff]  ;;  %259 = vst [vmem:[%s1149_s7 + $0x30] sm:$0xff] %v258_v6  ;;  %261 = vst [vmem:[%s1149_s7 + $0x38] sm:$0xff] %v260_v7  ;;  %v264_v9 = vld [vmem:[%s1144_s6 + $0x90] sm:$0xff] }
  0x1f   : > { %263 = vst [vmem:[%s1149_s7 + $0x40] sm:$0xff] %v262_v8  ;;  %v266_v10 = vld [vmem:[%s1144_s6 + $0xa0] sm:$0xff]  ;;  %v268_v11 = vld [vmem:[%s1144_s6 + $0xb0] sm:$0xff]  ;;  %265 = vst [vmem:[%s1149_s7 + $0x48] sm:$0xff] %v264_v9 }
  0x20   : > { %267 = vst [vmem:[%s1149_s7 + $0x50] sm:$0xff] %v266_v10  ;;  %269 = vst [vmem:[%s1149_s7 + $0x58] sm:$0xff] %v268_v11  ;;  %v270_v12 = vld [vmem:[%s1144_s6 + $0xc0] sm:$0xff]  ;;  %v272_v13 = vld [vmem:[%s1144_s6 + $0xd0] sm:$0xff] }
  0x21   : > { %v274_v14 = vld [vmem:[%s1144_s6 + $0xe0] sm:$0xff]  ;;  %271 = vst [vmem:[%s1149_s7 + $0x60] sm:$0xff] %v270_v12  ;;  %273 = vst [vmem:[%s1149_s7 + $0x68] sm:$0xff] %v272_v13  ;;  %v276_v15 = vld [vmem:[%s1144_s6 + $0xf0] sm:$0xff] }
  0x22   : > { %275 = vst [vmem:[%s1149_s7 + $0x70] sm:$0xff] %v274_v14  ;;  %v278_v16 = vld [vmem:[%s1144_s6 + $0x100] sm:$0xff]  ;;  %v280_v17 = vld [vmem:[%s1144_s6 + $0x110] sm:$0xff]  ;;  %277 = vst [vmem:[%s1149_s7 + $0x78] sm:$0xff] %v276_v15 }
  0x23   : > { %279 = vst [vmem:[%s1149_s7 + $0x80] sm:$0xff] %v278_v16  ;;  %281 = vst [vmem:[%s1149_s7 + $0x88] sm:$0xff] %v280_v17  ;;  %v282_v18 = vld [vmem:[%s1144_s6 + $0x120] sm:$0xff]  ;;  %v284_v19 = vld [vmem:[%s1144_s6 + $0x130] sm:$0xff] }
  0x24   : > { %v286_v20 = vld [vmem:[%s1144_s6 + $0x140] sm:$0xff]  ;;  %283 = vst [vmem:[%s1149_s7 + $0x90] sm:$0xff] %v282_v18  ;;  %285 = vst [vmem:[%s1149_s7 + $0x98] sm:$0xff] %v284_v19  ;;  %v288_v21 = vld [vmem:[%s1144_s6 + $0x150] sm:$0xff] }
  0x25   : > { %287 = vst [vmem:[%s1149_s7 + $0xa0] sm:$0xff] %v286_v20  ;;  %v290_v22 = vld [vmem:[%s1144_s6 + $0x160] sm:$0xff]  ;;  %v292_v23 = vld [vmem:[%s1144_s6 + $0x170] sm:$0xff]  ;;  %289 = vst [vmem:[%s1149_s7 + $0xa8] sm:$0xff] %v288_v21 }
  0x26   : > { %291 = vst [vmem:[%s1149_s7 + $0xb0] sm:$0xff] %v290_v22  ;;  %293 = vst [vmem:[%s1149_s7 + $0xb8] sm:$0xff] %v292_v23  ;;  %v294_v24 = vld [vmem:[%s1144_s6 + $0x180] sm:$0xff]  ;;  %v296_v25 = vld [vmem:[%s1144_s6 + $0x190] sm:$0xff] }
  0x27   : > { %v298_v26 = vld [vmem:[%s1144_s6 + $0x1a0] sm:$0xff]  ;;  %295 = vst [vmem:[%s1149_s7 + $0xc0] sm:$0xff] %v294_v24  ;;  %297 = vst [vmem:[%s1149_s7 + $0xc8] sm:$0xff] %v296_v25  ;;  %v300_v27 = vld [vmem:[%s1144_s6 + $0x1b0] sm:$0xff] }
  0x28   : > { %299 = vst [vmem:[%s1149_s7 + $0xd0] sm:$0xff] %v298_v26  ;;  %v302_v28 = vld [vmem:[%s1144_s6 + $0x1c0] sm:$0xff]  ;;  %v304_v29 = vld [vmem:[%s1144_s6 + $0x1d0] sm:$0xff]  ;;  %301 = vst [vmem:[%s1149_s7 + $0xd8] sm:$0xff] %v300_v27 }
  0x29   : > { %303 = vst [vmem:[%s1149_s7 + $0xe0] sm:$0xff] %v302_v28  ;;  %305 = vst [vmem:[%s1149_s7 + $0xe8] sm:$0xff] %v304_v29  ;;  %v306_v30 = vld [vmem:[%s1144_s6 + $0x1e0] sm:$0xff]  ;;  %v308_v31 = vld [vmem:[%s1144_s6 + $0x1f0] sm:$0xff] }
  0x2a   : > { %307 = vst [vmem:[%s1149_s7 + $0xf0] sm:$0xff] %v306_v30  ;;  %309 = vst [vmem:[%s1149_s7 + $0xf8] sm:$0xff] %v308_v31 }
  0x2b PF: > { %p809_p8 = scmp.ge.s32.totalorder %s1051_s17, 1  ;;  %p314_p9 = scmp.lt.s32.totalorder %s1051_s17, 37 }
  0x2d   : > { %p315_p10 = pnand %p809_p8, %p314_p9 }
  0x2e   : > { %s321_s8 = sand.u32 (!%p315_p10), 1, %s1019_s9   ;;  %s811_s21 = sshll.u32 (!%p315_p10), %s1027_s11, 1 }
  0x2f   : > { %318 = sbr.rel (%p315_p10) target bundleno = 386 (0x182), region = 62  ;;  %s810_s22 = sshll.u32 (!%p315_p10), %s321_s8, 8 }
  0x30   : > { %p356_p11 = scmp.lt.s32.totalorder (!%p315_p10), %s1035_s13, 1  ;;  %p358_p12 = scmp.lt.s32.totalorder (!%p315_p10), %s811_s21, 17 }
  0x31   : > { %s813_s24 = sshll.u32 (!%p315_p10), %s1031_s12, 1  ;;  %s1229_s8 = scalar_lea.vmem (!%p315_p10), [#allocation3], %s810_s22 }
  0x32   : > { %p370_p13 = scmp.lt.s32.totalorder (!%p315_p10), %s813_s24, 3  ;;  %p816_p0 = scmp.ne.s32.totalorder (!%p315_p10), %s1027_s11, 0 }
  0x34   : > { %s1318_s13 = smov (!%p356_p11, %s1035_s13), 1  ;;  %s1320_s21 = smov (!%p358_p12, %s811_s21), 17 }
  0x35   : > { %s854_s23 = smul.u32 18, %s1318_s13  ;;  %s814_s3 = sshll.u32 %s1318_s13, 2 }
  0x36   : > { %s1322_s24 = smov (!%p370_p13, %s813_s24), 3  ;;  %380 = sbr.rel (%p816_p0) target bundleno = 61 (0x3d), region = 70 }
  0x37   : > { %s361_s26 = sadd.s32 %s854_s23, %s1320_s21  ;;  %s373_s4 = sadd.s32 %s814_s3, %s1322_s24 }
  0x38   : > { %s812_s27 = sshll.u32 %s361_s26, 3  ;;  %s815_s9 = sshll.u32 %s373_s4, 3 }
  0x39   : > { %s1222_s30 = scalar_lea.vmem %s1296_s0, %s812_s27  ;;  %s1227_s7 = scalar_lea.vmem %s1298_s2, %s815_s9 }
  0x3b   : > { %v1053_v32 = vmov 0.0  }
  0x3c   : > { %381 = vst [vmem:[#allocation2] sm:$0xff] %v1053_v32  ;;  %382 = vst [vmem:[#allocation2 + $0x8] sm:$0xff] %v1053_v32 }
  0x3d PF: > { %v929_v33 = vld [vmem:[%s1229_s8 + $0x74] ss:$8 sps:$4 sm:$0xff]   ;;  %v931_v34 = vld [vmem:[%s1229_s8 + $0x70] ss:$8 sps:$4 sm:$0xff]   ;;  %v932_v35 = vld [vmem:[%s1229_s8 + $0x64] ss:$8 sps:$4 sm:$0xff]  }
  0x3e   : > { %581 = vmatprep.subr.bf16.mxu0 %v929_v33  ;;  %v934_v36 = vld [vmem:[%s1229_s8 + $0x60] ss:$8 sps:$4 sm:$0xff]   ;;  %v935_v37 = vld [vmem:[%s1229_s8 + $0x54] ss:$8 sps:$4 sm:$0xff]   ;;  %v937_v38 = vld [vmem:[%s1229_s8 + $0x50] ss:$8 sps:$4 sm:$0xff]  }
  0x3f   : > { %582 = vmatpush1.bf16.msra.mxu0 %v931_v34  ;;  %v938_v39 = vld [vmem:[%s1229_s8 + $0x44] ss:$8 sps:$4 sm:$0xff]   ;;  %v940_v40 = vld [vmem:[%s1229_s8 + $0x40] ss:$8 sps:$4 sm:$0xff]   ;;  %v941_v41 = vld [vmem:[%s1229_s8 + $0x34] ss:$8 sps:$4 sm:$0xff]  }
  0x40   : > { %583 = vmatprep.subr.bf16.mxu0 %v932_v35  ;;  %v943_v42 = vld [vmem:[%s1229_s8 + $0x30] ss:$8 sps:$4 sm:$0xff]   ;;  %v944_v43 = vld [vmem:[%s1229_s8 + $0x24] ss:$8 sps:$4 sm:$0xff]   ;;  %v946_v44 = vld [vmem:[%s1229_s8 + $0x20] ss:$8 sps:$4 sm:$0xff]  }
  0x41   : > { %v947_v45 = vld [vmem:[%s1229_s8 + $0x14] ss:$8 sps:$4 sm:$0xff]   ;;  %v949_v48 = vld [vmem:[%s1229_s8 + $0x10] ss:$8 sps:$4 sm:$0xff]   ;;  %v950_v49 = vld [vmem:[%s1229_s8 + $0x4] ss:$8 sps:$4 sm:$0xff]  }
  0x42   : > { %v384_v46 = vld [vmem:[%s1222_s30 + $0x8] sm:$0xff]  ;;  %v952_v50 = vld [vmem:[%s1229_s8] ss:$8 sps:$4 sm:$0xff]   ;;  %v956_v53 = vld [vmem:[%s1229_s8 + $0xe4] ss:$8 sps:$4 sm:$0xff]   ;;  %p849_p1 = scmp.ne.s32.totalorder %s1027_s11, 8 }
  0x43   : > { %584 = vmatpush1.bf16.msra.mxu0 %v934_v36  ;;  %v386_v47 = vpack.c.bf16 %v384_v46, %v384_v46  ;;  %v953_v51 = vld [vmem:[%s1229_s8 + $0xf4] ss:$8 sps:$4 sm:$0xff]   ;;  %v955_v52 = vld [vmem:[%s1229_s8 + $0xf0] ss:$8 sps:$4 sm:$0xff]   ;;  %v958_v54 = vld [vmem:[%s1229_s8 + $0xe0] ss:$8 sps:$4 sm:$0xff]  }
  0x44   : > { %585 = vmatprep.subr.bf16.mxu0 %v935_v37  ;;  %v959_v55 = vld [vmem:[%s1229_s8 + $0xd4] ss:$8 sps:$4 sm:$0xff]   ;;  %v961_v56 = vld [vmem:[%s1229_s8 + $0xd0] ss:$8 sps:$4 sm:$0xff]   ;;  %v962_v57 = vld [vmem:[%s1229_s8 + $0xc4] ss:$8 sps:$4 sm:$0xff]  }
  0x45   : > { %613 = vmatprep.mubr.bf16.mxu0 %v386_v47  ;;  %v964_v58 = vld [vmem:[%s1229_s8 + $0xc0] ss:$8 sps:$4 sm:$0xff]   ;;  %v965_v59 = vld [vmem:[%s1229_s8 + $0xb4] ss:$8 sps:$4 sm:$0xff]   ;;  %v967_v60 = vld [vmem:[%s1229_s8 + $0xb0] ss:$8 sps:$4 sm:$0xff]  }
  0x46   : > { %v968_v61 = vld [vmem:[%s1229_s8 + $0xa4] ss:$8 sps:$4 sm:$0xff]   ;;  %v970_v62 = vld [vmem:[%s1229_s8 + $0xa0] ss:$8 sps:$4 sm:$0xff]   ;;  %v971_v63 = vld [vmem:[%s1229_s8 + $0x94] ss:$8 sps:$4 sm:$0xff]  }
  0x47   : > { %586 = vmatpush1.bf16.msra.mxu0 %v937_v38  ;;  %v973_v0 = vld [vmem:[%s1229_s8 + $0x90] ss:$8 sps:$4 sm:$0xff]   ;;  %v974_v1 = vld [vmem:[%s1229_s8 + $0x84] ss:$8 sps:$4 sm:$0xff]   ;;  %v976_v2 = vld [vmem:[%s1229_s8 + $0x80] ss:$8 sps:$4 sm:$0xff]  }
  0x48   : > { %587 = vmatprep.subr.bf16.mxu0 %v938_v39  ;;  %v383_v3 = vld [vmem:[%s1222_s30] sm:$0xff]  ;;  %v420_v7 = vld [vmem:[#allocation2 + $0x8] sm:$0xff] }
  0x49   : > { %v385_v4 = vpack.c.bf16 %v383_v3, %v383_v3  ;;  %v419_v5 = vld [vmem:[#allocation2] sm:$0xff] }
  0x4b   : > { %588 = vmatpush1.bf16.msra.mxu0 %v940_v40 }
  0x4c   : > { %589 = vmatprep.subr.bf16.mxu0 %v941_v41 }
  0x4f   : > { %590 = vmatpush1.bf16.msra.mxu0 %v943_v42 }
  0x50   : > { %591 = vmatprep.subr.bf16.mxu0 %v944_v43 }
  0x53   : > { %592 = vmatpush1.bf16.msra.mxu0 %v946_v44 }
  0x54   : > { %593 = vmatprep.subr.bf16.mxu0 %v947_v45 }
  0x57   : > { %594 = vmatpush1.bf16.msra.mxu0 %v949_v48 }
  0x58   : > { %595 = vmatprep.subr.bf16.mxu0 %v950_v49 }
  0x5b   : > { %596 = vmatpush1.bf16.msra.mxu0 %v952_v50 }
  0x5c   : > { %597 = vmatprep.subr.bf16.mxu0 %v953_v51 }
  0x5f   : > { %598 = vmatpush2.bf16.msra.mxu0 %v955_v52 }
  0x60   : > { %599 = vmatprep.subr.bf16.mxu0 %v956_v53 }
  0x63   : > { %600 = vmatpush2.bf16.msra.mxu0 %v958_v54 }
  0x64   : > { %601 = vmatprep.subr.bf16.mxu0 %v959_v55 }
  0x67   : > { %602 = vmatpush2.bf16.msra.mxu0 %v961_v56 }
  0x68   : > { %603 = vmatprep.subr.bf16.mxu0 %v962_v57 }
  0x6b   : > { %604 = vmatpush2.bf16.msra.mxu0 %v964_v58 }
  0x6c   : > { %605 = vmatprep.subr.bf16.mxu0 %v965_v59 }
  0x6f   : > { %606 = vmatpush2.bf16.msra.mxu0 %v967_v60 }
  0x70   : > { %607 = vmatprep.subr.bf16.mxu0 %v968_v61 }
  0x73   : > { %608 = vmatpush2.bf16.msra.mxu0 %v970_v62 }
  0x74   : > { %609 = vmatprep.subr.bf16.mxu0 %v971_v63 }
  0x77   : > { %610 = vmatpush2.bf16.msra.mxu0 %v973_v0 }
  0x78   : > { %611 = vmatprep.subr.bf16.mxu0 %v974_v1 }
  0x7b   : > { %612 = vmatpush2.bf16.msra.mxu0 %v976_v2 }
  0x7e   : > { %614 = vmatmul.mubr.bf16.vlgmr.msra.gmra.mxu0 %v385_v4 }
 0x13e   : > { %v615_v6 = vpop.f32.mrf.mxu0 }
 0x13f   : > { %v622_v8 = vadd.f32 %v615_v6, %v419_v5 }
 0x140   : > { %v617_v9 = vpop.f32.mrf.mxu0  ;;  %629 = sbr.rel (%p849_p1) target bundleno = 386 (0x182), region = 74 }
 0x141   : > { %624 = vst [vmem:[#allocation2] sm:$0xff] %v622_v8  ;;  %v623_v10 = vadd.f32 %v617_v9, %v420_v7 }
 0x142   : > { %v619_v11 = vpop.f32.mrf.mxu0 }
 0x143   : > { %625 = vst [vmem:[#allocation2 + $0x8] sm:$0xff] %v623_v10 }
 0x144   : > { %v620_v12 = vpop.f32.mrf.mxu0 }
 0x145   : > { %v632_v13 = vlaneseq  ;;  %v1054_v17 = vmov 0.0  }
 0x147   : > { %v633_v14 = vshrl.u32 %v632_v13, 7 }
 0x148   : > { %v630_v15 = vld [vmem:[#allocation2] sm:$0xff] }
 0x149   : > { %vm634_vm0 = vcmp.lt.s32.totalorder %v633_v14, 1 }
 0x14a   : > { %v631_v16 = vld [vmem:[#allocation2 + $0x8] sm:$0xff]  ;;  %v850_v18 = vsel %vm634_vm0, 1.0, %v1054_v17 }
 0x14b   : > { %v637_v19 = vmul.f32 %v850_v18, %v630_v15  ;;  %v638_v20 = vmul.f32 %v850_v18, %v631_v16 }
 0x14d   : > { %v639_v21 = vrot.slane %v637_v19, 4  ;;  %v645_v22 = vrot.slane %v638_v20, 4 }
 0x14f   : > { %v640_v23 = vadd.f32 %v639_v21, %v637_v19  ;;  %v646_v24 = vadd.f32 %v645_v22, %v638_v20 }
 0x151   : > { %v641_v25 = vrot.slane %v640_v23, 2  ;;  %v647_v26 = vrot.slane %v646_v24, 2 }
 0x153   : > { %v642_v27 = vadd.f32 %v641_v25, %v640_v23  ;;  %v648_v28 = vadd.f32 %v647_v26, %v646_v24 }
 0x155   : > { %v643_v29 = vrot.slane %v642_v27, 1  ;;  %v649_v30 = vrot.slane %v648_v28, 1 }
 0x157   : > { %v644_v31 = vadd.f32 %v643_v29, %v642_v27  ;;  %v650_v32 = vadd.f32 %v649_v30, %v648_v28 }
 0x159   : > { %v651_v33 = vsub.f32 %v630_v15, %v644_v31  ;;  %v652_v34 = vsub.f32 %v631_v16, %v650_v32 }
 0x15b   : > { %v653_v35 = vmul.f32 %v850_v18, %v651_v33  ;;  %v654_v36 = vmul.f32 %v850_v18, %v652_v34 }
 0x15d   : > { %v655_v37 = vmul.f32 %v653_v35, %v653_v35  ;;  %v656_v38 = vmul.f32 %v654_v36, %v654_v36 }
 0x15f   : > { %v657_v39 = vrot.slane %v655_v37, 4  ;;  %v663_v40 = vrot.slane %v656_v38, 4 }
 0x161   : > { %v658_v41 = vadd.f32 %v657_v39, %v655_v37  ;;  %v664_v42 = vadd.f32 %v663_v40, %v656_v38 }
 0x163   : > { %v659_v43 = vrot.slane %v658_v41, 2  ;;  %v665_v44 = vrot.slane %v664_v42, 2 }
 0x165   : > { %v660_v45 = vadd.f32 %v659_v43, %v658_v41  ;;  %v666_v46 = vadd.f32 %v665_v44, %v664_v42 }
 0x167   : > { %v661_v47 = vrot.slane %v660_v45, 1  ;;  %v667_v48 = vrot.slane %v666_v46, 1 }
 0x169   : > { %v662_v49 = vadd.f32 %v661_v47, %v660_v45  ;;  %v668_v50 = vadd.f32 %v667_v48, %v666_v46 }
 0x16b   : > { %v669_v51 = vadd.f32 1e-05, %v662_v49  ;;  %v670_v52 = vadd.f32 1e-05, %v668_v50 }
 0x16d   : > { %977 = vrsqrt.f32 %v669_v51 }
 0x16e   : > { %979 = vrsqrt.f32 %v670_v52 }
 0x17a   : > { %v978_v53 = vpop.eup %977 }
 0x17b   : > { %v980_v54 = vpop.eup %979  ;;  %v673_v55 = vmul.f32 %v978_v53, %v651_v33 }
 0x17c   : > { %v674_v56 = vmul.f32 %v980_v54, %v652_v34 }
 0x17d   : > { %vm675_vm1 = vcmp.ge.f32.partialorder %v673_v55, 0.0  ;;  %v677_v57 = vmul.f32 0.2, %v673_v55 }
 0x17e   : > { %vm676_vm2 = vcmp.ge.f32.partialorder %v674_v56, 0.0  ;;  %v678_v58 = vmul.f32 0.2, %v674_v56 }
 0x17f   : > { %v679_v59 = vsel %vm675_vm1, %v673_v55, %v677_v57 }
 0x180   : > { %681 = vst [vmem:[%s1227_s7] sm:$0xff] %v679_v59  ;;  %v680_v60 = vsel %vm676_vm2, %v674_v56, %v678_v58 }
 0x181   : > { %682 = vst [vmem:[%s1227_s7 + $0x8] sm:$0xff] %v680_v60 }
 0x182 PF: > { %s12_s17 = sadd.s32 1, %s1051_s17   ;;  %s1299_s9 = smov %s1023_s10 }
 0x183   : > { %p9_p2 = scmp.ge.s32.totalorder %s12_s17, 38   ;;  %s1300_s10 = smov %s1135_s25 }
 0x184   : > { %s1301_s11 = smov %s1039_s14  ;;  %s1302_s12 = smov %s1043_s15 }
 0x185   : > { %s1303_s13 = smov %s1047_s16  ;;  %s1304_s14 = smov %s1308_s18 }
 0x186   : > { %s1305_s15 = smov %s1312_s19  ;;  %s1306_s16 = smov %s1316_s20 }
 0x187   :  { %11 = sbr.rel (!%p9_p2) target bundleno = 5 (0x5), region = 112 }

// kernel: generator_forward.32
= control target key start
LH: loop header
LB: loop body
LE: loop exit
PB: predicated region body
PF: predicated region fallthrough
CT: control target
= control target key end

     0   :  { %s866_s9 = smov 0   ;;  %s868_s10 = smov 0   ;;  %s1094_s0 = inlined_call_operand.vmem [shape: f32[9,2,8,1024], index: 0, kind: input, shape index: {}]   ;;  %s1095_s1 = inlined_call_operand.vmem [shape: f32[9,1,1024], index: 1, kind: input, shape index: {}]   ;;  %s1096_s2 = inlined_call_operand.vmem [shape: f32[2,8,1024], index: 2, kind: output, shape index: {}]  }
   0x1   :  { %s870_s11 = smov 0   ;;  %s872_s12 = smov 0  }
   0x2   :  { %s874_s13 = smov 0   ;;  %s876_s14 = smov 0  }
   0x3   :  { %s878_s15 = smov 0   ;;  %s880_s16 = smov 0  }
   0x4   :  { %s882_s17 = smov 0  }
   0x5 LB: > { %s21_s18 = sadd.s32 1, %s840_s15  ;;  %s24_s19 = sadd.s32 1, %s844_s16  ;;  %s848_s17 = sphi %s882_s17, %s12_s17   ;;  %s844_s16 = sphi %s880_s16, %s1106_s16   ;;  %s840_s15 = sphi %s878_s15, %s1105_s15   ;;  %s836_s14 = sphi %s876_s14, %s1104_s14   ;;  %s832_s13 = sphi %s874_s13, %s1103_s13   ;;  %s828_s12 = sphi %s872_s12, %s1102_s12   ;;  %s824_s11 = sphi %s870_s11, %s1101_s11   ;;  %s820_s10 = sphi %s868_s10, %s1100_s10   ;;  %s816_s9 = sphi %s866_s9, %s1099_s9  }
   0x6   : > { %p22_p0 = scmp.ge.s32.totalorder %s21_s18, 4  ;;  %p40_p1 = scmp.ne.s32.totalorder %s828_s12, %s824_s11 }
   0x7   : > { %p41_p2 = scmp.eq.s32.totalorder %s848_s17, 0  ;;  %s59_s22 = sadd.s32 1, %s820_s10 }
   0x8   : > { %s1108_s18 = smov (%p22_p0, %s21_s18), 0  ;;  %s1110_s19 = smov (!%p22_p0, %s24_s19), %s844_s16 }
   0x9   : > { %s29_s20 = ssub.s32 %s840_s15, %s1108_s18  ;;  %p921_p3 = por %p41_p2, %p40_p1 }
   0xa   : > { %p26_p4 = scmp.ge.s32.totalorder %s1110_s19, 2  ;;  %p57_p5 = scmp.eq.s32.totalorder %s29_s20, 0 }
   0xb   : > { %p66_p6 = scmp.ne.s32.totalorder %s820_s10, %s816_s9  ;;  %s33_s27 = sadd.s32 1, %s828_s12 }
   0xc   : > { %s1112_s19 = smov (%p26_p4, %s1110_s19), 0  ;;  %p661_p9 = scmp.ge.s32.totalorder %s848_s17, 8 }
   0xd   : > { %s931_s23 = scalar_select %p57_p5, %s820_s10, %s59_s22  }
   0xe   : > { %s28_s24 = ssub.s32 %s844_s16, %s1112_s19  ;;  %p935_p7 = por %p66_p6, %p41_p2 }
   0xf   : > { %s30_s26 = sor.u32 %s29_s20, %s28_s24  ;;  %120 = sbr.rel (%p661_p9) target bundleno = 46 (0x2e), region = 16 }
  0x10   : > { %p31_p8 = scmp.eq.s32.totalorder %s30_s26, 0 }
  0x12   : > { %s941_s28 = scalar_select %p31_p8, %s828_s12, %s33_s27  }
  0x14   : > { %123 = sbr.rel (!%p921_p3) target bundleno = 36 (0x24), region = 20  ;;  %s125_s29 = sand.u32 (%p921_p3), 1, %s828_s12  }
  0x15   : > { %s662_s30 = sshll.u32 (%p921_p3), %s840_s15, 1  ;;  %s697_s3 = smul.u32 (%p921_p3), 144, %s125_s29 }
  0x16   : > { %s663_s4 = sshll.u32 (%p921_p3), %s844_s16, 3 }
  0x17   : > { %s130_s5 = sadd.s32 (%p921_p3), %s663_s4, %s662_s30  ;;  %s957_s21 = scalar_lea.vmem (%p921_p3), [#allocation2], %s697_s3 }
  0x18   : > { %s664_s6 = sshll.u32 (%p921_p3), %s130_s5, 3 }
  0x19   : > { %s952_s20 = scalar_lea.vmem %s1094_s0, %s664_s6 }
  0x1a   : > { %v145_v0 = vld [vmem:[%s952_s20] sm:$0xff]  ;;  %v147_v1 = vld [vmem:[%s952_s20 + $0x8] sm:$0xff] }
  0x1b   : > { %v149_v2 = vld [vmem:[%s952_s20 + $0x80] sm:$0xff]  ;;  %146 = vst [vmem:[%s957_s21] sm:$0xff] %v145_v0  ;;  %148 = vst [vmem:[%s957_s21 + $0x8] sm:$0xff] %v147_v1  ;;  %v151_v3 = vld [vmem:[%s952_s20 + $0x88] sm:$0xff] }
  0x1c   : > { %150 = vst [vmem:[%s957_s21 + $0x10] sm:$0xff] %v149_v2  ;;  %v153_v4 = vld [vmem:[%s952_s20 + $0x100] sm:$0xff]  ;;  %v155_v5 = vld [vmem:[%s952_s20 + $0x108] sm:$0xff]  ;;  %152 = vst [vmem:[%s957_s21 + $0x18] sm:$0xff] %v151_v3 }
  0x1d   : > { %154 = vst [vmem:[%s957_s21 + $0x20] sm:$0xff] %v153_v4  ;;  %156 = vst [vmem:[%s957_s21 + $0x28] sm:$0xff] %v155_v5  ;;  %v157_v6 = vld [vmem:[%s952_s20 + $0x180] sm:$0xff]  ;;  %v159_v7 = vld [vmem:[%s952_s20 + $0x188] sm:$0xff] }
  0x1e   : > { %v161_v8 = vld [vmem:[%s952_s20 + $0x200] sm:$0xff]  ;;  %158 = vst [vmem:[%s957_s21 + $0x30] sm:$0xff] %v157_v6  ;;  %160 = vst [vmem:[%s957_s21 + $0x38] sm:$0xff] %v159_v7  ;;  %v163_v9 = vld [vmem:[%s952_s20 + $0x208] sm:$0xff] }
  0x1f   : > { %162 = vst [vmem:[%s957_s21 + $0x40] sm:$0xff] %v161_v8  ;;  %v165_v10 = vld [vmem:[%s952_s20 + $0x280] sm:$0xff]  ;;  %v167_v11 = vld [vmem:[%s952_s20 + $0x288] sm:$0xff]  ;;  %164 = vst [vmem:[%s957_s21 + $0x48] sm:$0xff] %v163_v9 }
  0x20   : > { %166 = vst [vmem:[%s957_s21 + $0x50] sm:$0xff] %v165_v10  ;;  %168 = vst [vmem:[%s957_s21 + $0x58] sm:$0xff] %v167_v11  ;;  %v169_v12 = vld [vmem:[%s952_s20 + $0x300] sm:$0xff]  ;;  %v171_v13 = vld [vmem:[%s952_s20 + $0x308] sm:$0xff] }
  0x21   : > { %v173_v14 = vld [vmem:[%s952_s20 + $0x380] sm:$0xff]  ;;  %170 = vst [vmem:[%s957_s21 + $0x60] sm:$0xff] %v169_v12  ;;  %172 = vst [vmem:[%s957_s21 + $0x68] sm:$0xff] %v171_v13  ;;  %v175_v15 = vld [vmem:[%s952_s20 + $0x388] sm:$0xff] }
  0x22   : > { %174 = vst [vmem:[%s957_s21 + $0x70] sm:$0xff] %v173_v14  ;;  %v177_v16 = vld [vmem:[%s952_s20 + $0x400] sm:$0xff]  ;;  %v179_v17 = vld [vmem:[%s952_s20 + $0x408] sm:$0xff]  ;;  %176 = vst [vmem:[%s957_s21 + $0x78] sm:$0xff] %v175_v15 }
  0x23   : > { %178 = vst [vmem:[%s957_s21 + $0x80] sm:$0xff] %v177_v16  ;;  %180 = vst [vmem:[%s957_s21 + $0x88] sm:$0xff] %v179_v17 }
  0x24 PF: > { %186 = sbr.rel (!%p935_p7) target bundleno = 46 (0x2e), region = 43  ;;  %s188_s22 = sand.u32 (%p935_p7), 1, %s820_s10  }
  0x25   : > { %s665_s24 = sshll.u32 (%p935_p7), %s840_s15, 1  ;;  %s698_s26 = smul.u32 (%p935_p7), 18, %s188_s22 }
  0x26   : > { %s192_s30 = scalar_lea.vmem (%p935_p7), %s1095_s1, %s665_s24 }
  0x27   : > { %v209_v18 = vld [vmem:[%s192_s30] sm:$0x3] (%p935_p7)  ;;  %v211_v19 = vld [vmem:[%s192_s30 + $0x8] sm:$0x3] (%p935_p7)  ;;  %v213_v20 = vld [vmem:[%s192_s30 + $0x10] sm:$0x3] (%p935_p7) }
  0x28   : > { %v215_v21 = vld [vmem:[%s192_s30 + $0x18] sm:$0x3] (%p935_p7)  ;;  %v217_v22 = vld [vmem:[%s192_s30 + $0x20] sm:$0x3] (%p935_p7)  ;;  %s190_s3 = scalar_lea.vmem (%p935_p7), [#allocation3], %s698_s26 }
  0x29   : > { %210 = vst [vmem:[%s190_s3] sm:$0x3] %v209_v18  ;;  %212 = vst [vmem:[%s190_s3 + $0x2] sm:$0x3] %v211_v19  ;;  %v219_v23 = vld [vmem:[%s192_s30 + $0x28] sm:$0x3] }
  0x2a   : > { %214 = vst [vmem:[%s190_s3 + $0x4] sm:$0x3] %v213_v20  ;;  %216 = vst [vmem:[%s190_s3 + $0x6] sm:$0x3] %v215_v21  ;;  %v221_v24 = vld [vmem:[%s192_s30 + $0x30] sm:$0x3] }
  0x2b   : > { %218 = vst [vmem:[%s190_s3 + $0x8] sm:$0x3] %v217_v22  ;;  %v223_v25 = vld [vmem:[%s192_s30 + $0x38] sm:$0x3]  ;;  %220 = vst [vmem:[%s190_s3 + $0xa] sm:$0x3] %v219_v23 }
  0x2c   : > { %222 = vst [vmem:[%s190_s3 + $0xc] sm:$0x3] %v221_v24  ;;  %224 = vst [vmem:[%s190_s3 + $0xe] sm:$0x3] %v223_v25  ;;  %v225_v26 = vld [vmem:[%s192_s30 + $0x40] sm:$0x3] }
  0x2d   : > { %226 = vst [vmem:[%s190_s3 + $0x10] sm:$0x3] %v225_v26 }
  0x2e PF: > { %p666_p10 = scmp.ge.s32.totalorder %s848_s17, 1  ;;  %p267_p11 = scmp.lt.s32.totalorder %s848_s17, 9 }
  0x30   : > { %p268_p12 = pnand %p666_p10, %p267_p11 }
  0x31   : > { %s274_s25 = sand.u32 (!%p268_p12), 1, %s824_s11   ;;  %s281_s4 = sand.u32 (!%p268_p12), 1, %s816_s9  }
  0x32   : > { %271 = sbr.rel (%p268_p12) target bundleno = 137 (0x89), region = 84  ;;  %s667_s11 = sshll.u32 (!%p268_p12), %s832_s13, 1 }
  0x33   : > { %s699_s5 = smul.u32 (!%p268_p12), 144, %s274_s25  ;;  %p313_p13 = scmp.lt.s32.totalorder (!%p268_p12), %s836_s14, 1 }
  0x34   : > { %s700_s6 = smul.u32 (!%p268_p12), 18, %s281_s4  ;;  %p315_p0 = scmp.lt.s32.totalorder (!%p268_p12), %s667_s11, 7 }
  0x35   : > { %s1005_s7 = scalar_lea.vmem (!%p268_p12), [#allocation2], %s699_s5 }
  0x36   : > { %s1016_s9 = scalar_lea.vmem (!%p268_p12), [#allocation3], %s700_s6 }
  0x37   : > { %v326_v27 = vlaneseq  ;;  %v322_v29 = vld [vmem:[%s1005_s7] sm:$0xff]  ;;  %v323_v30 = vld [vmem:[%s1005_s7 + $0x8] sm:$0xff]  ;;  %v670_v33 = vld [vmem:[%s1005_s7 + $0x10] sm:$0xff]  ;;  %s1114_s14 = smov (!%p313_p13, %s836_s14), 1  ;;  %s1116_s11 = smov (!%p315_p0, %s667_s11), 7 }
  0x38   : > { %v324_v34 = vld [vmem:[%s1016_s9] sm:$0x3]  ;;  %v671_v35 = vld [vmem:[%s1005_s7 + $0x18] sm:$0xff]  ;;  %v672_v36 = vld [vmem:[%s1016_s9 + $0x2] sm:$0x3]  ;;  %s668_s8 = sshll.u32 %s1114_s14, 3 }
  0x39   : > { %v1003_v28 = vshrl.u32 %v326_v27, 7  ;;  %v673_v41 = vld [vmem:[%s1005_s7 + $0x20] sm:$0xff]  ;;  %v674_v42 = vld [vmem:[%s1005_s7 + $0x28] sm:$0xff]  ;;  %v676_v51 = vld [vmem:[%s1005_s7 + $0x30] sm:$0xff]  ;;  %s318_s20 = sadd.s32 %s668_s8, %s1116_s11 }
  0x3a   : > { %v675_v43 = vld [vmem:[%s1016_s9 + $0x4] sm:$0x3]  ;;  %v678_v46 = vld [vmem:[%s1016_s9 + $0x6] sm:$0x3]  ;;  %v677_v52 = vld [vmem:[%s1005_s7 + $0x38] sm:$0xff]  ;;  %s669_s21 = sshll.u32 %s318_s20, 3 }
  0x3b   : > { %v1010_v31 = vsub.s32 0, %v1003_v28  ;;  %v1013_v32 = vsub.s32 1, %v1003_v28  ;;  %v681_v53 = vld [vmem:[%s1016_s9 + $0x8] sm:$0x3]  ;;  %v679_v58 = vld [vmem:[%s1005_s7 + $0x40] sm:$0xff]  ;;  %v682_v1 = vld [vmem:[%s1005_s7 + $0x50] sm:$0xff]  ;;  %s320_s26 = scalar_lea.vmem %s1096_s2, %s669_s21 }
  0x3c   : > { %v680_v59 = vld [vmem:[%s1005_s7 + $0x48] sm:$0xff]  ;;  %v683_v2 = vld [vmem:[%s1005_s7 + $0x58] sm:$0xff]  ;;  %v685_v13 = vld [vmem:[%s1005_s7 + $0x60] sm:$0xff]  ;;  %vm500_vm0 = vcmp.lt.s32.totalorder %v1003_v28, 1 }
  0x3d   : > { %v329_v37 = vrot.slane %v324_v34, %v1010_v31  ;;  %v333_v38 = vrot.slane %v324_v34, %v1013_v32  ;;  %v347_v39 = vrot.slane %v672_v36, %v1010_v31  ;;  %v351_v40 = vrot.slane %v672_v36, %v1013_v32  ;;  %v684_v60 = vld [vmem:[%s1016_s9 + $0xa] sm:$0x3]  ;;  %v687_v3 = vld [vmem:[%s1016_s9 + $0xc] sm:$0x3]  ;;  %v690_v8 = vld [vmem:[%s1016_s9 + $0xe] sm:$0x3] }
  0x3e   : > { %v367_v44 = vrot.slane %v675_v43, %v1010_v31  ;;  %v371_v45 = vrot.slane %v675_v43, %v1013_v32  ;;  %v387_v56 = vrot.slane %v678_v46, %v1010_v31  ;;  %v391_v57 = vrot.slane %v678_v46, %v1013_v32  ;;  %v686_v14 = vld [vmem:[%s1005_s7 + $0x68] sm:$0xff]  ;;  %v693_v19 = vld [vmem:[%s1016_s9 + $0x10] sm:$0x3]  ;;  %v689_v27 = vld [vmem:[%s1005_s7 + $0x78] sm:$0xff] }
  0x3f   : > { %v336_v47 = vmul.f32 %v329_v37, %v322_v29  ;;  %v337_v48 = vmul.f32 %v333_v38, %v323_v30  ;;  %v354_v49 = vmul.f32 %v670_v33, %v347_v39  ;;  %v355_v50 = vmul.f32 %v671_v35, %v351_v40  ;;  %v688_v26 = vld [vmem:[%s1005_s7 + $0x70] sm:$0xff]  ;;  %v691_v35 = vld [vmem:[%s1005_s7 + $0x80] sm:$0xff]  ;;  %v692_v36 = vld [vmem:[%s1005_s7 + $0x88] sm:$0xff] }
  0x40   : > { %v374_v54 = vmul.f32 %v673_v41, %v367_v44  ;;  %v375_v55 = vmul.f32 %v674_v42, %v371_v45  ;;  %v407_v63 = vrot.slane %v681_v53, %v1010_v31  ;;  %v411_v0 = vrot.slane %v681_v53, %v1013_v32 }
  0x41   : > { %v356_v61 = vadd.f32 %v354_v49, %v336_v47  ;;  %v357_v62 = vadd.f32 %v355_v50, %v337_v48  ;;  %v394_v4 = vmul.f32 %v676_v51, %v387_v56  ;;  %v395_v5 = vmul.f32 %v677_v52, %v391_v57 }
  0x42   : > { %v427_v6 = vrot.slane %v684_v60, %v1010_v31  ;;  %v431_v7 = vrot.slane %v684_v60, %v1013_v32  ;;  %v414_v11 = vmul.f32 %v679_v58, %v407_v63  ;;  %v415_v12 = vmul.f32 %v680_v59, %v411_v0 }
  0x43   : > { %v376_v9 = vadd.f32 %v374_v54, %v356_v61  ;;  %v377_v10 = vadd.f32 %v375_v55, %v357_v62  ;;  %v447_v17 = vrot.slane %v687_v3, %v1010_v31  ;;  %v451_v18 = vrot.slane %v687_v3, %v1013_v32 }
  0x44   : > { %v434_v15 = vmul.f32 %v682_v1, %v427_v6  ;;  %v435_v16 = vmul.f32 %v683_v2, %v431_v7  ;;  %v467_v22 = vrot.slane %v690_v8, %v1010_v31  ;;  %v471_v23 = vrot.slane %v690_v8, %v1013_v32 }
  0x45   : > { %v396_v20 = vadd.f32 %v394_v4, %v376_v9  ;;  %v397_v21 = vadd.f32 %v395_v5, %v377_v10  ;;  %v454_v24 = vmul.f32 %v685_v13, %v447_v17  ;;  %v455_v25 = vmul.f32 %v686_v14, %v451_v18 }
  0x46   : > { %v487_v33 = vrot.slane %v693_v19, %v1010_v31  ;;  %v491_v34 = vrot.slane %v693_v19, %v1013_v32  ;;  %v474_v39 = vmul.f32 %v688_v26, %v467_v22  ;;  %v475_v40 = vmul.f32 %v689_v27, %v471_v23 }
  0x47   : > { %v416_v29 = vadd.f32 %v414_v11, %v396_v20  ;;  %v417_v30 = vadd.f32 %v415_v12, %v397_v21  ;;  %v850_v47 = vmov 0.0  }
  0x48   : > { %v494_v43 = vmul.f32 %v691_v35, %v487_v33  ;;  %v495_v44 = vmul.f32 %v692_v36, %v491_v34  ;;  %v694_v48 = vsel %vm500_vm0, 1.0, %v850_v47 }
  0x49   : > { %v436_v37 = vadd.f32 %v434_v15, %v416_v29  ;;  %v437_v38 = vadd.f32 %v435_v16, %v417_v30 }
  0x4b   : > { %v456_v41 = vadd.f32 %v454_v24, %v436_v37  ;;  %v457_v42 = vadd.f32 %v455_v25, %v437_v38 }
  0x4d   : > { %v476_v45 = vadd.f32 %v474_v39, %v456_v41  ;;  %v477_v46 = vadd.f32 %v475_v40, %v457_v42 }
  0x4f   : > { %v496_v49 = vadd.f32 %v494_v43, %v476_v45  ;;  %v497_v31 = vadd.f32 %v495_v44, %v477_v46 }
  0x51   : > { %v503_v50 = vmul.f32 %v694_v48, %v496_v49  ;;  %v504_v32 = vmul.f32 %v694_v48, %v497_v31 }
  0x53   : > { %v505_v51 = vrot.slane %v503_v50, 4  ;;  %v511_v52 = vrot.slane %v504_v32, 4 }
  0x55   : > { %v506_v53 = vadd.f32 %v505_v51, %v503_v50  ;;  %v512_v54 = vadd.f32 %v511_v52, %v504_v32 }
  0x57   : > { %v507_v55 = vrot.slane %v506_v53, 2  ;;  %v513_v56 = vrot.slane %v512_v54, 2 }
  0x59   : > { %v508_v57 = vadd.f32 %v507_v55, %v506_v53  ;;  %v514_v28 = vadd.f32 %v513_v56, %v512_v54 }
  0x5b   : > { %v509_v58 = vrot.slane %v508_v57, 1  ;;  %v515_v59 = vrot.slane %v514_v28, 1 }
  0x5d   : > { %v510_v60 = vadd.f32 %v509_v58, %v508_v57  ;;  %v516_v61 = vadd.f32 %v515_v59, %v514_v28 }
  0x5f   : > { %v517_v62 = vsub.f32 %v496_v49, %v510_v60  ;;  %v518_v63 = vsub.f32 %v497_v31, %v516_v61 }
  0x61   : > { %v519_v0 = vmul.f32 %v694_v48, %v517_v62  ;;  %v520_v1 = vmul.f32 %v694_v48, %v518_v63 }
  0x63   : > { %v521_v2 = vmul.f32 %v519_v0, %v519_v0  ;;  %v522_v3 = vmul.f32 %v520_v1, %v520_v1 }
  0x65   : > { %v523_v4 = vrot.slane %v521_v2, 4  ;;  %v529_v5 = vrot.slane %v522_v3, 4 }
  0x67   : > { %v524_v6 = vadd.f32 %v523_v4, %v521_v2  ;;  %v530_v7 = vadd.f32 %v529_v5, %v522_v3 }
  0x69   : > { %v525_v8 = vrot.slane %v524_v6, 2  ;;  %v531_v9 = vrot.slane %v530_v7, 2 }
  0x6b   : > { %v526_v10 = vadd.f32 %v525_v8, %v524_v6  ;;  %v532_v11 = vadd.f32 %v531_v9, %v530_v7 }
  0x6d   : > { %v527_v12 = vrot.slane %v526_v10, 1  ;;  %v533_v13 = vrot.slane %v532_v11, 1 }
  0x6f   : > { %v528_v14 = vadd.f32 %v527_v12, %v526_v10  ;;  %v534_v15 = vadd.f32 %v533_v13, %v532_v11 }
  0x71   : > { %v535_v16 = vadd.f32 1e-05, %v528_v14  ;;  %v536_v17 = vadd.f32 1e-05, %v534_v15 }
  0x73   : > { %774 = vrsqrt.f32 %v535_v16 }
  0x74   : > { %776 = vrsqrt.f32 %v536_v17 }
  0x80   : > { %v775_v18 = vpop.eup %774 }
  0x81   : > { %v777_v19 = vpop.eup %776  ;;  %v539_v20 = vmul.f32 %v775_v18, %v517_v62 }
  0x82   : > { %v540_v21 = vmul.f32 %v777_v19, %v518_v63 }
  0x83   : > { %v541_v22 = vmax.f32 %v539_v20, 0.0 }
  0x84   : > { %v542_v23 = vmax.f32 %v540_v21, 0.0 }
  0x85   : > { %v543_v24 = vmin.f32 %v541_v22, 6.0 }
  0x86   : > { %v544_v25 = vmin.f32 %v542_v23, 6.0 }
  0x87   : > { %545 = vst [vmem:[%s320_s26] sm:$0xff] %v543_v24 }
  0x88   : > { %546 = vst [vmem:[%s320_s26 + $0x8] sm:$0xff] %v544_v25 }
  0x89 PF: > { %s12_s17 = sadd.s32 1, %s848_s17   ;;  %s1099_s9 = smov %s820_s10 }
  0x8a   : > { %p9_p1 = scmp.ge.s32.totalorder %s12_s17, 10   ;;  %s1100_s10 = smov %s931_s23 }
  0x8b   : > { %s1101_s11 = smov %s828_s12  ;;  %s1102_s12 = smov %s941_s28 }
  0x8c   : > { %s1103_s13 = smov %s840_s15  ;;  %s1104_s14 = smov %s844_s16 }
  0x8d   : > { %s1105_s15 = smov %s1108_s18  ;;  %s1106_s16 = smov %s1112_s19 }
  0x8e   :  { %11 = sbr.rel (!%p9_p1) target bundleno = 5 (0x5), region = 151 }

// kernel: generator_forward.33
= control target key start
LH: loop header
LB: loop body
LE: loop exit
PB: predicated region body
PF: predicated region fallthrough
CT: control target
= control target key end

     0   :  { %s1390_s0 = inlined_call_operand.vmem [shape: f32[2,8,1024], index: 0, kind: input, shape index: {}]   ;;  %s1391_s1 = inlined_call_operand.vmem [shape: bf16[1024,512], index: 1, kind: input, shape index: {}]   ;;  %s1392_s2 = inlined_call_operand.vmem [shape: f32[2,8,512], index: 2, kind: input, shape index: {}]   ;;  %s1393_s3 = inlined_call_operand.vmem [shape: f32[2,8,512], index: 3, kind: output, shape index: {}]  }
   0x1   :  { %1394 = sst [smem:[#allocation5_spill]] %s1391_s1 }
   0x2   :  { %s1157_s12 = smov 0   ;;  %s1159_s13 = smov 0  }
   0x3   :  { %s1161_s14 = smov 0   ;;  %s1163_s15 = smov 0  }
   0x4   :  { %s1165_s16 = smov 0   ;;  %s1167_s17 = smov 0  }
   0x5   :  { %s1169_s18 = smov 0   ;;  %s1171_s19 = smov 0  }
   0x6   :  { %s1173_s20 = smov 0  }
   0x7 LB: > { %s25_s21 = sadd.s32 1, %s1121_s17  ;;  %s28_s22 = sadd.s32 1, %s1125_s18  ;;  %s1133_s20 = sphi %s1173_s20, %s13_s20   ;;  %s1129_s19 = sphi %s1171_s19, %s1405_s19   ;;  %s1125_s18 = sphi %s1169_s18, %s1404_s18   ;;  %s1121_s17 = sphi %s1167_s17, %s1403_s17   ;;  %s1117_s16 = sphi %s1165_s16, %s1402_s16   ;;  %s1113_s15 = sphi %s1163_s15, %s1401_s15   ;;  %s1109_s14 = sphi %s1161_s14, %s1400_s14   ;;  %s1105_s13 = sphi %s1159_s13, %s1399_s13   ;;  %s1101_s12 = sphi %s1157_s12, %s1398_s12  }
   0x8   : > { %p26_p0 = scmp.ge.s32.totalorder %s25_s21, 4  ;;  %p76_p1 = scmp.ne.s32.totalorder %s1105_s13, %s1101_s12 }
   0x9   : > { %p77_p2 = scmp.eq.s32.totalorder %s1133_s20, 0  ;;  %s32_s23 = sadd.s32 1, %s1129_s19 }
   0xa   : > { %s1407_s21 = smov (%p26_p0, %s25_s21), 0  ;;  %s1409_s22 = smov (!%p26_p0, %s28_s22), %s1125_s18 }
   0xb   : > { %p30_p3 = scmp.ge.s32.totalorder %s1409_s22, 2  ;;  %s64_s24 = ssub.s32 %s1121_s17, %s1407_s21 }
   0xc   : > { %p78_p4 = por %p77_p2, %p76_p1  ;;  %s69_s26 = sadd.s32 1, %s1105_s13 }
   0xd   : > { %s1411_s22 = smov (%p30_p3, %s1409_s22), 0  ;;  %s1413_s23 = smov (!%p30_p3, %s32_s23), %s1129_s19 }
   0xe   : > { %s65_s25 = ssub.s32 %s1125_s18, %s1411_s22  ;;  %p34_p5 = scmp.ge.s32.totalorder %s1413_s23, 2 }
   0xf   : > { %s66_s27 = sor.u32 %s65_s25, %s64_s24  ;;  %p882_p7 = scmp.ge.s32.totalorder %s1133_s20, 16 }
  0x10   : > { %p67_p6 = scmp.eq.s32.totalorder %s66_s27, 0  ;;  %s1415_s23 = smov (%p34_p5, %s1413_s23), 0 }
  0x11   : > { %1395 = sst [smem:[#allocation4_spill]] %s1415_s23  ;;  %158 = sbr.rel (%p882_p7) target bundleno = 48 (0x30), region = 16 }
  0x12   : > { %s1222_s28 = scalar_select %p67_p6, %s1105_s13, %s69_s26  }
  0x16   : > { %174 = sbr.rel (!%p78_p4) target bundleno = 48 (0x30), region = 24  ;;  %s176_s29 = sand.u32 (%p78_p4), 1, %s1105_s13  }
  0x17   : > { %s885_s30 = sshll.u32 (%p78_p4), %s1125_s18, 1  ;;  %s883_s4 = sshll.u32 (%p78_p4), %s176_s29, 8 }
  0x18   : > { %s936_s5 = sshll.u32 (%p78_p4), %s1121_s17, 7  ;;  %s1396_s1 = sld [smem:[#allocation5_spill]] (%p78_p4) }
  0x19   : > { %s182_s6 = sadd.s32 (%p78_p4), %s936_s5, %s885_s30  ;;  %s1236_s11 = scalar_lea.vmem (%p78_p4), [#allocation3], %s883_s4 }
  0x1a   : > { %s887_s7 = sshll.u32 (%p78_p4), %s182_s6, 2 }
  0x1e   : > { %s1231_s10 = scalar_lea.vmem %s1396_s1, %s887_s7 }
  0x1f   : > { %v275_v0 = vld [vmem:[%s1231_s10] sm:$0xff]  ;;  %v277_v1 = vld [vmem:[%s1231_s10 + $0x10] sm:$0xff] }
  0x20   : > { %v279_v2 = vld [vmem:[%s1231_s10 + $0x20] sm:$0xff]  ;;  %276 = vst [vmem:[%s1236_s11] sm:$0xff] %v275_v0  ;;  %278 = vst [vmem:[%s1236_s11 + $0x8] sm:$0xff] %v277_v1  ;;  %v281_v3 = vld [vmem:[%s1231_s10 + $0x30] sm:$0xff] }
  0x21   : > { %280 = vst [vmem:[%s1236_s11 + $0x10] sm:$0xff] %v279_v2  ;;  %v283_v4 = vld [vmem:[%s1231_s10 + $0x40] sm:$0xff]  ;;  %v285_v5 = vld [vmem:[%s1231_s10 + $0x50] sm:$0xff]  ;;  %282 = vst [vmem:[%s1236_s11 + $0x18] sm:$0xff] %v281_v3 }
  0x22   : > { %284 = vst [vmem:[%s1236_s11 + $0x20] sm:$0xff] %v283_v4  ;;  %286 = vst [vmem:[%s1236_s11 + $0x28] sm:$0xff] %v285_v5  ;;  %v287_v6 = vld [vmem:[%s1231_s10 + $0x60] sm:$0xff]  ;;  %v289_v7 = vld [vmem:[%s1231_s10 + $0x70] sm:$0xff] }
  0x23   : > { %v291_v8 = vld [vmem:[%s1231_s10 + $0x80] sm:$0xff]  ;;  %288 = vst [vmem:[%s1236_s11 + $0x30] sm:$0xff] %v287_v6  ;;  %290 = vst [vmem:[%s1236_s11 + $0x38] sm:$0xff] %v289_v7  ;;  %v293_v9 = vld [vmem:[%s1231_s10 + $0x90] sm:$0xff] }
  0x24   : > { %292 = vst [vmem:[%s1236_s11 + $0x40] sm:$0xff] %v291_v8  ;;  %v295_v10 = vld [vmem:[%s1231_s10 + $0xa0] sm:$0xff]  ;;  %v297_v11 = vld [vmem:[%s1231_s10 + $0xb0] sm:$0xff]  ;;  %294 = vst [vmem:[%s1236_s11 + $0x48] sm:$0xff] %v293_v9 }
  0x25   : > { %296 = vst [vmem:[%s1236_s11 + $0x50] sm:$0xff] %v295_v10  ;;  %298 = vst [vmem:[%s1236_s11 + $0x58] sm:$0xff] %v297_v11  ;;  %v299_v12 = vld [vmem:[%s1231_s10 + $0xc0] sm:$0xff]  ;;  %v301_v13 = vld [vmem:[%s1231_s10 + $0xd0] sm:$0xff] }
  0x26   : > { %v303_v14 = vld [vmem:[%s1231_s10 + $0xe0] sm:$0xff]  ;;  %300 = vst [vmem:[%s1236_s11 + $0x60] sm:$0xff] %v299_v12  ;;  %302 = vst [vmem:[%s1236_s11 + $0x68] sm:$0xff] %v301_v13  ;;  %v305_v15 = vld [vmem:[%s1231_s10 + $0xf0] sm:$0xff] }
  0x27   : > { %304 = vst [vmem:[%s1236_s11 + $0x70] sm:$0xff] %v303_v14  ;;  %v307_v16 = vld [vmem:[%s1231_s10 + $0x100] sm:$0xff]  ;;  %v309_v17 = vld [vmem:[%s1231_s10 + $0x110] sm:$0xff]  ;;  %306 = vst [vmem:[%s1236_s11 + $0x78] sm:$0xff] %v305_v15 }
  0x28   : > { %308 = vst [vmem:[%s1236_s11 + $0x80] sm:$0xff] %v307_v16  ;;  %310 = vst [vmem:[%s1236_s11 + $0x88] sm:$0xff] %v309_v17  ;;  %v311_v18 = vld [vmem:[%s1231_s10 + $0x120] sm:$0xff]  ;;  %v313_v19 = vld [vmem:[%s1231_s10 + $0x130] sm:$0xff] }
  0x29   : > { %v315_v20 = vld [vmem:[%s1231_s10 + $0x140] sm:$0xff]  ;;  %312 = vst [vmem:[%s1236_s11 + $0x90] sm:$0xff] %v311_v18  ;;  %314 = vst [vmem:[%s1236_s11 + $0x98] sm:$0xff] %v313_v19  ;;  %v317_v21 = vld [vmem:[%s1231_s10 + $0x150] sm:$0xff] }
  0x2a   : > { %316 = vst [vmem:[%s1236_s11 + $0xa0] sm:$0xff] %v315_v20  ;;  %v319_v22 = vld [vmem:[%s1231_s10 + $0x160] sm:$0xff]  ;;  %v321_v23 = vld [vmem:[%s1231_s10 + $0x170] sm:$0xff]  ;;  %318 = vst [vmem:[%s1236_s11 + $0xa8] sm:$0xff] %v317_v21 }
  0x2b   : > { %320 = vst [vmem:[%s1236_s11 + $0xb0] sm:$0xff] %v319_v22  ;;  %322 = vst [vmem:[%s1236_s11 + $0xb8] sm:$0xff] %v321_v23  ;;  %v323_v24 = vld [vmem:[%s1231_s10 + $0x180] sm:$0xff]  ;;  %v325_v25 = vld [vmem:[%s1231_s10 + $0x190] sm:$0xff] }
  0x2c   : > { %v327_v26 = vld [vmem:[%s1231_s10 + $0x1a0] sm:$0xff]  ;;  %324 = vst [vmem:[%s1236_s11 + $0xc0] sm:$0xff] %v323_v24  ;;  %326 = vst [vmem:[%s1236_s11 + $0xc8] sm:$0xff] %v325_v25  ;;  %v329_v27 = vld [vmem:[%s1231_s10 + $0x1b0] sm:$0xff] }
  0x2d   : > { %328 = vst [vmem:[%s1236_s11 + $0xd0] sm:$0xff] %v327_v26  ;;  %v331_v28 = vld [vmem:[%s1231_s10 + $0x1c0] sm:$0xff]  ;;  %v333_v29 = vld [vmem:[%s1231_s10 + $0x1d0] sm:$0xff]  ;;  %330 = vst [vmem:[%s1236_s11 + $0xd8] sm:$0xff] %v329_v27 }
  0x2e   : > { %332 = vst [vmem:[%s1236_s11 + $0xe0] sm:$0xff] %v331_v28  ;;  %334 = vst [vmem:[%s1236_s11 + $0xe8] sm:$0xff] %v333_v29  ;;  %v335_v30 = vld [vmem:[%s1231_s10 + $0x1e0] sm:$0xff]  ;;  %v337_v31 = vld [vmem:[%s1231_s10 + $0x1f0] sm:$0xff] }
  0x2f   : > { %336 = vst [vmem:[%s1236_s11 + $0xf0] sm:$0xff] %v335_v30  ;;  %338 = vst [vmem:[%s1236_s11 + $0xf8] sm:$0xff] %v337_v31 }
  0x30 PF: > { %p888_p8 = scmp.ge.s32.totalorder %s1133_s20, 1  ;;  %p356_p9 = scmp.lt.s32.totalorder %s1133_s20, 17 }
  0x32   : > { %p357_p10 = pnand %p888_p8, %p356_p9 }
  0x33   : > { %s363_s24 = sand.u32 (!%p357_p10), 1, %s1101_s12   ;;  %s890_s25 = sshll.u32 (!%p357_p10), %s1109_s14, 1 }
  0x34   : > { %360 = sbr.rel (%p357_p10) target bundleno = 394 (0x18a), region = 66  ;;  %s889_s26 = sshll.u32 (!%p357_p10), %s363_s24, 8 }
  0x35   : > { %p409_p11 = scmp.lt.s32.totalorder (!%p357_p10), %s1117_s16, 1  ;;  %p411_p12 = scmp.lt.s32.totalorder (!%p357_p10), %s890_s25, 7 }
  0x36   : > { %s893_s29 = sshll.u32 (!%p357_p10), %s1113_s15, 1  ;;  %p899_p0 = scmp.ne.s32.totalorder (!%p357_p10), %s1109_s14, 0 }
  0x37   : > { %p423_p13 = scmp.lt.s32.totalorder (!%p357_p10), %s893_s29, 3 }
  0x39   : > { %s1417_s16 = smov (!%p409_p11, %s1117_s16), 1  ;;  %s1419_s25 = smov (!%p411_p12, %s890_s25), 7 }
  0x3a   : > { %s891_s27 = sshll.u32 %s1417_s16, 3  ;;  %s894_s8 = sshll.u32 %s1417_s16, 2 }
  0x3b   : > { %s414_s30 = sadd.s32 %s891_s27, %s1419_s25  ;;  %s1421_s29 = smov (!%p423_p13, %s893_s29), 3 }
  0x3c   : > { %s892_s4 = sshll.u32 %s414_s30, 3  ;;  %s426_s9 = sadd.s32 %s894_s8, %s1421_s29 }
  0x3d   : > { %s1309_s7 = scalar_lea.vmem %s1390_s0, %s892_s4  ;;  %s895_s12 = sshll.u32 %s426_s9, 3 }
  0x3e   : > { %s1314_s24 = scalar_lea.vmem %s1392_s2, %s895_s12  ;;  %s1319_s15 = scalar_lea.vmem %s1393_s3, %s895_s12 }
  0x3f   : > { %s1321_s25 = scalar_lea.vmem [#allocation3], %s889_s26  ;;  %443 = sbr.rel (%p899_p0) target bundleno = 70 (0x46), region = 74 }
  0x44   : > { %v1135_v32 = vmov 0.0  }
  0x45   : > { %444 = vst [vmem:[#allocation2] sm:$0xff] %v1135_v32  ;;  %445 = vst [vmem:[#allocation2 + $0x8] sm:$0xff] %v1135_v32 }
  0x46 PF: > { %v1011_v33 = vld [vmem:[%s1321_s25 + $0x74] ss:$8 sps:$4 sm:$0xff]   ;;  %v1013_v34 = vld [vmem:[%s1321_s25 + $0x70] ss:$8 sps:$4 sm:$0xff]   ;;  %v1014_v35 = vld [vmem:[%s1321_s25 + $0x64] ss:$8 sps:$4 sm:$0xff]  }
  0x47   : > { %644 = vmatprep.subr.bf16.mxu0 %v1011_v33  ;;  %v1016_v36 = vld [vmem:[%s1321_s25 + $0x60] ss:$8 sps:$4 sm:$0xff]   ;;  %v1017_v37 = vld [vmem:[%s1321_s25 + $0x54] ss:$8 sps:$4 sm:$0xff]   ;;  %v1019_v38 = vld [vmem:[%s1321_s25 + $0x50] ss:$8 sps:$4 sm:$0xff]  }
  0x48   : > { %645 = vmatpush1.bf16.msra.mxu0 %v1013_v34  ;;  %v1020_v39 = vld [vmem:[%s1321_s25 + $0x44] ss:$8 sps:$4 sm:$0xff]   ;;  %v1022_v40 = vld [vmem:[%s1321_s25 + $0x40] ss:$8 sps:$4 sm:$0xff]   ;;  %v1023_v41 = vld [vmem:[%s1321_s25 + $0x34] ss:$8 sps:$4 sm:$0xff]  }
  0x49   : > { %646 = vmatprep.subr.bf16.mxu0 %v1014_v35  ;;  %v1025_v42 = vld [vmem:[%s1321_s25 + $0x30] ss:$8 sps:$4 sm:$0xff]   ;;  %v1026_v43 = vld [vmem:[%s1321_s25 + $0x24] ss:$8 sps:$4 sm:$0xff]   ;;  %v1028_v44 = vld [vmem:[%s1321_s25 + $0x20] ss:$8 sps:$4 sm:$0xff]  }
  0x4a   : > { %v1029_v45 = vld [vmem:[%s1321_s25 + $0x14] ss:$8 sps:$4 sm:$0xff]   ;;  %v1031_v48 = vld [vmem:[%s1321_s25 + $0x10] ss:$8 sps:$4 sm:$0xff]   ;;  %v1032_v49 = vld [vmem:[%s1321_s25 + $0x4] ss:$8 sps:$4 sm:$0xff]  }
  0x4b   : > { %v447_v46 = vld [vmem:[%s1309_s7 + $0x8] sm:$0xff]  ;;  %v1034_v50 = vld [vmem:[%s1321_s25] ss:$8 sps:$4 sm:$0xff]   ;;  %v1038_v53 = vld [vmem:[%s1321_s25 + $0xe4] ss:$8 sps:$4 sm:$0xff]   ;;  %p932_p1 = scmp.ne.s32.totalorder %s1109_s14, 3 }
  0x4c   : > { %647 = vmatpush1.bf16.msra.mxu0 %v1016_v36  ;;  %v449_v47 = vpack.c.bf16 %v447_v46, %v447_v46  ;;  %v1035_v51 = vld [vmem:[%s1321_s25 + $0xf4] ss:$8 sps:$4 sm:$0xff]   ;;  %v1037_v52 = vld [vmem:[%s1321_s25 + $0xf0] ss:$8 sps:$4 sm:$0xff]   ;;  %v1040_v54 = vld [vmem:[%s1321_s25 + $0xe0] ss:$8 sps:$4 sm:$0xff]  }
  0x4d   : > { %648 = vmatprep.subr.bf16.mxu0 %v1017_v37  ;;  %v1041_v55 = vld [vmem:[%s1321_s25 + $0xd4] ss:$8 sps:$4 sm:$0xff]   ;;  %v1043_v56 = vld [vmem:[%s1321_s25 + $0xd0] ss:$8 sps:$4 sm:$0xff]   ;;  %v1044_v57 = vld [vmem:[%s1321_s25 + $0xc4] ss:$8 sps:$4 sm:$0xff]  }
  0x4e   : > { %676 = vmatprep.mubr.bf16.mxu0 %v449_v47  ;;  %v1046_v58 = vld [vmem:[%s1321_s25 + $0xc0] ss:$8 sps:$4 sm:$0xff]   ;;  %v1047_v59 = vld [vmem:[%s1321_s25 + $0xb4] ss:$8 sps:$4 sm:$0xff]   ;;  %v1049_v60 = vld [vmem:[%s1321_s25 + $0xb0] ss:$8 sps:$4 sm:$0xff]  }
  0x4f   : > { %v1050_v61 = vld [vmem:[%s1321_s25 + $0xa4] ss:$8 sps:$4 sm:$0xff]   ;;  %v1052_v62 = vld [vmem:[%s1321_s25 + $0xa0] ss:$8 sps:$4 sm:$0xff]   ;;  %v1053_v63 = vld [vmem:[%s1321_s25 + $0x94] ss:$8 sps:$4 sm:$0xff]  }
  0x50   : > { %649 = vmatpush1.bf16.msra.mxu0 %v1019_v38  ;;  %v1055_v0 = vld [vmem:[%s1321_s25 + $0x90] ss:$8 sps:$4 sm:$0xff]   ;;  %v1056_v1 = vld [vmem:[%s1321_s25 + $0x84] ss:$8 sps:$4 sm:$0xff]   ;;  %v1058_v2 = vld [vmem:[%s1321_s25 + $0x80] ss:$8 sps:$4 sm:$0xff]  }
  0x51   : > { %650 = vmatprep.subr.bf16.mxu0 %v1020_v39  ;;  %v446_v3 = vld [vmem:[%s1309_s7] sm:$0xff]  ;;  %v483_v7 = vld [vmem:[#allocation2 + $0x8] sm:$0xff] }
  0x52   : > { %v448_v4 = vpack.c.bf16 %v446_v3, %v446_v3  ;;  %v482_v5 = vld [vmem:[#allocation2] sm:$0xff] }
  0x54   : > { %651 = vmatpush1.bf16.msra.mxu0 %v1022_v40 }
  0x55   : > { %652 = vmatprep.subr.bf16.mxu0 %v1023_v41 }
  0x58   : > { %653 = vmatpush1.bf16.msra.mxu0 %v1025_v42 }
  0x59   : > { %654 = vmatprep.subr.bf16.mxu0 %v1026_v43 }
  0x5c   : > { %655 = vmatpush1.bf16.msra.mxu0 %v1028_v44 }
  0x5d   : > { %656 = vmatprep.subr.bf16.mxu0 %v1029_v45 }
  0x60   : > { %657 = vmatpush1.bf16.msra.mxu0 %v1031_v48 }
  0x61   : > { %658 = vmatprep.subr.bf16.mxu0 %v1032_v49 }
  0x64   : > { %659 = vmatpush1.bf16.msra.mxu0 %v1034_v50 }
  0x65   : > { %660 = vmatprep.subr.bf16.mxu0 %v1035_v51 }
  0x68   : > { %661 = vmatpush2.bf16.msra.mxu0 %v1037_v52 }
  0x69   : > { %662 = vmatprep.subr.bf16.mxu0 %v1038_v53 }
  0x6c   : > { %663 = vmatpush2.bf16.msra.mxu0 %v1040_v54 }
  0x6d   : > { %664 = vmatprep.subr.bf16.mxu0 %v1041_v55 }
  0x70   : > { %665 = vmatpush2.bf16.msra.mxu0 %v1043_v56 }
  0x71   : > { %666 = vmatprep.subr.bf16.mxu0 %v1044_v57 }
  0x74   : > { %667 = vmatpush2.bf16.msra.mxu0 %v1046_v58 }
  0x75   : > { %668 = vmatprep.subr.bf16.mxu0 %v1047_v59 }
  0x78   : > { %669 = vmatpush2.bf16.msra.mxu0 %v1049_v60 }
  0x79   : > { %670 = vmatprep.subr.bf16.mxu0 %v1050_v61 }
  0x7c   : > { %671 = vmatpush2.bf16.msra.mxu0 %v1052_v62 }
  0x7d   : > { %672 = vmatprep.subr.bf16.mxu0 %v1053_v63 }
  0x80   : > { %673 = vmatpush2.bf16.msra.mxu0 %v1055_v0 }
  0x81   : > { %674 = vmatprep.subr.bf16.mxu0 %v1056_v1 }
  0x84   : > { %675 = vmatpush2.bf16.msra.mxu0 %v1058_v2 }
  0x87   : > { %677 = vmatmul.mubr.bf16.vlgmr.msra.gmra.mxu0 %v448_v4 }
 0x147   : > { %v678_v6 = vpop.f32.mrf.mxu0 }
 0x148   : > { %v685_v8 = vadd.f32 %v678_v6, %v482_v5 }
 0x149   : > { %v680_v9 = vpop.f32.mrf.mxu0  ;;  %692 = sbr.rel (%p932_p1) target bundleno = 394 (0x18a), region = 78 }
 0x14a   : > { %687 = vst [vmem:[#allocation2] sm:$0xff] %v685_v8  ;;  %v686_v10 = vadd.f32 %v680_v9, %v483_v7 }
 0x14b   : > { %v682_v11 = vpop.f32.mrf.mxu0 }
 0x14c   : > { %688 = vst [vmem:[#allocation2 + $0x8] sm:$0xff] %v686_v10 }
 0x14d   : > { %v683_v12 = vpop.f32.mrf.mxu0 }
 0x14e   : > { %v695_v13 = vlaneseq  ;;  %v1136_v17 = vmov 0.0   ;;  %v738_v54 = vld [vmem:[%s1314_s24] sm:$0xff]  ;;  %v739_v57 = vld [vmem:[%s1314_s24 + $0x8] sm:$0xff] }
 0x150   : > { %v696_v14 = vshrl.u32 %v695_v13, 7 }
 0x151   : > { %v693_v15 = vld [vmem:[#allocation2] sm:$0xff] }
 0x152   : > { %vm697_vm0 = vcmp.lt.s32.totalorder %v696_v14, 1 }
 0x153   : > { %v694_v16 = vld [vmem:[#allocation2 + $0x8] sm:$0xff]  ;;  %v933_v18 = vsel %vm697_vm0, 1.0, %v1136_v17 }
 0x154   : > { %v700_v19 = vmul.f32 %v933_v18, %v693_v15  ;;  %v701_v20 = vmul.f32 %v933_v18, %v694_v16 }
 0x156   : > { %v702_v21 = vrot.slane %v700_v19, 4  ;;  %v708_v22 = vrot.slane %v701_v20, 4 }
 0x158   : > { %v703_v23 = vadd.f32 %v702_v21, %v700_v19  ;;  %v709_v24 = vadd.f32 %v708_v22, %v701_v20 }
 0x15a   : > { %v704_v25 = vrot.slane %v703_v23, 2  ;;  %v710_v26 = vrot.slane %v709_v24, 2 }
 0x15c   : > { %v705_v27 = vadd.f32 %v704_v25, %v703_v23  ;;  %v711_v28 = vadd.f32 %v710_v26, %v709_v24 }
 0x15e   : > { %v706_v29 = vrot.slane %v705_v27, 1  ;;  %v712_v30 = vrot.slane %v711_v28, 1 }
 0x160   : > { %v707_v31 = vadd.f32 %v706_v29, %v705_v27  ;;  %v713_v32 = vadd.f32 %v712_v30, %v711_v28 }
 0x162   : > { %v714_v33 = vsub.f32 %v693_v15, %v707_v31  ;;  %v715_v34 = vsub.f32 %v694_v16, %v713_v32 }
 0x164   : > { %v716_v35 = vmul.f32 %v933_v18, %v714_v33  ;;  %v717_v36 = vmul.f32 %v933_v18, %v715_v34 }
 0x166   : > { %v718_v37 = vmul.f32 %v716_v35, %v716_v35  ;;  %v719_v38 = vmul.f32 %v717_v36, %v717_v36 }
 0x168   : > { %v720_v39 = vrot.slane %v718_v37, 4  ;;  %v726_v40 = vrot.slane %v719_v38, 4 }
 0x16a   : > { %v721_v41 = vadd.f32 %v720_v39, %v718_v37  ;;  %v727_v42 = vadd.f32 %v726_v40, %v719_v38 }
 0x16c   : > { %v722_v43 = vrot.slane %v721_v41, 2  ;;  %v728_v44 = vrot.slane %v727_v42, 2 }
 0x16e   : > { %v723_v45 = vadd.f32 %v722_v43, %v721_v41  ;;  %v729_v46 = vadd.f32 %v728_v44, %v727_v42 }
 0x170   : > { %v724_v47 = vrot.slane %v723_v45, 1  ;;  %v730_v48 = vrot.slane %v729_v46, 1 }
 0x172   : > { %v725_v49 = vadd.f32 %v724_v47, %v723_v45  ;;  %v731_v50 = vadd.f32 %v730_v48, %v729_v46 }
 0x174   : > { %v732_v51 = vadd.f32 1e-05, %v725_v49  ;;  %v733_v52 = vadd.f32 1e-05, %v731_v50 }
 0x176   : > { %1059 = vrsqrt.f32 %v732_v51 }
 0x177   : > { %1061 = vrsqrt.f32 %v733_v52 }
 0x183   : > { %v1060_v53 = vpop.eup %1059 }
 0x184   : > { %v1062_v55 = vpop.eup %1061  ;;  %v736_v56 = vmul.f32 %v1060_v53, %v714_v33 }
 0x185   : > { %v737_v58 = vmul.f32 %v1062_v55, %v715_v34 }
 0x186   : > { %v740_v59 = vadd.f32 %v738_v54, %v736_v56 }
 0x187   : > { %v741_v60 = vadd.f32 %v739_v57, %v737_v58 }
 0x188   : > { %742 = vst [vmem:[%s1319_s15] sm:$0xff] %v740_v59 }
 0x189   : > { %743 = vst [vmem:[%s1319_s15 + $0x8] sm:$0xff] %v741_v60 }
 0x18a PF: > { %s13_s20 = sadd.s32 1, %s1133_s20   ;;  %s1397_s1 = sld [smem:[#allocation4_spill]] }
 0x18b   : > { %p10_p2 = scmp.ge.s32.totalorder %s13_s20, 18   ;;  %s1398_s12 = smov %s1105_s13 }
 0x18c   : > { %s1399_s13 = smov %s1222_s28  ;;  %s1400_s14 = smov %s1121_s17 }
 0x18d   : > { %s1401_s15 = smov %s1125_s18  ;;  %s1402_s16 = smov %s1129_s19 }
 0x18e   : > { %s1403_s17 = smov %s1407_s21  ;;  %s1404_s18 = smov %s1411_s22 }
 0x18f   :  { %12 = sbr.rel (!%p10_p2) target bundleno = 7 (0x7), region = 119 }
 0x190   : > { %s1405_s19 = smov %s1397_s1 }

// kernel: generator_forward.49
= control target key start
LH: loop header
LB: loop body
LE: loop exit
PB: predicated region body
PF: predicated region fallthrough
CT: control target
= control target key end

     0   :  { %s855_s9 = smov 0   ;;  %s857_s10 = smov 0   ;;  %s957_s0 = inlined_call_operand.vmem [shape: f32[2,8,4608], index: 0, kind: input, shape index: {}]   ;;  %s958_s1 = inlined_call_operand.vmem [shape: bf16[4608,256], index: 1, kind: input, shape index: {}]   ;;  %s959_s2 = inlined_call_operand.vmem [shape: f32[2,8,256], index: 2, kind: output, shape index: {}]  }
   0x1   :  { %s859_s11 = smov 0   ;;  %s861_s12 = smov 0  }
   0x2   :  { %s863_s13 = smov 0  }
   0x3 LB: > { %s24_s14 = sadd.s32 1, %s828_s11  ;;  %s31_s15 = sadd.s32 1, %s832_s12  ;;  %s836_s13 = sphi %s863_s13, %s12_s13   ;;  %s832_s12 = sphi %s861_s12, %s963_s12   ;;  %s828_s11 = sphi %s859_s11, %s962_s11   ;;  %s824_s10 = sphi %s857_s10, %s961_s10   ;;  %s820_s9 = sphi %s855_s9, %s960_s9  }
   0x4   : > { %p25_p0 = scmp.ge.s32.totalorder %s24_s14, 18  ;;  %p656_p1 = scmp.ge.s32.totalorder %s836_s13, 1 }
   0x5   : > { %p159_p2 = scmp.lt.s32.totalorder %s836_s13, 37 }
   0x6   : > { %s965_s14 = smov (%p25_p0, %s24_s14), 0  ;;  %s967_s15 = smov (!%p25_p0, %s31_s15), %s832_s12 }
   0x7   : > { %p160_p3 = pnand %p656_p1, %p159_p2  ;;  %p33_p4 = scmp.ge.s32.totalorder %s967_s15, 2 }
   0x8   : > { %s657_s16 = sshll.u32 (!%p160_p3), %s820_s9, 1  ;;  %p200_p5 = scmp.lt.s32.totalorder (!%p160_p3), %s824_s10, 1 }
   0x9   : > { %s969_s15 = smov (%p33_p4, %s967_s15), 0  ;;  %163 = sbr.rel (%p160_p3) target bundleno = 355 (0x163), region = 28 }
   0xa   : > { %p202_p6 = scmp.lt.s32.totalorder (!%p160_p3), %s657_s16, 35  ;;  %s659_s17 = sshll.u32 (!%p160_p3), %s820_s9, 5 }
   0xb   : > { %p211_p7 = scmp.lt.s32.totalorder (!%p160_p3), %s659_s17, 575  ;;  %p664_p8 = scmp.ne.s32.totalorder (!%p160_p3), %s820_s9, 0 }
   0xe   : > { %s971_s10 = smov (!%p200_p5, %s824_s10), 1  ;;  %s973_s16 = smov (!%p202_p6, %s657_s16), 35 }
   0xf   : > { %s703_s18 = smul.u32 36, %s971_s10  ;;  %s702_s19 = sshll.u32 %s971_s10, 4 }
  0x10   : > { %s892_s23 = scalar_lea.vmem %s959_s2, %s702_s19  ;;  %s975_s17 = smov (!%p211_p7, %s659_s17), 575 }
  0x11   : > { %s205_s20 = sadd.s32 %s703_s18, %s973_s16  ;;  %s701_s28 = sshll.u32 %s975_s17, 3 }
  0x12   : > { %s658_s24 = sshll.u32 %s205_s20, 3  ;;  %s902_s3 = scalar_lea.vmem %s958_s1, %s701_s28 }
  0x13   : > { %s897_s27 = scalar_lea.vmem %s957_s0, %s658_s24  ;;  %234 = sbr.rel (%p664_p8) target bundleno = 26 (0x1a), region = 32 }
  0x18   : > { %v838_v0 = vmov 0.0  }
  0x19   : > { %235 = vst [vmem:[#allocation2] sm:$0xff] %v838_v0  ;;  %236 = vst [vmem:[#allocation2 + $0x8] sm:$0xff] %v838_v0 }
  0x1a PF: > { %v746_v1 = vld [vmem:[%s902_s3 + $0x74] ss:$8 sps:$4 sm:$0xff]   ;;  %v748_v2 = vld [vmem:[%s902_s3 + $0x70] ss:$8 sps:$4 sm:$0xff]   ;;  %v749_v3 = vld [vmem:[%s902_s3 + $0x64] ss:$8 sps:$4 sm:$0xff]  }
  0x1b   : > { %435 = vmatprep.subr.bf16.mxu0 %v746_v1  ;;  %v751_v4 = vld [vmem:[%s902_s3 + $0x60] ss:$8 sps:$4 sm:$0xff]   ;;  %v752_v5 = vld [vmem:[%s902_s3 + $0x54] ss:$8 sps:$4 sm:$0xff]   ;;  %v754_v6 = vld [vmem:[%s902_s3 + $0x50] ss:$8 sps:$4 sm:$0xff]  }
  0x1c   : > { %436 = vmatpush1.bf16.msra.mxu0 %v748_v2  ;;  %v755_v7 = vld [vmem:[%s902_s3 + $0x44] ss:$8 sps:$4 sm:$0xff]   ;;  %v757_v8 = vld [vmem:[%s902_s3 + $0x40] ss:$8 sps:$4 sm:$0xff]   ;;  %v758_v9 = vld [vmem:[%s902_s3 + $0x34] ss:$8 sps:$4 sm:$0xff]  }
  0x1d   : > { %437 = vmatprep.subr.bf16.mxu0 %v749_v3  ;;  %v760_v10 = vld [vmem:[%s902_s3 + $0x30] ss:$8 sps:$4 sm:$0xff]   ;;  %v761_v11 = vld [vmem:[%s902_s3 + $0x24] ss:$8 sps:$4 sm:$0xff]   ;;  %v763_v12 = vld [vmem:[%s902_s3 + $0x20] ss:$8 sps:$4 sm:$0xff]  }
  0x1e   : > { %v764_v13 = vld [vmem:[%s902_s3 + $0x14] ss:$8 sps:$4 sm:$0xff]   ;;  %v238_v14 = vld [vmem:[%s897_s27 + $0x8] sm:$0xff]  ;;  %v766_v16 = vld [vmem:[%s902_s3 + $0x10] ss:$8 sps:$4 sm:$0xff]   ;;  %p697_p9 = scmp.ne.s32.totalorder %s820_s9, 17 }
  0x1f   : > { %v240_v15 = vpack.c.bf16 %v238_v14, %v238_v14  ;;  %v767_v17 = vld [vmem:[%s902_s3 + $0x4] ss:$8 sps:$4 sm:$0xff]   ;;  %v769_v18 = vld [vmem:[%s902_s3] ss:$8 sps:$4 sm:$0xff]   ;;  %v770_v19 = vld [vmem:[%s902_s3 + $0xf4] ss:$8 sps:$4 sm:$0xff]  }
  0x20   : > { %438 = vmatpush1.bf16.msra.mxu0 %v751_v4  ;;  %v772_v20 = vld [vmem:[%s902_s3 + $0xf0] ss:$8 sps:$4 sm:$0xff]   ;;  %v773_v21 = vld [vmem:[%s902_s3 + $0xe4] ss:$8 sps:$4 sm:$0xff]   ;;  %v775_v22 = vld [vmem:[%s902_s3 + $0xe0] ss:$8 sps:$4 sm:$0xff]  }
  0x21   : > { %439 = vmatprep.subr.bf16.mxu0 %v752_v5  ;;  %467 = vmatprep.mubr.bf16.mxu0 %v240_v15  ;;  %v776_v23 = vld [vmem:[%s902_s3 + $0xd4] ss:$8 sps:$4 sm:$0xff]   ;;  %v778_v24 = vld [vmem:[%s902_s3 + $0xd0] ss:$8 sps:$4 sm:$0xff]   ;;  %v779_v25 = vld [vmem:[%s902_s3 + $0xc4] ss:$8 sps:$4 sm:$0xff]  }
  0x22   : > { %v781_v26 = vld [vmem:[%s902_s3 + $0xc0] ss:$8 sps:$4 sm:$0xff]   ;;  %v782_v27 = vld [vmem:[%s902_s3 + $0xb4] ss:$8 sps:$4 sm:$0xff]   ;;  %v784_v28 = vld [vmem:[%s902_s3 + $0xb0] ss:$8 sps:$4 sm:$0xff]  }
  0x23   : > { %v785_v29 = vld [vmem:[%s902_s3 + $0xa4] ss:$8 sps:$4 sm:$0xff]   ;;  %v787_v30 = vld [vmem:[%s902_s3 + $0xa0] ss:$8 sps:$4 sm:$0xff]   ;;  %v788_v31 = vld [vmem:[%s902_s3 + $0x94] ss:$8 sps:$4 sm:$0xff]  }
  0x24   : > { %440 = vmatpush1.bf16.msra.mxu0 %v754_v6  ;;  %v790_v32 = vld [vmem:[%s902_s3 + $0x90] ss:$8 sps:$4 sm:$0xff]   ;;  %v791_v33 = vld [vmem:[%s902_s3 + $0x84] ss:$8 sps:$4 sm:$0xff]   ;;  %v793_v34 = vld [vmem:[%s902_s3 + $0x80] ss:$8 sps:$4 sm:$0xff]  }
  0x25   : > { %441 = vmatprep.subr.bf16.mxu0 %v755_v7  ;;  %v237_v35 = vld [vmem:[%s897_s27] sm:$0xff]  ;;  %v274_v39 = vld [vmem:[#allocation2 + $0x8] sm:$0xff] }
  0x26   : > { %v239_v36 = vpack.c.bf16 %v237_v35, %v237_v35  ;;  %v273_v37 = vld [vmem:[#allocation2] sm:$0xff] }
  0x28   : > { %442 = vmatpush1.bf16.msra.mxu0 %v757_v8 }
  0x29   : > { %443 = vmatprep.subr.bf16.mxu0 %v758_v9 }
  0x2c   : > { %444 = vmatpush1.bf16.msra.mxu0 %v760_v10 }
  0x2d   : > { %445 = vmatprep.subr.bf16.mxu0 %v761_v11 }
  0x30   : > { %446 = vmatpush1.bf16.msra.mxu0 %v763_v12 }
  0x31   : > { %447 = vmatprep.subr.bf16.mxu0 %v764_v13 }
  0x34   : > { %448 = vmatpush1.bf16.msra.mxu0 %v766_v16 }
  0x35   : > { %449 = vmatprep.subr.bf16.mxu0 %v767_v17 }
  0x38   : > { %450 = vmatpush1.bf16.msra.mxu0 %v769_v18 }
  0x39   : > { %451 = vmatprep.subr.bf16.mxu0 %v770_v19 }
  0x3c   : > { %452 = vmatpush2.bf16.msra.mxu0 %v772_v20 }
  0x3d   : > { %453 = vmatprep.subr.bf16.mxu0 %v773_v21 }
  0x40   : > { %454 = vmatpush2.bf16.msra.mxu0 %v775_v22 }
  0x41   : > { %455 = vmatprep.subr.bf16.mxu0 %v776_v23 }
  0x44   : > { %456 = vmatpush2.bf16.msra.mxu0 %v778_v24 }
  0x45   : > { %457 = vmatprep.subr.bf16.mxu0 %v779_v25 }
  0x48   : > { %458 = vmatpush2.bf16.msra.mxu0 %v781_v26 }
  0x49   : > { %459 = vmatprep.subr.bf16.mxu0 %v782_v27 }
  0x4c   : > { %460 = vmatpush2.bf16.msra.mxu0 %v784_v28 }
  0x4d   : > { %461 = vmatprep.subr.bf16.mxu0 %v785_v29 }
  0x50   : > { %462 = vmatpush2.bf16.msra.mxu0 %v787_v30 }
  0x51   : > { %463 = vmatprep.subr.bf16.mxu0 %v788_v31 }
  0x54   : > { %464 = vmatpush2.bf16.msra.mxu0 %v790_v32 }
  0x55   : > { %465 = vmatprep.subr.bf16.mxu0 %v791_v33 }
  0x58   : > { %466 = vmatpush2.bf16.msra.mxu0 %v793_v34 }
  0x5b   : > { %468 = vmatmul.mubr.bf16.vlgmr.msra.gmra.mxu0 %v239_v36 }
 0x11b   : > { %v469_v38 = vpop.f32.mrf.mxu0 }
 0x11c   : > { %v476_v40 = vadd.f32 %v469_v38, %v273_v37 }
 0x11d   : > { %v471_v41 = vpop.f32.mrf.mxu0  ;;  %483 = sbr.rel (%p697_p9) target bundleno = 355 (0x163), region = 36 }
 0x11e   : > { %478 = vst [vmem:[#allocation2] sm:$0xff] %v476_v40  ;;  %v477_v42 = vadd.f32 %v471_v41, %v274_v39 }
 0x11f   : > { %v473_v43 = vpop.f32.mrf.mxu0 }
 0x120   : > { %479 = vst [vmem:[#allocation2 + $0x8] sm:$0xff] %v477_v42 }
 0x121   : > { %v474_v44 = vpop.f32.mrf.mxu0 }
 0x122   : > { %v486_v45 = vlaneseq  ;;  %v839_v49 = vmov 0.0  }
 0x124   : > { %v487_v46 = vshrl.u32 %v486_v45, 7 }
 0x125   : > { %v484_v47 = vld [vmem:[#allocation2] sm:$0xff] }
 0x126   : > { %vm488_vm0 = vcmp.lt.s32.totalorder %v487_v46, 4 }
 0x127   : > { %v485_v48 = vld [vmem:[#allocation2 + $0x8] sm:$0xff]  ;;  %v698_v50 = vsel %vm488_vm0, 1.0, %v839_v49 }
 0x128   : > { %v491_v51 = vmul.f32 %v698_v50, %v484_v47  ;;  %v492_v52 = vmul.f32 %v698_v50, %v485_v48 }
 0x12a   : > { %v493_v53 = vrot.slane %v491_v51, 4  ;;  %v499_v54 = vrot.slane %v492_v52, 4 }
 0x12c   : > { %v494_v55 = vadd.f32 %v493_v53, %v491_v51  ;;  %v500_v56 = vadd.f32 %v499_v54, %v492_v52 }
 0x12e   : > { %v495_v57 = vrot.slane %v494_v55, 2  ;;  %v501_v58 = vrot.slane %v500_v56, 2 }
 0x130   : > { %v496_v59 = vadd.f32 %v495_v57, %v494_v55  ;;  %v502_v60 = vadd.f32 %v501_v58, %v500_v56 }
 0x132   : > { %v497_v61 = vrot.slane %v496_v59, 1  ;;  %v503_v62 = vrot.slane %v502_v60, 1 }
 0x134   : > { %v498_v63 = vadd.f32 %v497_v61, %v496_v59  ;;  %v504_v0 = vadd.f32 %v503_v62, %v502_v60 }
 0x136   : > { %v505_v1 = vmul.f32 0.25, %v498_v63  ;;  %v506_v2 = vmul.f32 0.25, %v504_v0 }
 0x138   : > { %v507_v3 = vsub.f32 %v484_v47, %v505_v1  ;;  %v508_v4 = vsub.f32 %v485_v48, %v506_v2 }
 0x13a   : > { %v509_v5 = vmul.f32 %v698_v50, %v507_v3  ;;  %v510_v6 = vmul.f32 %v698_v50, %v508_v4 }
 0x13c   : > { %v511_v7 = vmul.f32 %v509_v5, %v509_v5  ;;  %v512_v8 = vmul.f32 %v510_v6, %v510_v6 }
 0x13e   : > { %v513_v9 = vrot.slane %v511_v7, 4  ;;  %v519_v10 = vrot.slane %v512_v8, 4 }
 0x140   : > { %v514_v11 = vadd.f32 %v513_v9, %v511_v7  ;;  %v520_v12 = vadd.f32 %v519_v10, %v512_v8 }
 0x142   : > { %v515_v13 = vrot.slane %v514_v11, 2  ;;  %v521_v14 = vrot.slane %v520_v12, 2 }
 0x144   : > { %v516_v15 = vadd.f32 %v515_v13, %v514_v11  ;;  %v522_v16 = vadd.f32 %v521_v14, %v520_v12 }
 0x146   : > { %v517_v17 = vrot.slane %v516_v15, 1  ;;  %v523_v18 = vrot.slane %v522_v16, 1 }
 0x148   : > { %v518_v19 = vadd.f32 %v517_v17, %v516_v15  ;;  %v524_v20 = vadd.f32 %v523_v18, %v522_v16 }
 0x14a   : > { %v525_v21 = vmul.f32 0.25, %v518_v19  ;;  %v526_v22 = vmul.f32 0.25, %v524_v20 }
 0x14c   : > { %v527_v23 = vadd.f32 1e-05, %v525_v21  ;;  %v528_v24 = vadd.f32 1e-05, %v526_v22 }
 0x14e   : > { %794 = vrsqrt.f32 %v527_v23 }
 0x14f   : > { %796 = vrsqrt.f32 %v528_v24 }
 0x15b   : > { %v795_v25 = vpop.eup %794 }
 0x15c   : > { %v797_v26 = vpop.eup %796  ;;  %v531_v27 = vmul.f32 %v795_v25, %v507_v3 }
 0x15d   : > { %v532_v28 = vmul.f32 %v797_v26, %v508_v4 }
 0x15e   : > { %vm533_vm1 = vcmp.ge.f32.partialorder %v531_v27, 0.0  ;;  %v535_v29 = vmul.f32 0.2, %v531_v27 }
 0x15f   : > { %vm534_vm2 = vcmp.ge.f32.partialorder %v532_v28, 0.0  ;;  %v536_v30 = vmul.f32 0.2, %v532_v28 }
 0x160   : > { %v537_v31 = vsel %vm533_vm1, %v531_v27, %v535_v29 }
 0x161   : > { %539 = vst [vmem:[%s892_s23] sm:$0xff] %v537_v31  ;;  %v538_v32 = vsel %vm534_vm2, %v532_v28, %v536_v30 }
 0x162   : > { %540 = vst [vmem:[%s892_s23 + $0x8] sm:$0xff] %v538_v32 }
 0x163 PF: > { %s12_s13 = sadd.s32 1, %s836_s13   ;;  %s960_s9 = smov %s828_s11 }
 0x164   : > { %p9_p10 = scmp.ge.s32.totalorder %s12_s13, 38   ;;  %s961_s10 = smov %s832_s12 }
 0x165   : > { %s962_s11 = smov %s965_s14  ;;  %s963_s12 = smov %s969_s15 }
 0x166   :  { %11 = sbr.rel (!%p9_p10) target bundleno = 3 (0x3), region = 69 }

// kernel: generator_forward.50
= control target key start
LH: loop header
LB: loop body
LE: loop exit
PB: predicated region body
PF: predicated region fallthrough
CT: control target
= control target key end

     0   :  { %s773_s9 = smov 0   ;;  %s775_s10 = smov 0   ;;  %s896_s0 = inlined_call_operand.vmem [shape: f32[2,16,2304], index: 0, kind: input, shape index: {}]   ;;  %s897_s1 = inlined_call_operand.vmem [shape: bf16[2304,128], index: 1, kind: input, shape index: {}]   ;;  %s898_s2 = inlined_call_operand.vmem [shape: f32[2,16,128], index: 2, kind: output, shape index: {}]  }
   0x1   :  { %s777_s11 = smov 0   ;;  %s779_s12 = smov 0  }
   0x2   :  { %s781_s13 = smov 0   ;;  %s783_s14 = smov 0  }
   0x3   :  { %s785_s15 = smov 0  }
   0x4 LB: > { %s24_s16 = sadd.s32 1, %s747_s13  ;;  %s31_s17 = sadd.s32 1, %s751_s14  ;;  %s755_s15 = sphi %s785_s15, %s12_s15   ;;  %s751_s14 = sphi %s783_s14, %s904_s14   ;;  %s747_s13 = sphi %s781_s13, %s903_s13   ;;  %s743_s12 = sphi %s779_s12, %s902_s12   ;;  %s739_s11 = sphi %s777_s11, %s901_s11   ;;  %s735_s10 = sphi %s775_s10, %s900_s10   ;;  %s731_s9 = sphi %s773_s9, %s899_s9  }
   0x5   : > { %p25_p0 = scmp.ge.s32.totalorder %s24_s16, 9  ;;  %p47_p1 = scmp.ne.s32.totalorder %s735_s10, %s731_s9 }
   0x6   : > { %p48_p2 = scmp.eq.s32.totalorder %s755_s15, 0  ;;  %s40_s21 = sadd.s32 1, %s735_s10 }
   0x7   : > { %s906_s16 = smov (%p25_p0, %s24_s16), 0  ;;  %s908_s17 = smov (!%p25_p0, %s31_s17), %s751_s14 }
   0x8   : > { %p49_p3 = por %p48_p2, %p47_p1  ;;  %p33_p4 = scmp.ge.s32.totalorder %s908_s17, 2 }
   0x9   : > { %s36_s18 = ssub.s32 %s747_s13, %s906_s16  ;;  %p572_p6 = scmp.ge.s32.totalorder %s755_s15, 18 }
   0xa   : > { %s910_s17 = smov (%p33_p4, %s908_s17), 0 }
   0xb   : > { %s35_s19 = ssub.s32 %s751_s14, %s910_s17  ;;  %129 = sbr.rel (%p572_p6) target bundleno = 26 (0x1a), region = 16 }
   0xc   : > { %s37_s20 = sor.u32 %s36_s18, %s35_s19 }
   0xd   : > { %p38_p5 = scmp.eq.s32.totalorder %s37_s20, 0 }
   0xf   : > { %s824_s22 = scalar_select %p38_p5, %s735_s10, %s40_s21  }
  0x10   : > { %132 = sbr.rel (!%p49_p3) target bundleno = 26 (0x1a), region = 20  ;;  %s134_s23 = sand.u32 (%p49_p3), 1, %s735_s10  }
  0x11   : > { %s574_s24 = sshll.u32 (%p49_p3), %s747_s13, 1  ;;  %s573_s25 = sshll.u32 (%p49_p3), %s134_s23, 5 }
  0x12   : > { %s625_s26 = smul.u32 (%p49_p3), 36, %s751_s14  ;;  %s136_s4 = scalar_lea.vmem (%p49_p3), [#allocation3], %s573_s25 }
  0x14   : > { %s139_s27 = sadd.s32 (%p49_p3), %s625_s26, %s574_s24 }
  0x15   : > { %s575_s28 = sshll.u32 %s139_s27, 3 }
  0x16   : > { %s141_s3 = scalar_lea.vmem %s896_s0, %s575_s28 }
  0x17   : > { %v154_v0 = vld [vmem:[%s141_s3] sm:$0xff]  ;;  %v156_v1 = vld [vmem:[%s141_s3 + $0x8] sm:$0xff]  ;;  %v158_v2 = vld [vmem:[%s141_s3 + $0x90] sm:$0xff] }
  0x18   : > { %155 = vst [vmem:[%s136_s4] sm:$0xff] %v154_v0  ;;  %157 = vst [vmem:[%s136_s4 + $0x8] sm:$0xff] %v156_v1  ;;  %v160_v3 = vld [vmem:[%s141_s3 + $0x98] sm:$0xff] }
  0x19   : > { %159 = vst [vmem:[%s136_s4 + $0x10] sm:$0xff] %v158_v2  ;;  %161 = vst [vmem:[%s136_s4 + $0x18] sm:$0xff] %v160_v3 }
  0x1a PF: > { %p576_p7 = scmp.ge.s32.totalorder %s755_s15, 1  ;;  %p178_p8 = scmp.lt.s32.totalorder %s755_s15, 19 }
  0x1c   : > { %p179_p9 = pnand %p576_p7, %p178_p8 }
  0x1d   : > { %s185_s5 = sand.u32 (!%p179_p9), 1, %s731_s9   ;;  %s578_s6 = sshll.u32 (!%p179_p9), %s739_s11, 5 }
  0x1e   : > { %182 = sbr.rel (%p179_p9) target bundleno = 347 (0x15b), region = 47  ;;  %s577_s7 = sshll.u32 (!%p179_p9), %s185_s5, 5 }
  0x1f   : > { %p219_p10 = scmp.lt.s32.totalorder (!%p179_p9), %s578_s6, 287  ;;  %p227_p11 = scmp.lt.s32.totalorder (!%p179_p9), %s743_s12, 1 }
  0x20   : > { %s849_s26 = scalar_lea.vmem (!%p179_p9), [#allocation3], %s577_s7  ;;  %p582_p12 = scmp.ne.s32.totalorder (!%p179_p9), %s739_s11, 0 }
  0x23   : > { %s912_s6 = smov (!%p219_p10, %s578_s6), 287  ;;  %s914_s12 = smov (!%p227_p11, %s743_s12), 1 }
  0x24   : > { %s579_s8 = sshll.u32 %s912_s6, 2  ;;  %s602_s21 = sshll.u32 %s914_s12, 4 }
  0x25   : > { %s842_s20 = scalar_lea.vmem %s897_s1, %s579_s8  ;;  %s847_s25 = scalar_lea.vmem %s898_s2, %s602_s21 }
  0x26   : > { %239 = sbr.rel (%p582_p12) target bundleno = 45 (0x2d), region = 55 }
  0x2b   : > { %v757_v4 = vmov 0.0  }
  0x2c   : > { %240 = vst [vmem:[#allocation2] sm:$0xff] %v757_v4  ;;  %241 = vst [vmem:[#allocation2 + $0x8] sm:$0xff] %v757_v4 }
  0x2d PF: > { %v683_v5 = vld [vmem:[%s842_s20 + $0x78] sm:$0xff]   ;;  %v685_v7 = vld [vmem:[%s842_s20 + $0x70] sm:$0xff]   ;;  %v687_v9 = vld [vmem:[%s842_s20 + $0x68] sm:$0xff]   ;;  %p599_p13 = scmp.ne.s32.totalorder %s739_s11, 8 }
  0x2e   : > { %v684_v6 = vld [vmem:[%s842_s20 + $0x38] sm:$0xff]   ;;  %603 = vmatprep.subr.bf16.mxu0 %v683_v5  ;;  %v686_v8 = vld [vmem:[%s842_s20 + $0x30] sm:$0xff]   ;;  %v688_v10 = vld [vmem:[%s842_s20 + $0x28] sm:$0xff]  }
  0x2f   : > { %604 = vmatpush3.bf16.msra.mxu0 %v684_v6  ;;  %v689_v11 = vld [vmem:[%s842_s20 + $0x60] sm:$0xff]   ;;  %v691_v13 = vld [vmem:[%s842_s20 + $0x58] sm:$0xff]   ;;  %v693_v15 = vld [vmem:[%s842_s20 + $0x50] sm:$0xff]  }
  0x30   : > { %605 = vmatprep.subr.bf16.mxu0 %v685_v7  ;;  %v690_v12 = vld [vmem:[%s842_s20 + $0x20] sm:$0xff]   ;;  %v692_v14 = vld [vmem:[%s842_s20 + $0x18] sm:$0xff]   ;;  %v245_v17 = vld [vmem:[%s849_s26 + $0x18] sm:$0xff] }
  0x31   : > { %v243_v16 = vld [vmem:[%s849_s26 + $0x8] sm:$0xff]  ;;  %v694_v19 = vld [vmem:[%s842_s20 + $0x10] sm:$0xff]   ;;  %v695_v20 = vld [vmem:[%s842_s20 + $0x48] sm:$0xff]  }
  0x32   : > { %v247_v18 = vpack.c.bf16 %v245_v17, %v243_v16  ;;  %v696_v21 = vld [vmem:[%s842_s20 + $0x8] sm:$0xff]   ;;  %v697_v22 = vld [vmem:[%s842_s20 + $0x40] sm:$0xff]   ;;  %v242_v24 = vld [vmem:[%s849_s26] sm:$0xff] }
  0x33   : > { %606 = vmatpush3.bf16.msra.mxu0 %v686_v8  ;;  %v698_v23 = vld [vmem:[%s842_s20] sm:$0xff]   ;;  %v281_v33 = vld [vmem:[#allocation2 + $0x8] sm:$0xff] }
  0x34   : > { %607 = vmatprep.subr.bf16.mxu0 %v687_v9  ;;  %410 = vmatprep.mubr.bf16.mxu0 %v247_v18  ;;  %v244_v25 = vld [vmem:[%s849_s26 + $0x10] sm:$0xff] }
  0x35   : > { %v246_v26 = vpack.c.bf16 %v244_v25, %v242_v24  ;;  %v280_v28 = vld [vmem:[#allocation2] sm:$0xff] }
  0x37   : > { %608 = vmatpush3.bf16.msra.mxu0 %v688_v10 }
  0x38   : > { %609 = vmatprep.subr.bf16.mxu0 %v689_v11 }
  0x3b   : > { %610 = vmatpush3.bf16.msra.mxu0 %v690_v12 }
  0x3c   : > { %611 = vmatprep.subr.bf16.mxu0 %v691_v13 }
  0x3f   : > { %612 = vmatpush3.bf16.msra.mxu0 %v692_v14 }
  0x40   : > { %613 = vmatprep.subr.bf16.mxu0 %v693_v15 }
  0x43   : > { %614 = vmatpush3.bf16.msra.mxu0 %v694_v19 }
  0x44   : > { %615 = vmatprep.subr.bf16.mxu0 %v695_v20 }
  0x47   : > { %616 = vmatpush3.bf16.msra.mxu0 %v696_v21 }
  0x48   : > { %617 = vmatprep.subr.bf16.mxu0 %v697_v22 }
  0x4b   : > { %618 = vmatpush3.bf16.msra.mxu0 %v698_v23 }
  0x4e   : > { %411 = vmatmul.mubr.bf16.vlgmr.msra.gmra.mxu0 %v246_v26 }
 0x10e   : > { %v619_v27 = vpop.f32.mrf.mxu0 }
 0x110   : > { %v620_v29 = vpop.f32.mrf.mxu0 }
 0x111   : > { %v621_v30 = vadd.f32 %v620_v29, %v619_v27 }
 0x112   : > { %v622_v31 = vpop.f32.mrf.mxu0 }
 0x113   : > { %v419_v32 = vadd.f32 %v621_v30, %v280_v28 }
 0x114   : > { %v623_v34 = vpop.f32.mrf.mxu0 }
 0x115   : > { %421 = vst [vmem:[#allocation2] sm:$0xff] %v419_v32  ;;  %v624_v35 = vadd.f32 %v623_v34, %v622_v31  ;;  %426 = sbr.rel (%p599_p13) target bundleno = 347 (0x15b), region = 59 }
 0x117   : > { %v420_v36 = vadd.f32 %v624_v35, %v281_v33 }
 0x119   : > { %422 = vst [vmem:[#allocation2 + $0x8] sm:$0xff] %v420_v36 }
 0x11c   : > { %v427_v37 = vld [vmem:[#allocation2] sm:$0xff] }
 0x120   : > { %v428_v38 = vld [vmem:[#allocation2 + $0x8] sm:$0xff] }
 0x121   : > { %v429_v39 = vadd.f32 %v428_v38, %v427_v37 }
 0x123   : > { %v430_v40 = vrot.slane %v429_v39, 4 }
 0x125   : > { %v431_v41 = vadd.f32 %v430_v40, %v429_v39 }
 0x127   : > { %v432_v42 = vrot.slane %v431_v41, 2 }
 0x129   : > { %v433_v43 = vadd.f32 %v432_v42, %v431_v41 }
 0x12b   : > { %v434_v44 = vrot.slane %v433_v43, 1 }
 0x12d   : > { %v435_v45 = vadd.f32 %v434_v44, %v433_v43 }
 0x12f   : > { %v437_v46 = vmul.f32 0.0625, %v435_v45 }
 0x131   : > { %v438_v47 = vsub.f32 %v427_v37, %v437_v46  ;;  %v439_v48 = vsub.f32 %v428_v38, %v437_v46 }
 0x133   : > { %v440_v49 = vmul.f32 %v438_v47, %v438_v47  ;;  %v441_v50 = vmul.f32 %v439_v48, %v439_v48 }
 0x135   : > { %v442_v51 = vadd.f32 %v441_v50, %v440_v49 }
 0x137   : > { %v443_v52 = vrot.slane %v442_v51, 4 }
 0x139   : > { %v444_v53 = vadd.f32 %v443_v52, %v442_v51 }
 0x13b   : > { %v445_v54 = vrot.slane %v444_v53, 2 }
 0x13d   : > { %v446_v55 = vadd.f32 %v445_v54, %v444_v53 }
 0x13f   : > { %v447_v56 = vrot.slane %v446_v55, 1 }
 0x141   : > { %v448_v57 = vadd.f32 %v447_v56, %v446_v55 }
 0x143   : > { %v449_v58 = vmul.f32 0.0625, %v448_v57 }
 0x145   : > { %v450_v59 = vadd.f32 1e-05, %v449_v58 }
 0x147   : > { %699 = vrsqrt.f32 %v450_v59 }
 0x154   : > { %v700_v60 = vpop.eup %699 }
 0x155   : > { %v452_v61 = vmul.f32 %v700_v60, %v438_v47  ;;  %v453_v62 = vmul.f32 %v700_v60, %v439_v48 }
 0x157   : > { %vm454_vm0 = vcmp.ge.f32.partialorder %v452_v61, 0.0  ;;  %v456_v63 = vmul.f32 0.2, %v452_v61  ;;  %vm455_vm1 = vcmp.ge.f32.partialorder %v453_v62, 0.0  ;;  %v457_v0 = vmul.f32 0.2, %v453_v62 }
 0x159   : > { %v458_v1 = vsel %vm454_vm0, %v452_v61, %v456_v63  ;;  %v459_v2 = vsel %vm455_vm1, %v453_v62, %v457_v0 }
 0x15a   : > { %460 = vst [vmem:[%s847_s25] sm:$0xff] %v458_v1  ;;  %461 = vst [vmem:[%s847_s25 + $0x8] sm:$0xff] %v459_v2 }
 0x15b PF: > { %s12_s15 = sadd.s32 1, %s755_s15   ;;  %s899_s9 = smov %s735_s10 }
 0x15c   : > { %p9_p0 = scmp.ge.s32.totalorder %s12_s15, 20   ;;  %s900_s10 = smov %s824_s22 }
 0x15d   : > { %s901_s11 = smov %s747_s13  ;;  %s902_s12 = smov %s751_s14 }
 0x15e   : > { %s903_s13 = smov %s906_s16  ;;  %s904_s14 = smov %s910_s17 }
 0x15f   :  { %11 = sbr.rel (!%p9_p0) target bundleno = 4 (0x4), region = 97 }

// kernel: generator_forward.51
= control target key start
LH: loop header
LB: loop body
LE: loop exit
PB: predicated region body
PF: predicated region fallthrough
CT: control target
= control target key end

     0   :  { %s889_s9 = smov 0   ;;  %s891_s10 = smov 0   ;;  %s1046_s0 = inlined_call_operand.vmem [shape: f32[2,64,1152], index: 0, kind: input, shape index: {}]   ;;  %s1047_s1 = inlined_call_operand.vmem [shape: bf16[1152,64], index: 1, kind: input, shape index: {}]   ;;  %s1048_s2 = inlined_call_operand.vmem [shape: f32[2,64,64], index: 2, kind: output, shape index: {}]  }
   0x1   :  { %s893_s11 = smov 0   ;;  %s895_s12 = smov 0  }
   0x2   :  { %s897_s13 = smov 0   ;;  %s899_s14 = smov 0  }
   0x3   :  { %s901_s15 = smov 0  }
   0x4 LB: > { %s24_s16 = sadd.s32 1, %s863_s13  ;;  %s31_s17 = sadd.s32 1, %s867_s14  ;;  %s871_s15 = sphi %s901_s15, %s12_s15   ;;  %s867_s14 = sphi %s899_s14, %s1054_s14   ;;  %s863_s13 = sphi %s897_s13, %s1053_s13   ;;  %s859_s12 = sphi %s895_s12, %s1052_s12   ;;  %s855_s11 = sphi %s893_s11, %s1051_s11   ;;  %s851_s10 = sphi %s891_s10, %s1050_s10   ;;  %s847_s9 = sphi %s889_s9, %s1049_s9  }
   0x5   : > { %p25_p0 = scmp.ge.s32.totalorder %s24_s16, 9  ;;  %p47_p1 = scmp.ne.s32.totalorder %s851_s10, %s847_s9 }
   0x6   : > { %p48_p2 = scmp.eq.s32.totalorder %s871_s15, 0  ;;  %s40_s21 = sadd.s32 1, %s851_s10 }
   0x7   : > { %s1056_s16 = smov (%p25_p0, %s24_s16), 0  ;;  %s1058_s17 = smov (!%p25_p0, %s31_s17), %s867_s14 }
   0x8   : > { %p49_p3 = por %p48_p2, %p47_p1  ;;  %p33_p4 = scmp.ge.s32.totalorder %s1058_s17, 2 }
   0x9   : > { %s36_s18 = ssub.s32 %s863_s13, %s1056_s16  ;;  %p675_p6 = scmp.ge.s32.totalorder %s871_s15, 18 }
   0xa   : > { %s1060_s17 = smov (%p33_p4, %s1058_s17), 0 }
   0xb   : > { %s35_s19 = ssub.s32 %s867_s14, %s1060_s17  ;;  %129 = sbr.rel (%p675_p6) target bundleno = 27 (0x1b), region = 16 }
   0xc   : > { %s37_s20 = sor.u32 %s36_s18, %s35_s19 }
   0xd   : > { %p38_p5 = scmp.eq.s32.totalorder %s37_s20, 0 }
   0xf   : > { %s940_s22 = scalar_select %p38_p5, %s851_s10, %s40_s21  }
  0x10   : > { %132 = sbr.rel (!%p49_p3) target bundleno = 27 (0x1b), region = 20  ;;  %s134_s23 = sand.u32 (%p49_p3), 1, %s851_s10  }
  0x11   : > { %s749_s24 = smul.u32 (%p49_p3), 72, %s867_s14  ;;  %s676_s25 = sshll.u32 (%p49_p3), %s134_s23, 6 }
  0x12   : > { %s136_s3 = scalar_lea.vmem (%p49_p3), [#allocation3], %s676_s25 }
  0x13   : > { %s138_s26 = sadd.s32 (%p49_p3), %s863_s13, %s749_s24 }
  0x14   : > { %s677_s27 = sshll.u32 (%p49_p3), %s138_s26, 3 }
  0x15   : > { %s140_s30 = scalar_lea.vmem %s1046_s0, %s677_s27 }
  0x16   : > { %v183_v0 = vld [vmem:[%s140_s30] sm:$0xff]  ;;  %v185_v1 = vld [vmem:[%s140_s30 + $0x48] sm:$0xff]  ;;  %v187_v2 = vld [vmem:[%s140_s30 + $0x90] sm:$0xff] }
  0x17   : > { %184 = vst [vmem:[%s136_s3] sm:$0xff] %v183_v0  ;;  %186 = vst [vmem:[%s136_s3 + $0x8] sm:$0xff] %v185_v1  ;;  %v189_v3 = vld [vmem:[%s140_s30 + $0xd8] sm:$0xff]  ;;  %v191_v4 = vld [vmem:[%s140_s30 + $0x120] sm:$0xff] }
  0x18   : > { %188 = vst [vmem:[%s136_s3 + $0x10] sm:$0xff] %v187_v2  ;;  %v193_v5 = vld [vmem:[%s140_s30 + $0x168] sm:$0xff]  ;;  %190 = vst [vmem:[%s136_s3 + $0x18] sm:$0xff] %v189_v3  ;;  %v195_v6 = vld [vmem:[%s140_s30 + $0x1b0] sm:$0xff] }
  0x19   : > { %192 = vst [vmem:[%s136_s3 + $0x20] sm:$0xff] %v191_v4  ;;  %194 = vst [vmem:[%s136_s3 + $0x28] sm:$0xff] %v193_v5  ;;  %v197_v7 = vld [vmem:[%s140_s30 + $0x1f8] sm:$0xff] }
  0x1a   : > { %196 = vst [vmem:[%s136_s3 + $0x30] sm:$0xff] %v195_v6  ;;  %198 = vst [vmem:[%s136_s3 + $0x38] sm:$0xff] %v197_v7 }
  0x1b PF: > { %p678_p7 = scmp.ge.s32.totalorder %s871_s15, 1  ;;  %p215_p8 = scmp.lt.s32.totalorder %s871_s15, 19 }
  0x1d   : > { %p216_p9 = pnand %p678_p7, %p215_p8 }
  0x1e   : > { %s222_s4 = sand.u32 (!%p216_p9), 1, %s847_s9   ;;  %s680_s5 = sshll.u32 (!%p216_p9), %s855_s11, 4 }
  0x1f   : > { %219 = sbr.rel (%p216_p9) target bundleno = 380 (0x17c), region = 62  ;;  %s679_s6 = sshll.u32 (!%p216_p9), %s222_s4, 6 }
  0x20   : > { %p255_p10 = scmp.lt.s32.totalorder (!%p216_p9), %s680_s5, 143  ;;  %p263_p11 = scmp.lt.s32.totalorder (!%p216_p9), %s859_s12, 1 }
  0x21   : > { %s965_s25 = scalar_lea.vmem (!%p216_p9), [#allocation3], %s679_s6  ;;  %p684_p12 = scmp.ne.s32.totalorder (!%p216_p9), %s855_s11, 0 }
  0x24   : > { %s1062_s5 = smov (!%p255_p10, %s680_s5), 143  ;;  %s1064_s12 = smov (!%p263_p11, %s859_s12), 1 }
  0x25   : > { %s681_s7 = sshll.u32 %s1062_s5, 2  ;;  %s696_s20 = sshll.u32 %s1064_s12, 6 }
  0x26   : > { %s958_s19 = scalar_lea.vmem %s1047_s1, %s681_s7  ;;  %s963_s24 = scalar_lea.vmem %s1048_s2, %s696_s20 }
  0x27   : > { %275 = sbr.rel (%p684_p12) target bundleno = 49 (0x31), region = 70 }
  0x2c   : > { %vm276_vm0 = vcmask 523264   ;;  %v873_v8 = vmov 0.0  }
  0x2d   : > { %277 = vst.msk [vmem:[#allocation2] sm:$0xff] %vm276_vm0, %v873_v8  ;;  %278 = vst.msk [vmem:[#allocation2 + $0x8] sm:$0xff] %vm276_vm0, %v873_v8 }
  0x2e   : > { %279 = vst.msk [vmem:[#allocation2 + $0x10] sm:$0xff] %vm276_vm0, %v873_v8  ;;  %280 = vst.msk [vmem:[#allocation2 + $0x18] sm:$0xff] %vm276_vm0, %v873_v8 }
  0x2f   : > { %281 = vst.msk [vmem:[#allocation2 + $0x20] sm:$0xff] %vm276_vm0, %v873_v8  ;;  %282 = vst.msk [vmem:[#allocation2 + $0x28] sm:$0xff] %vm276_vm0, %v873_v8 }
  0x30   : > { %283 = vst.msk [vmem:[#allocation2 + $0x30] sm:$0xff] %vm276_vm0, %v873_v8  ;;  %284 = vst.msk [vmem:[#allocation2 + $0x38] sm:$0xff] %vm276_vm0, %v873_v8 }
  0x31 PF: > { %v807_v9 = vld [vmem:[%s958_s19 + $0x38] sm:$0xff]   ;;  %v808_v10 = vld [vmem:[%s958_s19 + $0x30] sm:$0xff]   ;;  %v809_v11 = vld [vmem:[%s958_s19 + $0x28] sm:$0xff]   ;;  %vm442_vm1 = vcmask 523264   ;;  %p693_p13 = scmp.ne.s32.totalorder %s855_s11, 8 }
  0x32   : > { %709 = vmatprep.subr.bf16.mxu0 %v807_v9  ;;  %733 = vmatprep.subr.bf16.mxu1 %v807_v9  ;;  %v810_v12 = vld [vmem:[%s958_s19 + $0x20] sm:$0xff]   ;;  %v286_v14 = vld [vmem:[%s965_s25 + $0x8] sm:$0xff]  ;;  %v811_v19 = vld [vmem:[%s958_s19 + $0x18] sm:$0xff]  }
  0x33   : > { %710 = vmatpush3.bf16.msra.mxu0 %v807_v9  ;;  %741 = vmatpush3.bf16.msra.mxu1 %v807_v9  ;;  %v285_v13 = vld [vmem:[%s965_s25] sm:$0xff]  ;;  %v290_v17 = vld [vmem:[%s965_s25 + $0x28] sm:$0xff]  ;;  %v812_v20 = vld [vmem:[%s958_s19 + $0x10] sm:$0xff]  }
  0x34   : > { %711 = vmatprep.subr.bf16.mxu0 %v808_v10  ;;  %734 = vmatprep.subr.bf16.mxu1 %v808_v10  ;;  %v289_v15 = vld [vmem:[%s965_s25 + $0x20] sm:$0xff]  ;;  %v293_v16 = vpack.c.bf16 %v286_v14, %v285_v13  ;;  %v813_v21 = vld [vmem:[%s958_s19 + $0x8] sm:$0xff]   ;;  %v287_v23 = vld [vmem:[%s965_s25 + $0x10] sm:$0xff] }
  0x35   : > { %v295_v18 = vpack.c.bf16 %v290_v17, %v289_v15  ;;  %v814_v22 = vld [vmem:[%s958_s19] sm:$0xff]   ;;  %v288_v24 = vld [vmem:[%s965_s25 + $0x18] sm:$0xff]  ;;  %v291_v25 = vld [vmem:[%s965_s25 + $0x30] sm:$0xff] }
  0x36   : > { %725 = vmatprep.mubr.bf16.mxu0 %v293_v16  ;;  %v292_v26 = vld [vmem:[%s965_s25 + $0x38] sm:$0xff]  ;;  %v294_v27 = vpack.c.bf16 %v288_v24, %v287_v23  ;;  %v315_v29 = vld [vmem:[#allocation2 + $0x10] sm:$0xff]  ;;  %v313_v33 = vld [vmem:[#allocation2] sm:$0xff] }
  0x37   : > { %712 = vmatpush3.bf16.msra.mxu0 %v808_v10  ;;  %742 = vmatpush3.bf16.msra.mxu1 %v808_v10  ;;  %v296_v28 = vpack.c.bf16 %v292_v26, %v291_v25  ;;  %v319_v30 = vld [vmem:[#allocation2 + $0x30] sm:$0xff]  ;;  %v317_v34 = vld [vmem:[#allocation2 + $0x20] sm:$0xff]  ;;  %v316_v39 = vld [vmem:[#allocation2 + $0x18] sm:$0xff] }
  0x38   : > { %713 = vmatprep.subr.bf16.mxu0 %v809_v11  ;;  %735 = vmatprep.subr.bf16.mxu1 %v809_v11  ;;  %v320_v40 = vld [vmem:[#allocation2 + $0x38] sm:$0xff]  ;;  %v314_v45 = vld [vmem:[#allocation2 + $0x8] sm:$0xff] }
  0x39   : > { %729 = vmatprep.mubr.bf16.mxu1 %v295_v18  ;;  %v318_v46 = vld [vmem:[#allocation2 + $0x28] sm:$0xff] }
  0x3b   : > { %714 = vmatpush3.bf16.msra.mxu0 %v809_v11  ;;  %743 = vmatpush3.bf16.msra.mxu1 %v809_v11 }
  0x3c   : > { %715 = vmatprep.subr.bf16.mxu0 %v810_v12  ;;  %736 = vmatprep.subr.bf16.mxu1 %v810_v12 }
  0x3f   : > { %716 = vmatpush3.bf16.msra.mxu0 %v810_v12  ;;  %744 = vmatpush3.bf16.msra.mxu1 %v810_v12 }
  0x40   : > { %717 = vmatprep.subr.bf16.mxu0 %v811_v19  ;;  %737 = vmatprep.subr.bf16.mxu1 %v811_v19 }
  0x43   : > { %718 = vmatpush3.bf16.msra.mxu0 %v811_v19  ;;  %745 = vmatpush3.bf16.msra.mxu1 %v811_v19 }
  0x44   : > { %719 = vmatprep.subr.bf16.mxu0 %v812_v20  ;;  %738 = vmatprep.subr.bf16.mxu1 %v812_v20 }
  0x47   : > { %720 = vmatpush3.bf16.msra.mxu0 %v812_v20  ;;  %746 = vmatpush3.bf16.msra.mxu1 %v812_v20 }
  0x48   : > { %721 = vmatprep.subr.bf16.mxu0 %v813_v21  ;;  %739 = vmatprep.subr.bf16.mxu1 %v813_v21 }
  0x4b   : > { %722 = vmatpush3.bf16.msra.mxu0 %v813_v21  ;;  %747 = vmatpush3.bf16.msra.mxu1 %v813_v21 }
  0x4c   : > { %723 = vmatprep.subr.bf16.mxu0 %v814_v22  ;;  %740 = vmatprep.subr.bf16.mxu1 %v814_v22 }
  0x4f   : > { %724 = vmatpush3.bf16.msra.mxu0 %v814_v22  ;;  %748 = vmatpush3.bf16.msra.mxu1 %v814_v22 }
  0x52   : > { %726 = vmatmul.mubr.bf16.vlgmr.msra.gmra.mxu0 %v294_v27  ;;  %730 = vmatmul.mubr.bf16.vlgmr.msra.gmra.mxu1 %v296_v28 }
 0x112   : > { %v727_v31 = vpop.f32.mrf.mxu0  ;;  %v731_v32 = vpop.f32.mrf.mxu1 }
 0x113   : > { %v436_v35 = vadd.f32 %v727_v31, %v315_v29  ;;  %v440_v36 = vadd.f32 %v731_v32, %v319_v30 }
 0x114   : > { %v403_v37 = vpop.f32.mrf.mxu0  ;;  %v419_v38 = vpop.f32.mrf.mxu1 }
 0x115   : > { %445 = vst.msk [vmem:[#allocation2 + $0x10] sm:$0xff] %vm442_vm1, %v436_v35  ;;  %449 = vst.msk [vmem:[#allocation2 + $0x30] sm:$0xff] %vm442_vm1, %v440_v36  ;;  %v434_v41 = vadd.f32 %v403_v37, %v313_v33  ;;  %v438_v42 = vadd.f32 %v419_v38, %v317_v34 }
 0x116   : > { %v728_v43 = vpop.f32.mrf.mxu0  ;;  %v732_v44 = vpop.f32.mrf.mxu1 }
 0x117   : > { %443 = vst.msk [vmem:[#allocation2] sm:$0xff] %vm442_vm1, %v434_v41  ;;  %447 = vst.msk [vmem:[#allocation2 + $0x20] sm:$0xff] %vm442_vm1, %v438_v42  ;;  %v437_v47 = vadd.f32 %v728_v43, %v316_v39  ;;  %v441_v48 = vadd.f32 %v732_v44, %v320_v40  ;;  %454 = sbr.rel (%p693_p13) target bundleno = 380 (0x17c), region = 74 }
 0x118   : > { %v406_v49 = vpop.f32.mrf.mxu0  ;;  %v422_v50 = vpop.f32.mrf.mxu1 }
 0x119   : > { %446 = vst.msk [vmem:[#allocation2 + $0x18] sm:$0xff] %vm442_vm1, %v437_v47  ;;  %450 = vst.msk [vmem:[#allocation2 + $0x38] sm:$0xff] %vm442_vm1, %v441_v48  ;;  %v435_v51 = vadd.f32 %v406_v49, %v314_v45  ;;  %v439_v52 = vadd.f32 %v422_v50, %v318_v46 }
 0x11b   : > { %444 = vst.msk [vmem:[#allocation2 + $0x8] sm:$0xff] %vm442_vm1, %v435_v51  ;;  %448 = vst.msk [vmem:[#allocation2 + $0x28] sm:$0xff] %vm442_vm1, %v439_v52 }
 0x11c   : > { %v457_v55 = vld [vmem:[#allocation2 + $0x10] sm:$0xff] }
 0x11d   : > { %v466_v59 = vsel %vm442_vm1, %v457_v55, 0.0  ;;  %v461_v2 = vld [vmem:[#allocation2 + $0x30] sm:$0xff] }
 0x11e   : > { %v455_v53 = vld [vmem:[#allocation2] sm:$0xff]  ;;  %v474_v7 = vsel %vm442_vm1, %v461_v2, 0.0 }
 0x11f   : > { %v463_v57 = vsel %vm442_vm1, %v455_v53, 0.0  ;;  %v459_v60 = vld [vmem:[#allocation2 + $0x20] sm:$0xff] }
 0x120   : > { %v458_v56 = vld [vmem:[#allocation2 + $0x18] sm:$0xff]  ;;  %v470_v1 = vsel %vm442_vm1, %v459_v60, 0.0 }
 0x121   : > { %v468_v62 = vsel %vm442_vm1, %v458_v56, 0.0  ;;  %v462_v5 = vld [vmem:[#allocation2 + $0x38] sm:$0xff] }
 0x122   : > { %v456_v54 = vld [vmem:[#allocation2 + $0x8] sm:$0xff]  ;;  %v476_v9 = vsel %vm442_vm1, %v462_v5, 0.0 }
 0x123   : > { %v464_v58 = vsel %vm442_vm1, %v456_v54, 0.0  ;;  %v460_v63 = vld [vmem:[#allocation2 + $0x28] sm:$0xff] }
 0x124   : > { %v465_v61 = vadd.f32 %v464_v58, %v463_v57  ;;  %v472_v4 = vsel %vm442_vm1, %v460_v63, 0.0 }
 0x126   : > { %v467_v0 = vadd.f32 %v466_v59, %v465_v61 }
 0x128   : > { %v469_v3 = vadd.f32 %v468_v62, %v467_v0 }
 0x12a   : > { %v471_v6 = vadd.f32 %v470_v1, %v469_v3 }
 0x12c   : > { %v473_v8 = vadd.f32 %v472_v4, %v471_v6 }
 0x12e   : > { %v475_v10 = vadd.f32 %v474_v7, %v473_v8 }
 0x130   : > { %v477_v11 = vadd.f32 %v476_v9, %v475_v10 }
 0x132   : > { %v478_v12 = vrot.slane %v477_v11, 4 }
 0x134   : > { %v479_v13 = vadd.f32 %v478_v12, %v477_v11 }
 0x136   : > { %v480_v14 = vrot.slane %v479_v13, 2 }
 0x138   : > { %v481_v15 = vadd.f32 %v480_v14, %v479_v13 }
 0x13a   : > { %v482_v16 = vrot.slane %v481_v15, 1 }
 0x13c   : > { %v483_v17 = vadd.f32 %v482_v16, %v481_v15 }
 0x13e   : > { %v485_v18 = vmul.f32 0.015625, %v483_v17 }
 0x140   : > { %v486_v19 = vsub.f32 %v455_v53, %v485_v18  ;;  %v487_v20 = vsub.f32 %v456_v54, %v485_v18  ;;  %v488_v21 = vsub.f32 %v457_v55, %v485_v18  ;;  %v489_v22 = vsub.f32 %v458_v56, %v485_v18 }
 0x141   : > { %v490_v23 = vsub.f32 %v459_v60, %v485_v18  ;;  %v491_v24 = vsub.f32 %v460_v63, %v485_v18  ;;  %v492_v29 = vsub.f32 %v461_v2, %v485_v18  ;;  %v493_v35 = vsub.f32 %v462_v5, %v485_v18 }
 0x142   : > { %v494_v25 = vmul.f32 %v486_v19, %v486_v19  ;;  %v495_v26 = vmul.f32 %v487_v20, %v487_v20  ;;  %v496_v27 = vmul.f32 %v488_v21, %v488_v21  ;;  %v497_v28 = vmul.f32 %v489_v22, %v489_v22 }
 0x143   : > { %v498_v30 = vmul.f32 %v490_v23, %v490_v23  ;;  %v499_v36 = vmul.f32 %v491_v24, %v491_v24  ;;  %v500_v39 = vmul.f32 %v492_v29, %v492_v29  ;;  %v501_v42 = vmul.f32 %v493_v35, %v493_v35 }
 0x144   : > { %v502_v31 = vsel %vm442_vm1, %v494_v25, 0.0  ;;  %v503_v32 = vsel %vm442_vm1, %v495_v26, 0.0  ;;  %v505_v33 = vsel %vm442_vm1, %v496_v27, 0.0  ;;  %v507_v37 = vsel %vm442_vm1, %v497_v28, 0.0 }
 0x145   : > { %v504_v34 = vadd.f32 %v503_v32, %v502_v31  ;;  %v509_v40 = vsel %vm442_vm1, %v498_v30, 0.0  ;;  %v511_v43 = vsel %vm442_vm1, %v499_v36, 0.0  ;;  %v513_v45 = vsel %vm442_vm1, %v500_v39, 0.0 }
 0x146   : > { %v515_v47 = vsel %vm442_vm1, %v501_v42, 0.0 }
 0x147   : > { %v506_v38 = vadd.f32 %v505_v33, %v504_v34 }
 0x149   : > { %v508_v41 = vadd.f32 %v507_v37, %v506_v38 }
 0x14b   : > { %v510_v44 = vadd.f32 %v509_v40, %v508_v41 }
 0x14d   : > { %v512_v46 = vadd.f32 %v511_v43, %v510_v44 }
 0x14f   : > { %v514_v48 = vadd.f32 %v513_v45, %v512_v46 }
 0x151   : > { %v516_v49 = vadd.f32 %v515_v47, %v514_v48 }
 0x153   : > { %v517_v50 = vrot.slane %v516_v49, 4 }
 0x155   : > { %v518_v51 = vadd.f32 %v517_v50, %v516_v49 }
 0x157   : > { %v519_v52 = vrot.slane %v518_v51, 2 }
 0x159   : > { %v520_v53 = vadd.f32 %v519_v52, %v518_v51 }
 0x15b   : > { %v521_v54 = vrot.slane %v520_v53, 1 }
 0x15d   : > { %v522_v55 = vadd.f32 %v521_v54, %v520_v53 }
 0x15f   : > { %v523_v56 = vmul.f32 0.015625, %v522_v55 }
 0x161   : > { %v524_v57 = vadd.f32 1e-05, %v523_v56 }
 0x163   : > { %815 = vrsqrt.f32 %v524_v57 }
 0x170   : > { %v816_v58 = vpop.eup %815 }
 0x171   : > { %v526_v59 = vmul.f32 %v816_v58, %v486_v19  ;;  %v527_v60 = vmul.f32 %v816_v58, %v487_v20  ;;  %v528_v61 = vmul.f32 %v816_v58, %v488_v21  ;;  %v529_v62 = vmul.f32 %v816_v58, %v489_v22 }
 0x172   : > { %v530_v63 = vmul.f32 %v816_v58, %v490_v23  ;;  %v531_v0 = vmul.f32 %v816_v58, %v491_v24  ;;  %v532_v1 = vmul.f32 %v816_v58, %v492_v29  ;;  %v533_v2 = vmul.f32 %v816_v58, %v493_v35 }
 0x173   : > { %vm534_vm2 = vcmp.ge.f32.partialorder %v526_v59, 0.0  ;;  %v542_v3 = vmul.f32 0.2, %v526_v59  ;;  %vm535_vm3 = vcmp.ge.f32.partialorder %v527_v60, 0.0  ;;  %v543_v4 = vmul.f32 0.2, %v527_v60 }
 0x174   : > { %vm536_vm4 = vcmp.ge.f32.partialorder %v528_v61, 0.0  ;;  %v544_v5 = vmul.f32 0.2, %v528_v61  ;;  %vm537_vm5 = vcmp.ge.f32.partialorder %v529_v62, 0.0  ;;  %v545_v6 = vmul.f32 0.2, %v529_v62 }
 0x175   : > { %v550_v7 = vsel %vm534_vm2, %v526_v59, %v542_v3  ;;  %v551_v8 = vsel %vm535_vm3, %v527_v60, %v543_v4  ;;  %vm538_vm6 = vcmp.ge.f32.partialorder %v530_v63, 0.0  ;;  %v546_v9 = vmul.f32 0.2, %v530_v63 }
 0x176   : > { %558 = vst.msk [vmem:[%s963_s24] sm:$0xff] %vm442_vm1, %v550_v7  ;;  %559 = vst.msk [vmem:[%s963_s24 + $0x8] sm:$0xff] %vm442_vm1, %v551_v8  ;;  %v552_v10 = vsel %vm536_vm4, %v528_v61, %v544_v5  ;;  %v553_v11 = vsel %vm537_vm5, %v529_v62, %v545_v6  ;;  %vm539_vm7 = vcmp.ge.f32.partialorder %v531_v0, 0.0  ;;  %v547_v12 = vmul.f32 0.2, %v531_v0 }
 0x177   : > { %560 = vst.msk [vmem:[%s963_s24 + $0x10] sm:$0xff] %vm442_vm1, %v552_v10  ;;  %561 = vst.msk [vmem:[%s963_s24 + $0x18] sm:$0xff] %vm442_vm1, %v553_v11  ;;  %v554_v13 = vsel %vm538_vm6, %v530_v63, %v546_v9  ;;  %vm540_vm8 = vcmp.ge.f32.partialorder %v532_v1, 0.0  ;;  %v548_v14 = vmul.f32 0.2, %v532_v1  ;;  %vm541_vm9 = vcmp.ge.f32.partialorder %v533_v2, 0.0 }
 0x178   : > { %562 = vst.msk [vmem:[%s963_s24 + $0x20] sm:$0xff] %vm442_vm1, %v554_v13  ;;  %v555_v15 = vsel %vm539_vm7, %v531_v0, %v547_v12  ;;  %v549_v16 = vmul.f32 0.2, %v533_v2 }
 0x179   : > { %563 = vst.msk [vmem:[%s963_s24 + $0x28] sm:$0xff] %vm442_vm1, %v555_v15  ;;  %v556_v17 = vsel %vm540_vm8, %v532_v1, %v548_v14 }
 0x17a   : > { %564 = vst.msk [vmem:[%s963_s24 + $0x30] sm:$0xff] %vm442_vm1, %v556_v17  ;;  %v557_v18 = vsel %vm541_vm9, %v533_v2, %v549_v16 }
 0x17b   : > { %565 = vst.msk [vmem:[%s963_s24 + $0x38] sm:$0xff] %vm442_vm1, %v557_v18 }
 0x17c PF: > { %s12_s15 = sadd.s32 1, %s871_s15   ;;  %s1049_s9 = smov %s851_s10 }
 0x17d   : > { %p9_p0 = scmp.ge.s32.totalorder %s12_s15, 20   ;;  %s1050_s10 = smov %s940_s22 }
 0x17e   : > { %s1051_s11 = smov %s863_s13  ;;  %s1052_s12 = smov %s867_s14 }
 0x17f   : > { %s1053_s13 = smov %s1056_s16  ;;  %s1054_s14 = smov %s1060_s17 }
 0x180   :  { %11 = sbr.rel (!%p9_p0) target bundleno = 4 (0x4), region = 112 }

// kernel: generator_forward.52
= control target key start
LH: loop header
LB: loop body
LE: loop exit
PB: predicated region body
PF: predicated region fallthrough
CT: control target
= control target key end

     0   :  { %s2390_s9 = smov 0   ;;  %s2392_s10 = smov 0   ;;  %s3657_s0 = inlined_call_operand.vmem [shape: f32[2,256,576], index: 0, kind: input, shape index: {}]   ;;  %s3658_s1 = inlined_call_operand.vmem [shape: bf16[576,32], index: 1, kind: input, shape index: {}]   ;;  %s3659_s2 = inlined_call_operand.vmem [shape: f32[2,256,32], index: 2, kind: output, shape index: {}]  }
   0x1   :  { %s2394_s11 = smov 0  }
   0x2 LB: > { %s31_s12 = sadd.s32 1, %s2368_s10  ;;  %p1927_p0 = scmp.ge.s32.totalorder %s2372_s11, 1  ;;  %s2372_s11 = sphi %s2394_s11, %s12_s11   ;;  %s2368_s10 = sphi %s2392_s10, %s3722_s10   ;;  %s2364_s9 = sphi %s2390_s9, %s3721_s9  }
   0x3   : > { %p33_p1 = scmp.ge.s32.totalorder %s31_s12, 2  ;;  %p156_p2 = scmp.lt.s32.totalorder %s2372_s11, 3 }
   0x5   : > { %s3724_s12 = smov (%p33_p1, %s31_s12), 0  ;;  %p157_p3 = pnand %p1927_p0, %p156_p2 }
   0x7   : > { %160 = sbr.rel (%p157_p3) target bundleno = 563 (0x233), region = 28 }
   0xc   : > { %v2312_v0 = vld [vmem:[%s3658_s1 + $0x78] sm:$0xff]   ;;  %p194_p4 = scmp.lt.s32.totalorder %s2364_s9, 1  ;;  %v2314_v2 = vld [vmem:[%s3658_s1 + $0x70] sm:$0xff]   ;;  %v2316_v4 = vld [vmem:[%s3658_s1 + $0x68] sm:$0xff]   ;;  %vm818_vm0 = vcmask 523264   ;;  %vm225_vm1 = vcmask 261120  }
   0xd   : > { %v2313_v1 = vld [vmem:[%s3658_s1 + $0x38] sm:$0xff]   ;;  %1986 = vmatprep.subr.bf16.mxu0 %v2312_v0  ;;  %2270 = vmatprep.subr.bf16.mxu1 %v2312_v0  ;;  %v2315_v3 = vld [vmem:[%s3658_s1 + $0x30] sm:$0xff]   ;;  %v2317_v5 = vld [vmem:[%s3658_s1 + $0x28] sm:$0xff]  }
   0xe   : > { %1987 = vmatpush3.bf16.msra.mxu0 %v2313_v1  ;;  %2278 = vmatpush3.bf16.msra.mxu1 %v2313_v1  ;;  %s3726_s9 = smov (!%p194_p4, %s2364_s9), 1  ;;  %v2318_v6 = vld [vmem:[%s3658_s1 + $0x60] sm:$0xff]   ;;  %v2320_v8 = vld [vmem:[%s3658_s1 + $0x58] sm:$0xff]   ;;  %v2322_v10 = vld [vmem:[%s3658_s1 + $0x50] sm:$0xff]  }
   0xf   : > { %1988 = vmatprep.subr.bf16.mxu0 %v2314_v2  ;;  %2271 = vmatprep.subr.bf16.mxu1 %v2314_v2  ;;  %s2286_s27 = smul.u32 1280, %s3726_s9  ;;  %v2319_v7 = vld [vmem:[%s3658_s1 + $0x20] sm:$0xff]   ;;  %v2321_v9 = vld [vmem:[%s3658_s1 + $0x18] sm:$0xff]   ;;  %v2323_v17 = vld [vmem:[%s3658_s1 + $0x10] sm:$0xff]  }
  0x10   : > { %v2324_v18 = vld [vmem:[%s3658_s1 + $0x48] sm:$0xff]   ;;  %v2326_v20 = vld [vmem:[%s3658_s1 + $0x40] sm:$0xff]   ;;  %v2328_v26 = vld [vmem:[%s3658_s1 + $0xf8] sm:$0xff]  }
  0x11   : > { %s2441_s6 = scalar_lea.vmem %s3657_s0, %s2286_s27  ;;  %v2325_v19 = vld [vmem:[%s3658_s1 + $0x8] sm:$0xff]   ;;  %v2327_v21 = vld [vmem:[%s3658_s1] sm:$0xff]   ;;  %v2329_v27 = vld [vmem:[%s3658_s1 + $0x118] sm:$0xff]  }
  0x12   : > { %1989 = vmatpush3.bf16.msra.mxu0 %v2315_v3  ;;  %2279 = vmatpush3.bf16.msra.mxu1 %v2315_v3  ;;  %v259_v11 = vld [vmem:[%s2441_s6 + $0x8] sm:$0xff]  ;;  %v264_v12 = vld [vmem:[%s2441_s6 + $0x30] sm:$0xff]  ;;  %v258_v22 = vld [vmem:[%s2441_s6] sm:$0xff] }
  0x13   : > { %1990 = vmatprep.subr.bf16.mxu0 %v2316_v4  ;;  %2272 = vmatprep.subr.bf16.mxu1 %v2316_v4  ;;  %v379_v13 = vld [vmem:[%s2441_s6 + $0x3c8] sm:$0xff]  ;;  %v419_v14 = vpack.c.bf16 %v264_v12, %v259_v11  ;;  %v384_v15 = vld [vmem:[%s2441_s6 + $0x3f0] sm:$0xff]  ;;  %v378_v24 = vld [vmem:[%s2441_s6 + $0x3c0] sm:$0xff] }
  0x14   : > { %v479_v16 = vpack.c.bf16 %v384_v15, %v379_v13  ;;  %v263_v23 = vld [vmem:[%s2441_s6 + $0x28] sm:$0xff]  ;;  %v269_v28 = vld [vmem:[%s2441_s6 + $0x58] sm:$0xff]  ;;  %v274_v29 = vld [vmem:[%s2441_s6 + $0x80] sm:$0xff] }
  0x15   : > { %899 = vmatprep.mubr.bf16.mxu0 %v419_v14  ;;  %v383_v25 = vld [vmem:[%s2441_s6 + $0x3e8] sm:$0xff]  ;;  %v418_v30 = vpack.c.bf16 %v263_v23, %v258_v22  ;;  %v389_v32 = vld [vmem:[%s2441_s6 + $0x418] sm:$0xff]  ;;  %v394_v33 = vld [vmem:[%s2441_s6 + $0x440] sm:$0xff]  ;;  %v424_v36 = vpack.c.bf16 %v274_v29, %v269_v28 }
  0x16   : > { %1991 = vmatpush3.bf16.msra.mxu0 %v2317_v5  ;;  %2280 = vmatpush3.bf16.msra.mxu1 %v2317_v5  ;;  %v478_v31 = vpack.c.bf16 %v383_v25, %v378_v24  ;;  %v2330_v34 = vld [vmem:[%s3658_s1 + $0xb8] sm:$0xff]   ;;  %v2331_v35 = vld [vmem:[%s3658_s1 + $0xf0] sm:$0xff]   ;;  %v484_v38 = vpack.c.bf16 %v394_v33, %v389_v32  ;;  %v2333_v43 = vld [vmem:[%s3658_s1 + $0xe8] sm:$0xff]  }
  0x17   : > { %1992 = vmatprep.subr.bf16.mxu0 %v2318_v6  ;;  %2273 = vmatprep.subr.bf16.mxu1 %v2318_v6  ;;  %v2332_v37 = vld [vmem:[%s3658_s1 + $0xb0] sm:$0xff]   ;;  %v273_v40 = vld [vmem:[%s2441_s6 + $0x78] sm:$0xff]  ;;  %v279_v44 = vld [vmem:[%s2441_s6 + $0xa8] sm:$0xff] }
  0x18   : > { %995 = vmatprep.mubr.bf16.mxu1 %v479_v16  ;;  %v268_v39 = vld [vmem:[%s2441_s6 + $0x50] sm:$0xff]  ;;  %v393_v42 = vld [vmem:[%s2441_s6 + $0x438] sm:$0xff]  ;;  %v399_v46 = vld [vmem:[%s2441_s6 + $0x468] sm:$0xff] }
  0x19   : > { %v388_v41 = vld [vmem:[%s2441_s6 + $0x410] sm:$0xff]  ;;  %v423_v48 = vpack.c.bf16 %v273_v40, %v268_v39  ;;  %v2334_v50 = vld [vmem:[%s3658_s1 + $0xa8] sm:$0xff]   ;;  %v2335_v52 = vld [vmem:[%s3658_s1 + $0xe0] sm:$0xff]  }
  0x1a   : > { %1993 = vmatpush3.bf16.msra.mxu0 %v2319_v7  ;;  %2281 = vmatpush3.bf16.msra.mxu1 %v2319_v7  ;;  %v284_v45 = vld [vmem:[%s2441_s6 + $0xd0] sm:$0xff]  ;;  %v483_v49 = vpack.c.bf16 %v393_v42, %v388_v41  ;;  %v2336_v54 = vld [vmem:[%s3658_s1 + $0xa0] sm:$0xff]   ;;  %v283_v56 = vld [vmem:[%s2441_s6 + $0xc8] sm:$0xff] }
  0x1b   : > { %1994 = vmatprep.subr.bf16.mxu0 %v2320_v8  ;;  %2274 = vmatprep.subr.bf16.mxu1 %v2320_v8  ;;  %v404_v47 = vld [vmem:[%s2441_s6 + $0x490] sm:$0xff]  ;;  %v429_v51 = vpack.c.bf16 %v284_v45, %v279_v44  ;;  %v278_v55 = vld [vmem:[%s2441_s6 + $0xa0] sm:$0xff]  ;;  %v403_v59 = vld [vmem:[%s2441_s6 + $0x488] sm:$0xff] }
  0x1c   : > { %v489_v53 = vpack.c.bf16 %v404_v47, %v399_v46  ;;  %v398_v57 = vld [vmem:[%s2441_s6 + $0x460] sm:$0xff]  ;;  %v2342_v58 = vld [vmem:[%s3658_s1 + $0x110] sm:$0xff]   ;;  %v2337_v60 = vld [vmem:[%s3658_s1 + $0xd8] sm:$0xff]   ;;  %v428_v1 = vpack.c.bf16 %v283_v56, %v278_v55 }
  0x1d   : > { %v289_v61 = vld [vmem:[%s2441_s6 + $0xf8] sm:$0xff]  ;;  %v294_v62 = vld [vmem:[%s2441_s6 + $0x120] sm:$0xff]  ;;  %v488_v2 = vpack.c.bf16 %v403_v59, %v398_v57  ;;  %v2339_v5 = vld [vmem:[%s3658_s1 + $0xd0] sm:$0xff]  }
  0x1e   : > { %1995 = vmatpush3.bf16.msra.mxu0 %v2321_v9  ;;  %2282 = vmatpush3.bf16.msra.mxu1 %v2321_v9  ;;  %v409_v63 = vld [vmem:[%s2441_s6 + $0x4b8] sm:$0xff]  ;;  %v414_v0 = vld [vmem:[%s2441_s6 + $0x4e0] sm:$0xff]  ;;  %v434_v4 = vpack.c.bf16 %v294_v62, %v289_v61  ;;  %v2340_v7 = vld [vmem:[%s3658_s1 + $0x90] sm:$0xff]  }
  0x1f   : > { %1996 = vmatprep.subr.bf16.mxu0 %v2322_v10  ;;  %2275 = vmatprep.subr.bf16.mxu1 %v2322_v10  ;;  %v2338_v3 = vld [vmem:[%s3658_s1 + $0x98] sm:$0xff]   ;;  %v494_v6 = vpack.c.bf16 %v414_v0, %v409_v63  ;;  %v288_v8 = vld [vmem:[%s2441_s6 + $0xf0] sm:$0xff]  ;;  %v2341_v12 = vld [vmem:[%s3658_s1 + $0xc8] sm:$0xff]  }
  0x20   : > { %v293_v9 = vld [vmem:[%s2441_s6 + $0x118] sm:$0xff]  ;;  %v408_v10 = vld [vmem:[%s2441_s6 + $0x4b0] sm:$0xff]  ;;  %v299_v13 = vld [vmem:[%s2441_s6 + $0x148] sm:$0xff] }
  0x21   : > { %v413_v11 = vld [vmem:[%s2441_s6 + $0x4d8] sm:$0xff]  ;;  %v304_v14 = vld [vmem:[%s2441_s6 + $0x170] sm:$0xff]  ;;  %v266_v16 = vld [vmem:[%s2441_s6 + $0x40] sm:$0xff] }
  0x22   : > { %1997 = vmatpush3.bf16.msra.mxu0 %v2323_v17  ;;  %2283 = vmatpush3.bf16.msra.mxu1 %v2323_v17  ;;  %v261_v15 = vld [vmem:[%s2441_s6 + $0x18] sm:$0xff]  ;;  %v2346_v17 = vld [vmem:[%s3658_s1 + $0x108] sm:$0xff]   ;;  %v2344_v22 = vld [vmem:[%s3658_s1 + $0xc0] sm:$0xff]  }
  0x23   : > { %1998 = vmatprep.subr.bf16.mxu0 %v2324_v18  ;;  %2276 = vmatprep.subr.bf16.mxu1 %v2324_v18  ;;  %v433_v18 = vpack.c.bf16 %v293_v9, %v288_v8  ;;  %v421_v23 = vpack.c.bf16 %v266_v16, %v261_v15  ;;  %v2345_v24 = vld [vmem:[%s3658_s1 + $0x80] sm:$0xff]   ;;  %v265_v28 = vld [vmem:[%s2441_s6 + $0x38] sm:$0xff]  ;;  %v276_v32 = vld [vmem:[%s2441_s6 + $0x90] sm:$0xff] }
  0x24   : > { %v298_v25 = vld [vmem:[%s2441_s6 + $0x140] sm:$0xff]  ;;  %v309_v29 = vld [vmem:[%s2441_s6 + $0x198] sm:$0xff]  ;;  %v275_v41 = vld [vmem:[%s2441_s6 + $0x88] sm:$0xff] }
  0x25   : > { %v313_v39 = vld [vmem:[%s2441_s6 + $0x1b8] sm:$0xff]  ;;  %v270_v40 = vld [vmem:[%s2441_s6 + $0x60] sm:$0xff]  ;;  %v319_v42 = vld [vmem:[%s2441_s6 + $0x1e8] sm:$0xff] }
  0x26   : > { %1999 = vmatpush3.bf16.msra.mxu0 %v2325_v19  ;;  %2284 = vmatpush3.bf16.msra.mxu1 %v2325_v19  ;;  %v493_v19 = vpack.c.bf16 %v413_v11, %v408_v10  ;;  %v281_v44 = vld [vmem:[%s2441_s6 + $0xb8] sm:$0xff]  ;;  %v286_v45 = vld [vmem:[%s2441_s6 + $0xe0] sm:$0xff]  ;;  %v425_v47 = vpack.c.bf16 %v275_v41, %v270_v40  ;;  %v291_v56 = vld [vmem:[%s2441_s6 + $0x108] sm:$0xff] }
  0x27   : > { %2000 = vmatprep.subr.bf16.mxu0 %v2326_v20  ;;  %2277 = vmatprep.subr.bf16.mxu1 %v2326_v20  ;;  %v2343_v20 = vld [vmem:[%s3658_s1 + $0x88] sm:$0xff]   ;;  %v334_v55 = vld [vmem:[%s2441_s6 + $0x260] sm:$0xff]  ;;  %v296_v57 = vld [vmem:[%s2441_s6 + $0x130] sm:$0xff] }
  0x28   : > { %v436_v61 = vpack.c.bf16 %v296_v57, %v291_v56  ;;  %v328_v62 = vld [vmem:[%s2441_s6 + $0x230] sm:$0xff]  ;;  %v333_v63 = vld [vmem:[%s2441_s6 + $0x258] sm:$0xff]  ;;  %v290_v0 = vld [vmem:[%s2441_s6 + $0x100] sm:$0xff] }
  0x29   : > { %v338_v10 = vld [vmem:[%s2441_s6 + $0x280] sm:$0xff]  ;;  %v343_v11 = vld [vmem:[%s2441_s6 + $0x2a8] sm:$0xff]  ;;  %v336_v41 = vld [vmem:[%s2441_s6 + $0x270] sm:$0xff] }
  0x2a   : > { %2001 = vmatpush3.bf16.msra.mxu0 %v2327_v21  ;;  %2285 = vmatpush3.bf16.msra.mxu1 %v2327_v21  ;;  %v439_v21 = vpack.c.bf16 %v304_v14, %v299_v13  ;;  %v305_v13 = vld [vmem:[%s2441_s6 + $0x178] sm:$0xff]  ;;  %v354_v15 = vld [vmem:[%s2441_s6 + $0x300] sm:$0xff]  ;;  %v311_v16 = vld [vmem:[%s2441_s6 + $0x1a8] sm:$0xff] }
  0x2b   : > { %2098 = vmatprep.subr.bf16.mxu1 %v2328_v26  ;;  %2230 = vmatprep.subr.bf16.mxu0 %v2329_v27  ;;  %v303_v26 = vld [vmem:[%s2441_s6 + $0x168] sm:$0xff]  ;;  %v349_v14 = vld [vmem:[%s2441_s6 + $0x2d8] sm:$0xff] }
  0x2c   : > { %v438_v33 = vpack.c.bf16 %v303_v26, %v298_v25  ;;  %v315_v25 = vld [vmem:[%s2441_s6 + $0x1c8] sm:$0xff] }
  0x2d   : > { %900 = vmatmul.mubr.bf16.vlgmr.msra.gmra.mxu0 %v418_v30  ;;  %996 = vmatmul.mubr.bf16.vlgmr.msra.gmra.mxu1 %v478_v31  ;;  %v314_v30 = vld [vmem:[%s2441_s6 + $0x1c0] sm:$0xff]  ;;  %v271_v31 = vld [vmem:[%s2441_s6 + $0x68] sm:$0xff] }
  0x2e   : > { %2099 = vmatpush3.bf16.msra.mxu1 %v2330_v34  ;;  %2231 = vmatpush3.bf16.msra.mxu0 %v2329_v27  ;;  %v260_v27 = vld [vmem:[%s2441_s6 + $0x10] sm:$0xff]  ;;  %v359_v26 = vld [vmem:[%s2441_s6 + $0x328] sm:$0xff] }
  0x2f   : > { %2100 = vmatprep.subr.bf16.mxu1 %v2331_v35  ;;  %907 = vmatprep.mubr.bf16.mxu0 %v424_v36  ;;  %v420_v34 = vpack.c.bf16 %v265_v28, %v260_v27  ;;  %v2347_v35 = vld [vmem:[%s3658_s1 + $0x100] sm:$0xff]   ;;  %v444_v36 = vpack.c.bf16 %v314_v30, %v309_v29  ;;  %v364_v27 = vld [vmem:[%s2441_s6 + $0x350] sm:$0xff]  ;;  %v321_v28 = vld [vmem:[%s2441_s6 + $0x1f8] sm:$0xff] }
  0x30   : > { %1003 = vmatprep.mubr.bf16.mxu1 %v484_v38  ;;  %2232 = vmatprep.subr.bf16.mxu0 %v2342_v58  ;;  %v308_v38 = vld [vmem:[%s2441_s6 + $0x190] sm:$0xff]  ;;  %v326_v29 = vld [vmem:[%s2441_s6 + $0x220] sm:$0xff]  ;;  %v331_v40 = vld [vmem:[%s2441_s6 + $0x248] sm:$0xff] }
  0x31   : > { %v443_v46 = vpack.c.bf16 %v313_v39, %v308_v38  ;;  %v369_v38 = vld [vmem:[%s2441_s6 + $0x378] sm:$0xff]  ;;  %v374_v39 = vld [vmem:[%s2441_s6 + $0x3a0] sm:$0xff] }
  0x32   : > { %2101 = vmatpush3.bf16.msra.mxu1 %v2332_v37  ;;  %2233 = vmatpush3.bf16.msra.mxu0 %v2342_v58  ;;  %v426_v37 = vpack.c.bf16 %v276_v32, %v271_v31  ;;  %v469_v32 = vpack.c.bf16 %v364_v27, %v359_v26 }
  0x33   : > { %2102 = vmatprep.subr.bf16.mxu1 %v2333_v43  ;;  %2234 = vmatprep.subr.bf16.mxu0 %v2346_v17  ;;  %v324_v43 = vld [vmem:[%s2441_s6 + $0x210] sm:$0xff] }
  0x35   : > { %908 = vmatmul.mubr.bf16.gmra.mxu0 %v423_v48  ;;  %1004 = vmatmul.mubr.bf16.gmra.mxu1 %v483_v49  ;;  %v449_v48 = vpack.c.bf16 %v324_v43, %v319_v42  ;;  %v431_v49 = vpack.c.bf16 %v286_v45, %v281_v44  ;;  %v474_v44 = vpack.c.bf16 %v374_v39, %v369_v38 }
  0x36   : > { %2103 = vmatpush3.bf16.msra.mxu1 %v2334_v50  ;;  %915 = vmatprep.mubr.bf16.mxu0 %v429_v51  ;;  %v318_v50 = vld [vmem:[%s2441_s6 + $0x1e0] sm:$0xff]  ;;  %v323_v51 = vld [vmem:[%s2441_s6 + $0x208] sm:$0xff]  ;;  %v456_v45 = vpack.c.bf16 %v336_v41, %v331_v40 }
  0x37   : > { %2104 = vmatprep.subr.bf16.mxu1 %v2335_v52  ;;  %1011 = vmatprep.mubr.bf16.mxu1 %v489_v53  ;;  %v280_v52 = vld [vmem:[%s2441_s6 + $0xb0] sm:$0xff]  ;;  %v285_v53 = vld [vmem:[%s2441_s6 + $0xd8] sm:$0xff]  ;;  %v448_v58 = vpack.c.bf16 %v323_v51, %v318_v50  ;;  %v346_v51 = vld [vmem:[%s2441_s6 + $0x2c0] sm:$0xff] }
  0x38   : > { %2235 = vmatpush3.bf16.msra.mxu0 %v2346_v17  ;;  %v430_v59 = vpack.c.bf16 %v285_v53, %v280_v52  ;;  %v316_v17 = vld [vmem:[%s2441_s6 + $0x1d0] sm:$0xff]  ;;  %v341_v50 = vld [vmem:[%s2441_s6 + $0x298] sm:$0xff]  ;;  %v262_v52 = vld [vmem:[%s2441_s6 + $0x20] sm:$0xff] }
  0x39   : > { %2236 = vmatprep.subr.bf16.mxu0 %v2347_v35  ;;  %v267_v53 = vld [vmem:[%s2441_s6 + $0x48] sm:$0xff]  ;;  %v461_v56 = vpack.c.bf16 %v346_v51, %v341_v50 }
  0x3a   : > { %2105 = vmatpush3.bf16.msra.mxu1 %v2336_v54  ;;  %v329_v54 = vld [vmem:[%s2441_s6 + $0x238] sm:$0xff]  ;;  %v422_v57 = vpack.c.bf16 %v267_v53, %v262_v52 }
  0x3b   : > { %2106 = vmatprep.subr.bf16.mxu1 %v2337_v60  ;;  %v454_v60 = vpack.c.bf16 %v334_v55, %v329_v54 }
  0x3c   : > { %2237 = vmatpush3.bf16.msra.mxu0 %v2347_v35  ;;  %v363_v35 = vld [vmem:[%s2441_s6 + $0x348] sm:$0xff] }
  0x3d   : > { %916 = vmatmul.mubr.bf16.gmra.mxu0 %v428_v1  ;;  %1012 = vmatmul.mubr.bf16.gmra.mxu1 %v488_v2  ;;  %v295_v1 = vld [vmem:[%s2441_s6 + $0x128] sm:$0xff] }
  0x3e   : > { %2107 = vmatpush3.bf16.msra.mxu1 %v2338_v3  ;;  %923 = vmatprep.mubr.bf16.mxu0 %v434_v4  ;;  %v339_v2 = vld [vmem:[%s2441_s6 + $0x288] sm:$0xff]  ;;  %v344_v3 = vld [vmem:[%s2441_s6 + $0x2b0] sm:$0xff]  ;;  %v301_v4 = vld [vmem:[%s2441_s6 + $0x158] sm:$0xff] }
  0x3f   : > { %2108 = vmatprep.subr.bf16.mxu1 %v2339_v5  ;;  %1019 = vmatprep.mubr.bf16.mxu1 %v494_v6  ;;  %v306_v5 = vld [vmem:[%s2441_s6 + $0x180] sm:$0xff]  ;;  %v453_v6 = vpack.c.bf16 %v333_v63, %v328_v62  ;;  %v459_v8 = vpack.c.bf16 %v344_v3, %v339_v2  ;;  %v351_v62 = vld [vmem:[%s2441_s6 + $0x2e8] sm:$0xff]  ;;  %v356_v63 = vld [vmem:[%s2441_s6 + $0x310] sm:$0xff] }
  0x40   : > { %v441_v9 = vpack.c.bf16 %v306_v5, %v301_v4  ;;  %v466_v4 = vpack.c.bf16 %v356_v63, %v351_v62 }
  0x42   : > { %2109 = vmatpush3.bf16.msra.mxu1 %v2340_v7  ;;  %v435_v7 = vpack.c.bf16 %v295_v1, %v290_v0  ;;  %v282_v0 = vld [vmem:[%s2441_s6 + $0xc0] sm:$0xff]  ;;  %v287_v1 = vld [vmem:[%s2441_s6 + $0xe8] sm:$0xff] }
  0x43   : > { %2110 = vmatprep.subr.bf16.mxu1 %v2341_v12  ;;  %v300_v12 = vld [vmem:[%s2441_s6 + $0x150] sm:$0xff]  ;;  %v432_v5 = vpack.c.bf16 %v287_v1, %v282_v0 }
  0x45   : > { %924 = vmatmul.mubr.bf16.gmra.mxu0 %v433_v18  ;;  %1020 = vmatmul.mubr.bf16.gmra.mxu1 %v493_v19  ;;  %v458_v18 = vpack.c.bf16 %v343_v11, %v338_v10  ;;  %v440_v19 = vpack.c.bf16 %v305_v13, %v300_v12  ;;  %v361_v10 = vld [vmem:[%s2441_s6 + $0x338] sm:$0xff]  ;;  %v366_v11 = vld [vmem:[%s2441_s6 + $0x360] sm:$0xff]  ;;  %v307_v13 = vld [vmem:[%s2441_s6 + $0x188] sm:$0xff] }
  0x46   : > { %2111 = vmatpush3.bf16.msra.mxu1 %v2343_v20  ;;  %931 = vmatprep.mubr.bf16.mxu0 %v439_v21  ;;  %v464_v20 = vpack.c.bf16 %v354_v15, %v349_v14  ;;  %v446_v21 = vpack.c.bf16 %v316_v17, %v311_v16  ;;  %v302_v12 = vld [vmem:[%s2441_s6 + $0x160] sm:$0xff]  ;;  %v471_v16 = vpack.c.bf16 %v366_v11, %v361_v10 }
  0x47   : > { %2112 = vmatprep.subr.bf16.mxu1 %v2344_v22  ;;  %1060 = vmatprep.mubr.bf16.mxu1 %v421_v23  ;;  %v348_v22 = vld [vmem:[%s2441_s6 + $0x2d0] sm:$0xff]  ;;  %v353_v23 = vld [vmem:[%s2441_s6 + $0x2f8] sm:$0xff]  ;;  %v442_v17 = vpack.c.bf16 %v307_v13, %v302_v12 }
  0x48   : > { %v463_v30 = vpack.c.bf16 %v353_v23, %v348_v22  ;;  %v371_v22 = vld [vmem:[%s2441_s6 + $0x388] sm:$0xff]  ;;  %v376_v23 = vld [vmem:[%s2441_s6 + $0x3b0] sm:$0xff] }
  0x4a   : > { %2113 = vmatpush3.bf16.msra.mxu1 %v2345_v24  ;;  %v310_v24 = vld [vmem:[%s2441_s6 + $0x1a0] sm:$0xff] }
  0x4b   : > { %v445_v31 = vpack.c.bf16 %v315_v25, %v310_v24  ;;  %v322_v24 = vld [vmem:[%s2441_s6 + $0x200] sm:$0xff]  ;;  %v327_v25 = vld [vmem:[%s2441_s6 + $0x228] sm:$0xff] }
  0x4d   : > { %932 = vmatmul.mubr.bf16.gmra.mxu0 %v438_v33  ;;  %1061 = vmatmul.mubr.bf16.vlgmr.msra.gmra.mxu1 %v420_v34  ;;  %v451_v33 = vpack.c.bf16 %v326_v29, %v321_v28  ;;  %v358_v34 = vld [vmem:[%s2441_s6 + $0x320] sm:$0xff]  ;;  %v476_v28 = vpack.c.bf16 %v376_v23, %v371_v22  ;;  %v452_v29 = vpack.c.bf16 %v327_v25, %v322_v24 }
  0x4e   : > { %939 = vmatprep.mubr.bf16.mxu0 %v444_v36  ;;  %1068 = vmatprep.mubr.bf16.mxu1 %v426_v37  ;;  %v320_v36 = vld [vmem:[%s2441_s6 + $0x1f0] sm:$0xff]  ;;  %v325_v37 = vld [vmem:[%s2441_s6 + $0x218] sm:$0xff]  ;;  %v468_v42 = vpack.c.bf16 %v363_v35, %v358_v34  ;;  %v386_v35 = vld [vmem:[%s2441_s6 + $0x400] sm:$0xff] }
  0x4f   : > { %v450_v43 = vpack.c.bf16 %v325_v37, %v320_v36  ;;  %v381_v34 = vld [vmem:[%s2441_s6 + $0x3d8] sm:$0xff]  ;;  %v342_v36 = vld [vmem:[%s2441_s6 + $0x2a0] sm:$0xff]  ;;  %v347_v37 = vld [vmem:[%s2441_s6 + $0x2c8] sm:$0xff] }
  0x50   : > { %v481_v40 = vpack.c.bf16 %v386_v35, %v381_v34  ;;  %v462_v41 = vpack.c.bf16 %v347_v37, %v342_v36 }
  0x55   : > { %940 = vmatmul.mubr.bf16.gmra.mxu0 %v443_v46  ;;  %1069 = vmatmul.mubr.bf16.gmra.mxu1 %v425_v47  ;;  %v368_v46 = vld [vmem:[%s2441_s6 + $0x370] sm:$0xff]  ;;  %v373_v47 = vld [vmem:[%s2441_s6 + $0x398] sm:$0xff] }
  0x56   : > { %947 = vmatprep.mubr.bf16.mxu0 %v449_v48  ;;  %1076 = vmatprep.mubr.bf16.mxu1 %v431_v49  ;;  %v330_v48 = vld [vmem:[%s2441_s6 + $0x240] sm:$0xff]  ;;  %v335_v49 = vld [vmem:[%s2441_s6 + $0x268] sm:$0xff]  ;;  %v473_v54 = vpack.c.bf16 %v373_v47, %v368_v46  ;;  %v396_v47 = vld [vmem:[%s2441_s6 + $0x450] sm:$0xff] }
  0x57   : > { %v455_v55 = vpack.c.bf16 %v335_v49, %v330_v48  ;;  %v391_v46 = vld [vmem:[%s2441_s6 + $0x428] sm:$0xff]  ;;  %v362_v48 = vld [vmem:[%s2441_s6 + $0x340] sm:$0xff] }
  0x58   : > { %v367_v49 = vld [vmem:[%s2441_s6 + $0x368] sm:$0xff]  ;;  %v486_v52 = vpack.c.bf16 %v396_v47, %v391_v46 }
  0x59   : > { %v472_v53 = vpack.c.bf16 %v367_v49, %v362_v48 }
  0x5d   : > { %948 = vmatmul.mubr.bf16.gmra.mxu0 %v448_v58  ;;  %1077 = vmatmul.mubr.bf16.gmra.mxu1 %v430_v59  ;;  %v340_v58 = vld [vmem:[%s2441_s6 + $0x290] sm:$0xff]  ;;  %v345_v59 = vld [vmem:[%s2441_s6 + $0x2b8] sm:$0xff] }
  0x5e   : > { %955 = vmatprep.mubr.bf16.mxu0 %v454_v60  ;;  %1084 = vmatprep.mubr.bf16.mxu1 %v436_v61  ;;  %v272_v60 = vld [vmem:[%s2441_s6 + $0x70] sm:$0xff]  ;;  %v277_v61 = vld [vmem:[%s2441_s6 + $0x98] sm:$0xff]  ;;  %v460_v2 = vpack.c.bf16 %v345_v59, %v340_v58  ;;  %v406_v59 = vld [vmem:[%s2441_s6 + $0x4a0] sm:$0xff] }
  0x5f   : > { %v427_v3 = vpack.c.bf16 %v277_v61, %v272_v60  ;;  %v401_v58 = vld [vmem:[%s2441_s6 + $0x478] sm:$0xff]  ;;  %v382_v60 = vld [vmem:[%s2441_s6 + $0x3e0] sm:$0xff]  ;;  %v387_v61 = vld [vmem:[%s2441_s6 + $0x408] sm:$0xff] }
  0x60   : > { %v491_v0 = vpack.c.bf16 %v406_v59, %v401_v58  ;;  %v482_v1 = vpack.c.bf16 %v387_v61, %v382_v60 }
  0x65   : > { %956 = vmatmul.mubr.bf16.gmra.mxu0 %v453_v6  ;;  %1085 = vmatmul.mubr.bf16.gmra.mxu1 %v435_v7  ;;  %v350_v6 = vld [vmem:[%s2441_s6 + $0x2e0] sm:$0xff]  ;;  %v355_v7 = vld [vmem:[%s2441_s6 + $0x308] sm:$0xff] }
  0x66   : > { %963 = vmatprep.mubr.bf16.mxu0 %v459_v8  ;;  %1092 = vmatprep.mubr.bf16.mxu1 %v441_v9  ;;  %v292_v8 = vld [vmem:[%s2441_s6 + $0x110] sm:$0xff]  ;;  %v297_v9 = vld [vmem:[%s2441_s6 + $0x138] sm:$0xff]  ;;  %v465_v14 = vpack.c.bf16 %v355_v7, %v350_v6  ;;  %v411_v6 = vld [vmem:[%s2441_s6 + $0x4c8] sm:$0xff] }
  0x67   : > { %v437_v15 = vpack.c.bf16 %v297_v9, %v292_v8  ;;  %v416_v7 = vld [vmem:[%s2441_s6 + $0x4f0] sm:$0xff]  ;;  %v402_v8 = vld [vmem:[%s2441_s6 + $0x480] sm:$0xff]  ;;  %v407_v9 = vld [vmem:[%s2441_s6 + $0x4a8] sm:$0xff] }
  0x68   : > { %v496_v12 = vpack.c.bf16 %v416_v7, %v411_v6  ;;  %v492_v13 = vpack.c.bf16 %v407_v9, %v402_v8 }
  0x6d   : > { %964 = vmatmul.mubr.bf16.gmra.mxu0 %v458_v18  ;;  %1093 = vmatmul.mubr.bf16.gmra.mxu1 %v440_v19  ;;  %v360_v18 = vld [vmem:[%s2441_s6 + $0x330] sm:$0xff]  ;;  %v365_v19 = vld [vmem:[%s2441_s6 + $0x358] sm:$0xff] }
  0x6e   : > { %971 = vmatprep.mubr.bf16.mxu0 %v464_v20  ;;  %1100 = vmatprep.mubr.bf16.mxu1 %v446_v21  ;;  %v312_v20 = vld [vmem:[%s2441_s6 + $0x1b0] sm:$0xff]  ;;  %v317_v21 = vld [vmem:[%s2441_s6 + $0x1d8] sm:$0xff]  ;;  %v470_v26 = vpack.c.bf16 %v365_v19, %v360_v18 }
  0x6f   : > { %v447_v27 = vpack.c.bf16 %v317_v21, %v312_v20  ;;  %v2374_v20 = vmov 0.0  }
  0x70   : > { %228 = vst.msk [vmem:[#allocation2 + $0x10] sm:$0xff] %vm225_vm1, %v2374_v20  ;;  %226 = vst.msk [vmem:[#allocation2] sm:$0xff] %vm225_vm1, %v2374_v20 }
  0x71   : > { %227 = vst.msk [vmem:[#allocation2 + $0x8] sm:$0xff] %vm225_vm1, %v2374_v20  ;;  %229 = vst.msk [vmem:[#allocation2 + $0x18] sm:$0xff] %vm225_vm1, %v2374_v20 }
  0x72   : > { %230 = vst.msk [vmem:[#allocation2 + $0x20] sm:$0xff] %vm225_vm1, %v2374_v20  ;;  %231 = vst.msk [vmem:[#allocation2 + $0x28] sm:$0xff] %vm225_vm1, %v2374_v20 }
  0x73   : > { %232 = vst.msk [vmem:[#allocation2 + $0x30] sm:$0xff] %vm225_vm1, %v2374_v20  ;;  %233 = vst.msk [vmem:[#allocation2 + $0x38] sm:$0xff] %vm225_vm1, %v2374_v20 }
  0x74   : > { %234 = vst.msk [vmem:[#allocation2 + $0x40] sm:$0xff] %vm225_vm1, %v2374_v20  ;;  %235 = vst.msk [vmem:[#allocation2 + $0x48] sm:$0xff] %vm225_vm1, %v2374_v20 }
  0x75   : > { %972 = vmatmul.mubr.bf16.gmra.mxu0 %v463_v30  ;;  %1101 = vmatmul.mubr.bf16.gmra.mxu1 %v445_v31  ;;  %v370_v30 = vld [vmem:[%s2441_s6 + $0x380] sm:$0xff]  ;;  %v375_v31 = vld [vmem:[%s2441_s6 + $0x3a8] sm:$0xff]  ;;  %236 = vst.msk [vmem:[#allocation2 + $0x50] sm:$0xff] %vm225_vm1, %v2374_v20  ;;  %237 = vst.msk [vmem:[#allocation2 + $0x58] sm:$0xff] %vm225_vm1, %v2374_v20 }
  0x76   : > { %979 = vmatprep.mubr.bf16.mxu0 %v469_v32  ;;  %1108 = vmatprep.mubr.bf16.mxu1 %v451_v33  ;;  %v332_v32 = vld [vmem:[%s2441_s6 + $0x250] sm:$0xff]  ;;  %v337_v33 = vld [vmem:[%s2441_s6 + $0x278] sm:$0xff]  ;;  %v475_v38 = vpack.c.bf16 %v375_v31, %v370_v30  ;;  %238 = vst.msk [vmem:[#allocation2 + $0x60] sm:$0xff] %vm225_vm1, %v2374_v20  ;;  %239 = vst.msk [vmem:[#allocation2 + $0x68] sm:$0xff] %vm225_vm1, %v2374_v20 }
  0x77   : > { %v457_v39 = vpack.c.bf16 %v337_v33, %v332_v32  ;;  %240 = vst.msk [vmem:[#allocation2 + $0x70] sm:$0xff] %vm225_vm1, %v2374_v20  ;;  %241 = vst.msk [vmem:[#allocation2 + $0x78] sm:$0xff] %vm225_vm1, %v2374_v20 }
  0x78   : > { %242 = vst.msk [vmem:[#allocation2 + $0x80] sm:$0xff] %vm225_vm1, %v2374_v20  ;;  %243 = vst.msk [vmem:[#allocation2 + $0x88] sm:$0xff] %vm225_vm1, %v2374_v20 }
  0x79   : > { %244 = vst.msk [vmem:[#allocation2 + $0x90] sm:$0xff] %vm225_vm1, %v2374_v20  ;;  %245 = vst.msk [vmem:[#allocation2 + $0x98] sm:$0xff] %vm225_vm1, %v2374_v20 }
  0x7a   : > { %246 = vst.msk [vmem:[#allocation2 + $0xa0] sm:$0xff] %vm225_vm1, %v2374_v20  ;;  %247 = vst.msk [vmem:[#allocation2 + $0xa8] sm:$0xff] %vm225_vm1, %v2374_v20 }
  0x7b   : > { %248 = vst.msk [vmem:[#allocation2 + $0xb0] sm:$0xff] %vm225_vm1, %v2374_v20  ;;  %249 = vst.msk [vmem:[#allocation2 + $0xb8] sm:$0xff] %vm225_vm1, %v2374_v20 }
  0x7c   : > { %250 = vst.msk [vmem:[#allocation2 + $0xc0] sm:$0xff] %vm225_vm1, %v2374_v20  ;;  %251 = vst.msk [vmem:[#allocation2 + $0xc8] sm:$0xff] %vm225_vm1, %v2374_v20 }
  0x7d   : > { %980 = vmatmul.mubr.bf16.gmra.mxu0 %v468_v42  ;;  %1109 = vmatmul.mubr.bf16.gmra.mxu1 %v450_v43  ;;  %v380_v42 = vld [vmem:[%s2441_s6 + $0x3d0] sm:$0xff]  ;;  %v385_v43 = vld [vmem:[%s2441_s6 + $0x3f8] sm:$0xff]  ;;  %252 = vst.msk [vmem:[#allocation2 + $0xd0] sm:$0xff] %vm225_vm1, %v2374_v20  ;;  %253 = vst.msk [vmem:[#allocation2 + $0xd8] sm:$0xff] %vm225_vm1, %v2374_v20 }
  0x7e   : > { %987 = vmatprep.mubr.bf16.mxu0 %v474_v44  ;;  %1116 = vmatprep.mubr.bf16.mxu1 %v456_v45  ;;  %v352_v44 = vld [vmem:[%s2441_s6 + $0x2f0] sm:$0xff]  ;;  %v357_v45 = vld [vmem:[%s2441_s6 + $0x318] sm:$0xff]  ;;  %v480_v50 = vpack.c.bf16 %v385_v43, %v380_v42  ;;  %254 = vst.msk [vmem:[#allocation2 + $0xe0] sm:$0xff] %vm225_vm1, %v2374_v20  ;;  %255 = vst.msk [vmem:[#allocation2 + $0xe8] sm:$0xff] %vm225_vm1, %v2374_v20 }
  0x7f   : > { %v467_v51 = vpack.c.bf16 %v357_v45, %v352_v44  ;;  %256 = vst.msk [vmem:[#allocation2 + $0xf0] sm:$0xff] %vm225_vm1, %v2374_v20  ;;  %257 = vst.msk [vmem:[#allocation2 + $0xf8] sm:$0xff] %vm225_vm1, %v2374_v20 }
  0x85   : > { %988 = vmatmul.mubr.bf16.gmra.mxu0 %v473_v54  ;;  %1117 = vmatmul.mubr.bf16.gmra.mxu1 %v455_v55  ;;  %v390_v54 = vld [vmem:[%s2441_s6 + $0x420] sm:$0xff]  ;;  %v395_v55 = vld [vmem:[%s2441_s6 + $0x448] sm:$0xff] }
  0x86   : > { %1124 = vmatprep.mubr.bf16.mxu1 %v461_v56  ;;  %2238 = vmatprep.mubr.msk.bf16.mxu0 %vm818_vm0, %v422_v57  ;;  %v372_v56 = vld [vmem:[%s2441_s6 + $0x390] sm:$0xff]  ;;  %v377_v57 = vld [vmem:[%s2441_s6 + $0x3b8] sm:$0xff]  ;;  %v485_v62 = vpack.c.bf16 %v395_v55, %v390_v54 }
  0x87   : > { %v477_v63 = vpack.c.bf16 %v377_v57, %v372_v56 }
  0x8d   : > { %1125 = vmatmul.mubr.bf16.gmra.mxu1 %v460_v2  ;;  %2239 = vmatmul.mubr.msk.bf16.vlgmr.msra.gmra.mxu0 %vm818_vm0, %v427_v3  ;;  %v400_v2 = vld [vmem:[%s2441_s6 + $0x470] sm:$0xff]  ;;  %v405_v3 = vld [vmem:[%s2441_s6 + $0x498] sm:$0xff] }
  0x8e   : > { %1132 = vmatprep.mubr.bf16.mxu1 %v466_v4  ;;  %2242 = vmatprep.mubr.msk.bf16.mxu0 %vm818_vm0, %v432_v5  ;;  %v392_v4 = vld [vmem:[%s2441_s6 + $0x430] sm:$0xff]  ;;  %v397_v5 = vld [vmem:[%s2441_s6 + $0x458] sm:$0xff]  ;;  %v490_v10 = vpack.c.bf16 %v405_v3, %v400_v2 }
  0x8f   : > { %v487_v11 = vpack.c.bf16 %v397_v5, %v392_v4 }
  0x95   : > { %1133 = vmatmul.mubr.bf16.gmra.mxu1 %v465_v14  ;;  %2243 = vmatmul.mubr.msk.bf16.gmra.mxu0 %vm818_vm0, %v437_v15  ;;  %v410_v14 = vld [vmem:[%s2441_s6 + $0x4c0] sm:$0xff]  ;;  %v415_v15 = vld [vmem:[%s2441_s6 + $0x4e8] sm:$0xff] }
  0x96   : > { %1140 = vmatprep.mubr.bf16.mxu1 %v471_v16  ;;  %2246 = vmatprep.mubr.msk.bf16.mxu0 %vm818_vm0, %v442_v17  ;;  %v412_v16 = vld [vmem:[%s2441_s6 + $0x4d0] sm:$0xff]  ;;  %v417_v17 = vld [vmem:[%s2441_s6 + $0x4f8] sm:$0xff]  ;;  %v495_v18 = vpack.c.bf16 %v415_v15, %v410_v14  ;;  %s1985_s6 = sshll.u32 %s3726_s9, 8 }
  0x97   : > { %v497_v19 = vpack.c.bf16 %v417_v17, %v412_v16  ;;  %s3432_s20 = scalar_lea.vmem %s3659_s2, %s1985_s6 }
  0x9d   : > { %1141 = vmatmul.mubr.bf16.gmra.mxu1 %v470_v26  ;;  %2247 = vmatmul.mubr.msk.bf16.gmra.mxu0 %vm818_vm0, %v447_v27 }
  0x9e   : > { %1148 = vmatprep.mubr.bf16.mxu1 %v476_v28  ;;  %2250 = vmatprep.mubr.msk.bf16.mxu0 %vm818_vm0, %v452_v29 }
  0xa5   : > { %1149 = vmatmul.mubr.bf16.gmra.mxu1 %v475_v38  ;;  %2251 = vmatmul.mubr.msk.bf16.gmra.mxu0 %vm818_vm0, %v457_v39 }
  0xa6   : > { %1156 = vmatprep.mubr.bf16.mxu1 %v481_v40  ;;  %2254 = vmatprep.mubr.msk.bf16.mxu0 %vm818_vm0, %v462_v41 }
  0xad   : > { %1157 = vmatmul.mubr.bf16.gmra.mxu1 %v480_v50  ;;  %2255 = vmatmul.mubr.msk.bf16.gmra.mxu0 %vm818_vm0, %v467_v51 }
  0xae   : > { %1164 = vmatprep.mubr.bf16.mxu1 %v486_v52  ;;  %2258 = vmatprep.mubr.msk.bf16.mxu0 %vm818_vm0, %v472_v53 }
  0xb5   : > { %1165 = vmatmul.mubr.bf16.gmra.mxu1 %v485_v62  ;;  %2259 = vmatmul.mubr.msk.bf16.gmra.mxu0 %vm818_vm0, %v477_v63 }
  0xb6   : > { %1172 = vmatprep.mubr.bf16.mxu1 %v491_v0  ;;  %2262 = vmatprep.mubr.msk.bf16.mxu0 %vm818_vm0, %v482_v1 }
  0xbd   : > { %1173 = vmatmul.mubr.bf16.gmra.mxu1 %v490_v10  ;;  %2263 = vmatmul.mubr.msk.bf16.gmra.mxu0 %vm818_vm0, %v487_v11 }
  0xbe   : > { %1180 = vmatprep.mubr.bf16.mxu1 %v496_v12  ;;  %2266 = vmatprep.mubr.msk.bf16.mxu0 %vm818_vm0, %v492_v13 }
  0xc5   : > { %1181 = vmatmul.mubr.bf16.gmra.mxu1 %v495_v18  ;;  %2267 = vmatmul.mubr.msk.bf16.gmra.mxu0 %vm818_vm0, %v497_v19 }
  0xed   : > { %v2002_v21 = vpop.f32.mrf.mxu0  ;;  %v2074_v22 = vpop.f32.mrf.mxu1 }
  0xef   : > { %v2003_v23 = vpop.f32.mrf.mxu0  ;;  %v2075_v24 = vpop.f32.mrf.mxu1 }
  0xf0   : > { %v2732_v25 = vadd.f32 %v2003_v23, %v2002_v21  ;;  %v2734_v26 = vadd.f32 %v2075_v24, %v2074_v22 }
  0xf1   : > { %v2005_v27 = vpop.f32.mrf.mxu0  ;;  %v2077_v28 = vpop.f32.mrf.mxu1 }
  0xf2   : > { %3660 = vst [vmem:[#allocation3_spill] sm:$0xff] %v2734_v26 }
  0xf3   : > { %v2006_v29 = vpop.f32.mrf.mxu0  ;;  %v2078_v30 = vpop.f32.mrf.mxu1 }
  0xf4   : > { %v2736_v31 = vadd.f32 %v2006_v29, %v2005_v27  ;;  %v2738_v32 = vadd.f32 %v2078_v30, %v2077_v28 }
  0xf5   : > { %v2008_v33 = vpop.f32.mrf.mxu0  ;;  %v2080_v34 = vpop.f32.mrf.mxu1 }
  0xf6   : > { %3661 = vst [vmem:[#allocation4_spill] sm:$0xff] %v2738_v32 }
  0xf7   : > { %v2009_v35 = vpop.f32.mrf.mxu0  ;;  %v2081_v36 = vpop.f32.mrf.mxu1 }
  0xf8   : > { %v2740_v37 = vadd.f32 %v2009_v35, %v2008_v33  ;;  %v2742_v38 = vadd.f32 %v2081_v36, %v2080_v34 }
  0xf9   : > { %v2011_v39 = vpop.f32.mrf.mxu0  ;;  %v2083_v40 = vpop.f32.mrf.mxu1 }
  0xfa   : > { %3662 = vst [vmem:[#allocation5_spill] sm:$0xff] %v2742_v38 }
  0xfb   : > { %v2012_v41 = vpop.f32.mrf.mxu0  ;;  %v2084_v42 = vpop.f32.mrf.mxu1 }
  0xfc   : > { %v2744_v43 = vadd.f32 %v2012_v41, %v2011_v39  ;;  %v2746_v44 = vadd.f32 %v2084_v42, %v2083_v40 }
  0xfd   : > { %v2014_v45 = vpop.f32.mrf.mxu0  ;;  %v2086_v46 = vpop.f32.mrf.mxu1 }
  0xfe   : > { %3663 = vst [vmem:[#allocation6_spill] sm:$0xff] %v2746_v44 }
  0xff   : > { %v2015_v47 = vpop.f32.mrf.mxu0  ;;  %v2087_v48 = vpop.f32.mrf.mxu1 }
 0x100   : > { %v2748_v49 = vadd.f32 %v2015_v47, %v2014_v45  ;;  %v2750_v50 = vadd.f32 %v2087_v48, %v2086_v46 }
 0x101   : > { %v2017_v51 = vpop.f32.mrf.mxu0  ;;  %v2089_v52 = vpop.f32.mrf.mxu1 }
 0x102   : > { %3664 = vst [vmem:[#allocation7_spill] sm:$0xff] %v2750_v50 }
 0x103   : > { %v2018_v53 = vpop.f32.mrf.mxu0  ;;  %v2090_v54 = vpop.f32.mrf.mxu1 }
 0x104   : > { %v2752_v55 = vadd.f32 %v2018_v53, %v2017_v51  ;;  %v2754_v56 = vadd.f32 %v2090_v54, %v2089_v52 }
 0x105   : > { %v2020_v57 = vpop.f32.mrf.mxu0  ;;  %v2092_v58 = vpop.f32.mrf.mxu1 }
 0x106   : > { %3665 = vst [vmem:[#allocation8_spill] sm:$0xff] %v2754_v56 }
 0x107   : > { %v2021_v59 = vpop.f32.mrf.mxu0  ;;  %v2093_v60 = vpop.f32.mrf.mxu1 }
 0x108   : > { %v2756_v61 = vadd.f32 %v2021_v59, %v2020_v57  ;;  %v2758_v62 = vadd.f32 %v2093_v60, %v2092_v58 }
 0x109   : > { %v2023_v63 = vpop.f32.mrf.mxu0  ;;  %v2095_v0 = vpop.f32.mrf.mxu1 }
 0x10a   : > { %3666 = vst [vmem:[#allocation9_spill] sm:$0xff] %v2758_v62 }
 0x10b   : > { %v2024_v1 = vpop.f32.mrf.mxu0  ;;  %v2096_v2 = vpop.f32.mrf.mxu1 }
 0x10c   : > { %v2760_v3 = vadd.f32 %v2024_v1, %v2023_v63  ;;  %v2762_v4 = vadd.f32 %v2096_v2, %v2095_v0 }
 0x10d   : > { %v2026_v5 = vpop.f32.mrf.mxu0  ;;  %v2764_v6 = vpop.f32.mrf.mxu1 }
 0x10e   : > { %3667 = vst [vmem:[#allocation10_spill] sm:$0xff] %v2762_v4 }
 0x10f   : > { %v2027_v7 = vpop.f32.mrf.mxu0  ;;  %v2766_v8 = vpop.f32.mrf.mxu1 }
 0x110   : > { %v2768_v9 = vadd.f32 %v2027_v7, %v2026_v5 }
 0x111   : > { %v2029_v10 = vpop.f32.mrf.mxu0  ;;  %v2770_v11 = vpop.f32.mrf.mxu1 }
 0x113   : > { %v2030_v12 = vpop.f32.mrf.mxu0  ;;  %v2772_v13 = vpop.f32.mrf.mxu1 }
 0x114   : > { %v2774_v14 = vadd.f32 %v2030_v12, %v2029_v10 }
 0x115   : > { %v2032_v15 = vpop.f32.mrf.mxu0  ;;  %v2120_v16 = vpop.f32.mrf.mxu1 }
 0x117   : > { %v2033_v17 = vpop.f32.mrf.mxu0  ;;  %v2121_v18 = vpop.f32.mrf.mxu1 }
 0x118   : > { %v2776_v19 = vadd.f32 %v2033_v17, %v2032_v15  ;;  %v2122_v26 = vadd.f32 %v2121_v18, %v2120_v16  ;;  %v2119_v16 = vadd.f32 %v2772_v13, %v2770_v11 }
 0x119   : > { %v2035_v20 = vpop.f32.mrf.mxu0  ;;  %v2123_v21 = vpop.f32.mrf.mxu1 }
 0x11a   : > { %v1066_v11 = vadd.f32 %v2119_v16, %v2736_v31 }
 0x11b   : > { %v2036_v22 = vpop.f32.mrf.mxu0  ;;  %v2124_v23 = vpop.f32.mrf.mxu1 }
 0x11c   : > { %v2778_v24 = vadd.f32 %v2036_v22, %v2035_v20 }
 0x11d   : > { %v2038_v27 = vpop.f32.mrf.mxu0  ;;  %v2780_v28 = vpop.f32.mrf.mxu1 }
 0x11f   : > { %v2039_v29 = vpop.f32.mrf.mxu0  ;;  %v2782_v30 = vpop.f32.mrf.mxu1 }
 0x120   : > { %v2784_v33 = vadd.f32 %v2039_v29, %v2038_v27 }
 0x121   : > { %v2041_v34 = vpop.f32.mrf.mxu0  ;;  %v2786_v35 = vpop.f32.mrf.mxu1 }
 0x123   : > { %v2042_v36 = vpop.f32.mrf.mxu0  ;;  %v2788_v39 = vpop.f32.mrf.mxu1 }
 0x124   : > { %v2790_v40 = vadd.f32 %v2042_v36, %v2041_v34 }
 0x125   : > { %v2792_v41 = vpop.f32.mrf.mxu0  ;;  %v2132_v42 = vpop.f32.mrf.mxu1 }
 0x127   : > { %v2794_v45 = vpop.f32.mrf.mxu0  ;;  %v2133_v46 = vpop.f32.mrf.mxu1 }
 0x129   : > { %v2796_v47 = vpop.f32.mrf.mxu0  ;;  %v2798_v48 = vpop.f32.mrf.mxu1 }
 0x12b   : > { %v2800_v51 = vpop.f32.mrf.mxu0  ;;  %v2136_v52 = vpop.f32.mrf.mxu1 }
 0x12d   : > { %v2802_v53 = vpop.f32.mrf.mxu0  ;;  %v2804_v54 = vpop.f32.mrf.mxu1 }
 0x12e   : > { %3668 = vst [vmem:[#allocation11_spill] sm:$0xff] %v2802_v53 }
 0x12f   : > { %v2806_v57 = vpop.f32.mrf.mxu0  ;;  %v2808_v58 = vpop.f32.mrf.mxu1 }
 0x130   : > { %3669 = vst [vmem:[#allocation12_spill] sm:$0xff] %v2806_v57 }
 0x131   : > { %v2810_v59 = vpop.f32.mrf.mxu0  ;;  %v2812_v60 = vpop.f32.mrf.mxu1 }
 0x132   : > { %3670 = vst [vmem:[#allocation13_spill] sm:$0xff] %v2810_v59 }
 0x133   : > { %v2814_v63 = vpop.f32.mrf.mxu0  ;;  %v2816_v0 = vpop.f32.mrf.mxu1 }
 0x134   : > { %3671 = vst [vmem:[#allocation14_spill] sm:$0xff] %v2814_v63  ;;  %v2125_v63 = vadd.f32 %v2124_v23, %v2123_v21 }
 0x135   : > { %v2818_v1 = vpop.f32.mrf.mxu0  ;;  %v2820_v2 = vpop.f32.mrf.mxu1 }
 0x136   : > { %v1074_v21 = vadd.f32 %v2125_v63, %v2744_v43 }
 0x137   : > { %v2822_v5 = vpop.f32.mrf.mxu0  ;;  %v2824_v7 = vpop.f32.mrf.mxu1 }
 0x139   : > { %v2826_v10 = vpop.f32.mrf.mxu0  ;;  %v2828_v12 = vpop.f32.mrf.mxu1 }
 0x13a   : > { %3672 = vst [vmem:[#allocation15_spill] sm:$0xff] %v2826_v10 }
 0x13b   : > { %v2830_v15 = vpop.f32.mrf.mxu0  ;;  %v2832_v17 = vpop.f32.mrf.mxu1 }
 0x13c   : > { %3673 = vst [vmem:[#allocation16_spill] sm:$0xff] %v2830_v15 }
 0x13d   : > { %v2834_v20 = vpop.f32.mrf.mxu0  ;;  %v2836_v22 = vpop.f32.mrf.mxu1 }
 0x13e   : > { %3674 = vst [vmem:[#allocation17_spill] sm:$0xff] %v2834_v20 }
 0x13f   : > { %v2838_v27 = vpop.f32.mrf.mxu0  ;;  %v2840_v29 = vpop.f32.mrf.mxu1 }
 0x140   : > { %3675 = vst [vmem:[#allocation18_spill] sm:$0xff] %v2838_v27 }
 0x141   : > { %v2842_v34 = vpop.f32.mrf.mxu0  ;;  %v2844_v36 = vpop.f32.mrf.mxu1 }
 0x142   : > { %3676 = vst [vmem:[#allocation19_spill] sm:$0xff] %v2842_v34  ;;  %v2116_v34 = vadd.f32 %v2766_v8, %v2764_v6  ;;  %v570_v6 = vld [vmem:[#allocation2] sm:$0xff] }
 0x143   : > { %v2846_v4 = vpop.f32.mrf.mxu0  ;;  %v2848_v56 = vpop.f32.mrf.mxu1 }
 0x144   : > { %3677 = vst [vmem:[#allocation20_spill] sm:$0xff] %v2846_v4 }
 0x145   : > { %v2850_v62 = vpop.f32.mrf.mxu0  ;;  %v2852_v50 = vpop.f32.mrf.mxu1 }
 0x146   : > { %3678 = vst [vmem:[#allocation21_spill] sm:$0xff] %v2850_v62  ;;  %v1071_v62 = vadd.f32 %v2122_v26, %v2740_v37  ;;  %v573_v37 = vld [vmem:[#allocation2 + $0x18] sm:$0xff] }
 0x147   : > { %v2854_v32 = vpop.f32.mrf.mxu0  ;;  %v2856_v44 = vpop.f32.mrf.mxu1 }
 0x148   : > { %3679 = vst [vmem:[#allocation22_spill] sm:$0xff] %v2854_v32  ;;  %v572_v32 = vld [vmem:[#allocation2 + $0x10] sm:$0xff] }
 0x149   : > { %v2858_v38 = vpop.f32.mrf.mxu0  ;;  %v2860_v27 = vpop.f32.mrf.mxu1 }
 0x14a   : > { %3680 = vst [vmem:[#allocation23_spill] sm:$0xff] %v2858_v38  ;;  %v1063_v38 = vadd.f32 %v2116_v34, %v2732_v25 }
 0x14b   : > { %v2864_v20 = vpop.f32.mrf.mxu0  ;;  %v2866_v4 = vpop.f32.mrf.mxu1 }
 0x14c   : > { %3681 = vst [vmem:[#allocation24_spill] sm:$0xff] %v2864_v20  ;;  %v2134_v20 = vadd.f32 %v2133_v46, %v2132_v42  ;;  %v571_v42 = vld [vmem:[#allocation2 + $0x8] sm:$0xff] }
 0x14d   : > { %v2869_v59 = vpop.f32.mrf.mxu1  ;;  %v2240_v15 = vpop.f32.mrf.mxu0 }
 0x14e   : > { %3682 = vst [vmem:[#allocation25_spill] sm:$0xff] %v2869_v59  ;;  %v1232_v18 = vadd.f32 %v2240_v15, %v1071_v62  ;;  %v2128_v59 = vadd.f32 %v2782_v30, %v2780_v28  ;;  %v1087_v63 = vadd.f32 %v2134_v20, %v2756_v61  ;;  %v576_v28 = vld [vmem:[#allocation2 + $0x30] sm:$0xff]  ;;  %v2146_v61 = vadd.f32 %v2824_v7, %v2820_v2 }
 0x14f   : > { %v2874_v10 = vpop.f32.mrf.mxu1  ;;  %v1223_v8 = vpop.f32.mrf.mxu0  ;;  %v2149_v2 = vadd.f32 %v2832_v17, %v2828_v12 }
 0x150   : > { %v1352_v57 = vadd.f32 %v1232_v18, %v572_v32  ;;  %v1224_v53 = vadd.f32 %v1223_v8, %v1063_v38  ;;  %v2137_v38 = vadd.f32 %v2136_v52, %v2798_v48  ;;  %v1079_v34 = vadd.f32 %v2128_v59, %v2748_v49  ;;  %v574_v52 = vld [vmem:[#allocation2 + $0x20] sm:$0xff] }
 0x151   : > { %v2877_v26 = vpop.f32.mrf.mxu1  ;;  %v2241_v23 = vpop.f32.mrf.mxu0  ;;  %v2140_v49 = vadd.f32 %v2808_v58, %v2804_v54  ;;  %v2143_v54 = vadd.f32 %v2816_v0, %v2812_v60  ;;  %v578_v0 = vld [vmem:[#allocation2 + $0x40] sm:$0xff] }
 0x152   : > { %1385 = vst.msk [vmem:[#allocation2 + $0x10] sm:$0xff] %vm225_vm1, %v1352_v57  ;;  %v1350_v62 = vadd.f32 %v1224_v53, %v570_v6  ;;  %v1235_v25 = vadd.f32 %v2241_v23, %v1074_v21  ;;  %v2131_v53 = vadd.f32 %v2788_v39, %v2786_v35  ;;  %v1090_v6 = vadd.f32 %v2137_v38, %v2760_v3  ;;  %v577_v39 = vld [vmem:[#allocation2 + $0x38] sm:$0xff]  ;;  %v575_v23 = vld [vmem:[#allocation2 + $0x28] sm:$0xff] }
 0x153   : > { %v2883_v13 = vpop.f32.mrf.mxu1  ;;  %v1226_v32 = vpop.f32.mrf.mxu0  ;;  %v1095_v38 = vadd.f32 %v2140_v49, %v2768_v9  ;;  %v579_v49 = vld [vmem:[#allocation2 + $0x48] sm:$0xff] }
 0x154   : > { %1383 = vst.msk [vmem:[#allocation2] sm:$0xff] %vm225_vm1, %v1350_v62  ;;  %v1353_v43 = vadd.f32 %v1235_v25, %v573_v37  ;;  %v1227_v46 = vadd.f32 %v1226_v32, %v1066_v11  ;;  %v1082_v37 = vadd.f32 %v2131_v53, %v2752_v55  ;;  %v1103_v11 = vadd.f32 %v2146_v61, %v2776_v19  ;;  %v580_v55 = vld [vmem:[#allocation2 + $0x50] sm:$0xff] }
 0x155   : > { %v2888_v15 = vpop.f32.mrf.mxu1  ;;  %v2244_v30 = vpop.f32.mrf.mxu0  ;;  %v2152_v61 = vadd.f32 %v2840_v29, %v2836_v22 }
 0x156   : > { %1386 = vst.msk [vmem:[#allocation2 + $0x18] sm:$0xff] %vm225_vm1, %v1353_v43  ;;  %v1351_v31 = vadd.f32 %v1227_v46, %v571_v42  ;;  %v1248_v57 = vadd.f32 %v2244_v30, %v1087_v63  ;;  %v2158_v43 = vadd.f32 %v2856_v44, %v2852_v50  ;;  %v2046_v50 = vadd.f32 %v2794_v45, %v2792_v41 }
 0x157   : > { %v2894_v48 = vpop.f32.mrf.mxu1  ;;  %v1239_v16 = vpop.f32.mrf.mxu0  ;;  %v2161_v41 = vadd.f32 %v2866_v4, %v2860_v27  ;;  %v2155_v4 = vadd.f32 %v2848_v56, %v2844_v36  ;;  %v582_v36 = vld [vmem:[#allocation2 + $0x60] sm:$0xff] }
 0x158   : > { %1384 = vst.msk [vmem:[#allocation2 + $0x8] sm:$0xff] %vm225_vm1, %v1351_v31  ;;  %v1356_v20 = vadd.f32 %v1248_v57, %v576_v28  ;;  %v1240_v18 = vadd.f32 %v1239_v16, %v1079_v34  ;;  %v1106_v28 = vadd.f32 %v2149_v2, %v2778_v24  ;;  %v1098_v16 = vadd.f32 %v2143_v54, %v2774_v14 }
 0x159   : > { %v2900_v35 = vpop.f32.mrf.mxu1  ;;  %v2245_v8 = vpop.f32.mrf.mxu0  ;;  %v2922_v46 = vld [vmem:[#allocation2 + $0x10] sm:$0xff]  ;;  %v1111_v54 = vadd.f32 %v2152_v61, %v2784_v33  ;;  %v2058_v33 = vadd.f32 %v2822_v5, %v2818_v1  ;;  %v3685_v1 = vld [vmem:[#allocation12_spill] sm:$0xff] }
 0x15a   : > { %1389 = vst.msk [vmem:[#allocation2 + $0x30] sm:$0xff] %vm225_vm1, %v1356_v20  ;;  %v1354_v59 = vadd.f32 %v1240_v18, %v574_v52  ;;  %v1251_v21 = vadd.f32 %v2245_v8, %v1090_v6  ;;  %v581_v52 = vld [vmem:[#allocation2 + $0x58] sm:$0xff]  ;;  %v1453_v20 = vsel %vm225_vm1, %v2922_v46, 0.0 }
 0x15b   : > { %v2908_v7 = vpop.f32.mrf.mxu1  ;;  %v1242_v3 = vpop.f32.mrf.mxu0  ;;  %v2914_v58 = vld [vmem:[#allocation2] sm:$0xff] }
 0x15c   : > { %1387 = vst.msk [vmem:[#allocation2 + $0x20] sm:$0xff] %vm225_vm1, %v1354_v59  ;;  %v1357_v62 = vadd.f32 %v1251_v21, %v577_v39  ;;  %v1243_v25 = vadd.f32 %v1242_v3, %v1082_v37  ;;  %v1450_v30 = vsel %vm225_vm1, %v2914_v58, 0.0  ;;  %v1119_v21 = vadd.f32 %v2158_v43, %v2046_v50  ;;  %v3683_v50 = vld [vmem:[#allocation25_spill] sm:$0xff] }
 0x15d   : > { %v2916_v42 = vpop.f32.mrf.mxu1  ;;  %v2248_v32 = vpop.f32.mrf.mxu0  ;;  %v2936_v31 = vld [vmem:[#allocation2 + $0x18] sm:$0xff]  ;;  %v2049_v37 = vadd.f32 %v2800_v51, %v2796_v47 }
 0x15e   : > { %1390 = vst.msk [vmem:[#allocation2 + $0x38] sm:$0xff] %vm225_vm1, %v1357_v62  ;;  %v1355_v12 = vadd.f32 %v1243_v25, %v575_v23  ;;  %v1264_v17 = vadd.f32 %v2248_v32, %v1103_v11  ;;  %v1455_v22 = vsel %vm225_vm1, %v2936_v31, 0.0  ;;  %v584_v23 = vld [vmem:[#allocation2 + $0x70] sm:$0xff] }
 0x15f   : > { %v2924_v19 = vld [vmem:[#allocation2 + $0x8] sm:$0xff]  ;;  %v2926_v60 = vpop.f32.mrf.mxu1  ;;  %v1255_v63 = vpop.f32.mrf.mxu0 }
 0x160   : > { %v1451_v53 = vsel %vm225_vm1, %v2924_v19, 0.0  ;;  %1388 = vst.msk [vmem:[#allocation2 + $0x28] sm:$0xff] %vm225_vm1, %v1355_v12  ;;  %v1360_v9 = vadd.f32 %v1264_v17, %v580_v55  ;;  %v1256_v44 = vadd.f32 %v1255_v63, %v1095_v38  ;;  %v1122_v12 = vadd.f32 %v2161_v41, %v2049_v37 }
 0x161   : > { %v1452_v57 = vadd.f32 %v1451_v53, %v1450_v30  ;;  %v2938_v34 = vpop.f32.mrf.mxu1  ;;  %v2249_v24 = vpop.f32.mrf.mxu0  ;;  %v2965_v55 = vld [vmem:[#allocation2 + $0x30] sm:$0xff]  ;;  %v2170_v17 = vadd.f32 %v2894_v48, %v2888_v15  ;;  %v585_v53 = vld [vmem:[#allocation2 + $0x78] sm:$0xff]  ;;  %v2164_v15 = vadd.f32 %v2874_v10, %v3683_v50 }
 0x162   : > { %1393 = vst.msk [vmem:[#allocation2 + $0x50] sm:$0xff] %vm225_vm1, %v1360_v9  ;;  %v1358_v18 = vadd.f32 %v1256_v44, %v578_v0  ;;  %v1267_v6 = vadd.f32 %v2249_v24, %v1106_v28  ;;  %v1114_v44 = vadd.f32 %v2155_v4, %v2790_v40  ;;  %v1461_v48 = vsel %vm225_vm1, %v2965_v55, 0.0  ;;  %v3684_v24 = vld [vmem:[#allocation11_spill] sm:$0xff] }
 0x163   : > { %v1454_v45 = vadd.f32 %v1453_v20, %v1452_v57  ;;  %v2948_v39 = vld [vmem:[#allocation2 + $0x20] sm:$0xff]  ;;  %v2950_v8 = vpop.f32.mrf.mxu1  ;;  %v1258_v14 = vpop.f32.mrf.mxu0  ;;  %v2052_v5 = vadd.f32 %v3685_v1, %v3684_v24  ;;  %v3692_v1 = vld [vmem:[#allocation17_spill] sm:$0xff] }
 0x164   : > { %1391 = vst.msk [vmem:[#allocation2 + $0x40] sm:$0xff] %vm225_vm1, %v1358_v18  ;;  %v1361_v29 = vadd.f32 %v1267_v6, %v581_v52  ;;  %v1259_v59 = vadd.f32 %v1258_v14, %v1098_v16  ;;  %v1457_v62 = vsel %vm225_vm1, %v2948_v39, 0.0  ;;  %v2173_v16 = vadd.f32 %v2908_v7, %v2900_v35  ;;  %v583_v18 = vld [vmem:[#allocation2 + $0x68] sm:$0xff]  ;;  %v3686_v14 = vld [vmem:[#allocation15_spill] sm:$0xff] }
 0x165   : > { %v1456_v27 = vadd.f32 %v1455_v22, %v1454_v45  ;;  %v2959_v2 = vpop.f32.mrf.mxu1  ;;  %v2252_v3 = vpop.f32.mrf.mxu0  ;;  %v2976_v63 = vld [vmem:[#allocation2 + $0x38] sm:$0xff]  ;;  %v3687_v22 = vld [vmem:[#allocation16_spill] sm:$0xff]  ;;  %v2167_v35 = vadd.f32 %v2883_v13, %v2877_v26 }
 0x166   : > { %1394 = vst.msk [vmem:[#allocation2 + $0x58] sm:$0xff] %vm225_vm1, %v1361_v29  ;;  %v1359_v25 = vadd.f32 %v1259_v59, %v579_v49  ;;  %v1280_v11 = vadd.f32 %v2252_v3, %v1119_v21  ;;  %v1463_v10 = vsel %vm225_vm1, %v2976_v63, 0.0  ;;  %v1135_v49 = vadd.f32 %v2170_v17, %v2058_v33  ;;  %v588_v21 = vld [vmem:[#allocation2 + $0x90] sm:$0xff] }
 0x167   : > { %v1458_v47 = vadd.f32 %v1457_v62, %v1456_v27  ;;  %v2967_v51 = vld [vmem:[#allocation2 + $0x28] sm:$0xff]  ;;  %v2181_v56 = vpop.f32.mrf.mxu1  ;;  %v1271_v32 = vpop.f32.mrf.mxu0  ;;  %v2061_v29 = vadd.f32 %v3687_v22, %v3686_v14  ;;  %v1127_v3 = vadd.f32 %v2164_v15, %v2052_v5  ;;  %v3688_v62 = vld [vmem:[#allocation13_spill] sm:$0xff]  ;;  %v589_v15 = vld [vmem:[#allocation2 + $0x98] sm:$0xff] }
 0x168   : > { %v1459_v38 = vsel %vm225_vm1, %v2967_v51, 0.0  ;;  %1392 = vst.msk [vmem:[#allocation2 + $0x48] sm:$0xff] %vm225_vm1, %v1359_v25  ;;  %v1364_v43 = vadd.f32 %v1280_v11, %v584_v23  ;;  %v1272_v0 = vadd.f32 %v1271_v32, %v1111_v54  ;;  %v3689_v25 = vld [vmem:[#allocation14_spill] sm:$0xff]  ;;  %v3690_v33 = vld [vmem:[#allocation21_spill] sm:$0xff]  ;;  %v3694_v22 = vld [vmem:[#allocation23_spill] sm:$0xff] }
 0x169   : > { %v1460_v28 = vadd.f32 %v1459_v38, %v1458_v47  ;;  %v2183_v30 = vpop.f32.mrf.mxu1  ;;  %v2253_v9 = vpop.f32.mrf.mxu0  ;;  %v2055_v11 = vadd.f32 %v3689_v25, %v3688_v62  ;;  %v3004_v54 = vld [vmem:[#allocation2 + $0x50] sm:$0xff]  ;;  %v2182_v38 = vadd.f32 %v2181_v56, %v2959_v2  ;;  %v2176_v2 = vadd.f32 %v2926_v60, %v2916_v42  ;;  %v3693_v5 = vld [vmem:[#allocation18_spill] sm:$0xff]  ;;  %v3696_v62 = vld [vmem:[#allocation19_spill] sm:$0xff] }
 0x16a   : > { %1397 = vst.msk [vmem:[#allocation2 + $0x70] sm:$0xff] %vm225_vm1, %v1364_v43  ;;  %v1362_v57 = vadd.f32 %v1272_v0, %v582_v36  ;;  %v1283_v52 = vadd.f32 %v2253_v9, %v1122_v12  ;;  %v586_v36 = vld [vmem:[#allocation2 + $0x80] sm:$0xff]  ;;  %v1138_v12 = vadd.f32 %v2173_v16, %v2061_v29  ;;  %v2064_v16 = vadd.f32 %v3693_v5, %v3692_v1  ;;  %v3695_v29 = vld [vmem:[#allocation24_spill] sm:$0xff] }
 0x16b   : > { %v1462_v61 = vadd.f32 %v1461_v48, %v1460_v28  ;;  %v2988_v20 = vld [vmem:[#allocation2 + $0x40] sm:$0xff]  ;;  %v2184_v40 = vpop.f32.mrf.mxu1  ;;  %v1274_v6 = vpop.f32.mrf.mxu0  ;;  %v3691_v28 = vld [vmem:[#allocation22_spill] sm:$0xff]  ;;  %v3697_v25 = vld [vmem:[#allocation20_spill] sm:$0xff] }
 0x16c   : > { %1395 = vst.msk [vmem:[#allocation2 + $0x60] sm:$0xff] %vm225_vm1, %v1362_v57  ;;  %v1365_v41 = vadd.f32 %v1283_v52, %v585_v53  ;;  %v1275_v45 = vadd.f32 %v1274_v6, %v1114_v44  ;;  %v1465_v4 = vsel %vm225_vm1, %v2988_v20, 0.0  ;;  %v2070_v53 = vadd.f32 %v3691_v28, %v3690_v33 }
 0x16d   : > { %v1464_v7 = vadd.f32 %v1463_v10, %v1462_v61  ;;  %v2997_v59 = vpop.f32.mrf.mxu1  ;;  %v2256_v37 = vpop.f32.mrf.mxu0  ;;  %v3016_v9 = vld [vmem:[#allocation2 + $0x58] sm:$0xff]  ;;  %v1130_v57 = vadd.f32 %v2167_v35, %v2055_v11  ;;  %v1469_v52 = vsel %vm225_vm1, %v3004_v54, 0.0  ;;  %v2185_v6 = vadd.f32 %v2184_v40, %v2183_v30  ;;  %v592_v30 = vld [vmem:[#allocation2 + $0xb0] sm:$0xff] }
 0x16e   : > { %1398 = vst.msk [vmem:[#allocation2 + $0x78] sm:$0xff] %vm225_vm1, %v1365_v41  ;;  %v1363_v27 = vadd.f32 %v1275_v45, %v583_v18  ;;  %v1296_v23 = vadd.f32 %v2256_v37, %v1135_v49  ;;  %v587_v41 = vld [vmem:[#allocation2 + $0x88] sm:$0xff]  ;;  %v1471_v49 = vsel %vm225_vm1, %v3016_v9, 0.0  ;;  %v1151_v14 = vadd.f32 %v2182_v38, %v2070_v53 }
 0x16f   : > { %v1466_v47 = vadd.f32 %v1465_v4, %v1464_v7  ;;  %v3006_v26 = vld [vmem:[#allocation2 + $0x48] sm:$0xff]  ;;  %v3008_v13 = vpop.f32.mrf.mxu1  ;;  %v1287_v32 = vpop.f32.mrf.mxu0  ;;  %v2073_v35 = vadd.f32 %v3695_v29, %v3694_v22  ;;  %v2179_v7 = vadd.f32 %v2950_v8, %v2938_v34  ;;  %v2067_v11 = vadd.f32 %v3697_v25, %v3696_v62  ;;  %v590_v8 = vld [vmem:[#allocation2 + $0xa0] sm:$0xff]  ;;  %v596_v29 = vld [vmem:[#allocation2 + $0xd0] sm:$0xff] }
 0x170   : > { %v1467_v17 = vsel %vm225_vm1, %v3006_v26, 0.0  ;;  %1396 = vst.msk [vmem:[#allocation2 + $0x68] sm:$0xff] %vm225_vm1, %v1363_v27  ;;  %v1368_v43 = vadd.f32 %v1296_v23, %v588_v21  ;;  %v1288_v0 = vadd.f32 %v1287_v32, %v1127_v3  ;;  %v1143_v3 = vadd.f32 %v2176_v2, %v2064_v16  ;;  %v594_v62 = vld [vmem:[#allocation2 + $0xc0] sm:$0xff] }
 0x171   : > { %v1468_v44 = vadd.f32 %v1467_v17, %v1466_v47  ;;  %v3018_v50 = vpop.f32.mrf.mxu1  ;;  %v2257_v48 = vpop.f32.mrf.mxu0  ;;  %v3041_v47 = vld [vmem:[#allocation2 + $0x70] sm:$0xff]  ;;  %v1154_v17 = vadd.f32 %v2185_v6, %v2073_v35  ;;  %v2188_v2 = vadd.f32 %v3008_v13, %v2997_v59  ;;  %v591_v6 = vld [vmem:[#allocation2 + $0xa8] sm:$0xff] }
 0x172   : > { %1401 = vst.msk [vmem:[#allocation2 + $0x90] sm:$0xff] %vm225_vm1, %v1368_v43  ;;  %v1366_v56 = vadd.f32 %v1288_v0, %v586_v36  ;;  %v1299_v24 = vadd.f32 %v2257_v48, %v1138_v12 }
 0x173   : > { %v1470_v61 = vadd.f32 %v1469_v52, %v1468_v44  ;;  %v3027_v18 = vld [vmem:[#allocation2 + $0x60] sm:$0xff]  ;;  %v2190_v10 = vpop.f32.mrf.mxu1  ;;  %v1290_v45 = vpop.f32.mrf.mxu0  ;;  %v1477_v52 = vsel %vm225_vm1, %v3041_v47, 0.0 }
 0x174   : > { %1399 = vst.msk [vmem:[#allocation2 + $0x80] sm:$0xff] %vm225_vm1, %v1366_v56  ;;  %v1369_v42 = vadd.f32 %v1299_v24, %v589_v15  ;;  %v1291_v60 = vadd.f32 %v1290_v45, %v1130_v57  ;;  %v1473_v4 = vsel %vm225_vm1, %v3027_v18, 0.0  ;;  %v593_v15 = vld [vmem:[#allocation2 + $0xb8] sm:$0xff]  ;;  %v1146_v57 = vadd.f32 %v2179_v7, %v2067_v11 }
 0x175   : > { %v1472_v21 = vadd.f32 %v1471_v49, %v1470_v61  ;;  %v2192_v37 = vpop.f32.mrf.mxu1  ;;  %v2260_v40 = vpop.f32.mrf.mxu0  ;;  %v3045_v38 = vld [vmem:[#allocation2 + $0x78] sm:$0xff] }
 0x176   : > { %1402 = vst.msk [vmem:[#allocation2 + $0x98] sm:$0xff] %vm225_vm1, %v1369_v42  ;;  %v1367_v27 = vadd.f32 %v1291_v60, %v587_v41  ;;  %v1312_v23 = vadd.f32 %v2260_v40, %v1151_v14  ;;  %v1479_v1 = vsel %vm225_vm1, %v3045_v38, 0.0  ;;  %v3698_v60 = vld [vmem:[#allocation5_spill] sm:$0xff]  ;;  %v2191_v14 = vadd.f32 %v2190_v10, %v3018_v50 }
 0x177   : > { %v1474_v36 = vadd.f32 %v1473_v4, %v1472_v21  ;;  %v3043_v32 = vld [vmem:[#allocation2 + $0x68] sm:$0xff]  ;;  %v2193_v34 = vpop.f32.mrf.mxu1  ;;  %v1303_v12 = vpop.f32.mrf.mxu0 }
 0x178   : > { %v1475_v43 = vsel %vm225_vm1, %v3043_v32, 0.0  ;;  %1400 = vst.msk [vmem:[#allocation2 + $0x88] sm:$0xff] %vm225_vm1, %v1367_v27  ;;  %v1372_v0 = vadd.f32 %v1312_v23, %v592_v30  ;;  %v2194_v33 = vadd.f32 %v2193_v34, %v2192_v37  ;;  %v1304_v28 = vadd.f32 %v1303_v12, %v1143_v3  ;;  %v3699_v30 = vld [vmem:[#allocation3_spill] sm:$0xff] }
 0x179   : > { %v1476_v53 = vadd.f32 %v1475_v43, %v1474_v36  ;;  %v2195_v44 = vpop.f32.mrf.mxu1  ;;  %v2261_v48 = vpop.f32.mrf.mxu0  ;;  %v1159_v40 = vadd.f32 %v2188_v2, %v3699_v30  ;;  %v3066_v4 = vld [vmem:[#allocation2 + $0x90] sm:$0xff]  ;;  %v3700_v36 = vld [vmem:[#allocation6_spill] sm:$0xff] }
 0x17a   : > { %1405 = vst.msk [vmem:[#allocation2 + $0xb0] sm:$0xff] %vm225_vm1, %v1372_v0  ;;  %v1370_v56 = vadd.f32 %v1304_v28, %v590_v8  ;;  %v1315_v24 = vadd.f32 %v2261_v48, %v1154_v17  ;;  %v1167_v59 = vadd.f32 %v2194_v33, %v3698_v60  ;;  %v597_v43 = vld [vmem:[#allocation2 + $0xd8] sm:$0xff]  ;;  %v3701_v33 = vld [vmem:[#allocation4_spill] sm:$0xff] }
 0x17b   : > { %v1478_v5 = vadd.f32 %v1477_v52, %v1476_v53  ;;  %v3057_v16 = vld [vmem:[#allocation2 + $0x80] sm:$0xff]  ;;  %v2196_v61 = vpop.f32.mrf.mxu1  ;;  %v1306_v41 = vpop.f32.mrf.mxu0  ;;  %v1162_v28 = vadd.f32 %v2191_v14, %v3701_v33  ;;  %v1485_v53 = vsel %vm225_vm1, %v3066_v4, 0.0 }
 0x17c   : > { %1403 = vst.msk [vmem:[#allocation2 + $0xa0] sm:$0xff] %vm225_vm1, %v1370_v56  ;;  %v1373_v45 = vadd.f32 %v1315_v24, %v593_v15  ;;  %v2197_v49 = vadd.f32 %v2196_v61, %v2195_v44  ;;  %v1307_v42 = vadd.f32 %v1306_v41, %v1146_v57  ;;  %v1481_v7 = vsel %vm225_vm1, %v3057_v16, 0.0  ;;  %v595_v56 = vld [vmem:[#allocation2 + $0xc8] sm:$0xff] }
 0x17d   : > { %v1480_v13 = vadd.f32 %v1479_v1, %v1478_v5  ;;  %v2198_v22 = vpop.f32.mrf.mxu1  ;;  %v2264_v35 = vpop.f32.mrf.mxu0  ;;  %v3074_v8 = vld [vmem:[#allocation2 + $0x98] sm:$0xff] }
 0x17e   : > { %1406 = vst.msk [vmem:[#allocation2 + $0xb8] sm:$0xff] %vm225_vm1, %v1373_v45  ;;  %v1371_v21 = vadd.f32 %v1307_v42, %v591_v6  ;;  %v1328_v37 = vadd.f32 %v2264_v35, %v1167_v59  ;;  %v1170_v34 = vadd.f32 %v2197_v49, %v3700_v36  ;;  %v1487_v1 = vsel %vm225_vm1, %v3074_v8, 0.0  ;;  %v3702_v59 = vld [vmem:[#allocation7_spill] sm:$0xff] }
 0x17f   : > { %v1482_v27 = vadd.f32 %v1481_v7, %v1480_v13  ;;  %v3068_v23 = vld [vmem:[#allocation2 + $0x88] sm:$0xff]  ;;  %v2199_v3 = vpop.f32.mrf.mxu1  ;;  %v1319_v50 = vpop.f32.mrf.mxu0  ;;  %v598_v7 = vld [vmem:[#allocation2 + $0xe0] sm:$0xff] }
 0x180   : > { %v1483_v10 = vsel %vm225_vm1, %v3068_v23, 0.0  ;;  %1404 = vst.msk [vmem:[#allocation2 + $0xa8] sm:$0xff] %vm225_vm1, %v1371_v21  ;;  %v1376_v25 = vadd.f32 %v1328_v37, %v596_v29  ;;  %v1320_v11 = vadd.f32 %v1319_v50, %v1159_v40  ;;  %v2200_v44 = vadd.f32 %v2199_v3, %v2198_v22 }
 0x181   : > { %v1484_v12 = vadd.f32 %v1483_v10, %v1482_v27  ;;  %v2201_v17 = vpop.f32.mrf.mxu1  ;;  %v2265_v0 = vpop.f32.mrf.mxu0  ;;  %v3089_v14 = vld [vmem:[#allocation2 + $0xb0] sm:$0xff] }
 0x182   : > { %1409 = vst.msk [vmem:[#allocation2 + $0xd0] sm:$0xff] %vm225_vm1, %v1376_v25  ;;  %v1374_v15 = vadd.f32 %v1320_v11, %v594_v62  ;;  %v1331_v48 = vadd.f32 %v2265_v0, %v1170_v34  ;;  %v1175_v13 = vadd.f32 %v2200_v44, %v3702_v59  ;;  %v1493_v10 = vsel %vm225_vm1, %v3089_v14, 0.0  ;;  %v3703_v25 = vld [vmem:[#allocation9_spill] sm:$0xff]  ;;  %v3704_v34 = vld [vmem:[#allocation8_spill] sm:$0xff] }
 0x183   : > { %v1486_v57 = vadd.f32 %v1485_v53, %v1484_v12  ;;  %v3080_v52 = vld [vmem:[#allocation2 + $0xa0] sm:$0xff]  ;;  %v2202_v2 = vpop.f32.mrf.mxu1  ;;  %v1322_v24 = vpop.f32.mrf.mxu0  ;;  %v600_v0 = vld [vmem:[#allocation2 + $0xf0] sm:$0xff] }
 0x184   : > { %1407 = vst.msk [vmem:[#allocation2 + $0xc0] sm:$0xff] %vm225_vm1, %v1374_v15  ;;  %v1377_v5 = vadd.f32 %v1331_v48, %v597_v43  ;;  %v1323_v61 = vadd.f32 %v1322_v24, %v1162_v28  ;;  %v1489_v49 = vsel %vm225_vm1, %v3080_v52, 0.0  ;;  %v2203_v42 = vadd.f32 %v2202_v2, %v2201_v17  ;;  %v599_v28 = vld [vmem:[#allocation2 + $0xe8] sm:$0xff] }
 0x185   : > { %v1488_v6 = vadd.f32 %v1487_v1, %v1486_v57  ;;  %v2204_v41 = vpop.f32.mrf.mxu1  ;;  %v2268_v45 = vpop.f32.mrf.mxu0  ;;  %v3096_v27 = vld [vmem:[#allocation2 + $0xb8] sm:$0xff] }
 0x186   : > { %1410 = vst.msk [vmem:[#allocation2 + $0xd8] sm:$0xff] %vm225_vm1, %v1377_v5  ;;  %v1375_v60 = vadd.f32 %v1323_v61, %v595_v56  ;;  %v1178_v12 = vadd.f32 %v2203_v42, %v3704_v34  ;;  %v1495_v44 = vsel %vm225_vm1, %v3096_v27, 0.0  ;;  %v3705_v1 = vld [vmem:[#allocation10_spill] sm:$0xff] }
 0x187   : > { %v1490_v22 = vadd.f32 %v1489_v49, %v1488_v6  ;;  %v3091_v29 = vld [vmem:[#allocation2 + $0xa8] sm:$0xff]  ;;  %v2205_v35 = vpop.f32.mrf.mxu1  ;;  %v1335_v21 = vpop.f32.mrf.mxu0  ;;  %v601_v42 = vld [vmem:[#allocation2 + $0xf8] sm:$0xff] }
 0x188   : > { %v1491_v37 = vsel %vm225_vm1, %v3091_v29, 0.0  ;;  %1408 = vst.msk [vmem:[#allocation2 + $0xc8] sm:$0xff] %vm225_vm1, %v1375_v60  ;;  %v2206_v30 = vadd.f32 %v2205_v35, %v2204_v41  ;;  %v1336_v40 = vadd.f32 %v1335_v21, %v1175_v13 }
 0x189   : > { %v1492_v3 = vadd.f32 %v1491_v37, %v1490_v22  ;;  %v2207_v62 = vpop.f32.mrf.mxu1  ;;  %v2269_v50 = vpop.f32.mrf.mxu0  ;;  %v3110_v6 = vld [vmem:[#allocation2 + $0xd0] sm:$0xff] }
 0x18a   : > { %v1183_v11 = vadd.f32 %v2206_v30, %v3703_v25  ;;  %v1378_v36 = vadd.f32 %v1336_v40, %v598_v7  ;;  %v1501_v22 = vsel %vm225_vm1, %v3110_v6, 0.0 }
 0x18b   : > { %v1494_v17 = vadd.f32 %v1493_v10, %v1492_v3  ;;  %v3102_v43 = vld [vmem:[#allocation2 + $0xc0] sm:$0xff]  ;;  %v2208_v33 = vpop.f32.mrf.mxu1  ;;  %v1338_v53 = vpop.f32.mrf.mxu0 }
 0x18c   : > { %v1344_v15 = vadd.f32 %v2268_v45, %v1183_v11  ;;  %1411 = vst.msk [vmem:[#allocation2 + $0xe0] sm:$0xff] %vm225_vm1, %v1378_v36  ;;  %v2209_v48 = vadd.f32 %v2208_v33, %v2207_v62  ;;  %v1339_v57 = vadd.f32 %v1338_v53, %v1178_v12  ;;  %v1497_v56 = vsel %vm225_vm1, %v3102_v43, 0.0 }
 0x18d   : > { %v1496_v2 = vadd.f32 %v1495_v44, %v1494_v17  ;;  %v3118_v59 = vld [vmem:[#allocation2 + $0xd8] sm:$0xff] }
 0x18e   : > { %v1380_v24 = vadd.f32 %v1344_v15, %v600_v0  ;;  %v1186_v5 = vadd.f32 %v2209_v48, %v3705_v1  ;;  %v1379_v61 = vadd.f32 %v1339_v57, %v599_v28  ;;  %v1503_v37 = vsel %vm225_vm1, %v3118_v59, 0.0 }
 0x18f   : > { %v1498_v41 = vadd.f32 %v1497_v56, %v1496_v2  ;;  %v3112_v49 = vld [vmem:[#allocation2 + $0xc8] sm:$0xff] }
 0x190   : > { %v1499_v45 = vsel %vm225_vm1, %v3112_v49, 0.0  ;;  %1413 = vst.msk [vmem:[#allocation2 + $0xf0] sm:$0xff] %vm225_vm1, %v1380_v24  ;;  %v1347_v60 = vadd.f32 %v2269_v50, %v1186_v5  ;;  %1412 = vst.msk [vmem:[#allocation2 + $0xe8] sm:$0xff] %vm225_vm1, %v1379_v61 }
 0x191   : > { %v1500_v13 = vadd.f32 %v1499_v45, %v1498_v41 }
 0x192   : > { %v1381_v35 = vadd.f32 %v1347_v60, %v601_v42 }
 0x193   : > { %v1502_v7 = vadd.f32 %v1501_v22, %v1500_v13  ;;  %v3122_v21 = vld [vmem:[#allocation2 + $0xe0] sm:$0xff] }
 0x194   : > { %1414 = vst.msk [vmem:[#allocation2 + $0xf8] sm:$0xff] %vm225_vm1, %v1381_v35  ;;  %v1505_v40 = vsel %vm225_vm1, %v3122_v21, 0.0 }
 0x195   : > { %v1504_v30 = vadd.f32 %v1503_v37, %v1502_v7 }
 0x197   : > { %v3129_v3 = vld [vmem:[#allocation2 + $0xf0] sm:$0xff]  ;;  %v1506_v62 = vadd.f32 %v1505_v40, %v1504_v30  ;;  %v3131_v50 = vld [vmem:[#allocation2 + $0xe8] sm:$0xff] }
 0x198   : > { %v1507_v10 = vsel %vm225_vm1, %v3131_v50, 0.0  ;;  %v1509_v11 = vsel %vm225_vm1, %v3129_v3, 0.0 }
 0x199   : > { %v1508_v25 = vadd.f32 %v1507_v10, %v1506_v62 }
 0x19b   : > { %v3137_v36 = vld [vmem:[#allocation2 + $0xf8] sm:$0xff]  ;;  %v1510_v34 = vadd.f32 %v1509_v11, %v1508_v25 }
 0x19c   : > { %v1511_v12 = vsel %vm225_vm1, %v3137_v36, 0.0 }
 0x19d   : > { %v1512_v17 = vadd.f32 %v1511_v12, %v1510_v34 }
 0x19f   : > { %v1513_v0 = vrot.slane %v1512_v17, 4 }
 0x1a1   : > { %v1514_v33 = vadd.f32 %v1513_v0, %v1512_v17 }
 0x1a3   : > { %v1515_v28 = vrot.slane %v1514_v33, 2 }
 0x1a5   : > { %v1516_v53 = vadd.f32 %v1515_v28, %v1514_v33 }
 0x1a7   : > { %v1517_v44 = vrot.slane %v1516_v53, 1 }
 0x1a9   : > { %v1518_v15 = vadd.f32 %v1517_v44, %v1516_v53 }
 0x1ab   : > { %v3141_v48 = vmul.f32 0.00390625, %v1518_v15 }
 0x1ad   : > { %v3145_v57 = vsub.f32 %v2914_v58, %v3141_v48  ;;  %v3149_v2 = vsub.f32 %v2924_v19, %v3141_v48  ;;  %v3153_v56 = vsub.f32 %v2922_v46, %v3141_v48  ;;  %v3157_v24 = vsub.f32 %v2936_v31, %v3141_v48 }
 0x1ae   : > { %v3165_v58 = vsub.f32 %v2948_v39, %v3141_v48  ;;  %v3171_v46 = vsub.f32 %v2967_v51, %v3141_v48  ;;  %v3179_v45 = vsub.f32 %v2965_v55, %v3141_v48  ;;  %v3186_v51 = vsub.f32 %v2976_v63, %v3141_v48 }
 0x1af   : > { %v1553_v1 = vmul.f32 %v3145_v57, %v3145_v57  ;;  %v1554_v5 = vmul.f32 %v3149_v2, %v3149_v2  ;;  %v1555_v19 = vmul.f32 %v3153_v56, %v3153_v56  ;;  %v1556_v31 = vmul.f32 %v3157_v24, %v3157_v24 }
 0x1b0   : > { %v1557_v39 = vmul.f32 %v3165_v58, %v3165_v58  ;;  %v1558_v22 = vmul.f32 %v3171_v46, %v3171_v46  ;;  %v3193_v55 = vsub.f32 %v2988_v20, %v3141_v48  ;;  %v1559_v37 = vmul.f32 %v3179_v45, %v3179_v45 }
 0x1b1   : > { %v1585_v61 = vsel %vm225_vm1, %v1553_v1, 0.0  ;;  %v1586_v41 = vsel %vm225_vm1, %v1554_v5, 0.0  ;;  %v1588_v60 = vsel %vm225_vm1, %v1555_v19, 0.0  ;;  %v1590_v35 = vsel %vm225_vm1, %v1556_v31, 0.0 }
 0x1b2   : > { %v1587_v42 = vadd.f32 %v1586_v41, %v1585_v61  ;;  %v1592_v30 = vsel %vm225_vm1, %v1557_v39, 0.0  ;;  %v3200_v63 = vsub.f32 %v3006_v26, %v3141_v48  ;;  %v1560_v62 = vmul.f32 %v3186_v51, %v3186_v51 }
 0x1b3   : > { %v1594_v10 = vsel %vm225_vm1, %v1558_v22, 0.0  ;;  %v3207_v20 = vsub.f32 %v3004_v54, %v3141_v48  ;;  %v1561_v11 = vmul.f32 %v3193_v55, %v3193_v55  ;;  %v1596_v34 = vsel %vm225_vm1, %v1559_v37, 0.0 }
 0x1b4   : > { %v1589_v13 = vadd.f32 %v1588_v60, %v1587_v42  ;;  %v3214_v26 = vsub.f32 %v3016_v9, %v3141_v48  ;;  %v1562_v17 = vmul.f32 %v3200_v63, %v3200_v63  ;;  %v1598_v0 = vsel %vm225_vm1, %v1560_v62, 0.0 }
 0x1b5   : > { %v3221_v54 = vsub.f32 %v3027_v18, %v3141_v48  ;;  %v1563_v28 = vmul.f32 %v3207_v20, %v3207_v20  ;;  %v1600_v53 = vsel %vm225_vm1, %v1561_v11, 0.0  ;;  %v3228_v9 = vsub.f32 %v3043_v32, %v3141_v48 }
 0x1b6   : > { %v1591_v7 = vadd.f32 %v1590_v35, %v1589_v13  ;;  %v1564_v15 = vmul.f32 %v3214_v26, %v3214_v26  ;;  %v1602_v1 = vsel %vm225_vm1, %v1562_v17, 0.0  ;;  %v3235_v18 = vsub.f32 %v3041_v47, %v3141_v48 }
 0x1b7   : > { %v1565_v19 = vmul.f32 %v3221_v54, %v3221_v54  ;;  %v1604_v31 = vsel %vm225_vm1, %v1563_v28, 0.0  ;;  %v3242_v32 = vsub.f32 %v3045_v38, %v3141_v48  ;;  %v1566_v41 = vmul.f32 %v3228_v9, %v3228_v9 }
 0x1b8   : > { %v1593_v40 = vadd.f32 %v1592_v30, %v1591_v7  ;;  %v1606_v42 = vsel %vm225_vm1, %v1564_v15, 0.0  ;;  %v3249_v47 = vsub.f32 %v3057_v16, %v3141_v48  ;;  %v1567_v60 = vmul.f32 %v3235_v18, %v3235_v18 }
 0x1b9   : > { %v1608_v13 = vsel %vm225_vm1, %v1565_v19, 0.0  ;;  %v3256_v38 = vsub.f32 %v3068_v23, %v3141_v48  ;;  %v1568_v35 = vmul.f32 %v3242_v32, %v3242_v32  ;;  %v1610_v7 = vsel %vm225_vm1, %v1566_v41, 0.0 }
 0x1ba   : > { %v1595_v25 = vadd.f32 %v1594_v10, %v1593_v40  ;;  %v3263_v16 = vsub.f32 %v3066_v4, %v3141_v48  ;;  %v1569_v30 = vmul.f32 %v3249_v47, %v3249_v47  ;;  %v1612_v40 = vsel %vm225_vm1, %v1567_v60, 0.0 }
 0x1bb   : > { %v3270_v23 = vsub.f32 %v3074_v8, %v3141_v48  ;;  %v1570_v10 = vmul.f32 %v3256_v38, %v3256_v38  ;;  %v3277_v4 = vsub.f32 %v3080_v52, %v3141_v48  ;;  %v3284_v8 = vsub.f32 %v3091_v29, %v3141_v48 }
 0x1bc   : > { %v1597_v12 = vadd.f32 %v1596_v34, %v1595_v25  ;;  %v1614_v25 = vsel %vm225_vm1, %v1568_v35, 0.0  ;;  %v1571_v34 = vmul.f32 %v3263_v16, %v3263_v16  ;;  %v3291_v52 = vsub.f32 %v3089_v14, %v3141_v48 }
 0x1bd   : > { %v1544_v29 = vsub.f32 %v3096_v27, %v3141_v48 }
 0x1be   : > { %v1599_v33 = vadd.f32 %v1598_v0, %v1597_v12  ;;  %v1616_v12 = vsel %vm225_vm1, %v1569_v30, 0.0  ;;  %v1572_v0 = vmul.f32 %v3270_v23, %v3270_v23  ;;  %v1575_v14 = vmul.f32 %v3291_v52, %v3291_v52 }
 0x1c0   : > { %v1601_v44 = vadd.f32 %v1600_v53, %v1599_v33  ;;  %v1618_v33 = vsel %vm225_vm1, %v1570_v10, 0.0  ;;  %v1573_v53 = vmul.f32 %v3277_v4, %v3277_v4  ;;  %v1628_v35 = vsel %vm225_vm1, %v1575_v14, 0.0 }
 0x1c2   : > { %v1603_v5 = vadd.f32 %v1602_v1, %v1601_v44  ;;  %v1620_v44 = vsel %vm225_vm1, %v1571_v34, 0.0  ;;  %v1574_v1 = vmul.f32 %v3284_v8, %v3284_v8 }
 0x1c4   : > { %v1605_v61 = vadd.f32 %v1604_v31, %v1603_v5  ;;  %v1622_v5 = vsel %vm225_vm1, %v1572_v0, 0.0  ;;  %v1545_v31 = vsub.f32 %v3102_v43, %v3141_v48  ;;  %v1626_v27 = vsel %vm225_vm1, %v1574_v1, 0.0 }
 0x1c6   : > { %v1607_v39 = vadd.f32 %v1606_v42, %v1605_v61  ;;  %v1624_v61 = vsel %vm225_vm1, %v1573_v53, 0.0  ;;  %v1546_v42 = vsub.f32 %v3112_v49, %v3141_v48  ;;  %v1549_v49 = vsub.f32 %v3122_v21, %v3141_v48 }
 0x1c7   : > { %v1552_v21 = vsub.f32 %v3137_v36, %v3141_v48 }
 0x1c8   : > { %v1609_v22 = vadd.f32 %v1608_v13, %v1607_v39  ;;  %v1576_v39 = vmul.f32 %v1544_v29, %v1544_v29  ;;  %v1547_v13 = vsub.f32 %v3110_v6, %v3141_v48  ;;  %v1550_v6 = vsub.f32 %v3131_v50, %v3141_v48 }
 0x1ca   : > { %v1611_v37 = vadd.f32 %v1610_v7, %v1609_v22  ;;  %v1577_v22 = vmul.f32 %v1545_v31, %v1545_v31  ;;  %v1548_v7 = vsub.f32 %v3118_v59, %v3141_v48  ;;  %v1630_v30 = vsel %vm225_vm1, %v1576_v39, 0.0 }
 0x1cb   : > { %v1551_v59 = vsub.f32 %v3129_v3, %v3141_v48 }
 0x1cc   : > { %v1613_v62 = vadd.f32 %v1612_v40, %v1611_v37  ;;  %v1578_v37 = vmul.f32 %v1546_v42, %v1546_v42  ;;  %v1632_v10 = vsel %vm225_vm1, %v1577_v22, 0.0 }
 0x1ce   : > { %v1615_v11 = vadd.f32 %v1614_v25, %v1613_v62  ;;  %v1579_v62 = vmul.f32 %v1547_v13, %v1547_v13  ;;  %v1634_v34 = vsel %vm225_vm1, %v1578_v37, 0.0 }
 0x1d0   : > { %v1617_v17 = vadd.f32 %v1616_v12, %v1615_v11  ;;  %v1580_v11 = vmul.f32 %v1548_v7, %v1548_v7  ;;  %v1636_v0 = vsel %vm225_vm1, %v1579_v62, 0.0 }
 0x1d2   : > { %v1619_v28 = vadd.f32 %v1618_v33, %v1617_v17  ;;  %v1581_v17 = vmul.f32 %v1549_v49, %v1549_v49  ;;  %v1638_v53 = vsel %vm225_vm1, %v1580_v11, 0.0 }
 0x1d4   : > { %v1621_v15 = vadd.f32 %v1620_v44, %v1619_v28  ;;  %v1582_v28 = vmul.f32 %v1550_v6, %v1550_v6  ;;  %v1640_v50 = vsel %vm225_vm1, %v1581_v17, 0.0 }
 0x1d6   : > { %v1623_v19 = vadd.f32 %v1622_v5, %v1621_v15  ;;  %v1583_v15 = vmul.f32 %v1551_v59, %v1551_v59  ;;  %v1584_v5 = vmul.f32 %v1552_v21, %v1552_v21 }
 0x1d8   : > { %v1625_v41 = vadd.f32 %v1624_v61, %v1623_v19  ;;  %v1642_v19 = vsel %vm225_vm1, %v1582_v28, 0.0  ;;  %v1644_v3 = vsel %vm225_vm1, %v1583_v15, 0.0 }
 0x1da   : > { %v1627_v60 = vadd.f32 %v1626_v27, %v1625_v41  ;;  %v1646_v41 = vsel %vm225_vm1, %v1584_v5, 0.0 }
 0x1dc   : > { %v1629_v43 = vadd.f32 %v1628_v35, %v1627_v60 }
 0x1de   : > { %v1631_v40 = vadd.f32 %v1630_v30, %v1629_v43 }
 0x1e0   : > { %v1633_v25 = vadd.f32 %v1632_v10, %v1631_v40 }
 0x1e2   : > { %v1635_v12 = vadd.f32 %v1634_v34, %v1633_v25 }
 0x1e4   : > { %v1637_v33 = vadd.f32 %v1636_v0, %v1635_v12 }
 0x1e6   : > { %v1639_v44 = vadd.f32 %v1638_v53, %v1637_v33 }
 0x1e8   : > { %v1641_v1 = vadd.f32 %v1640_v50, %v1639_v44 }
 0x1ea   : > { %v1643_v14 = vadd.f32 %v1642_v19, %v1641_v1 }
 0x1ec   : > { %v1645_v61 = vadd.f32 %v1644_v3, %v1643_v14 }
 0x1ee   : > { %v1647_v39 = vadd.f32 %v1646_v41, %v1645_v61 }
 0x1f0   : > { %v1648_v27 = vrot.slane %v1647_v39, 4 }
 0x1f2   : > { %v1649_v36 = vadd.f32 %v1648_v27, %v1647_v39 }
 0x1f4   : > { %v1650_v48 = vrot.slane %v1649_v36, 2 }
 0x1f6   : > { %v1651_v60 = vadd.f32 %v1650_v48, %v1649_v36 }
 0x1f8   : > { %v1652_v22 = vrot.slane %v1651_v60, 1 }
 0x1fa   : > { %v1653_v35 = vadd.f32 %v1652_v22, %v1651_v60 }
 0x1fc   : > { %v1654_v43 = vmul.f32 0.00390625, %v1653_v35 }
 0x1fe   : > { %v1655_v37 = vadd.f32 1e-05, %v1654_v43 }
 0x200   : > { %2348 = vrsqrt.f32 %v1655_v37 }
 0x20d   : > { %v2349_v30 = vpop.eup %2348 }
 0x20e   : > { %v3332_v40 = vmul.f32 %v2349_v30, %v3145_v57  ;;  %v3334_v62 = vmul.f32 %v2349_v30, %v1544_v29  ;;  %v3336_v10 = vmul.f32 %v2349_v30, %v1545_v31  ;;  %v3338_v25 = vmul.f32 %v2349_v30, %v1546_v42 }
 0x20f   : > { %v3340_v11 = vmul.f32 %v2349_v30, %v1547_v13  ;;  %v3342_v34 = vmul.f32 %v2349_v30, %v1548_v7  ;;  %v3344_v12 = vmul.f32 %v2349_v30, %v1549_v49  ;;  %v3346_v17 = vmul.f32 %v2349_v30, %v1550_v6 }
 0x210   : > { %v3348_v0 = vmul.f32 %v2349_v30, %v1551_v59  ;;  %v3350_v33 = vmul.f32 %v2349_v30, %v1552_v21  ;;  %v3353_v57 = vmul.f32 %v2349_v30, %v3149_v2  ;;  %v3356_v29 = vmul.f32 %v2349_v30, %v3153_v56 }
 0x211   : > { %v3359_v31 = vmul.f32 %v2349_v30, %v3157_v24  ;;  %v3362_v42 = vmul.f32 %v2349_v30, %v3165_v58  ;;  %v3365_v13 = vmul.f32 %v2349_v30, %v3171_v46  ;;  %v3368_v7 = vmul.f32 %v2349_v30, %v3179_v45 }
 0x212   : > { %v3371_v49 = vmul.f32 %v2349_v30, %v3186_v51  ;;  %v3374_v2 = vmul.f32 %v2349_v30, %v3193_v55  ;;  %v3377_v56 = vmul.f32 %v2349_v30, %v3200_v63  ;;  %v3380_v24 = vmul.f32 %v2349_v30, %v3207_v20 }
 0x213   : > { %v3383_v58 = vmul.f32 %v2349_v30, %v3214_v26  ;;  %v3386_v46 = vmul.f32 %v2349_v30, %v3221_v54  ;;  %v3389_v45 = vmul.f32 %v2349_v30, %v3228_v9  ;;  %v3392_v51 = vmul.f32 %v2349_v30, %v3235_v18 }
 0x214   : > { %v3395_v55 = vmul.f32 %v2349_v30, %v3242_v32  ;;  %v3398_v63 = vmul.f32 %v2349_v30, %v3249_v47  ;;  %v3401_v20 = vmul.f32 %v2349_v30, %v3256_v38  ;;  %v3404_v26 = vmul.f32 %v2349_v30, %v3263_v16 }
 0x215   : > { %v3407_v54 = vmul.f32 %v2349_v30, %v3270_v23  ;;  %v3410_v9 = vmul.f32 %v2349_v30, %v3277_v4  ;;  %v3414_v18 = vmul.f32 %v2349_v30, %v3284_v8  ;;  %v3417_v32 = vmul.f32 %v2349_v30, %v3291_v52 }
 0x216   : > { %vm1689_vm2 = vcmp.ge.f32.partialorder %v3332_v40, 0.0  ;;  %vm1690_vm3 = vcmp.ge.f32.partialorder %v3353_v57, 0.0  ;;  %vm1691_vm4 = vcmp.ge.f32.partialorder %v3356_v29, 0.0  ;;  %vm1692_vm5 = vcmp.ge.f32.partialorder %v3359_v31, 0.0 }
 0x217   : > { %vm1693_vm6 = vcmp.ge.f32.partialorder %v3362_v42, 0.0  ;;  %vm1694_vm7 = vcmp.ge.f32.partialorder %v3365_v13, 0.0  ;;  %vm1695_vm8 = vcmp.ge.f32.partialorder %v3368_v7, 0.0  ;;  %vm1696_vm9 = vcmp.ge.f32.partialorder %v3371_v49, 0.0 }
 0x218   : > { %v1721_v47 = vmul.f32 0.2, %v3332_v40  ;;  %v1722_v38 = vmul.f32 0.2, %v3353_v57  ;;  %v1723_v16 = vmul.f32 0.2, %v3356_v29 }
 0x219   : > { %vm1704_vm11 = vcmp.ge.f32.partialorder %v3395_v55, 0.0  ;;  %vm1705_vm10 = vcmp.ge.f32.partialorder %v3398_v63, 0.0  ;;  %v1724_v23 = vmul.f32 0.2, %v3359_v31  ;;  %v1725_v4 = vmul.f32 0.2, %v3362_v42 }
 0x21a   : > { %v1726_v8 = vmul.f32 0.2, %v3365_v13  ;;  %vm1710_vm0 = vcmp.ge.f32.partialorder %v3414_v18, 0.0  ;;  %v1727_v52 = vmul.f32 0.2, %v3368_v7  ;;  %v1753_v21 = vsel %vm1689_vm2, %v3332_v40, %v1721_v47 }
 0x21b   : > { %v1728_v6 = vmul.f32 0.2, %v3371_v49  ;;  %v1729_v59 = vmul.f32 0.2, %v3374_v2  ;;  %vm1711_vm12 = vcmp.ge.f32.partialorder %v3417_v32, 0.0  ;;  %v1754_v15 = vsel %vm1690_vm3, %v3353_v57, %v1722_v38  ;;  %1785 = vst.msk [vmem:[%s3432_s20] sm:$0xff] %vm225_vm1, %v1753_v21 }
 0x21c   : > { %v1730_v28 = vmul.f32 0.2, %v3377_v56  ;;  %v1731_v53 = vmul.f32 0.2, %v3380_v24  ;;  %v1732_v44 = vmul.f32 0.2, %v3383_v58  ;;  %v1755_v19 = vsel %vm1691_vm4, %v3356_v29, %v1723_v16 }
 0x21d   : > { %vm1715_vm2 = vcmp.ge.f32.partialorder %v3340_v11, 0.0  ;;  %vm1716_vm15 = vcmp.ge.f32.partialorder %v3342_v34, 0.0  ;;  %vm1718_vm13 = vcmp.ge.f32.partialorder %v3346_v17, 0.0  ;;  %v1733_v50 = vmul.f32 0.2, %v3386_v46  ;;  %1786 = vst.msk [vmem:[%s3432_s20 + $0x8] sm:$0xff] %vm225_vm1, %v1754_v15 }
 0x21e   : > { %v1734_v1 = vmul.f32 0.2, %v3389_v45  ;;  %v1735_v5 = vmul.f32 0.2, %v3392_v51  ;;  %vm1719_vm3 = vcmp.ge.f32.partialorder %v3348_v0, 0.0  ;;  %vm1720_vm14 = vcmp.ge.f32.partialorder %v3350_v33, 0.0 }
 0x21f   : > { %v1736_v14 = vmul.f32 0.2, %v3395_v55  ;;  %v1737_v3 = vmul.f32 0.2, %v3398_v63  ;;  %v1738_v61 = vmul.f32 0.2, %v3401_v20  ;;  %v1756_v41 = vsel %vm1692_vm5, %v3359_v31, %v1724_v23 }
 0x220   : > { %1787 = vst.msk [vmem:[%s3432_s20 + $0x10] sm:$0xff] %vm225_vm1, %v1755_v19  ;;  %v1739_v39 = vmul.f32 0.2, %v3404_v26  ;;  %v1740_v27 = vmul.f32 0.2, %v3407_v54  ;;  %v1757_v48 = vsel %vm1693_vm6, %v3362_v42, %v1725_v4  ;;  %1788 = vst.msk [vmem:[%s3432_s20 + $0x18] sm:$0xff] %vm225_vm1, %v1756_v41  ;;  %v1758_v43 = vsel %vm1694_vm7, %v3365_v13, %v1726_v8 }
 0x221   : > { %v1741_v36 = vmul.f32 0.2, %v3410_v9  ;;  %v1742_v60 = vmul.f32 0.2, %v3414_v18  ;;  %v1743_v22 = vmul.f32 0.2, %v3417_v32  ;;  %v1759_v57 = vsel %vm1695_vm8, %v3368_v7, %v1727_v52 }
 0x222   : > { %v1744_v35 = vmul.f32 0.2, %v3334_v62  ;;  %1789 = vst.msk [vmem:[%s3432_s20 + $0x20] sm:$0xff] %vm225_vm1, %v1757_v48  ;;  %v1745_v37 = vmul.f32 0.2, %v3336_v10  ;;  %1790 = vst.msk [vmem:[%s3432_s20 + $0x28] sm:$0xff] %vm225_vm1, %v1758_v43  ;;  %v1760_v13 = vsel %vm1696_vm9, %v3371_v49, %v1728_v6 }
 0x223   : > { %v1746_v30 = vmul.f32 0.2, %v3338_v25  ;;  %v1747_v40 = vmul.f32 0.2, %v3340_v11  ;;  %v1748_v29 = vmul.f32 0.2, %v3342_v34 }
 0x224   : > { %v1749_v31 = vmul.f32 0.2, %v3344_v12  ;;  %v1750_v42 = vmul.f32 0.2, %v3346_v17  ;;  %1791 = vst.msk [vmem:[%s3432_s20 + $0x30] sm:$0xff] %vm225_vm1, %v1759_v57  ;;  %vm3706_vm4 = vcmp.ge.f32.partialorder %v3374_v2, 0.0 }
 0x225   : > { %v1751_v47 = vmul.f32 0.2, %v3348_v0  ;;  %v1752_v7 = vmul.f32 0.2, %v3350_v33  ;;  %v1761_v38 = vsel %vm3706_vm4, %v3374_v2, %v1729_v59  ;;  %vm3707_vm5 = vcmp.ge.f32.partialorder %v3377_v56, 0.0  ;;  %1792 = vst.msk [vmem:[%s3432_s20 + $0x38] sm:$0xff] %vm225_vm1, %v1760_v13 }
 0x226   : > { %v1762_v16 = vsel %vm3707_vm5, %v3377_v56, %v1730_v28  ;;  %vm3708_vm6 = vcmp.ge.f32.partialorder %v3380_v24, 0.0  ;;  %vm3709_vm7 = vcmp.ge.f32.partialorder %v3383_v58, 0.0  ;;  %vm3710_vm8 = vcmp.ge.f32.partialorder %v3386_v46, 0.0  ;;  %1793 = vst.msk [vmem:[%s3432_s20 + $0x40] sm:$0xff] %vm225_vm1, %v1761_v38 }
 0x227   : > { %v1763_v49 = vsel %vm3708_vm6, %v3380_v24, %v1731_v53  ;;  %v1764_v23 = vsel %vm3709_vm7, %v3383_v58, %v1732_v44  ;;  %v1765_v4 = vsel %vm3710_vm8, %v3386_v46, %v1733_v50  ;;  %vm3711_vm9 = vcmp.ge.f32.partialorder %v3389_v45, 0.0  ;;  %1794 = vst.msk [vmem:[%s3432_s20 + $0x48] sm:$0xff] %vm225_vm1, %v1762_v16 }
 0x228   : > { %v1766_v2 = vsel %vm3711_vm9, %v3389_v45, %v1734_v1  ;;  %vm3712_vm4 = vcmp.ge.f32.partialorder %v3392_v51, 0.0  ;;  %v1768_v24 = vsel %vm1704_vm11, %v3395_v55, %v1736_v14  ;;  %v1769_v58 = vsel %vm1705_vm10, %v3398_v63, %v1737_v3  ;;  %1795 = vst.msk [vmem:[%s3432_s20 + $0x50] sm:$0xff] %vm225_vm1, %v1763_v49  ;;  %1796 = vst.msk [vmem:[%s3432_s20 + $0x58] sm:$0xff] %vm225_vm1, %v1764_v23 }
 0x229   : > { %v1767_v56 = vsel %vm3712_vm4, %v3392_v51, %v1735_v5  ;;  %vm3713_vm5 = vcmp.ge.f32.partialorder %v3401_v20, 0.0  ;;  %1797 = vst.msk [vmem:[%s3432_s20 + $0x60] sm:$0xff] %vm225_vm1, %v1765_v4  ;;  %1798 = vst.msk [vmem:[%s3432_s20 + $0x68] sm:$0xff] %vm225_vm1, %v1766_v2  ;;  %vm3714_vm11 = vcmp.ge.f32.partialorder %v3404_v26, 0.0  ;;  %vm3715_vm10 = vcmp.ge.f32.partialorder %v3407_v54, 0.0 }
 0x22a   : > { %v1770_v46 = vsel %vm3713_vm5, %v3401_v20, %v1738_v61  ;;  %v1771_v45 = vsel %vm3714_vm11, %v3404_v26, %v1739_v39  ;;  %v1772_v51 = vsel %vm3715_vm10, %v3407_v54, %v1740_v27  ;;  %vm3716_vm6 = vcmp.ge.f32.partialorder %v3410_v9, 0.0  ;;  %1799 = vst.msk [vmem:[%s3432_s20 + $0x70] sm:$0xff] %vm225_vm1, %v1767_v56  ;;  %1800 = vst.msk [vmem:[%s3432_s20 + $0x78] sm:$0xff] %vm225_vm1, %v1768_v24 }
 0x22b   : > { %v1773_v55 = vsel %vm3716_vm6, %v3410_v9, %v1741_v36  ;;  %v1774_v63 = vsel %vm1710_vm0, %v3414_v18, %v1742_v60  ;;  %1801 = vst.msk [vmem:[%s3432_s20 + $0x80] sm:$0xff] %vm225_vm1, %v1769_v58  ;;  %1802 = vst.msk [vmem:[%s3432_s20 + $0x88] sm:$0xff] %vm225_vm1, %v1770_v46  ;;  %v1775_v20 = vsel %vm1711_vm12, %v3417_v32, %v1743_v22  ;;  %vm3717_vm7 = vcmp.ge.f32.partialorder %v3334_v62, 0.0 }
 0x22c   : > { %v1776_v26 = vsel %vm3717_vm7, %v3334_v62, %v1744_v35  ;;  %vm3718_vm0 = vcmp.ge.f32.partialorder %v3336_v10, 0.0  ;;  %vm3719_vm8 = vcmp.ge.f32.partialorder %v3338_v25, 0.0  ;;  %1803 = vst.msk [vmem:[%s3432_s20 + $0x90] sm:$0xff] %vm225_vm1, %v1771_v45  ;;  %1804 = vst.msk [vmem:[%s3432_s20 + $0x98] sm:$0xff] %vm225_vm1, %v1772_v51  ;;  %v1779_v62 = vsel %vm1715_vm2, %v3340_v11, %v1747_v40 }
 0x22d   : > { %v1777_v54 = vsel %vm3718_vm0, %v3336_v10, %v1745_v37  ;;  %v1778_v9 = vsel %vm3719_vm8, %v3338_v25, %v1746_v30  ;;  %1805 = vst.msk [vmem:[%s3432_s20 + $0xa0] sm:$0xff] %vm225_vm1, %v1773_v55  ;;  %1806 = vst.msk [vmem:[%s3432_s20 + $0xa8] sm:$0xff] %vm225_vm1, %v1774_v63  ;;  %v1780_v10 = vsel %vm1716_vm15, %v3342_v34, %v1748_v29  ;;  %vm3720_vm12 = vcmp.ge.f32.partialorder %v3344_v12, 0.0 }
 0x22e   : > { %v1781_v25 = vsel %vm3720_vm12, %v3344_v12, %v1749_v31  ;;  %v1782_v18 = vsel %vm1718_vm13, %v3346_v17, %v1750_v42  ;;  %1807 = vst.msk [vmem:[%s3432_s20 + $0xb0] sm:$0xff] %vm225_vm1, %v1775_v20  ;;  %1808 = vst.msk [vmem:[%s3432_s20 + $0xb8] sm:$0xff] %vm225_vm1, %v1776_v26  ;;  %v1783_v11 = vsel %vm1719_vm3, %v3348_v0, %v1751_v47 }
 0x22f   : > { %1809 = vst.msk [vmem:[%s3432_s20 + $0xc0] sm:$0xff] %vm225_vm1, %v1777_v54  ;;  %1810 = vst.msk [vmem:[%s3432_s20 + $0xc8] sm:$0xff] %vm225_vm1, %v1778_v9  ;;  %v1784_v34 = vsel %vm1720_vm14, %v3350_v33, %v1752_v7 }
 0x230   : > { %1811 = vst.msk [vmem:[%s3432_s20 + $0xd0] sm:$0xff] %vm225_vm1, %v1779_v62  ;;  %1812 = vst.msk [vmem:[%s3432_s20 + $0xd8] sm:$0xff] %vm225_vm1, %v1780_v10 }
 0x231   : > { %1813 = vst.msk [vmem:[%s3432_s20 + $0xe0] sm:$0xff] %vm225_vm1, %v1781_v25  ;;  %1814 = vst.msk [vmem:[%s3432_s20 + $0xe8] sm:$0xff] %vm225_vm1, %v1782_v18 }
 0x232   : > { %1815 = vst.msk [vmem:[%s3432_s20 + $0xf0] sm:$0xff] %vm225_vm1, %v1783_v11  ;;  %1816 = vst.msk [vmem:[%s3432_s20 + $0xf8] sm:$0xff] %vm225_vm1, %v1784_v34 }
 0x233 PF: > { %s12_s11 = sadd.s32 1, %s2372_s11   ;;  %s3721_s9 = smov %s2368_s10 }
 0x234   : > { %p9_p5 = scmp.ge.s32.totalorder %s12_s11, 4   ;;  %s3722_s10 = smov %s3724_s12 }
 0x236   :  { %11 = sbr.rel (!%p9_p5) target bundleno = 2 (0x2), region = 69 }

// kernel: generator_forward.53
= control target key start
LH: loop header
LB: loop body
LE: loop exit
PB: predicated region body
PF: predicated region fallthrough
CT: control target
= control target key end

     0   :  { %s1594_s9 = smov 0   ;;  %s1596_s10 = smov 0   ;;  %s1968_s0 = inlined_call_operand.vmem [shape: f32[2,256,288], index: 0, kind: input, shape index: {}]   ;;  %s1969_s1 = inlined_call_operand.vmem [shape: bf16[288,3], index: 1, kind: input, shape index: {}]   ;;  %s1970_s2 = inlined_call_operand.vmem [shape: f32[2,256,3], index: 2, kind: output, shape index: {}]  }
   0x1   :  { %s1598_s11 = smov 0  }
   0x2 LB: > { %s31_s12 = sadd.s32 1, %s1572_s10  ;;  %p1223_p0 = scmp.ge.s32.totalorder %s1576_s11, 1  ;;  %s1576_s11 = sphi %s1598_s11, %s12_s11   ;;  %s1572_s10 = sphi %s1596_s10, %s1972_s10   ;;  %s1568_s9 = sphi %s1594_s9, %s1971_s9  }
   0x3   : > { %p33_p1 = scmp.ge.s32.totalorder %s31_s12, 2  ;;  %p156_p2 = scmp.lt.s32.totalorder %s1576_s11, 3 }
   0x5   : > { %s1974_s12 = smov (%p33_p1, %s31_s12), 0  ;;  %p157_p3 = pnand %p1223_p0, %p156_p2 }
   0x6   : > { %p194_p4 = scmp.lt.s32.totalorder (!%p157_p3), %s1568_s9, 1 }
   0x7   : > { %160 = sbr.rel (%p157_p3) target bundleno = 361 (0x169), region = 28 }
   0xc   : > { %v1472_v0 = vld [vmem:[%s1969_s1 + $0x78] sm:$0xff]   ;;  %v1474_v2 = vld [vmem:[%s1969_s1 + $0x70] sm:$0xff]   ;;  %v1476_v4 = vld [vmem:[%s1969_s1 + $0x68] sm:$0xff]   ;;  %s1976_s9 = smov (!%p194_p4, %s1568_s9), 1  ;;  %vm578_vm0 = vcmask 261120   ;;  %vm225_vm1 = vcmask 23552  }
   0xd   : > { %v1473_v1 = vld [vmem:[%s1969_s1 + $0x38] sm:$0xff]   ;;  %1264 = vmatprep.subr.bf16.mxu0 %v1472_v0  ;;  %1430 = vmatprep.subr.bf16.mxu1 %v1472_v0  ;;  %v1475_v3 = vld [vmem:[%s1969_s1 + $0x30] sm:$0xff]   ;;  %v1477_v5 = vld [vmem:[%s1969_s1 + $0x28] sm:$0xff]   ;;  %s1446_s27 = smul.u32 768, %s1976_s9  ;;  %s1263_s29 = sshll.u32 %s1976_s9, 8 }
   0xe   : > { %1265 = vmatpush3.bf16.msra.mxu0 %v1473_v1  ;;  %1438 = vmatpush3.bf16.msra.mxu1 %v1473_v1  ;;  %v1478_v6 = vld [vmem:[%s1969_s1 + $0x60] sm:$0xff]   ;;  %v1480_v8 = vld [vmem:[%s1969_s1 + $0x58] sm:$0xff]   ;;  %v1482_v10 = vld [vmem:[%s1969_s1 + $0x50] sm:$0xff]   ;;  %s1855_s9 = scalar_lea.vmem %s1970_s2, %s1263_s29 }
   0xf   : > { %1266 = vmatprep.subr.bf16.mxu0 %v1474_v2  ;;  %1431 = vmatprep.subr.bf16.mxu1 %v1474_v2  ;;  %v1479_v7 = vld [vmem:[%s1969_s1 + $0x20] sm:$0xff]   ;;  %s1645_s6 = scalar_lea.vmem %s1968_s0, %s1446_s27  ;;  %v1481_v9 = vld [vmem:[%s1969_s1 + $0x18] sm:$0xff]   ;;  %v1483_v17 = vld [vmem:[%s1969_s1 + $0x10] sm:$0xff]  }
  0x10   : > { %v259_v11 = vld [vmem:[%s1645_s6 + $0x8] sm:$0xff]  ;;  %v262_v12 = vld [vmem:[%s1645_s6 + $0x20] sm:$0xff]  ;;  %v261_v23 = vld [vmem:[%s1645_s6 + $0x18] sm:$0xff] }
  0x11   : > { %v331_v13 = vld [vmem:[%s1645_s6 + $0x248] sm:$0xff]  ;;  %v355_v14 = vpack.c.bf16 %v262_v12, %v259_v11  ;;  %v334_v15 = vld [vmem:[%s1645_s6 + $0x260] sm:$0xff]  ;;  %v333_v25 = vld [vmem:[%s1645_s6 + $0x258] sm:$0xff] }
  0x12   : > { %1267 = vmatpush3.bf16.msra.mxu0 %v1475_v3  ;;  %1439 = vmatpush3.bf16.msra.mxu1 %v1475_v3  ;;  %v391_v16 = vpack.c.bf16 %v334_v15, %v331_v13  ;;  %v1484_v18 = vld [vmem:[%s1969_s1 + $0x48] sm:$0xff]   ;;  %v1486_v20 = vld [vmem:[%s1969_s1 + $0x40] sm:$0xff]   ;;  %v265_v27 = vld [vmem:[%s1645_s6 + $0x38] sm:$0xff] }
  0x13   : > { %1268 = vmatprep.subr.bf16.mxu0 %v1476_v4  ;;  %1432 = vmatprep.subr.bf16.mxu1 %v1476_v4  ;;  %v1485_v19 = vld [vmem:[%s1969_s1 + $0x8] sm:$0xff]   ;;  %v1487_v21 = vld [vmem:[%s1969_s1] sm:$0xff]   ;;  %v268_v28 = vld [vmem:[%s1645_s6 + $0x50] sm:$0xff] }
  0x14   : > { %659 = vmatprep.mubr.bf16.mxu0 %v355_v14  ;;  %755 = vmatprep.mubr.bf16.mxu1 %v391_v16  ;;  %v258_v22 = vld [vmem:[%s1645_s6] sm:$0xff]  ;;  %v1488_v26 = vld [vmem:[%s1969_s1 + $0x88] sm:$0xff]   ;;  %v337_v29 = vld [vmem:[%s1645_s6 + $0x278] sm:$0xff]  ;;  %v358_v33 = vpack.c.bf16 %v268_v28, %v265_v27 }
  0x15   : > { %v330_v24 = vld [vmem:[%s1645_s6 + $0x240] sm:$0xff]  ;;  %v340_v30 = vld [vmem:[%s1645_s6 + $0x290] sm:$0xff]  ;;  %v354_v31 = vpack.c.bf16 %v261_v23, %v258_v22  ;;  %v267_v37 = vld [vmem:[%s1645_s6 + $0x48] sm:$0xff] }
  0x16   : > { %1269 = vmatpush3.bf16.msra.mxu0 %v1477_v5  ;;  %1440 = vmatpush3.bf16.msra.mxu1 %v1477_v5  ;;  %v390_v32 = vpack.c.bf16 %v333_v25, %v330_v24  ;;  %v394_v34 = vpack.c.bf16 %v340_v30, %v337_v29  ;;  %v1489_v35 = vld [vmem:[%s1969_s1 + $0x80] sm:$0xff]   ;;  %v264_v36 = vld [vmem:[%s1645_s6 + $0x30] sm:$0xff]  ;;  %v339_v39 = vld [vmem:[%s1645_s6 + $0x288] sm:$0xff] }
  0x17   : > { %1270 = vmatprep.subr.bf16.mxu0 %v1478_v6  ;;  %1433 = vmatprep.subr.bf16.mxu1 %v1478_v6  ;;  %v336_v38 = vld [vmem:[%s1645_s6 + $0x270] sm:$0xff]  ;;  %v271_v40 = vld [vmem:[%s1645_s6 + $0x68] sm:$0xff]  ;;  %v274_v41 = vld [vmem:[%s1645_s6 + $0x80] sm:$0xff]  ;;  %v357_v44 = vpack.c.bf16 %v267_v37, %v264_v36 }
  0x18   : > { %v343_v42 = vld [vmem:[%s1645_s6 + $0x2a8] sm:$0xff]  ;;  %v346_v43 = vld [vmem:[%s1645_s6 + $0x2c0] sm:$0xff]  ;;  %v393_v45 = vpack.c.bf16 %v339_v39, %v336_v38  ;;  %v361_v46 = vpack.c.bf16 %v274_v41, %v271_v40  ;;  %v273_v49 = vld [vmem:[%s1645_s6 + $0x78] sm:$0xff] }
  0x19   : > { %v397_v47 = vpack.c.bf16 %v346_v43, %v343_v42  ;;  %v270_v48 = vld [vmem:[%s1645_s6 + $0x60] sm:$0xff]  ;;  %v345_v51 = vld [vmem:[%s1645_s6 + $0x2b8] sm:$0xff]  ;;  %v280_v53 = vld [vmem:[%s1645_s6 + $0xb0] sm:$0xff] }
  0x1a   : > { %1271 = vmatpush3.bf16.msra.mxu0 %v1479_v7  ;;  %1441 = vmatpush3.bf16.msra.mxu1 %v1479_v7  ;;  %v342_v50 = vld [vmem:[%s1645_s6 + $0x2a0] sm:$0xff]  ;;  %v277_v52 = vld [vmem:[%s1645_s6 + $0x98] sm:$0xff]  ;;  %v352_v55 = vld [vmem:[%s1645_s6 + $0x2f0] sm:$0xff]  ;;  %v360_v56 = vpack.c.bf16 %v273_v49, %v270_v48 }
  0x1b   : > { %1272 = vmatprep.subr.bf16.mxu0 %v1480_v8  ;;  %1434 = vmatprep.subr.bf16.mxu1 %v1480_v8  ;;  %v349_v54 = vld [vmem:[%s1645_s6 + $0x2d8] sm:$0xff]  ;;  %v396_v57 = vpack.c.bf16 %v345_v51, %v342_v50  ;;  %v364_v58 = vpack.c.bf16 %v280_v53, %v277_v52  ;;  %v276_v60 = vld [vmem:[%s1645_s6 + $0x90] sm:$0xff]  ;;  %v279_v61 = vld [vmem:[%s1645_s6 + $0xa8] sm:$0xff] }
  0x1c   : > { %v400_v59 = vpack.c.bf16 %v352_v55, %v349_v54  ;;  %v348_v62 = vld [vmem:[%s1645_s6 + $0x2d0] sm:$0xff]  ;;  %v351_v63 = vld [vmem:[%s1645_s6 + $0x2e8] sm:$0xff]  ;;  %v286_v1 = vld [vmem:[%s1645_s6 + $0xe0] sm:$0xff]  ;;  %v363_v4 = vpack.c.bf16 %v279_v61, %v276_v60 }
  0x1d   : > { %v283_v0 = vld [vmem:[%s1645_s6 + $0xc8] sm:$0xff]  ;;  %v260_v2 = vld [vmem:[%s1645_s6 + $0x10] sm:$0xff]  ;;  %v399_v5 = vpack.c.bf16 %v351_v63, %v348_v62  ;;  %v282_v8 = vld [vmem:[%s1645_s6 + $0xc0] sm:$0xff] }
  0x1e   : > { %1273 = vmatpush3.bf16.msra.mxu0 %v1481_v9  ;;  %1442 = vmatpush3.bf16.msra.mxu1 %v1481_v9  ;;  %v263_v3 = vld [vmem:[%s1645_s6 + $0x28] sm:$0xff]  ;;  %v367_v6 = vpack.c.bf16 %v286_v1, %v283_v0  ;;  %v285_v9 = vld [vmem:[%s1645_s6 + $0xd8] sm:$0xff]  ;;  %v292_v13 = vld [vmem:[%s1645_s6 + $0x110] sm:$0xff] }
  0x1f   : > { %1274 = vmatprep.subr.bf16.mxu0 %v1482_v10  ;;  %1435 = vmatprep.subr.bf16.mxu1 %v1482_v10  ;;  %v356_v7 = vpack.c.bf16 %v263_v3, %v260_v2  ;;  %v266_v10 = vld [vmem:[%s1645_s6 + $0x40] sm:$0xff]  ;;  %v269_v11 = vld [vmem:[%s1645_s6 + $0x58] sm:$0xff]  ;;  %v272_v14 = vld [vmem:[%s1645_s6 + $0x70] sm:$0xff]  ;;  %v366_v16 = vpack.c.bf16 %v285_v9, %v282_v8 }
  0x20   : > { %v289_v12 = vld [vmem:[%s1645_s6 + $0xf8] sm:$0xff]  ;;  %v275_v15 = vld [vmem:[%s1645_s6 + $0x88] sm:$0xff]  ;;  %v278_v22 = vld [vmem:[%s1645_s6 + $0xa0] sm:$0xff] }
  0x21   : > { %v281_v23 = vld [vmem:[%s1645_s6 + $0xb8] sm:$0xff]  ;;  %v295_v24 = vld [vmem:[%s1645_s6 + $0x128] sm:$0xff]  ;;  %v298_v25 = vld [vmem:[%s1645_s6 + $0x140] sm:$0xff] }
  0x22   : > { %1275 = vmatpush3.bf16.msra.mxu0 %v1483_v17  ;;  %1443 = vmatpush3.bf16.msra.mxu1 %v1483_v17  ;;  %v359_v17 = vpack.c.bf16 %v269_v11, %v266_v10  ;;  %v287_v27 = vld [vmem:[%s1645_s6 + $0xe8] sm:$0xff]  ;;  %v365_v29 = vpack.c.bf16 %v281_v23, %v278_v22  ;;  %v373_v30 = vpack.c.bf16 %v298_v25, %v295_v24  ;;  %v301_v36 = vld [vmem:[%s1645_s6 + $0x158] sm:$0xff]  ;;  %v304_v37 = vld [vmem:[%s1645_s6 + $0x170] sm:$0xff] }
  0x23   : > { %1276 = vmatprep.subr.bf16.mxu0 %v1484_v18  ;;  %1436 = vmatprep.subr.bf16.mxu1 %v1484_v18  ;;  %v370_v18 = vpack.c.bf16 %v292_v13, %v289_v12  ;;  %v296_v38 = vld [vmem:[%s1645_s6 + $0x130] sm:$0xff]  ;;  %v299_v39 = vld [vmem:[%s1645_s6 + $0x148] sm:$0xff]  ;;  %v376_v42 = vpack.c.bf16 %v304_v37, %v301_v36  ;;  %v310_v49 = vld [vmem:[%s1645_s6 + $0x1a0] sm:$0xff] }
  0x24   : > { %v374_v43 = vpack.c.bf16 %v299_v39, %v296_v38  ;;  %v307_v48 = vld [vmem:[%s1645_s6 + $0x188] sm:$0xff]  ;;  %v308_v50 = vld [vmem:[%s1645_s6 + $0x190] sm:$0xff]  ;;  %v313_v60 = vld [vmem:[%s1645_s6 + $0x1b8] sm:$0xff] }
  0x25   : > { %v311_v51 = vld [vmem:[%s1645_s6 + $0x1a8] sm:$0xff]  ;;  %v379_v54 = vpack.c.bf16 %v310_v49, %v307_v48  ;;  %v316_v61 = vld [vmem:[%s1645_s6 + $0x1d0] sm:$0xff]  ;;  %v322_v9 = vld [vmem:[%s1645_s6 + $0x200] sm:$0xff] }
  0x26   : > { %1277 = vmatpush3.bf16.msra.mxu0 %v1485_v19  ;;  %1444 = vmatpush3.bf16.msra.mxu1 %v1485_v19  ;;  %v362_v19 = vpack.c.bf16 %v275_v15, %v272_v14  ;;  %v380_v55 = vpack.c.bf16 %v311_v51, %v308_v50  ;;  %v320_v62 = vld [vmem:[%s1645_s6 + $0x1f0] sm:$0xff]  ;;  %v323_v63 = vld [vmem:[%s1645_s6 + $0x208] sm:$0xff]  ;;  %v382_v2 = vpack.c.bf16 %v316_v61, %v313_v60 }
  0x27   : > { %1278 = vmatprep.subr.bf16.mxu0 %v1486_v20  ;;  %1437 = vmatprep.subr.bf16.mxu1 %v1486_v20  ;;  %v288_v20 = vld [vmem:[%s1645_s6 + $0xf0] sm:$0xff]  ;;  %v386_v3 = vpack.c.bf16 %v323_v63, %v320_v62  ;;  %v319_v8 = vld [vmem:[%s1645_s6 + $0x1e8] sm:$0xff] }
  0x28   : > { %v332_v10 = vld [vmem:[%s1645_s6 + $0x250] sm:$0xff]  ;;  %v335_v11 = vld [vmem:[%s1645_s6 + $0x268] sm:$0xff]  ;;  %v385_v14 = vpack.c.bf16 %v322_v9, %v319_v8 }
  0x29   : > { %v392_v15 = vpack.c.bf16 %v335_v11, %v332_v10  ;;  %v344_v22 = vld [vmem:[%s1645_s6 + $0x2b0] sm:$0xff]  ;;  %v347_v23 = vld [vmem:[%s1645_s6 + $0x2c8] sm:$0xff] }
  0x2a   : > { %1279 = vmatpush3.bf16.msra.mxu0 %v1487_v21  ;;  %1445 = vmatpush3.bf16.msra.mxu1 %v1487_v21  ;;  %v291_v21 = vld [vmem:[%s1645_s6 + $0x108] sm:$0xff] }
  0x2b   : > { %1394 = vmatprep.subr.bf16.mxu1 %v1488_v26  ;;  %v369_v28 = vpack.c.bf16 %v291_v21, %v288_v20  ;;  %v325_v20 = vld [vmem:[%s1645_s6 + $0x218] sm:$0xff]  ;;  %v328_v21 = vld [vmem:[%s1645_s6 + $0x230] sm:$0xff] }
  0x2d   : > { %660 = vmatmul.mubr.bf16.vlgmr.msra.gmra.mxu0 %v354_v31  ;;  %756 = vmatmul.mubr.bf16.vlgmr.msra.gmra.mxu1 %v390_v32  ;;  %v294_v32 = vld [vmem:[%s1645_s6 + $0x120] sm:$0xff] }
  0x2e   : > { %1395 = vmatpush3.bf16.msra.mxu1 %v1488_v26  ;;  %667 = vmatprep.mubr.bf16.mxu0 %v358_v33  ;;  %v284_v26 = vld [vmem:[%s1645_s6 + $0xd0] sm:$0xff]  ;;  %v297_v33 = vld [vmem:[%s1645_s6 + $0x138] sm:$0xff] }
  0x2f   : > { %763 = vmatprep.mubr.bf16.mxu1 %v394_v34  ;;  %1396 = vmatprep.subr.bf16.mxu1 %v1489_v35  ;;  %v368_v31 = vpack.c.bf16 %v287_v27, %v284_v26  ;;  %v290_v34 = vld [vmem:[%s1645_s6 + $0x100] sm:$0xff]  ;;  %v372_v40 = vpack.c.bf16 %v297_v33, %v294_v32  ;;  %v388_v26 = vpack.c.bf16 %v328_v21, %v325_v20 }
  0x30   : > { %v398_v27 = vpack.c.bf16 %v347_v23, %v344_v22 }
  0x32   : > { %1397 = vmatpush3.bf16.msra.mxu1 %v1489_v35  ;;  %v293_v35 = vld [vmem:[%s1645_s6 + $0x118] sm:$0xff] }
  0x33   : > { %v371_v41 = vpack.c.bf16 %v293_v35, %v290_v34  ;;  %v1578_v34 = vmov 0.0  }
  0x34   : > { %228 = vst.msk [vmem:[#allocation2 + $0x10] sm:$0xff] %vm225_vm1, %v1578_v34  ;;  %226 = vst.msk [vmem:[#allocation2] sm:$0xff] %vm225_vm1, %v1578_v34 }
  0x35   : > { %668 = vmatmul.mubr.bf16.gmra.mxu0 %v357_v44  ;;  %764 = vmatmul.mubr.bf16.gmra.mxu1 %v393_v45  ;;  %v300_v44 = vld [vmem:[%s1645_s6 + $0x150] sm:$0xff]  ;;  %v303_v45 = vld [vmem:[%s1645_s6 + $0x168] sm:$0xff]  ;;  %227 = vst.msk [vmem:[#allocation2 + $0x8] sm:$0xff] %vm225_vm1, %v1578_v34  ;;  %229 = vst.msk [vmem:[#allocation2 + $0x18] sm:$0xff] %vm225_vm1, %v1578_v34 }
  0x36   : > { %675 = vmatprep.mubr.bf16.mxu0 %v361_v46  ;;  %771 = vmatprep.mubr.bf16.mxu1 %v397_v47  ;;  %v302_v46 = vld [vmem:[%s1645_s6 + $0x160] sm:$0xff]  ;;  %v305_v47 = vld [vmem:[%s1645_s6 + $0x178] sm:$0xff]  ;;  %v375_v52 = vpack.c.bf16 %v303_v45, %v300_v44  ;;  %230 = vst.msk [vmem:[#allocation2 + $0x20] sm:$0xff] %vm225_vm1, %v1578_v34  ;;  %231 = vst.msk [vmem:[#allocation2 + $0x28] sm:$0xff] %vm225_vm1, %v1578_v34 }
  0x37   : > { %v377_v53 = vpack.c.bf16 %v305_v47, %v302_v46  ;;  %232 = vst.msk [vmem:[#allocation2 + $0x30] sm:$0xff] %vm225_vm1, %v1578_v34  ;;  %233 = vst.msk [vmem:[#allocation2 + $0x38] sm:$0xff] %vm225_vm1, %v1578_v34 }
  0x38   : > { %234 = vst.msk [vmem:[#allocation2 + $0x40] sm:$0xff] %vm225_vm1, %v1578_v34  ;;  %235 = vst.msk [vmem:[#allocation2 + $0x48] sm:$0xff] %vm225_vm1, %v1578_v34 }
  0x39   : > { %236 = vst.msk [vmem:[#allocation2 + $0x50] sm:$0xff] %vm225_vm1, %v1578_v34  ;;  %237 = vst.msk [vmem:[#allocation2 + $0x58] sm:$0xff] %vm225_vm1, %v1578_v34 }
  0x3a   : > { %238 = vst.msk [vmem:[#allocation2 + $0x60] sm:$0xff] %vm225_vm1, %v1578_v34  ;;  %239 = vst.msk [vmem:[#allocation2 + $0x68] sm:$0xff] %vm225_vm1, %v1578_v34 }
  0x3b   : > { %240 = vst.msk [vmem:[#allocation2 + $0x70] sm:$0xff] %vm225_vm1, %v1578_v34  ;;  %241 = vst.msk [vmem:[#allocation2 + $0x78] sm:$0xff] %vm225_vm1, %v1578_v34  ;;  %v440_v11 = vld [vmem:[#allocation2 + $0x10] sm:$0xff] }
  0x3c   : > { %242 = vst.msk [vmem:[#allocation2 + $0x80] sm:$0xff] %vm225_vm1, %v1578_v34  ;;  %243 = vst.msk [vmem:[#allocation2 + $0x88] sm:$0xff] %vm225_vm1, %v1578_v34  ;;  %v441_v22 = vld [vmem:[#allocation2 + $0x18] sm:$0xff] }
  0x3d   : > { %676 = vmatmul.mubr.bf16.gmra.mxu0 %v360_v56  ;;  %772 = vmatmul.mubr.bf16.gmra.mxu1 %v396_v57  ;;  %v306_v56 = vld [vmem:[%s1645_s6 + $0x180] sm:$0xff]  ;;  %v309_v57 = vld [vmem:[%s1645_s6 + $0x198] sm:$0xff]  ;;  %244 = vst.msk [vmem:[#allocation2 + $0x90] sm:$0xff] %vm225_vm1, %v1578_v34  ;;  %245 = vst.msk [vmem:[#allocation2 + $0x98] sm:$0xff] %vm225_vm1, %v1578_v34 }
  0x3e   : > { %683 = vmatprep.mubr.bf16.mxu0 %v364_v58  ;;  %779 = vmatprep.mubr.bf16.mxu1 %v400_v59  ;;  %v314_v58 = vld [vmem:[%s1645_s6 + $0x1c0] sm:$0xff]  ;;  %v317_v59 = vld [vmem:[%s1645_s6 + $0x1d8] sm:$0xff]  ;;  %v378_v0 = vpack.c.bf16 %v309_v57, %v306_v56  ;;  %246 = vst.msk [vmem:[#allocation2 + $0xa0] sm:$0xff] %vm225_vm1, %v1578_v34  ;;  %247 = vst.msk [vmem:[#allocation2 + $0xa8] sm:$0xff] %vm225_vm1, %v1578_v34 }
  0x3f   : > { %v383_v1 = vpack.c.bf16 %v317_v59, %v314_v58  ;;  %248 = vst.msk [vmem:[#allocation2 + $0xb0] sm:$0xff] %vm225_vm1, %v1578_v34  ;;  %249 = vst.msk [vmem:[#allocation2 + $0xb8] sm:$0xff] %vm225_vm1, %v1578_v34 }
  0x40   : > { %250 = vst.msk [vmem:[#allocation2 + $0xc0] sm:$0xff] %vm225_vm1, %v1578_v34  ;;  %251 = vst.msk [vmem:[#allocation2 + $0xc8] sm:$0xff] %vm225_vm1, %v1578_v34 }
  0x41   : > { %252 = vst.msk [vmem:[#allocation2 + $0xd0] sm:$0xff] %vm225_vm1, %v1578_v34  ;;  %253 = vst.msk [vmem:[#allocation2 + $0xd8] sm:$0xff] %vm225_vm1, %v1578_v34 }
  0x42   : > { %254 = vst.msk [vmem:[#allocation2 + $0xe0] sm:$0xff] %vm225_vm1, %v1578_v34  ;;  %255 = vst.msk [vmem:[#allocation2 + $0xe8] sm:$0xff] %vm225_vm1, %v1578_v34 }
  0x43   : > { %256 = vst.msk [vmem:[#allocation2 + $0xf0] sm:$0xff] %vm225_vm1, %v1578_v34  ;;  %257 = vst.msk [vmem:[#allocation2 + $0xf8] sm:$0xff] %vm225_vm1, %v1578_v34  ;;  %v444_v34 = vld [vmem:[#allocation2 + $0x30] sm:$0xff] }
  0x45   : > { %684 = vmatmul.mubr.bf16.gmra.mxu0 %v363_v4  ;;  %780 = vmatmul.mubr.bf16.gmra.mxu1 %v399_v5  ;;  %v312_v4 = vld [vmem:[%s1645_s6 + $0x1b0] sm:$0xff]  ;;  %v315_v5 = vld [vmem:[%s1645_s6 + $0x1c8] sm:$0xff] }
  0x46   : > { %691 = vmatprep.mubr.bf16.mxu0 %v367_v6  ;;  %1398 = vmatprep.mubr.msk.bf16.mxu1 %vm578_vm0, %v356_v7  ;;  %v326_v6 = vld [vmem:[%s1645_s6 + $0x220] sm:$0xff]  ;;  %v329_v7 = vld [vmem:[%s1645_s6 + $0x238] sm:$0xff]  ;;  %v381_v12 = vpack.c.bf16 %v315_v5, %v312_v4 }
  0x47   : > { %v389_v13 = vpack.c.bf16 %v329_v7, %v326_v6 }
  0x4d   : > { %692 = vmatmul.mubr.bf16.gmra.mxu0 %v366_v16  ;;  %1399 = vmatmul.mubr.msk.bf16.vlgmr.msra.gmra.mxu1 %vm578_vm0, %v359_v17  ;;  %v318_v16 = vld [vmem:[%s1645_s6 + $0x1e0] sm:$0xff]  ;;  %v321_v17 = vld [vmem:[%s1645_s6 + $0x1f8] sm:$0xff] }
  0x4e   : > { %699 = vmatprep.mubr.bf16.mxu0 %v370_v18  ;;  %1402 = vmatprep.mubr.msk.bf16.mxu1 %vm578_vm0, %v362_v19  ;;  %v338_v18 = vld [vmem:[%s1645_s6 + $0x280] sm:$0xff]  ;;  %v341_v19 = vld [vmem:[%s1645_s6 + $0x298] sm:$0xff]  ;;  %v384_v24 = vpack.c.bf16 %v321_v17, %v318_v16 }
  0x4f   : > { %v395_v25 = vpack.c.bf16 %v341_v19, %v338_v18  ;;  %v438_v16 = vld [vmem:[#allocation2] sm:$0xff] }
  0x55   : > { %700 = vmatmul.mubr.bf16.gmra.mxu0 %v369_v28  ;;  %1403 = vmatmul.mubr.msk.bf16.gmra.mxu1 %vm578_vm0, %v365_v29  ;;  %v324_v28 = vld [vmem:[%s1645_s6 + $0x210] sm:$0xff]  ;;  %v327_v29 = vld [vmem:[%s1645_s6 + $0x228] sm:$0xff] }
  0x56   : > { %707 = vmatprep.mubr.bf16.mxu0 %v373_v30  ;;  %1406 = vmatprep.mubr.msk.bf16.mxu1 %vm578_vm0, %v368_v31  ;;  %v350_v30 = vld [vmem:[%s1645_s6 + $0x2e0] sm:$0xff]  ;;  %v353_v31 = vld [vmem:[%s1645_s6 + $0x2f8] sm:$0xff]  ;;  %v387_v32 = vpack.c.bf16 %v327_v29, %v324_v28  ;;  %v439_v28 = vld [vmem:[#allocation2 + $0x8] sm:$0xff] }
  0x57   : > { %v401_v33 = vpack.c.bf16 %v353_v31, %v350_v30 }
  0x5d   : > { %708 = vmatmul.mubr.bf16.gmra.mxu0 %v372_v40  ;;  %1407 = vmatmul.mubr.msk.bf16.gmra.mxu1 %vm578_vm0, %v371_v41 }
  0x5e   : > { %715 = vmatprep.mubr.bf16.mxu0 %v376_v42  ;;  %1410 = vmatprep.mubr.msk.bf16.mxu1 %vm578_vm0, %v374_v43 }
  0x65   : > { %716 = vmatmul.mubr.bf16.gmra.mxu0 %v375_v52  ;;  %1411 = vmatmul.mubr.msk.bf16.gmra.mxu1 %vm578_vm0, %v377_v53 }
  0x66   : > { %723 = vmatprep.mubr.bf16.mxu0 %v379_v54  ;;  %1414 = vmatprep.mubr.msk.bf16.mxu1 %vm578_vm0, %v380_v55 }
  0x6d   : > { %724 = vmatmul.mubr.bf16.gmra.mxu0 %v378_v0  ;;  %1415 = vmatmul.mubr.msk.bf16.gmra.mxu1 %vm578_vm0, %v383_v1 }
  0x6e   : > { %731 = vmatprep.mubr.bf16.mxu0 %v382_v2  ;;  %1418 = vmatprep.mubr.msk.bf16.mxu1 %vm578_vm0, %v386_v3 }
  0x75   : > { %732 = vmatmul.mubr.bf16.gmra.mxu0 %v381_v12  ;;  %1419 = vmatmul.mubr.msk.bf16.gmra.mxu1 %vm578_vm0, %v389_v13 }
  0x76   : > { %739 = vmatprep.mubr.bf16.mxu0 %v385_v14  ;;  %1422 = vmatprep.mubr.msk.bf16.mxu1 %vm578_vm0, %v392_v15 }
  0x7d   : > { %740 = vmatmul.mubr.bf16.gmra.mxu0 %v384_v24  ;;  %1423 = vmatmul.mubr.msk.bf16.gmra.mxu1 %vm578_vm0, %v395_v25 }
  0x7e   : > { %747 = vmatprep.mubr.bf16.mxu0 %v388_v26  ;;  %1426 = vmatprep.mubr.msk.bf16.mxu1 %vm578_vm0, %v398_v27 }
  0x85   : > { %748 = vmatmul.mubr.bf16.gmra.mxu0 %v387_v32  ;;  %1427 = vmatmul.mubr.msk.bf16.gmra.mxu1 %vm578_vm0, %v401_v33 }
  0xed   : > { %v1280_v35 = vpop.f32.mrf.mxu0  ;;  %v1352_v36 = vpop.f32.mrf.mxu1 }
  0xef   : > { %v1281_v37 = vpop.f32.mrf.mxu0  ;;  %v1353_v38 = vpop.f32.mrf.mxu1 }
  0xf0   : > { %v1818_v39 = vadd.f32 %v1353_v38, %v1352_v36  ;;  %v1282_v13 = vadd.f32 %v1281_v37, %v1280_v35 }
  0xf1   : > { %v1283_v40 = vpop.f32.mrf.mxu0  ;;  %v1355_v41 = vpop.f32.mrf.mxu1 }
  0xf3   : > { %v1284_v42 = vpop.f32.mrf.mxu0  ;;  %v1356_v43 = vpop.f32.mrf.mxu1 }
  0xf4   : > { %v1820_v44 = vadd.f32 %v1356_v43, %v1355_v41  ;;  %v1285_v24 = vadd.f32 %v1284_v42, %v1283_v40  ;;  %v442_v41 = vld [vmem:[#allocation2 + $0x20] sm:$0xff] }
  0xf5   : > { %v1286_v45 = vpop.f32.mrf.mxu0  ;;  %v1358_v46 = vpop.f32.mrf.mxu1 }
  0xf7   : > { %v1287_v47 = vpop.f32.mrf.mxu0  ;;  %v1359_v48 = vpop.f32.mrf.mxu1 }
  0xf8   : > { %v1822_v49 = vadd.f32 %v1359_v48, %v1358_v46  ;;  %v1288_v9 = vadd.f32 %v1287_v47, %v1286_v45 }
  0xf9   : > { %v1289_v50 = vpop.f32.mrf.mxu0  ;;  %v1361_v51 = vpop.f32.mrf.mxu1 }
  0xfb   : > { %v1290_v52 = vpop.f32.mrf.mxu0  ;;  %v1362_v53 = vpop.f32.mrf.mxu1 }
  0xfc   : > { %v1824_v54 = vadd.f32 %v1362_v53, %v1361_v51  ;;  %v1291_v18 = vadd.f32 %v1290_v52, %v1289_v50  ;;  %v445_v50 = vld [vmem:[#allocation2 + $0x38] sm:$0xff] }
  0xfd   : > { %v1292_v55 = vpop.f32.mrf.mxu0  ;;  %v1364_v56 = vpop.f32.mrf.mxu1 }
  0xff   : > { %v1293_v57 = vpop.f32.mrf.mxu0  ;;  %v1365_v58 = vpop.f32.mrf.mxu1 }
 0x100   : > { %v1826_v59 = vadd.f32 %v1365_v58, %v1364_v56  ;;  %v1294_v36 = vadd.f32 %v1293_v57, %v1292_v55  ;;  %v443_v58 = vld [vmem:[#allocation2 + $0x28] sm:$0xff] }
 0x101   : > { %v1295_v60 = vpop.f32.mrf.mxu0  ;;  %v1367_v61 = vpop.f32.mrf.mxu1 }
 0x103   : > { %v1296_v62 = vpop.f32.mrf.mxu0  ;;  %v1368_v63 = vpop.f32.mrf.mxu1 }
 0x104   : > { %v1828_v0 = vadd.f32 %v1368_v63, %v1367_v61  ;;  %v1297_v52 = vadd.f32 %v1296_v62, %v1295_v60 }
 0x105   : > { %v1298_v1 = vpop.f32.mrf.mxu0  ;;  %v1830_v2 = vpop.f32.mrf.mxu1 }
 0x107   : > { %v1299_v3 = vpop.f32.mrf.mxu0  ;;  %v1832_v4 = vpop.f32.mrf.mxu1 }
 0x108   : > { %v1300_v30 = vadd.f32 %v1299_v3, %v1298_v1 }
 0x109   : > { %v1301_v5 = vpop.f32.mrf.mxu0  ;;  %v1834_v6 = vpop.f32.mrf.mxu1 }
 0x10b   : > { %v1302_v7 = vpop.f32.mrf.mxu0  ;;  %v1836_v8 = vpop.f32.mrf.mxu1 }
 0x10c   : > { %v1303_v43 = vadd.f32 %v1302_v7, %v1301_v5 }
 0x10d   : > { %v1304_v10 = vpop.f32.mrf.mxu0  ;;  %v1400_v12 = vpop.f32.mrf.mxu1 }
 0x10e   : > { %v831_v14 = vadd.f32 %v1400_v12, %v1288_v9  ;;  %v448_v9 = vld [vmem:[#allocation2 + $0x50] sm:$0xff] }
 0x10f   : > { %v1305_v15 = vpop.f32.mrf.mxu0  ;;  %v822_v17 = vpop.f32.mrf.mxu1 }
 0x110   : > { %v951_v19 = vadd.f32 %v831_v14, %v440_v11  ;;  %v823_v20 = vadd.f32 %v1282_v13, %v822_v17  ;;  %v1306_v60 = vadd.f32 %v1305_v15, %v1304_v10 }
 0x111   : > { %v1838_v21 = vpop.f32.mrf.mxu0  ;;  %v1401_v23 = vpop.f32.mrf.mxu1 }
 0x112   : > { %984 = vst.msk [vmem:[#allocation2 + $0x10] sm:$0xff] %vm225_vm1, %v951_v19  ;;  %v949_v25 = vadd.f32 %v823_v20, %v438_v16  ;;  %v834_v26 = vadd.f32 %v1401_v23, %v1291_v18  ;;  %v446_v16 = vld [vmem:[#allocation2 + $0x40] sm:$0xff] }
 0x113   : > { %v1308_v27 = vpop.f32.mrf.mxu0  ;;  %v825_v29 = vpop.f32.mrf.mxu1 }
 0x114   : > { %982 = vst.msk [vmem:[#allocation2] sm:$0xff] %vm225_vm1, %v949_v25  ;;  %v952_v31 = vadd.f32 %v834_v26, %v441_v22  ;;  %v826_v32 = vadd.f32 %v1285_v24, %v825_v29  ;;  %v449_v24 = vld [vmem:[#allocation2 + $0x58] sm:$0xff]  ;;  %v1309_v15 = vadd.f32 %v1308_v27, %v1838_v21 }
 0x115   : > { %v1310_v33 = vpop.f32.mrf.mxu0  ;;  %v1404_v35 = vpop.f32.mrf.mxu1 }
 0x116   : > { %985 = vst.msk [vmem:[#allocation2 + $0x18] sm:$0xff] %vm225_vm1, %v952_v31  ;;  %v950_v37 = vadd.f32 %v826_v32, %v439_v28  ;;  %v847_v38 = vadd.f32 %v1404_v35, %v1300_v30  ;;  %v447_v30 = vld [vmem:[#allocation2 + $0x48] sm:$0xff] }
 0x117   : > { %v1311_v40 = vpop.f32.mrf.mxu0  ;;  %v838_v42 = vpop.f32.mrf.mxu1 }
 0x118   : > { %983 = vst.msk [vmem:[#allocation2 + $0x8] sm:$0xff] %vm225_vm1, %v950_v37  ;;  %v955_v45 = vadd.f32 %v847_v38, %v444_v34  ;;  %v839_v46 = vadd.f32 %v1294_v36, %v838_v42  ;;  %v1312_v63 = vadd.f32 %v1311_v40, %v1310_v33 }
 0x119   : > { %v1019_v47 = vld [vmem:[#allocation2 + $0x10] sm:$0xff]  ;;  %v1313_v48 = vpop.f32.mrf.mxu0  ;;  %v1405_v51 = vpop.f32.mrf.mxu1 }
 0x11a   : > { %1490 = vtanh.f32 %v1019_v47  ;;  %988 = vst.msk [vmem:[#allocation2 + $0x30] sm:$0xff] %vm225_vm1, %v955_v45  ;;  %v953_v53 = vadd.f32 %v839_v46, %v442_v41  ;;  %v850_v55 = vadd.f32 %v1405_v51, %v1303_v43  ;;  %v450_v41 = vld [vmem:[#allocation2 + $0x60] sm:$0xff] }
 0x11b   : > { %v1017_v56 = vld [vmem:[#allocation2] sm:$0xff]  ;;  %v1314_v57 = vpop.f32.mrf.mxu0  ;;  %v841_v61 = vpop.f32.mrf.mxu1 }
 0x11c   : > { %1492 = vtanh.f32 %v1017_v56  ;;  %986 = vst.msk [vmem:[#allocation2 + $0x20] sm:$0xff] %vm225_vm1, %v953_v53  ;;  %v956_v1 = vadd.f32 %v850_v55, %v445_v50  ;;  %v842_v3 = vadd.f32 %v1297_v52, %v841_v61  ;;  %v1315_v18 = vadd.f32 %v1314_v57, %v1313_v48  ;;  %v452_v48 = vld [vmem:[#allocation2 + $0x70] sm:$0xff]  ;;  %v451_v61 = vld [vmem:[#allocation2 + $0x68] sm:$0xff] }
 0x11d   : > { %v1020_v5 = vld [vmem:[#allocation2 + $0x18] sm:$0xff]  ;;  %v1316_v7 = vpop.f32.mrf.mxu0  ;;  %v1408_v11 = vpop.f32.mrf.mxu1 }
 0x11e   : > { %1494 = vtanh.f32 %v1020_v5  ;;  %989 = vst.msk [vmem:[#allocation2 + $0x38] sm:$0xff] %vm225_vm1, %v956_v1  ;;  %v954_v62 = vadd.f32 %v842_v3, %v443_v58  ;;  %v863_v12 = vadd.f32 %v1408_v11, %v1312_v63  ;;  %v453_v11 = vld [vmem:[#allocation2 + $0x78] sm:$0xff] }
 0x11f   : > { %v1018_v13 = vld [vmem:[#allocation2 + $0x8] sm:$0xff]  ;;  %v1317_v14 = vpop.f32.mrf.mxu0  ;;  %v854_v17 = vpop.f32.mrf.mxu1 }
 0x120   : > { %1496 = vtanh.f32 %v1018_v13  ;;  %987 = vst.msk [vmem:[#allocation2 + $0x28] sm:$0xff] %vm225_vm1, %v954_v62  ;;  %v959_v19 = vadd.f32 %v863_v12, %v448_v9  ;;  %v855_v20 = vadd.f32 %v1306_v60, %v854_v17  ;;  %v1318_v35 = vadd.f32 %v1317_v14, %v1316_v7 }
 0x121   : > { %v1023_v22 = vld [vmem:[#allocation2 + $0x30] sm:$0xff]  ;;  %v1319_v23 = vpop.f32.mrf.mxu0  ;;  %v1409_v10 = vpop.f32.mrf.mxu1 }
 0x122   : > { %1498 = vtanh.f32 %v1023_v22  ;;  %992 = vst.msk [vmem:[#allocation2 + $0x50] sm:$0xff] %vm225_vm1, %v959_v19  ;;  %v957_v25 = vadd.f32 %v855_v20, %v446_v16  ;;  %v866_v26 = vadd.f32 %v1409_v10, %v1315_v18 }
 0x123   : > { %v1021_v28 = vld [vmem:[#allocation2 + $0x20] sm:$0xff]  ;;  %v1320_v29 = vpop.f32.mrf.mxu0  ;;  %v857_v31 = vpop.f32.mrf.mxu1 }
 0x124   : > { %1500 = vtanh.f32 %v1021_v28  ;;  %990 = vst.msk [vmem:[#allocation2 + $0x40] sm:$0xff] %vm225_vm1, %v957_v25  ;;  %v960_v32 = vadd.f32 %v866_v26, %v449_v24  ;;  %v858_v33 = vadd.f32 %v1309_v15, %v857_v31  ;;  %v1321_v52 = vadd.f32 %v1320_v29, %v1319_v23  ;;  %v454_v23 = vld [vmem:[#allocation2 + $0x80] sm:$0xff] }
 0x125   : > { %v1024_v21 = vld [vmem:[#allocation2 + $0x38] sm:$0xff]  ;;  %v1322_v27 = vpop.f32.mrf.mxu0  ;;  %v1412_v34 = vpop.f32.mrf.mxu1 }
 0x126   : > { %1502 = vtanh.f32 %v1024_v21  ;;  %993 = vst.msk [vmem:[#allocation2 + $0x58] sm:$0xff] %vm225_vm1, %v960_v32  ;;  %v958_v36 = vadd.f32 %v858_v33, %v447_v30  ;;  %v455_v21 = vld [vmem:[#allocation2 + $0x88] sm:$0xff] }
 0x127   : > { %v1491_v37 = vpop.eup %1490  ;;  %v1022_v38 = vld [vmem:[#allocation2 + $0x28] sm:$0xff]  ;;  %v1323_v40 = vpop.f32.mrf.mxu0 }
 0x128   : > { %v870_v42 = vpop.f32.mrf.mxu1  ;;  %1083 = vst.msk [vmem:[%s1855_s9 + $0x10] sm:$0xff] %vm225_vm1, %v1491_v37  ;;  %1504 = vtanh.f32 %v1022_v38  ;;  %991 = vst.msk [vmem:[#allocation2 + $0x48] sm:$0xff] %vm225_vm1, %v958_v36  ;;  %v1324_v43 = vadd.f32 %v1323_v40, %v1322_v27 }
 0x129   : > { %v871_v45 = vadd.f32 %v1318_v35, %v870_v42  ;;  %v1493_v46 = vpop.eup %1492  ;;  %v1027_v47 = vld [vmem:[#allocation2 + $0x50] sm:$0xff]  ;;  %v1325_v50 = vpop.f32.mrf.mxu0 }
 0x12a   : > { %v1413_v51 = vpop.f32.mrf.mxu1  ;;  %1081 = vst.msk [vmem:[%s1855_s9] sm:$0xff] %vm225_vm1, %v1493_v46  ;;  %1506 = vtanh.f32 %v1027_v47  ;;  %v879_v53 = vadd.f32 %v1412_v34, %v1324_v43  ;;  %v456_v46 = vld [vmem:[#allocation2 + $0x90] sm:$0xff] }
 0x12b   : > { %v961_v55 = vadd.f32 %v871_v45, %v450_v41  ;;  %v1495_v56 = vpop.eup %1494  ;;  %v1025_v57 = vld [vmem:[#allocation2 + $0x40] sm:$0xff]  ;;  %v1326_v58 = vpop.f32.mrf.mxu0 }
 0x12c   : > { %v873_v63 = vpop.f32.mrf.mxu1  ;;  %1084 = vst.msk [vmem:[%s1855_s9 + $0x18] sm:$0xff] %vm225_vm1, %v1495_v56  ;;  %1508 = vtanh.f32 %v1025_v57  ;;  %v963_v1 = vadd.f32 %v879_v53, %v452_v48  ;;  %v1327_v3 = vadd.f32 %v1326_v58, %v1325_v50 }
 0x12d   : > { %994 = vst.msk [vmem:[#allocation2 + $0x60] sm:$0xff] %vm225_vm1, %v961_v55  ;;  %v874_v5 = vadd.f32 %v1321_v52, %v873_v63  ;;  %v1497_v7 = vpop.eup %1496  ;;  %v1028_v9 = vld [vmem:[#allocation2 + $0x58] sm:$0xff]  ;;  %v1328_v60 = vpop.f32.mrf.mxu0 }
 0x12e   : > { %v1416_v62 = vpop.f32.mrf.mxu1  ;;  %1082 = vst.msk [vmem:[%s1855_s9 + $0x8] sm:$0xff] %vm225_vm1, %v1497_v7  ;;  %1510 = vtanh.f32 %v1028_v9  ;;  %996 = vst.msk [vmem:[#allocation2 + $0x70] sm:$0xff] %vm225_vm1, %v963_v1  ;;  %v882_v12 = vadd.f32 %v1413_v51, %v1327_v3  ;;  %v464_v1 = vld [vmem:[#allocation2 + $0xd0] sm:$0xff] }
 0x12f   : > { %v962_v13 = vadd.f32 %v874_v5, %v451_v61  ;;  %v1499_v14 = vpop.eup %1498  ;;  %v1026_v16 = vld [vmem:[#allocation2 + $0x48] sm:$0xff]  ;;  %v1329_v17 = vpop.f32.mrf.mxu0  ;;  %v457_v61 = vld [vmem:[#allocation2 + $0x98] sm:$0xff] }
 0x130   : > { %v886_v18 = vpop.f32.mrf.mxu1  ;;  %1087 = vst.msk [vmem:[%s1855_s9 + $0x30] sm:$0xff] %vm225_vm1, %v1499_v14  ;;  %1512 = vtanh.f32 %v1026_v16  ;;  %v964_v19 = vadd.f32 %v882_v12, %v453_v11  ;;  %v1330_v20 = vadd.f32 %v1329_v17, %v1328_v60  ;;  %v462_v11 = vld [vmem:[#allocation2 + $0xc0] sm:$0xff] }
 0x131   : > { %995 = vst.msk [vmem:[#allocation2 + $0x68] sm:$0xff] %vm225_vm1, %v962_v13  ;;  %v1501_v22 = vpop.eup %1500  ;;  %v1331_v24 = vpop.f32.mrf.mxu0 }
 0x132   : > { %v1417_v10 = vpop.f32.mrf.mxu1  ;;  %1085 = vst.msk [vmem:[%s1855_s9 + $0x20] sm:$0xff] %vm225_vm1, %v1501_v22  ;;  %997 = vst.msk [vmem:[#allocation2 + $0x78] sm:$0xff] %vm225_vm1, %v964_v19  ;;  %v887_v15 = vadd.f32 %v1330_v20, %v886_v18  ;;  %v458_v18 = vld [vmem:[#allocation2 + $0xa0] sm:$0xff]  ;;  %v465_v20 = vld [vmem:[#allocation2 + $0xd8] sm:$0xff] }
 0x133   : > { %v1503_v25 = vpop.eup %1502  ;;  %v1332_v28 = vpop.f32.mrf.mxu0 }
 0x134   : > { %v1029_v26 = vld [vmem:[#allocation2 + $0x60] sm:$0xff]  ;;  %v889_v29 = vpop.f32.mrf.mxu1  ;;  %1088 = vst.msk [vmem:[%s1855_s9 + $0x38] sm:$0xff] %vm225_vm1, %v1503_v25  ;;  %v965_v30 = vadd.f32 %v887_v15, %v454_v23  ;;  %v1333_v31 = vadd.f32 %v1332_v28, %v1331_v24  ;;  %v463_v25 = vld [vmem:[#allocation2 + $0xc8] sm:$0xff] }
 0x135   : > { %1514 = vtanh.f32 %v1029_v26  ;;  %v1505_v32 = vpop.eup %1504  ;;  %v1031_v33 = vld [vmem:[#allocation2 + $0x70] sm:$0xff]  ;;  %v1334_v27 = vpop.f32.mrf.mxu0 }
 0x136   : > { %v1877_v34 = vpop.f32.mrf.mxu1  ;;  %1086 = vst.msk [vmem:[%s1855_s9 + $0x28] sm:$0xff] %vm225_vm1, %v1505_v32  ;;  %1516 = vtanh.f32 %v1031_v33  ;;  %998 = vst.msk [vmem:[#allocation2 + $0x80] sm:$0xff] %vm225_vm1, %v965_v30  ;;  %v890_v35 = vadd.f32 %v1333_v31, %v889_v29 }
 0x137   : > { %v1507_v36 = vpop.eup %1506  ;;  %v1335_v38 = vpop.f32.mrf.mxu0 }
 0x138   : > { %v1030_v37 = vld [vmem:[#allocation2 + $0x68] sm:$0xff]  ;;  %v902_v40 = vpop.f32.mrf.mxu1  ;;  %1091 = vst.msk [vmem:[%s1855_s9 + $0x50] sm:$0xff] %vm225_vm1, %v1507_v36  ;;  %v966_v41 = vadd.f32 %v890_v35, %v455_v21  ;;  %v1336_v42 = vadd.f32 %v1335_v38, %v1334_v27  ;;  %v468_v27 = vld [vmem:[#allocation2 + $0xf0] sm:$0xff] }
 0x139   : > { %1518 = vtanh.f32 %v1030_v37  ;;  %v1509_v43 = vpop.eup %1508  ;;  %v1032_v45 = vld [vmem:[#allocation2 + $0x78] sm:$0xff]  ;;  %v1337_v47 = vpop.f32.mrf.mxu0 }
 0x13a   : > { %v1884_v48 = vpop.f32.mrf.mxu1  ;;  %1089 = vst.msk [vmem:[%s1855_s9 + $0x40] sm:$0xff] %vm225_vm1, %v1509_v43  ;;  %1520 = vtanh.f32 %v1032_v45  ;;  %999 = vst.msk [vmem:[#allocation2 + $0x88] sm:$0xff] %vm225_vm1, %v966_v41  ;;  %v895_v50 = vadd.f32 %v1416_v62, %v1336_v42  ;;  %v460_v45 = vld [vmem:[#allocation2 + $0xb0] sm:$0xff] }
 0x13b   : > { %v1511_v51 = vpop.eup %1510  ;;  %v1338_v52 = vpop.f32.mrf.mxu0 }
 0x13c   : > { %v905_v53 = vpop.f32.mrf.mxu1  ;;  %1092 = vst.msk [vmem:[%s1855_s9 + $0x58] sm:$0xff] %vm225_vm1, %v1511_v51  ;;  %v967_v55 = vadd.f32 %v895_v50, %v456_v46  ;;  %v1339_v56 = vadd.f32 %v1338_v52, %v1337_v47 }
 0x13d   : > { %v1513_v57 = vpop.eup %1512  ;;  %v1033_v58 = vld [vmem:[#allocation2 + $0x80] sm:$0xff]  ;;  %v1340_v63 = vpop.f32.mrf.mxu0 }
 0x13e   : > { %v1424_v3 = vpop.f32.mrf.mxu1  ;;  %1090 = vst.msk [vmem:[%s1855_s9 + $0x48] sm:$0xff] %vm225_vm1, %v1513_v57  ;;  %1522 = vtanh.f32 %v1033_v58  ;;  %1000 = vst.msk [vmem:[#allocation2 + $0x90] sm:$0xff] %vm225_vm1, %v967_v55  ;;  %v898_v5 = vadd.f32 %v1417_v10, %v1339_v56 }
 0x13f   : > { %v927_v7 = vadd.f32 %v1424_v3, %v1822_v49  ;;  %v1341_v9 = vpop.f32.mrf.mxu0 }
 0x140   : > { %v918_v60 = vpop.f32.mrf.mxu1  ;;  %v968_v62 = vadd.f32 %v898_v5, %v457_v61  ;;  %v1342_v13 = vadd.f32 %v1341_v9, %v1340_v63  ;;  %v467_v5 = vld [vmem:[#allocation2 + $0xe8] sm:$0xff] }
 0x141   : > { %v975_v12 = vadd.f32 %v927_v7, %v464_v1  ;;  %v919_v14 = vadd.f32 %v1818_v39, %v918_v60  ;;  %v1034_v17 = vld [vmem:[#allocation2 + $0x88] sm:$0xff]  ;;  %v1343_v19 = vpop.f32.mrf.mxu0  ;;  %v1372_v39 = vadd.f32 %v1832_v4, %v1830_v2 }
 0x142   : > { %v1515_v16 = vpop.eup %1514  ;;  %v1425_v22 = vpop.f32.mrf.mxu1  ;;  %1524 = vtanh.f32 %v1034_v17  ;;  %1001 = vst.msk [vmem:[#allocation2 + $0x98] sm:$0xff] %vm225_vm1, %v968_v62  ;;  %v903_v49 = vadd.f32 %v1342_v13, %v902_v40  ;;  %v466_v40 = vld [vmem:[#allocation2 + $0xe0] sm:$0xff] }
 0x143   : > { %1093 = vst.msk [vmem:[%s1855_s9 + $0x60] sm:$0xff] %vm225_vm1, %v1515_v16  ;;  %1008 = vst.msk [vmem:[#allocation2 + $0xd0] sm:$0xff] %vm225_vm1, %v975_v12  ;;  %v973_v23 = vadd.f32 %v919_v14, %v462_v11  ;;  %v930_v24 = vadd.f32 %v1425_v22, %v1824_v54  ;;  %v1517_v10 = vpop.eup %1516  ;;  %v1344_v15 = vpop.f32.mrf.mxu0  ;;  %v459_v54 = vld [vmem:[#allocation2 + $0xa8] sm:$0xff] }
 0x144   : > { %v921_v26 = vpop.f32.mrf.mxu1  ;;  %1095 = vst.msk [vmem:[%s1855_s9 + $0x70] sm:$0xff] %vm225_vm1, %v1517_v10  ;;  %v969_v28 = vadd.f32 %v903_v49, %v458_v18  ;;  %v1345_v30 = vadd.f32 %v1344_v15, %v1343_v19 }
 0x145   : > { %1006 = vst.msk [vmem:[#allocation2 + $0xc0] sm:$0xff] %vm225_vm1, %v973_v23  ;;  %v976_v29 = vadd.f32 %v930_v24, %v465_v20  ;;  %v922_v31 = vadd.f32 %v1820_v44, %v921_v26  ;;  %v1035_v33 = vld [vmem:[#allocation2 + $0x90] sm:$0xff]  ;;  %v1346_v21 = vpop.f32.mrf.mxu0  ;;  %v1375_v44 = vadd.f32 %v1836_v8, %v1834_v6 }
 0x146   : > { %v1519_v32 = vpop.eup %1518  ;;  %v1428_v2 = vpop.f32.mrf.mxu1  ;;  %1526 = vtanh.f32 %v1035_v33  ;;  %1002 = vst.msk [vmem:[#allocation2 + $0xa0] sm:$0xff] %vm225_vm1, %v969_v28  ;;  %v906_v4 = vadd.f32 %v1345_v30, %v905_v53  ;;  %v469_v53 = vld [vmem:[#allocation2 + $0xf8] sm:$0xff] }
 0x147   : > { %1094 = vst.msk [vmem:[%s1855_s9 + $0x68] sm:$0xff] %vm225_vm1, %v1519_v32  ;;  %1009 = vst.msk [vmem:[#allocation2 + $0xd8] sm:$0xff] %vm225_vm1, %v976_v29  ;;  %v974_v35 = vadd.f32 %v922_v31, %v463_v25  ;;  %v943_v36 = vadd.f32 %v1428_v2, %v1372_v39  ;;  %v1521_v37 = vpop.eup %1520  ;;  %v1347_v38 = vpop.f32.mrf.mxu0 }
 0x148   : > { %v934_v41 = vpop.f32.mrf.mxu1  ;;  %1096 = vst.msk [vmem:[%s1855_s9 + $0x78] sm:$0xff] %vm225_vm1, %v1521_v37  ;;  %v970_v42 = vadd.f32 %v906_v4, %v459_v54  ;;  %v1348_v46 = vadd.f32 %v1347_v38, %v1346_v21 }
 0x149   : > { %1007 = vst.msk [vmem:[#allocation2 + $0xc8] sm:$0xff] %vm225_vm1, %v974_v35  ;;  %v979_v43 = vadd.f32 %v943_v36, %v468_v27  ;;  %v935_v47 = vadd.f32 %v1826_v59, %v934_v41  ;;  %v1036_v50 = vld [vmem:[#allocation2 + $0x98] sm:$0xff]  ;;  %v1349_v52 = vpop.f32.mrf.mxu0 }
 0x14a   : > { %v1043_v51 = vld [vmem:[#allocation2 + $0xd0] sm:$0xff]  ;;  %v1429_v55 = vpop.f32.mrf.mxu1  ;;  %1528 = vtanh.f32 %v1036_v50  ;;  %1003 = vst.msk [vmem:[#allocation2 + $0xa8] sm:$0xff] %vm225_vm1, %v970_v42  ;;  %v911_v6 = vadd.f32 %v1877_v34, %v1348_v46  ;;  %v461_v34 = vld [vmem:[#allocation2 + $0xb8] sm:$0xff] }
 0x14b   : > { %1012 = vst.msk [vmem:[#allocation2 + $0xf0] sm:$0xff] %vm225_vm1, %v979_v43  ;;  %v977_v8 = vadd.f32 %v935_v47, %v466_v40  ;;  %v946_v56 = vadd.f32 %v1429_v55, %v1375_v44  ;;  %v1523_v57 = vpop.eup %1522  ;;  %1530 = vtanh.f32 %v1043_v51  ;;  %v1350_v61 = vpop.f32.mrf.mxu0 }
 0x14c   : > { %v1041_v58 = vld [vmem:[#allocation2 + $0xc0] sm:$0xff]  ;;  %v937_v59 = vpop.f32.mrf.mxu1  ;;  %1097 = vst.msk [vmem:[%s1855_s9 + $0x80] sm:$0xff] %vm225_vm1, %v1523_v57  ;;  %v971_v63 = vadd.f32 %v911_v6, %v460_v45  ;;  %v1351_v3 = vadd.f32 %v1350_v61, %v1349_v52 }
 0x14d   : > { %1532 = vtanh.f32 %v1041_v58  ;;  %1010 = vst.msk [vmem:[#allocation2 + $0xe0] sm:$0xff] %vm225_vm1, %v977_v8  ;;  %v980_v1 = vadd.f32 %v946_v56, %v469_v53  ;;  %v1037_v7 = vld [vmem:[#allocation2 + $0xa0] sm:$0xff]  ;;  %v938_v11 = vadd.f32 %v1828_v0, %v937_v59 }
 0x14e   : > { %v1044_v9 = vld [vmem:[#allocation2 + $0xd8] sm:$0xff]  ;;  %1534 = vtanh.f32 %v1037_v7  ;;  %1004 = vst.msk [vmem:[#allocation2 + $0xb0] sm:$0xff] %vm225_vm1, %v971_v63  ;;  %v914_v60 = vadd.f32 %v1884_v48, %v1351_v3 }
 0x14f   : > { %1013 = vst.msk [vmem:[#allocation2 + $0xf8] sm:$0xff] %vm225_vm1, %v980_v1  ;;  %v1525_v62 = vpop.eup %1524  ;;  %1536 = vtanh.f32 %v1044_v9  ;;  %v978_v13 = vadd.f32 %v938_v11, %v467_v5 }
 0x150   : > { %v1042_v12 = vld [vmem:[#allocation2 + $0xc8] sm:$0xff]  ;;  %1098 = vst.msk [vmem:[%s1855_s9 + $0x88] sm:$0xff] %vm225_vm1, %v1525_v62  ;;  %v972_v14 = vadd.f32 %v914_v60, %v461_v34 }
 0x151   : > { %1538 = vtanh.f32 %v1042_v12  ;;  %v1038_v16 = vld [vmem:[#allocation2 + $0xa8] sm:$0xff]  ;;  %1011 = vst.msk [vmem:[#allocation2 + $0xe8] sm:$0xff] %vm225_vm1, %v978_v13 }
 0x152   : > { %v1047_v17 = vld [vmem:[#allocation2 + $0xf0] sm:$0xff]  ;;  %1540 = vtanh.f32 %v1038_v16  ;;  %1005 = vst.msk [vmem:[#allocation2 + $0xb8] sm:$0xff] %vm225_vm1, %v972_v14 }
 0x153   : > { %v1527_v0 = vpop.eup %1526  ;;  %1542 = vtanh.f32 %v1047_v17 }
 0x154   : > { %v1045_v48 = vld [vmem:[#allocation2 + $0xe0] sm:$0xff]  ;;  %1099 = vst.msk [vmem:[%s1855_s9 + $0x90] sm:$0xff] %vm225_vm1, %v1527_v0 }
 0x155   : > { %1544 = vtanh.f32 %v1045_v48  ;;  %v1039_v18 = vld [vmem:[#allocation2 + $0xb0] sm:$0xff] }
 0x156   : > { %v1048_v19 = vld [vmem:[#allocation2 + $0xf8] sm:$0xff]  ;;  %1546 = vtanh.f32 %v1039_v18 }
 0x157   : > { %v1529_v20 = vpop.eup %1528  ;;  %1548 = vtanh.f32 %v1048_v19 }
 0x158   : > { %v1531_v22 = vpop.eup %1530  ;;  %1100 = vst.msk [vmem:[%s1855_s9 + $0x98] sm:$0xff] %vm225_vm1, %v1529_v20  ;;  %v1046_v49 = vld [vmem:[#allocation2 + $0xe8] sm:$0xff] }
 0x159   : > { %1107 = vst.msk [vmem:[%s1855_s9 + $0xd0] sm:$0xff] %vm225_vm1, %v1531_v22  ;;  %v1040_v24 = vld [vmem:[#allocation2 + $0xb8] sm:$0xff]  ;;  %1550 = vtanh.f32 %v1046_v49 }
 0x15a   : > { %v1533_v23 = vpop.eup %1532  ;;  %1552 = vtanh.f32 %v1040_v24 }
 0x15b   : > { %1105 = vst.msk [vmem:[%s1855_s9 + $0xc0] sm:$0xff] %vm225_vm1, %v1533_v23  ;;  %v1535_v10 = vpop.eup %1534 }
 0x15c   : > { %v1537_v39 = vpop.eup %1536  ;;  %1101 = vst.msk [vmem:[%s1855_s9 + $0xa0] sm:$0xff] %vm225_vm1, %v1535_v10 }
 0x15d   : > { %1108 = vst.msk [vmem:[%s1855_s9 + $0xd8] sm:$0xff] %vm225_vm1, %v1537_v39 }
 0x15e   : > { %v1539_v15 = vpop.eup %1538 }
 0x15f   : > { %1106 = vst.msk [vmem:[%s1855_s9 + $0xc8] sm:$0xff] %vm225_vm1, %v1539_v15  ;;  %v1541_v25 = vpop.eup %1540 }
 0x160   : > { %v1543_v26 = vpop.eup %1542  ;;  %1102 = vst.msk [vmem:[%s1855_s9 + $0xa8] sm:$0xff] %vm225_vm1, %v1541_v25 }
 0x161   : > { %1111 = vst.msk [vmem:[%s1855_s9 + $0xf0] sm:$0xff] %vm225_vm1, %v1543_v26 }
 0x162   : > { %v1545_v28 = vpop.eup %1544 }
 0x163   : > { %1109 = vst.msk [vmem:[%s1855_s9 + $0xe0] sm:$0xff] %vm225_vm1, %v1545_v28  ;;  %v1547_v29 = vpop.eup %1546 }
 0x164   : > { %v1549_v30 = vpop.eup %1548  ;;  %1103 = vst.msk [vmem:[%s1855_s9 + $0xb0] sm:$0xff] %vm225_vm1, %v1547_v29 }
 0x165   : > { %1112 = vst.msk [vmem:[%s1855_s9 + $0xf8] sm:$0xff] %vm225_vm1, %v1549_v30 }
 0x166   : > { %v1551_v31 = vpop.eup %1550 }
 0x167   : > { %v1553_v32 = vpop.eup %1552  ;;  %1110 = vst.msk [vmem:[%s1855_s9 + $0xe8] sm:$0xff] %vm225_vm1, %v1551_v31 }
 0x168   : > { %1104 = vst.msk [vmem:[%s1855_s9 + $0xb8] sm:$0xff] %vm225_vm1, %v1553_v32 }
 0x169 PF: > { %s12_s11 = sadd.s32 1, %s1576_s11   ;;  %s1971_s9 = smov %s1572_s10 }
 0x16a   : > { %p9_p5 = scmp.ge.s32.totalorder %s12_s11, 4   ;;  %s1972_s10 = smov %s1974_s12 }
 0x16c   :  { %11 = sbr.rel (!%p9_p5) target bundleno = 2 (0x2), region = 69 }

</bundles_post_ra>
